<compile_context>
chip_gen: v7x
topology: tpu7x:2x2x1
jax: 0.10.0
libtpu: 0.0.40
codegen_flags: <defaults>
</compile_context>

<pallas_src>
import numpy as np
import jax
import jax.numpy as jnp
from jax.experimental import pallas as pl
from jax.experimental.pallas import tpu as pltpu


_VMEM_LIMIT = 16 * 1024 * 1024   # real footprint < 8 MiB/step; leaves v7x headroom


# ----------------------------- Pallas kernels -----------------------------

def _stage_kernel(a_ref, w_ref, b_ref, g_ref, beta_ref, o_ref):
    """Fused conv (matmul + bias) + GDN + 2x2 maxpool, all 4 pool taps fused.

    Channels-on-sublanes / spatial-on-lanes layout:
      a_ref:    (4, Kp, S)  bf16  im2col rows, one (Kp, S) slab per pool tap
      w_ref:    (C, Kp)     bf16  conv weight
      b_ref:    (C, 1)      f32   conv bias
      g_ref:    (C, C)      bf16  GDN gamma (rows = output channel)
      beta_ref: (C, 1)      f32   GDN beta
      o_ref:    (C, S)      bf16  pooled output (max over the 4 taps)
    """
    acc = None
    for t in range(4):                      # short static unroll (4 taps)
        y = jnp.dot(w_ref[...], a_ref[t],
                    preferred_element_type=jnp.float32) + b_ref[...]
        y2 = (y * y).astype(jnp.bfloat16)
        denom = jnp.dot(g_ref[...], y2,
                        preferred_element_type=jnp.float32) + beta_ref[...]
        z = y * jax.lax.rsqrt(denom)
        acc = z if acc is None else jnp.maximum(acc, z)
    o_ref[...] = acc.astype(o_ref.dtype)


def _stage4_tail_kernel(a_ref, w4_ref, b4_ref, g4_ref, bt4_ref,
                        w1_ref, b1_ref, g1_ref, bt1_ref, w2_ref, b2_ref,
                        o_ref):
    """Fused conv4 + GDN(64) + pool + fc1(64->256) + GDN(256) + fc2(256->1).

      a_ref: (4, K4, S4) bf16  im2col of the conv4 input (S4 = 2*2 = 4)
      o_ref: (1, S4)     f32   per-spatial-location scores for this patch
    """
    acc = None
    for t in range(4):
        y = jnp.dot(w4_ref[...], a_ref[t],
                    preferred_element_type=jnp.float32) + b4_ref[...]
        d = jnp.dot(g4_ref[...], (y * y).astype(jnp.bfloat16),
                    preferred_element_type=jnp.float32) + bt4_ref[...]
        z = y * jax.lax.rsqrt(d)
        acc = z if acc is None else jnp.maximum(acc, z)
    x = acc.astype(jnp.bfloat16)                                  # (64, S4)
    y1 = jnp.dot(w1_ref[...], x,
                 preferred_element_type=jnp.float32) + b1_ref[...]   # (256, S4)
    d1 = jnp.dot(g1_ref[...], (y1 * y1).astype(jnp.bfloat16),
                 preferred_element_type=jnp.float32) + bt1_ref[...]
    z1 = (y1 * jax.lax.rsqrt(d1)).astype(jnp.bfloat16)
    o_ref[...] = jnp.dot(w2_ref[...], z1,
                         preferred_element_type=jnp.float32) + b2_ref[...]


# ----------------------------- im2col (XLA glue) ----------------------------

def _pool_grouped_im2col_nchw(x, kh, kw, stride, padding):
    """x: (N, Cin, H, W) -> (N, 4, Kp, S) bf16.

    S = (Ho//2)*(Wo//2); K = kh*kw*cin, zero-padded on the sublane axis to a
    multiple of 8 (Kp).  Axis 1 enumerates the 4 positions of the 2x2 pool
    window over the conv-output grid (odd trailing conv rows/cols are dropped,
    matching F.max_pool2d's floor behaviour)."""
    n, cin, h, w = x.shape
    ho = (h + 2 * padding - kh) // stride + 1
    wo = (w + 2 * padding - kw) // stride + 1
    ho2, wo2 = ho // 2, wo // 2
    k = kh * kw * cin
    kp = ((k + 7) // 8) * 8
    xp = jnp.pad(x, ((0, 0), (0, 0), (padding, padding), (padding, padding)))
    step = 2 * stride
    taps = []
    for a in (0, 1):
        for b in (0, 1):
            cols = []
            for di in range(kh):
                for dj in range(kw):
                    r0 = a * stride + di
                    c0 = b * stride + dj
                    sl = xp[:, :, r0:r0 + step * (ho2 - 1) + 1:step,
                            c0:c0 + step * (wo2 - 1) + 1:step]
                    cols.append(sl.reshape(n, cin, ho2 * wo2))
            grp = jnp.concatenate(cols, axis=1)          # (N, K, S)
            taps.append(grp[:, None])                    # (N, 1, K, S)
    out = jnp.concatenate(taps, axis=1)                  # (N, 4, K, S)
    if kp != k:
        out = jnp.pad(out, ((0, 0), (0, 0), (0, kp - k), (0, 0)))
    return out.astype(jnp.bfloat16), ho2, wo2, kp


def _conv_weight_mat(w, kp):
    """PyTorch (Cout, Cin, KH, KW) -> (Cout, Kp) bf16, K index = (di*kw+dj)*cin+c."""
    cout, cin, kh, kw = w.shape
    k = kh * kw * cin
    wmat = jnp.transpose(w, (0, 2, 3, 1)).reshape(cout, k)
    if kp != k:
        wmat = jnp.pad(wmat, ((0, 0), (0, kp - k)))
    return wmat.astype(jnp.bfloat16)


# ----------------------------- wrappers ------------------------------------

def fused_conv_gdn_pool(x, w, b, gamma, beta, stride, padding):
    """x: (N, Cin, H, W) bf16.  w: (Cout, Cin, KH, KW) (PyTorch layout).
    Returns maxpool2x2(GDN(conv(x))) as (N, Cout, Ho//2, Wo//2) bf16."""
    n = x.shape[0]
    cout = w.shape[0]
    a, ho2, wo2, kp = _pool_grouped_im2col_nchw(x, w.shape[2], w.shape[3],
                                                stride, padding)
    s = ho2 * wo2
    wmat = _conv_weight_mat(w, kp)
    bias = b.reshape(cout, 1).astype(jnp.float32)
    gmat = gamma.astype(jnp.bfloat16)
    beta_c = beta.reshape(cout, 1).astype(jnp.float32)

    out = pl.pallas_call(
        _stage_kernel,
        out_shape=jax.ShapeDtypeStruct((n, cout, s), jnp.bfloat16),
        grid=(n,),
        in_specs=[
            pl.BlockSpec((None, 4, kp, s), lambda i: (i, 0, 0, 0)),
            pl.BlockSpec((cout, kp), lambda i: (0, 0)),
            pl.BlockSpec((cout, 1), lambda i: (0, 0)),
            pl.BlockSpec((cout, cout), lambda i: (0, 0)),
            pl.BlockSpec((cout, 1), lambda i: (0, 0)),
        ],
        out_specs=pl.BlockSpec((None, cout, s), lambda i: (i, 0, 0)),
        compiler_params=pltpu.CompilerParams(
            dimension_semantics=("parallel",),
            vmem_limit_bytes=_VMEM_LIMIT),
    )(a, wmat, bias, gmat, beta_c)
    return out.reshape(n, cout, ho2, wo2)


def fused_stage4_tail(x3, p):
    """x3: (N, 32, 4, 4) bf16.  conv4+GDN+pool+fc1+GDN256+fc2 in one kernel.
    Returns (N, 1, 4) f32 per-location scores."""
    n = x3.shape[0]
    a, ho2, wo2, kp = _pool_grouped_im2col_nchw(x3, 3, 3, 1, 1)   # (N,4,288,4)
    s = ho2 * wo2                                                 # 4
    w4 = _conv_weight_mat(p['conv4_w'], kp)                       # (64, 288)
    b4 = p['conv4_b'].reshape(64, 1).astype(jnp.float32)
    g4 = p['gdn4_gamma'].astype(jnp.bfloat16)
    bt4 = p['gdn4_beta'].reshape(64, 1).astype(jnp.float32)
    w1 = p['st2_fc1_w'].reshape(256, 64).astype(jnp.bfloat16)
    b1 = p['st2_fc1_b'].reshape(256, 1).astype(jnp.float32)
    g1 = p['st2_gdn1_gamma'].astype(jnp.bfloat16)
    bt1 = p['st2_gdn1_beta'].reshape(256, 1).astype(jnp.float32)
    w2 = p['st2_fc2_w'].reshape(1, 256).astype(jnp.bfloat16)
    b2 = p['st2_fc2_b'].reshape(1, 1).astype(jnp.float32)

    return pl.pallas_call(
        _stage4_tail_kernel,
        out_shape=jax.ShapeDtypeStruct((n, 1, s), jnp.float32),
        grid=(n,),
        in_specs=[
            pl.BlockSpec((None, 4, kp, s), lambda i: (i, 0, 0, 0)),
            pl.BlockSpec((64, kp), lambda i: (0, 0)),
            pl.BlockSpec((64, 1), lambda i: (0, 0)),
            pl.BlockSpec((64, 64), lambda i: (0, 0)),
            pl.BlockSpec((64, 1), lambda i: (0, 0)),
            pl.BlockSpec((256, 64), lambda i: (0, 0)),
            pl.BlockSpec((256, 1), lambda i: (0, 0)),
            pl.BlockSpec((256, 256), lambda i: (0, 0)),
            pl.BlockSpec((256, 1), lambda i: (0, 0)),
            pl.BlockSpec((1, 256), lambda i: (0, 0)),
            pl.BlockSpec((1, 1), lambda i: (0, 0)),
        ],
        out_specs=pl.BlockSpec((None, 1, s), lambda i: (i, 0, 0)),
        compiler_params=pltpu.CompilerParams(
            dimension_semantics=("parallel",),
            vmem_limit_bytes=_VMEM_LIMIT),
    )(a, w4, b4, g4, bt4, w1, b1, g1, bt1, w2, b2)


# ----------------------------- EONSS model ---------------------------------

def init_eonss_params(key):
    # Deterministic in-script init (replaces torch.load of a checkpoint).
    def conv_init(k, cout, cin, kh, kw):
        k1, k2 = jax.random.split(k)
        fan_in = cin * kh * kw
        w = jax.random.normal(k1, (cout, cin, kh, kw), jnp.float32) / np.sqrt(fan_in)
        b = 0.01 * jax.random.normal(k2, (cout,), jnp.float32)
        return w, b

    def gdn_init(c):
        gamma = (0.1 * jnp.eye(c, dtype=jnp.float32)
                 + 0.01 * jnp.ones((c, c), jnp.float32))
        beta = jnp.ones((c,), jnp.float32)
        return gamma, beta

    keys = jax.random.split(key, 6)
    p = {}
    p['conv1_w'], p['conv1_b'] = conv_init(keys[0], 8, 3, 5, 5)
    p['gdn1_gamma'], p['gdn1_beta'] = gdn_init(8)
    p['conv2_w'], p['conv2_b'] = conv_init(keys[1], 16, 8, 5, 5)
    p['gdn2_gamma'], p['gdn2_beta'] = gdn_init(16)
    p['conv3_w'], p['conv3_b'] = conv_init(keys[2], 32, 16, 5, 5)
    p['gdn3_gamma'], p['gdn3_beta'] = gdn_init(32)
    p['conv4_w'], p['conv4_b'] = conv_init(keys[3], 64, 32, 3, 3)
    p['gdn4_gamma'], p['gdn4_beta'] = gdn_init(64)
    p['st2_fc1_w'], p['st2_fc1_b'] = conv_init(keys[4], 256, 64, 1, 1)
    p['st2_gdn1_gamma'], p['st2_gdn1_beta'] = gdn_init(256)
    p['st2_fc2_w'], p['st2_fc2_b'] = conv_init(keys[5], 1, 256, 1, 1)
    return p


def eonss_forward(x_nchw, p):
    # x_nchw: (P, 3, 235, 235) patches; NCHW kept throughout (channels -> sublanes).
    x = x_nchw.astype(jnp.bfloat16)
    x = fused_conv_gdn_pool(x, p['conv1_w'], p['conv1_b'],
                            p['gdn1_gamma'], p['gdn1_beta'], 2, 2)   # (P,8,59,59)
    x = fused_conv_gdn_pool(x, p['conv2_w'], p['conv2_b'],
                            p['gdn2_gamma'], p['gdn2_beta'], 2, 2)   # (P,16,15,15)
    x = fused_conv_gdn_pool(x, p['conv3_w'], p['conv3_b'],
                            p['gdn3_gamma'], p['gdn3_beta'], 2, 2)   # (P,32,4,4)
    scores = fused_stage4_tail(x, p)                                 # (P,1,4)
    return scores.reshape(scores.shape[0], -1)                       # (P,4)


# --------------------------- MetricModel glue -------------------------------

def get_patches(image, output_size, stride):
    # image: (1, C, H, W) NCHW (same semantics as torchvision crop + concat)
    h, w = image.shape[-2:]
    h_start = np.arange(0, h - output_size, stride)
    w_start = np.arange(0, w - output_size, stride)
    patches = [image[..., hs:hs + output_size, ws:ws + output_size]
               for hs in h_start for ws in w_start]
    return jnp.concatenate(patches, axis=0)


def metric_model_forward(dist, params):
    patches = get_patches(dist, 235, 128)
    if patches.shape[1] == 1:            # torch .squeeze(1) (no-op when C == 3)
        patches = jnp.squeeze(patches, axis=1)
    scores = eonss_forward(patches, params)
    return jnp.mean(scores)              # tiny final reduction kept in JAX glue


if __name__ == "__main__":
    key = jax.random.PRNGKey(0)
    pkey, dkey = jax.random.split(key)
    params = init_eonss_params(pkey)
    # Smallest consistent input: 235x235 patches with stride 128 need H, W > 235;
    # 364x364 gives a 2x2 grid of 4 patches.
    dist = jax.random.uniform(dkey, (1, 3, 364, 364), dtype=jnp.float32)
    fwd = jax.jit(metric_model_forward)
    score = fwd(dist, params)
    score = jax.block_until_ready(score)
    assert np.isfinite(float(score))
    print("KERNEL_OK")
</pallas_src>

<mosaic_0001>
module attributes {stable_mosaic.version = 11 : i64} {
  func.func @_stage_kernel(%arg0: i32, %arg1: memref<1x4x80x3481xbf16, #tpu.memory_space<vmem>>, %arg2: memref<8x80xbf16, #tpu.memory_space<vmem>>, %arg3: memref<8x1xf32, #tpu.memory_space<vmem>>, %arg4: memref<8x8xbf16, #tpu.memory_space<vmem>>, %arg5: memref<8x1xf32, #tpu.memory_space<vmem>>, %arg6: memref<1x8x3481xbf16, #tpu.memory_space<vmem>>) attributes {dimension_semantics = [#tpu.dimension_semantics<parallel>], iteration_bounds = array<i64: 4>, scalar_prefetch = 0 : i64, scratch_operands = 0 : i64, tpu.core_type = #tpu.core_type<tc>, window_params = [{transform_indices = @transform_0, window_bounds = array<i64: 1, 4, 80, 3481>}, {pipeline_mode = #tpu.pipeline_mode<synchronous>, transform_indices = @transform_1, window_bounds = array<i64: 8, 80>}, {pipeline_mode = #tpu.pipeline_mode<synchronous>, transform_indices = @transform_2, window_bounds = array<i64: 8, 1>}, {pipeline_mode = #tpu.pipeline_mode<synchronous>, transform_indices = @transform_3, window_bounds = array<i64: 8, 8>}, {pipeline_mode = #tpu.pipeline_mode<synchronous>, transform_indices = @transform_4, window_bounds = array<i64: 8, 1>}, {transform_indices = @transform_5, window_bounds = array<i64: 1, 8, 3481>}]} {
    %c0 = arith.constant 0 : index
    %c0_0 = arith.constant 0 : index
    %0 = vector.load %arg2[%c0, %c0_0] : memref<8x80xbf16, #tpu.memory_space<vmem>>, vector<8x80xbf16>
    %c0_1 = arith.constant 0 : index
    %c0_2 = arith.constant 0 : index
    %c0_3 = arith.constant 0 : index
    %c0_4 = arith.constant 0 : index
    %1 = vector.load %arg1[%c0_1, %c0_2, %c0_3, %c0_4] : memref<1x4x80x3481xbf16, #tpu.memory_space<vmem>>, vector<1x1x80x3481xbf16>
    %2 = vector.shape_cast %1 : vector<1x1x80x3481xbf16> to vector<80x3481xbf16>
    %cst = arith.constant dense<0.000000e+00> : vector<8x3481xf32>
    %3 = tpu.matmul %0, %2, %cst {dimension_numbers = #tpu.dot_dimension_numbers<[1], [0], [0], [1], [0, 0, 1, 1], [], []>} : vector<8x80xbf16>, vector<80x3481xbf16>, vector<8x3481xf32> -> vector<8x3481xf32>
    %c0_5 = arith.constant 0 : index
    %c0_6 = arith.constant 0 : index
    %4 = vector.load %arg3[%c0_5, %c0_6] : memref<8x1xf32, #tpu.memory_space<vmem>>, vector<8x1xf32>
    %5 = vector.broadcast %4 : vector<8x1xf32> to vector<8x3481xf32>
    %6 = arith.addf %3, %5 : vector<8x3481xf32>
    %7 = arith.mulf %6, %6 : vector<8x3481xf32>
    %8 = arith.truncf %7 : vector<8x3481xf32> to vector<8x3481xbf16>
    %c0_7 = arith.constant 0 : index
    %c0_8 = arith.constant 0 : index
    %9 = vector.load %arg4[%c0_7, %c0_8] : memref<8x8xbf16, #tpu.memory_space<vmem>>, vector<8x8xbf16>
    %cst_9 = arith.constant dense<0.000000e+00> : vector<8x3481xf32>
    %10 = tpu.matmul %9, %8, %cst_9 {dimension_numbers = #tpu.dot_dimension_numbers<[1], [0], [0], [1], [0, 0, 1, 1], [], []>} : vector<8x8xbf16>, vector<8x3481xbf16>, vector<8x3481xf32> -> vector<8x3481xf32>
    %c0_10 = arith.constant 0 : index
    %c0_11 = arith.constant 0 : index
    %11 = vector.load %arg5[%c0_10, %c0_11] : memref<8x1xf32, #tpu.memory_space<vmem>>, vector<8x1xf32>
    %12 = vector.broadcast %11 : vector<8x1xf32> to vector<8x3481xf32>
    %13 = arith.addf %10, %12 : vector<8x3481xf32>
    %14 = math.rsqrt %13 : vector<8x3481xf32>
    %15 = arith.mulf %6, %14 : vector<8x3481xf32>
    %c0_12 = arith.constant 0 : index
    %c0_13 = arith.constant 0 : index
    %16 = vector.load %arg2[%c0_12, %c0_13] : memref<8x80xbf16, #tpu.memory_space<vmem>>, vector<8x80xbf16>
    %c0_14 = arith.constant 0 : index
    %c1 = arith.constant 1 : index
    %c0_15 = arith.constant 0 : index
    %c0_16 = arith.constant 0 : index
    %17 = vector.load %arg1[%c0_14, %c1, %c0_15, %c0_16] : memref<1x4x80x3481xbf16, #tpu.memory_space<vmem>>, vector<1x1x80x3481xbf16>
    %18 = vector.shape_cast %17 : vector<1x1x80x3481xbf16> to vector<80x3481xbf16>
    %cst_17 = arith.constant dense<0.000000e+00> : vector<8x3481xf32>
    %19 = tpu.matmul %16, %18, %cst_17 {dimension_numbers = #tpu.dot_dimension_numbers<[1], [0], [0], [1], [0, 0, 1, 1], [], []>} : vector<8x80xbf16>, vector<80x3481xbf16>, vector<8x3481xf32> -> vector<8x3481xf32>
    %c0_18 = arith.constant 0 : index
    %c0_19 = arith.constant 0 : index
    %20 = vector.load %arg3[%c0_18, %c0_19] : memref<8x1xf32, #tpu.memory_space<vmem>>, vector<8x1xf32>
    %21 = vector.broadcast %20 : vector<8x1xf32> to vector<8x3481xf32>
    %22 = arith.addf %19, %21 : vector<8x3481xf32>
    %23 = arith.mulf %22, %22 : vector<8x3481xf32>
    %24 = arith.truncf %23 : vector<8x3481xf32> to vector<8x3481xbf16>
    %c0_20 = arith.constant 0 : index
    %c0_21 = arith.constant 0 : index
    %25 = vector.load %arg4[%c0_20, %c0_21] : memref<8x8xbf16, #tpu.memory_space<vmem>>, vector<8x8xbf16>
    %cst_22 = arith.constant dense<0.000000e+00> : vector<8x3481xf32>
    %26 = tpu.matmul %25, %24, %cst_22 {dimension_numbers = #tpu.dot_dimension_numbers<[1], [0], [0], [1], [0, 0, 1, 1], [], []>} : vector<8x8xbf16>, vector<8x3481xbf16>, vector<8x3481xf32> -> vector<8x3481xf32>
    %c0_23 = arith.constant 0 : index
    %c0_24 = arith.constant 0 : index
    %27 = vector.load %arg5[%c0_23, %c0_24] : memref<8x1xf32, #tpu.memory_space<vmem>>, vector<8x1xf32>
    %28 = vector.broadcast %27 : vector<8x1xf32> to vector<8x3481xf32>
    %29 = arith.addf %26, %28 : vector<8x3481xf32>
    %30 = math.rsqrt %29 : vector<8x3481xf32>
    %31 = arith.mulf %22, %30 : vector<8x3481xf32>
    %32 = arith.maximumf %15, %31 : vector<8x3481xf32>
    %c0_25 = arith.constant 0 : index
    %c0_26 = arith.constant 0 : index
    %33 = vector.load %arg2[%c0_25, %c0_26] : memref<8x80xbf16, #tpu.memory_space<vmem>>, vector<8x80xbf16>
    %c0_27 = arith.constant 0 : index
    %c2 = arith.constant 2 : index
    %c0_28 = arith.constant 0 : index
    %c0_29 = arith.constant 0 : index
    %34 = vector.load %arg1[%c0_27, %c2, %c0_28, %c0_29] : memref<1x4x80x3481xbf16, #tpu.memory_space<vmem>>, vector<1x1x80x3481xbf16>
    %35 = vector.shape_cast %34 : vector<1x1x80x3481xbf16> to vector<80x3481xbf16>
    %cst_30 = arith.constant dense<0.000000e+00> : vector<8x3481xf32>
    %36 = tpu.matmul %33, %35, %cst_30 {dimension_numbers = #tpu.dot_dimension_numbers<[1], [0], [0], [1], [0, 0, 1, 1], [], []>} : vector<8x80xbf16>, vector<80x3481xbf16>, vector<8x3481xf32> -> vector<8x3481xf32>
    %c0_31 = arith.constant 0 : index
    %c0_32 = arith.constant 0 : index
    %37 = vector.load %arg3[%c0_31, %c0_32] : memref<8x1xf32, #tpu.memory_space<vmem>>, vector<8x1xf32>
    %38 = vector.broadcast %37 : vector<8x1xf32> to vector<8x3481xf32>
    %39 = arith.addf %36, %38 : vector<8x3481xf32>
    %40 = arith.mulf %39, %39 : vector<8x3481xf32>
    %41 = arith.truncf %40 : vector<8x3481xf32> to vector<8x3481xbf16>
    %c0_33 = arith.constant 0 : index
    %c0_34 = arith.constant 0 : index
    %42 = vector.load %arg4[%c0_33, %c0_34] : memref<8x8xbf16, #tpu.memory_space<vmem>>, vector<8x8xbf16>
    %cst_35 = arith.constant dense<0.000000e+00> : vector<8x3481xf32>
    %43 = tpu.matmul %42, %41, %cst_35 {dimension_numbers = #tpu.dot_dimension_numbers<[1], [0], [0], [1], [0, 0, 1, 1], [], []>} : vector<8x8xbf16>, vector<8x3481xbf16>, vector<8x3481xf32> -> vector<8x3481xf32>
    %c0_36 = arith.constant 0 : index
    %c0_37 = arith.constant 0 : index
    %44 = vector.load %arg5[%c0_36, %c0_37] : memref<8x1xf32, #tpu.memory_space<vmem>>, vector<8x1xf32>
    %45 = vector.broadcast %44 : vector<8x1xf32> to vector<8x3481xf32>
    %46 = arith.addf %43, %45 : vector<8x3481xf32>
    %47 = math.rsqrt %46 : vector<8x3481xf32>
    %48 = arith.mulf %39, %47 : vector<8x3481xf32>
    %49 = arith.maximumf %32, %48 : vector<8x3481xf32>
    %c0_38 = arith.constant 0 : index
    %c0_39 = arith.constant 0 : index
    %50 = vector.load %arg2[%c0_38, %c0_39] : memref<8x80xbf16, #tpu.memory_space<vmem>>, vector<8x80xbf16>
    %c0_40 = arith.constant 0 : index
    %c3 = arith.constant 3 : index
    %c0_41 = arith.constant 0 : index
    %c0_42 = arith.constant 0 : index
    %51 = vector.load %arg1[%c0_40, %c3, %c0_41, %c0_42] : memref<1x4x80x3481xbf16, #tpu.memory_space<vmem>>, vector<1x1x80x3481xbf16>
    %52 = vector.shape_cast %51 : vector<1x1x80x3481xbf16> to vector<80x3481xbf16>
    %cst_43 = arith.constant dense<0.000000e+00> : vector<8x3481xf32>
    %53 = tpu.matmul %50, %52, %cst_43 {dimension_numbers = #tpu.dot_dimension_numbers<[1], [0], [0], [1], [0, 0, 1, 1], [], []>} : vector<8x80xbf16>, vector<80x3481xbf16>, vector<8x3481xf32> -> vector<8x3481xf32>
    %c0_44 = arith.constant 0 : index
    %c0_45 = arith.constant 0 : index
    %54 = vector.load %arg3[%c0_44, %c0_45] : memref<8x1xf32, #tpu.memory_space<vmem>>, vector<8x1xf32>
    %55 = vector.broadcast %54 : vector<8x1xf32> to vector<8x3481xf32>
    %56 = arith.addf %53, %55 : vector<8x3481xf32>
    %57 = arith.mulf %56, %56 : vector<8x3481xf32>
    %58 = arith.truncf %57 : vector<8x3481xf32> to vector<8x3481xbf16>
    %c0_46 = arith.constant 0 : index
    %c0_47 = arith.constant 0 : index
    %59 = vector.load %arg4[%c0_46, %c0_47] : memref<8x8xbf16, #tpu.memory_space<vmem>>, vector<8x8xbf16>
    %cst_48 = arith.constant dense<0.000000e+00> : vector<8x3481xf32>
    %60 = tpu.matmul %59, %58, %cst_48 {dimension_numbers = #tpu.dot_dimension_numbers<[1], [0], [0], [1], [0, 0, 1, 1], [], []>} : vector<8x8xbf16>, vector<8x3481xbf16>, vector<8x3481xf32> -> vector<8x3481xf32>
    %c0_49 = arith.constant 0 : index
    %c0_50 = arith.constant 0 : index
    %61 = vector.load %arg5[%c0_49, %c0_50] : memref<8x1xf32, #tpu.memory_space<vmem>>, vector<8x1xf32>
    %62 = vector.broadcast %61 : vector<8x1xf32> to vector<8x3481xf32>
    %63 = arith.addf %60, %62 : vector<8x3481xf32>
    %64 = math.rsqrt %63 : vector<8x3481xf32>
    %65 = arith.mulf %56, %64 : vector<8x3481xf32>
    %66 = arith.maximumf %49, %65 : vector<8x3481xf32>
    %67 = arith.truncf %66 : vector<8x3481xf32> to vector<8x3481xbf16>
    %c0_51 = arith.constant 0 : index
    %c0_52 = arith.constant 0 : index
    %c0_53 = arith.constant 0 : index
    %68 = vector.load %arg6[%c0_51, %c0_52, %c0_53] : memref<1x8x3481xbf16, #tpu.memory_space<vmem>>, vector<1x8x3481xbf16>
    %69 = vector.shape_cast %68 : vector<1x8x3481xbf16> to vector<8x3481xbf16>
    %70 = vector.shape_cast %67 : vector<8x3481xbf16> to vector<1x8x3481xbf16>
    tpu.vector_store %arg6[%c0_51, %c0_52, %c0_53], %70 {strides = array<i32>} : memref<1x8x3481xbf16, #tpu.memory_space<vmem>>, vector<1x8x3481xbf16>,
    return
  }
  func.func @transform_0(%arg0: i32) -> (i32, i32, i32, i32) {
    %c0_i32 = arith.constant 0 : i32
    %c0_i32_0 = arith.constant 0 : i32
    %c0_i32_1 = arith.constant 0 : i32
    %c0_i32_2 = arith.constant 0 : i32
    return %arg0, %c0_i32, %c0_i32_0, %c0_i32_1 : i32, i32, i32, i32
  }
  func.func @transform_1(%arg0: i32) -> (i32, i32) {
    %c0_i32 = arith.constant 0 : i32
    %c0_i32_0 = arith.constant 0 : i32
    %c0_i32_1 = arith.constant 0 : i32
    return %c0_i32, %c0_i32_0 : i32, i32
  }
  func.func @transform_2(%arg0: i32) -> (i32, i32) {
    %c0_i32 = arith.constant 0 : i32
    %c0_i32_0 = arith.constant 0 : i32
    %c0_i32_1 = arith.constant 0 : i32
    return %c0_i32, %c0_i32_0 : i32, i32
  }
  func.func @transform_3(%arg0: i32) -> (i32, i32) {
    %c0_i32 = arith.constant 0 : i32
    %c0_i32_0 = arith.constant 0 : i32
    %c0_i32_1 = arith.constant 0 : i32
    return %c0_i32, %c0_i32_0 : i32, i32
  }
  func.func @transform_4(%arg0: i32) -> (i32, i32) {
    %c0_i32 = arith.constant 0 : i32
    %c0_i32_0 = arith.constant 0 : i32
    %c0_i32_1 = arith.constant 0 : i32
    return %c0_i32, %c0_i32_0 : i32, i32
  }
  func.func @transform_5(%arg0: i32) -> (i32, i32, i32) {
    %c0_i32 = arith.constant 0 : i32
    %c0_i32_0 = arith.constant 0 : i32
    %c0_i32_1 = arith.constant 0 : i32
    return %arg0, %c0_i32, %c0_i32_0 : i32, i32, i32
  }
}

module attributes {stable_mosaic.version = 11 : i64} {
  func.func @_stage_kernel(%arg0: i32, %arg1: memref<1x4x200x225xbf16, #tpu.memory_space<vmem>>, %arg2: memref<16x200xbf16, #tpu.memory_space<vmem>>, %arg3: memref<16x1xf32, #tpu.memory_space<vmem>>, %arg4: memref<16x16xbf16, #tpu.memory_space<vmem>>, %arg5: memref<16x1xf32, #tpu.memory_space<vmem>>, %arg6: memref<1x16x225xbf16, #tpu.memory_space<vmem>>) attributes {dimension_semantics = [#tpu.dimension_semantics<parallel>], iteration_bounds = array<i64: 4>, scalar_prefetch = 0 : i64, scratch_operands = 0 : i64, tpu.core_type = #tpu.core_type<tc>, window_params = [{transform_indices = @transform_0, window_bounds = array<i64: 1, 4, 200, 225>}, {pipeline_mode = #tpu.pipeline_mode<synchronous>, transform_indices = @transform_1, window_bounds = array<i64: 16, 200>}, {pipeline_mode = #tpu.pipeline_mode<synchronous>, transform_indices = @transform_2, window_bounds = array<i64: 16, 1>}, {pipeline_mode = #tpu.pipeline_mode<synchronous>, transform_indices = @transform_3, window_bounds = array<i64: 16, 16>}, {pipeline_mode = #tpu.pipeline_mode<synchronous>, transform_indices = @transform_4, window_bounds = array<i64: 16, 1>}, {transform_indices = @transform_5, window_bounds = array<i64: 1, 16, 225>}]} {
    %c0 = arith.constant 0 : index
    %c0_0 = arith.constant 0 : index
    %0 = vector.load %arg2[%c0, %c0_0] : memref<16x200xbf16, #tpu.memory_space<vmem>>, vector<16x200xbf16>
    %c0_1 = arith.constant 0 : index
    %c0_2 = arith.constant 0 : index
    %c0_3 = arith.constant 0 : index
    %c0_4 = arith.constant 0 : index
    %1 = vector.load %arg1[%c0_1, %c0_2, %c0_3, %c0_4] : memref<1x4x200x225xbf16, #tpu.memory_space<vmem>>, vector<1x1x200x225xbf16>
    %2 = vector.shape_cast %1 : vector<1x1x200x225xbf16> to vector<200x225xbf16>
    %cst = arith.constant dense<0.000000e+00> : vector<16x225xf32>
    %3 = tpu.matmul %0, %2, %cst {dimension_numbers = #tpu.dot_dimension_numbers<[1], [0], [0], [1], [0, 0, 1, 1], [], []>} : vector<16x200xbf16>, vector<200x225xbf16>, vector<16x225xf32> -> vector<16x225xf32>
    %c0_5 = arith.constant 0 : index
    %c0_6 = arith.constant 0 : index
    %4 = vector.load %arg3[%c0_5, %c0_6] : memref<16x1xf32, #tpu.memory_space<vmem>>, vector<16x1xf32>
    %5 = vector.broadcast %4 : vector<16x1xf32> to vector<16x225xf32>
    %6 = arith.addf %3, %5 : vector<16x225xf32>
    %7 = arith.mulf %6, %6 : vector<16x225xf32>
    %8 = arith.truncf %7 : vector<16x225xf32> to vector<16x225xbf16>
    %c0_7 = arith.constant 0 : index
    %c0_8 = arith.constant 0 : index
    %9 = vector.load %arg4[%c0_7, %c0_8] : memref<16x16xbf16, #tpu.memory_space<vmem>>, vector<16x16xbf16>
    %cst_9 = arith.constant dense<0.000000e+00> : vector<16x225xf32>
    %10 = tpu.matmul %9, %8, %cst_9 {dimension_numbers = #tpu.dot_dimension_numbers<[1], [0], [0], [1], [0, 0, 1, 1], [], []>} : vector<16x16xbf16>, vector<16x225xbf16>, vector<16x225xf32> -> vector<16x225xf32>
    %c0_10 = arith.constant 0 : index
    %c0_11 = arith.constant 0 : index
    %11 = vector.load %arg5[%c0_10, %c0_11] : memref<16x1xf32, #tpu.memory_space<vmem>>, vector<16x1xf32>
    %12 = vector.broadcast %11 : vector<16x1xf32> to vector<16x225xf32>
    %13 = arith.addf %10, %12 : vector<16x225xf32>
    %14 = math.rsqrt %13 : vector<16x225xf32>
    %15 = arith.mulf %6, %14 : vector<16x225xf32>
    %c0_12 = arith.constant 0 : index
    %c0_13 = arith.constant 0 : index
    %16 = vector.load %arg2[%c0_12, %c0_13] : memref<16x200xbf16, #tpu.memory_space<vmem>>, vector<16x200xbf16>
    %c0_14 = arith.constant 0 : index
    %c1 = arith.constant 1 : index
    %c0_15 = arith.constant 0 : index
    %c0_16 = arith.constant 0 : index
    %17 = vector.load %arg1[%c0_14, %c1, %c0_15, %c0_16] : memref<1x4x200x225xbf16, #tpu.memory_space<vmem>>, vector<1x1x200x225xbf16>
    %18 = vector.shape_cast %17 : vector<1x1x200x225xbf16> to vector<200x225xbf16>
    %cst_17 = arith.constant dense<0.000000e+00> : vector<16x225xf32>
    %19 = tpu.matmul %16, %18, %cst_17 {dimension_numbers = #tpu.dot_dimension_numbers<[1], [0], [0], [1], [0, 0, 1, 1], [], []>} : vector<16x200xbf16>, vector<200x225xbf16>, vector<16x225xf32> -> vector<16x225xf32>
    %c0_18 = arith.constant 0 : index
    %c0_19 = arith.constant 0 : index
    %20 = vector.load %arg3[%c0_18, %c0_19] : memref<16x1xf32, #tpu.memory_space<vmem>>, vector<16x1xf32>
    %21 = vector.broadcast %20 : vector<16x1xf32> to vector<16x225xf32>
    %22 = arith.addf %19, %21 : vector<16x225xf32>
    %23 = arith.mulf %22, %22 : vector<16x225xf32>
    %24 = arith.truncf %23 : vector<16x225xf32> to vector<16x225xbf16>
    %c0_20 = arith.constant 0 : index
    %c0_21 = arith.constant 0 : index
    %25 = vector.load %arg4[%c0_20, %c0_21] : memref<16x16xbf16, #tpu.memory_space<vmem>>, vector<16x16xbf16>
    %cst_22 = arith.constant dense<0.000000e+00> : vector<16x225xf32>
    %26 = tpu.matmul %25, %24, %cst_22 {dimension_numbers = #tpu.dot_dimension_numbers<[1], [0], [0], [1], [0, 0, 1, 1], [], []>} : vector<16x16xbf16>, vector<16x225xbf16>, vector<16x225xf32> -> vector<16x225xf32>
    %c0_23 = arith.constant 0 : index
    %c0_24 = arith.constant 0 : index
    %27 = vector.load %arg5[%c0_23, %c0_24] : memref<16x1xf32, #tpu.memory_space<vmem>>, vector<16x1xf32>
    %28 = vector.broadcast %27 : vector<16x1xf32> to vector<16x225xf32>
    %29 = arith.addf %26, %28 : vector<16x225xf32>
    %30 = math.rsqrt %29 : vector<16x225xf32>
    %31 = arith.mulf %22, %30 : vector<16x225xf32>
    %32 = arith.maximumf %15, %31 : vector<16x225xf32>
    %c0_25 = arith.constant 0 : index
    %c0_26 = arith.constant 0 : index
    %33 = vector.load %arg2[%c0_25, %c0_26] : memref<16x200xbf16, #tpu.memory_space<vmem>>, vector<16x200xbf16>
    %c0_27 = arith.constant 0 : index
    %c2 = arith.constant 2 : index
    %c0_28 = arith.constant 0 : index
    %c0_29 = arith.constant 0 : index
    %34 = vector.load %arg1[%c0_27, %c2, %c0_28, %c0_29] : memref<1x4x200x225xbf16, #tpu.memory_space<vmem>>, vector<1x1x200x225xbf16>
    %35 = vector.shape_cast %34 : vector<1x1x200x225xbf16> to vector<200x225xbf16>
    %cst_30 = arith.constant dense<0.000000e+00> : vector<16x225xf32>
    %36 = tpu.matmul %33, %35, %cst_30 {dimension_numbers = #tpu.dot_dimension_numbers<[1], [0], [0], [1], [0, 0, 1, 1], [], []>} : vector<16x200xbf16>, vector<200x225xbf16>, vector<16x225xf32> -> vector<16x225xf32>
    %c0_31 = arith.constant 0 : index
    %c0_32 = arith.constant 0 : index
    %37 = vector.load %arg3[%c0_31, %c0_32] : memref<16x1xf32, #tpu.memory_space<vmem>>, vector<16x1xf32>
    %38 = vector.broadcast %37 : vector<16x1xf32> to vector<16x225xf32>
    %39 = arith.addf %36, %38 : vector<16x225xf32>
    %40 = arith.mulf %39, %39 : vector<16x225xf32>
    %41 = arith.truncf %40 : vector<16x225xf32> to vector<16x225xbf16>
    %c0_33 = arith.constant 0 : index
    %c0_34 = arith.constant 0 : index
    %42 = vector.load %arg4[%c0_33, %c0_34] : memref<16x16xbf16, #tpu.memory_space<vmem>>, vector<16x16xbf16>
    %cst_35 = arith.constant dense<0.000000e+00> : vector<16x225xf32>
    %43 = tpu.matmul %42, %41, %cst_35 {dimension_numbers = #tpu.dot_dimension_numbers<[1], [0], [0], [1], [0, 0, 1, 1], [], []>} : vector<16x16xbf16>, vector<16x225xbf16>, vector<16x225xf32> -> vector<16x225xf32>
    %c0_36 = arith.constant 0 : index
    %c0_37 = arith.constant 0 : index
    %44 = vector.load %arg5[%c0_36, %c0_37] : memref<16x1xf32, #tpu.memory_space<vmem>>, vector<16x1xf32>
    %45 = vector.broadcast %44 : vector<16x1xf32> to vector<16x225xf32>
    %46 = arith.addf %43, %45 : vector<16x225xf32>
    %47 = math.rsqrt %46 : vector<16x225xf32>
    %48 = arith.mulf %39, %47 : vector<16x225xf32>
    %49 = arith.maximumf %32, %48 : vector<16x225xf32>
    %c0_38 = arith.constant 0 : index
    %c0_39 = arith.constant 0 : index
    %50 = vector.load %arg2[%c0_38, %c0_39] : memref<16x200xbf16, #tpu.memory_space<vmem>>, vector<16x200xbf16>
    %c0_40 = arith.constant 0 : index
    %c3 = arith.constant 3 : index
    %c0_41 = arith.constant 0 : index
    %c0_42 = arith.constant 0 : index
    %51 = vector.load %arg1[%c0_40, %c3, %c0_41, %c0_42] : memref<1x4x200x225xbf16, #tpu.memory_space<vmem>>, vector<1x1x200x225xbf16>
    %52 = vector.shape_cast %51 : vector<1x1x200x225xbf16> to vector<200x225xbf16>
    %cst_43 = arith.constant dense<0.000000e+00> : vector<16x225xf32>
    %53 = tpu.matmul %50, %52, %cst_43 {dimension_numbers = #tpu.dot_dimension_numbers<[1], [0], [0], [1], [0, 0, 1, 1], [], []>} : vector<16x200xbf16>, vector<200x225xbf16>, vector<16x225xf32> -> vector<16x225xf32>
    %c0_44 = arith.constant 0 : index
    %c0_45 = arith.constant 0 : index
    %54 = vector.load %arg3[%c0_44, %c0_45] : memref<16x1xf32, #tpu.memory_space<vmem>>, vector<16x1xf32>
    %55 = vector.broadcast %54 : vector<16x1xf32> to vector<16x225xf32>
    %56 = arith.addf %53, %55 : vector<16x225xf32>
    %57 = arith.mulf %56, %56 : vector<16x225xf32>
    %58 = arith.truncf %57 : vector<16x225xf32> to vector<16x225xbf16>
    %c0_46 = arith.constant 0 : index
    %c0_47 = arith.constant 0 : index
    %59 = vector.load %arg4[%c0_46, %c0_47] : memref<16x16xbf16, #tpu.memory_space<vmem>>, vector<16x16xbf16>
    %cst_48 = arith.constant dense<0.000000e+00> : vector<16x225xf32>
    %60 = tpu.matmul %59, %58, %cst_48 {dimension_numbers = #tpu.dot_dimension_numbers<[1], [0], [0], [1], [0, 0, 1, 1], [], []>} : vector<16x16xbf16>, vector<16x225xbf16>, vector<16x225xf32> -> vector<16x225xf32>
    %c0_49 = arith.constant 0 : index
    %c0_50 = arith.constant 0 : index
    %61 = vector.load %arg5[%c0_49, %c0_50] : memref<16x1xf32, #tpu.memory_space<vmem>>, vector<16x1xf32>
    %62 = vector.broadcast %61 : vector<16x1xf32> to vector<16x225xf32>
    %63 = arith.addf %60, %62 : vector<16x225xf32>
    %64 = math.rsqrt %63 : vector<16x225xf32>
    %65 = arith.mulf %56, %64 : vector<16x225xf32>
    %66 = arith.maximumf %49, %65 : vector<16x225xf32>
    %67 = arith.truncf %66 : vector<16x225xf32> to vector<16x225xbf16>
    %c0_51 = arith.constant 0 : index
    %c0_52 = arith.constant 0 : index
    %c0_53 = arith.constant 0 : index
    %68 = vector.load %arg6[%c0_51, %c0_52, %c0_53] : memref<1x16x225xbf16, #tpu.memory_space<vmem>>, vector<1x16x225xbf16>
    %69 = vector.shape_cast %68 : vector<1x16x225xbf16> to vector<16x225xbf16>
    %70 = vector.shape_cast %67 : vector<16x225xbf16> to vector<1x16x225xbf16>
    tpu.vector_store %arg6[%c0_51, %c0_52, %c0_53], %70 {strides = array<i32>} : memref<1x16x225xbf16, #tpu.memory_space<vmem>>, vector<1x16x225xbf16>,
    return
  }
  func.func @transform_0(%arg0: i32) -> (i32, i32, i32, i32) {
    %c0_i32 = arith.constant 0 : i32
    %c0_i32_0 = arith.constant 0 : i32
    %c0_i32_1 = arith.constant 0 : i32
    %c0_i32_2 = arith.constant 0 : i32
    return %arg0, %c0_i32, %c0_i32_0, %c0_i32_1 : i32, i32, i32, i32
  }
  func.func @transform_1(%arg0: i32) -> (i32, i32) {
    %c0_i32 = arith.constant 0 : i32
    %c0_i32_0 = arith.constant 0 : i32
    %c0_i32_1 = arith.constant 0 : i32
    return %c0_i32, %c0_i32_0 : i32, i32
  }
  func.func @transform_2(%arg0: i32) -> (i32, i32) {
    %c0_i32 = arith.constant 0 : i32
    %c0_i32_0 = arith.constant 0 : i32
    %c0_i32_1 = arith.constant 0 : i32
    return %c0_i32, %c0_i32_0 : i32, i32
  }
  func.func @transform_3(%arg0: i32) -> (i32, i32) {
    %c0_i32 = arith.constant 0 : i32
    %c0_i32_0 = arith.constant 0 : i32
    %c0_i32_1 = arith.constant 0 : i32
    return %c0_i32, %c0_i32_0 : i32, i32
  }
  func.func @transform_4(%arg0: i32) -> (i32, i32) {
    %c0_i32 = arith.constant 0 : i32
    %c0_i32_0 = arith.constant 0 : i32
    %c0_i32_1 = arith.constant 0 : i32
    return %c0_i32, %c0_i32_0 : i32, i32
  }
  func.func @transform_5(%arg0: i32) -> (i32, i32, i32) {
    %c0_i32 = arith.constant 0 : i32
    %c0_i32_0 = arith.constant 0 : i32
    %c0_i32_1 = arith.constant 0 : i32
    return %arg0, %c0_i32, %c0_i32_0 : i32, i32, i32
  }
}

module attributes {stable_mosaic.version = 11 : i64} {
  func.func @_stage_kernel(%arg0: i32, %arg1: memref<1x4x400x16xbf16, #tpu.memory_space<vmem>>, %arg2: memref<32x400xbf16, #tpu.memory_space<vmem>>, %arg3: memref<32x1xf32, #tpu.memory_space<vmem>>, %arg4: memref<32x32xbf16, #tpu.memory_space<vmem>>, %arg5: memref<32x1xf32, #tpu.memory_space<vmem>>, %arg6: memref<1x32x16xbf16, #tpu.memory_space<vmem>>) attributes {dimension_semantics = [#tpu.dimension_semantics<parallel>], iteration_bounds = array<i64: 4>, scalar_prefetch = 0 : i64, scratch_operands = 0 : i64, tpu.core_type = #tpu.core_type<tc>, window_params = [{transform_indices = @transform_0, window_bounds = array<i64: 1, 4, 400, 16>}, {pipeline_mode = #tpu.pipeline_mode<synchronous>, transform_indices = @transform_1, window_bounds = array<i64: 32, 400>}, {pipeline_mode = #tpu.pipeline_mode<synchronous>, transform_indices = @transform_2, window_bounds = array<i64: 32, 1>}, {pipeline_mode = #tpu.pipeline_mode<synchronous>, transform_indices = @transform_3, window_bounds = array<i64: 32, 32>}, {pipeline_mode = #tpu.pipeline_mode<synchronous>, transform_indices = @transform_4, window_bounds = array<i64: 32, 1>}, {transform_indices = @transform_5, window_bounds = array<i64: 1, 32, 16>}]} {
    %c0 = arith.constant 0 : index
    %c0_0 = arith.constant 0 : index
    %0 = vector.load %arg2[%c0, %c0_0] : memref<32x400xbf16, #tpu.memory_space<vmem>>, vector<32x400xbf16>
    %c0_1 = arith.constant 0 : index
    %c0_2 = arith.constant 0 : index
    %c0_3 = arith.constant 0 : index
    %c0_4 = arith.constant 0 : index
    %1 = vector.load %arg1[%c0_1, %c0_2, %c0_3, %c0_4] : memref<1x4x400x16xbf16, #tpu.memory_space<vmem>>, vector<1x1x400x16xbf16>
    %2 = vector.shape_cast %1 : vector<1x1x400x16xbf16> to vector<400x16xbf16>
    %cst = arith.constant dense<0.000000e+00> : vector<32x16xf32>
    %3 = tpu.matmul %0, %2, %cst {dimension_numbers = #tpu.dot_dimension_numbers<[1], [0], [0], [1], [0, 0, 1, 1], [], []>} : vector<32x400xbf16>, vector<400x16xbf16>, vector<32x16xf32> -> vector<32x16xf32>
    %c0_5 = arith.constant 0 : index
    %c0_6 = arith.constant 0 : index
    %4 = vector.load %arg3[%c0_5, %c0_6] : memref<32x1xf32, #tpu.memory_space<vmem>>, vector<32x1xf32>
    %5 = vector.broadcast %4 : vector<32x1xf32> to vector<32x16xf32>
    %6 = arith.addf %3, %5 : vector<32x16xf32>
    %7 = arith.mulf %6, %6 : vector<32x16xf32>
    %8 = arith.truncf %7 : vector<32x16xf32> to vector<32x16xbf16>
    %c0_7 = arith.constant 0 : index
    %c0_8 = arith.constant 0 : index
    %9 = vector.load %arg4[%c0_7, %c0_8] : memref<32x32xbf16, #tpu.memory_space<vmem>>, vector<32x32xbf16>
    %cst_9 = arith.constant dense<0.000000e+00> : vector<32x16xf32>
    %10 = tpu.matmul %9, %8, %cst_9 {dimension_numbers = #tpu.dot_dimension_numbers<[1], [0], [0], [1], [0, 0, 1, 1], [], []>} : vector<32x32xbf16>, vector<32x16xbf16>, vector<32x16xf32> -> vector<32x16xf32>
    %c0_10 = arith.constant 0 : index
    %c0_11 = arith.constant 0 : index
    %11 = vector.load %arg5[%c0_10, %c0_11] : memref<32x1xf32, #tpu.memory_space<vmem>>, vector<32x1xf32>
    %12 = vector.broadcast %11 : vector<32x1xf32> to vector<32x16xf32>
    %13 = arith.addf %10, %12 : vector<32x16xf32>
    %14 = math.rsqrt %13 : vector<32x16xf32>
    %15 = arith.mulf %6, %14 : vector<32x16xf32>
    %c0_12 = arith.constant 0 : index
    %c0_13 = arith.constant 0 : index
    %16 = vector.load %arg2[%c0_12, %c0_13] : memref<32x400xbf16, #tpu.memory_space<vmem>>, vector<32x400xbf16>
    %c0_14 = arith.constant 0 : index
    %c1 = arith.constant 1 : index
    %c0_15 = arith.constant 0 : index
    %c0_16 = arith.constant 0 : index
    %17 = vector.load %arg1[%c0_14, %c1, %c0_15, %c0_16] : memref<1x4x400x16xbf16, #tpu.memory_space<vmem>>, vector<1x1x400x16xbf16>
    %18 = vector.shape_cast %17 : vector<1x1x400x16xbf16> to vector<400x16xbf16>
    %cst_17 = arith.constant dense<0.000000e+00> : vector<32x16xf32>
    %19 = tpu.matmul %16, %18, %cst_17 {dimension_numbers = #tpu.dot_dimension_numbers<[1], [0], [0], [1], [0, 0, 1, 1], [], []>} : vector<32x400xbf16>, vector<400x16xbf16>, vector<32x16xf32> -> vector<32x16xf32>
    %c0_18 = arith.constant 0 : index
    %c0_19 = arith.constant 0 : index
    %20 = vector.load %arg3[%c0_18, %c0_19] : memref<32x1xf32, #tpu.memory_space<vmem>>, vector<32x1xf32>
    %21 = vector.broadcast %20 : vector<32x1xf32> to vector<32x16xf32>
    %22 = arith.addf %19, %21 : vector<32x16xf32>
    %23 = arith.mulf %22, %22 : vector<32x16xf32>
    %24 = arith.truncf %23 : vector<32x16xf32> to vector<32x16xbf16>
    %c0_20 = arith.constant 0 : index
    %c0_21 = arith.constant 0 : index
    %25 = vector.load %arg4[%c0_20, %c0_21] : memref<32x32xbf16, #tpu.memory_space<vmem>>, vector<32x32xbf16>
    %cst_22 = arith.constant dense<0.000000e+00> : vector<32x16xf32>
    %26 = tpu.matmul %25, %24, %cst_22 {dimension_numbers = #tpu.dot_dimension_numbers<[1], [0], [0], [1], [0, 0, 1, 1], [], []>} : vector<32x32xbf16>, vector<32x16xbf16>, vector<32x16xf32> -> vector<32x16xf32>
    %c0_23 = arith.constant 0 : index
    %c0_24 = arith.constant 0 : index
    %27 = vector.load %arg5[%c0_23, %c0_24] : memref<32x1xf32, #tpu.memory_space<vmem>>, vector<32x1xf32>
    %28 = vector.broadcast %27 : vector<32x1xf32> to vector<32x16xf32>
    %29 = arith.addf %26, %28 : vector<32x16xf32>
    %30 = math.rsqrt %29 : vector<32x16xf32>
    %31 = arith.mulf %22, %30 : vector<32x16xf32>
    %32 = arith.maximumf %15, %31 : vector<32x16xf32>
    %c0_25 = arith.constant 0 : index
    %c0_26 = arith.constant 0 : index
    %33 = vector.load %arg2[%c0_25, %c0_26] : memref<32x400xbf16, #tpu.memory_space<vmem>>, vector<32x400xbf16>
    %c0_27 = arith.constant 0 : index
    %c2 = arith.constant 2 : index
    %c0_28 = arith.constant 0 : index
    %c0_29 = arith.constant 0 : index
    %34 = vector.load %arg1[%c0_27, %c2, %c0_28, %c0_29] : memref<1x4x400x16xbf16, #tpu.memory_space<vmem>>, vector<1x1x400x16xbf16>
    %35 = vector.shape_cast %34 : vector<1x1x400x16xbf16> to vector<400x16xbf16>
    %cst_30 = arith.constant dense<0.000000e+00> : vector<32x16xf32>
    %36 = tpu.matmul %33, %35, %cst_30 {dimension_numbers = #tpu.dot_dimension_numbers<[1], [0], [0], [1], [0, 0, 1, 1], [], []>} : vector<32x400xbf16>, vector<400x16xbf16>, vector<32x16xf32> -> vector<32x16xf32>
    %c0_31 = arith.constant 0 : index
    %c0_32 = arith.constant 0 : index
    %37 = vector.load %arg3[%c0_31, %c0_32] : memref<32x1xf32, #tpu.memory_space<vmem>>, vector<32x1xf32>
    %38 = vector.broadcast %37 : vector<32x1xf32> to vector<32x16xf32>
    %39 = arith.addf %36, %38 : vector<32x16xf32>
    %40 = arith.mulf %39, %39 : vector<32x16xf32>
    %41 = arith.truncf %40 : vector<32x16xf32> to vector<32x16xbf16>
    %c0_33 = arith.constant 0 : index
    %c0_34 = arith.constant 0 : index
    %42 = vector.load %arg4[%c0_33, %c0_34] : memref<32x32xbf16, #tpu.memory_space<vmem>>, vector<32x32xbf16>
    %cst_35 = arith.constant dense<0.000000e+00> : vector<32x16xf32>
    %43 = tpu.matmul %42, %41, %cst_35 {dimension_numbers = #tpu.dot_dimension_numbers<[1], [0], [0], [1], [0, 0, 1, 1], [], []>} : vector<32x32xbf16>, vector<32x16xbf16>, vector<32x16xf32> -> vector<32x16xf32>
    %c0_36 = arith.constant 0 : index
    %c0_37 = arith.constant 0 : index
    %44 = vector.load %arg5[%c0_36, %c0_37] : memref<32x1xf32, #tpu.memory_space<vmem>>, vector<32x1xf32>
    %45 = vector.broadcast %44 : vector<32x1xf32> to vector<32x16xf32>
    %46 = arith.addf %43, %45 : vector<32x16xf32>
    %47 = math.rsqrt %46 : vector<32x16xf32>
    %48 = arith.mulf %39, %47 : vector<32x16xf32>
    %49 = arith.maximumf %32, %48 : vector<32x16xf32>
    %c0_38 = arith.constant 0 : index
    %c0_39 = arith.constant 0 : index
    %50 = vector.load %arg2[%c0_38, %c0_39] : memref<32x400xbf16, #tpu.memory_space<vmem>>, vector<32x400xbf16>
    %c0_40 = arith.constant 0 : index
    %c3 = arith.constant 3 : index
    %c0_41 = arith.constant 0 : index
    %c0_42 = arith.constant 0 : index
    %51 = vector.load %arg1[%c0_40, %c3, %c0_41, %c0_42] : memref<1x4x400x16xbf16, #tpu.memory_space<vmem>>, vector<1x1x400x16xbf16>
    %52 = vector.shape_cast %51 : vector<1x1x400x16xbf16> to vector<400x16xbf16>
    %cst_43 = arith.constant dense<0.000000e+00> : vector<32x16xf32>
    %53 = tpu.matmul %50, %52, %cst_43 {dimension_numbers = #tpu.dot_dimension_numbers<[1], [0], [0], [1], [0, 0, 1, 1], [], []>} : vector<32x400xbf16>, vector<400x16xbf16>, vector<32x16xf32> -> vector<32x16xf32>
    %c0_44 = arith.constant 0 : index
    %c0_45 = arith.constant 0 : index
    %54 = vector.load %arg3[%c0_44, %c0_45] : memref<32x1xf32, #tpu.memory_space<vmem>>, vector<32x1xf32>
    %55 = vector.broadcast %54 : vector<32x1xf32> to vector<32x16xf32>
    %56 = arith.addf %53, %55 : vector<32x16xf32>
    %57 = arith.mulf %56, %56 : vector<32x16xf32>
    %58 = arith.truncf %57 : vector<32x16xf32> to vector<32x16xbf16>
    %c0_46 = arith.constant 0 : index
    %c0_47 = arith.constant 0 : index
    %59 = vector.load %arg4[%c0_46, %c0_47] : memref<32x32xbf16, #tpu.memory_space<vmem>>, vector<32x32xbf16>
    %cst_48 = arith.constant dense<0.000000e+00> : vector<32x16xf32>
    %60 = tpu.matmul %59, %58, %cst_48 {dimension_numbers = #tpu.dot_dimension_numbers<[1], [0], [0], [1], [0, 0, 1, 1], [], []>} : vector<32x32xbf16>, vector<32x16xbf16>, vector<32x16xf32> -> vector<32x16xf32>
    %c0_49 = arith.constant 0 : index
    %c0_50 = arith.constant 0 : index
    %61 = vector.load %arg5[%c0_49, %c0_50] : memref<32x1xf32, #tpu.memory_space<vmem>>, vector<32x1xf32>
    %62 = vector.broadcast %61 : vector<32x1xf32> to vector<32x16xf32>
    %63 = arith.addf %60, %62 : vector<32x16xf32>
    %64 = math.rsqrt %63 : vector<32x16xf32>
    %65 = arith.mulf %56, %64 : vector<32x16xf32>
    %66 = arith.maximumf %49, %65 : vector<32x16xf32>
    %67 = arith.truncf %66 : vector<32x16xf32> to vector<32x16xbf16>
    %c0_51 = arith.constant 0 : index
    %c0_52 = arith.constant 0 : index
    %c0_53 = arith.constant 0 : index
    %68 = vector.load %arg6[%c0_51, %c0_52, %c0_53] : memref<1x32x16xbf16, #tpu.memory_space<vmem>>, vector<1x32x16xbf16>
    %69 = vector.shape_cast %68 : vector<1x32x16xbf16> to vector<32x16xbf16>
    %70 = vector.shape_cast %67 : vector<32x16xbf16> to vector<1x32x16xbf16>
    tpu.vector_store %arg6[%c0_51, %c0_52, %c0_53], %70 {strides = array<i32>} : memref<1x32x16xbf16, #tpu.memory_space<vmem>>, vector<1x32x16xbf16>,
    return
  }
  func.func @transform_0(%arg0: i32) -> (i32, i32, i32, i32) {
    %c0_i32 = arith.constant 0 : i32
    %c0_i32_0 = arith.constant 0 : i32
    %c0_i32_1 = arith.constant 0 : i32
    %c0_i32_2 = arith.constant 0 : i32
    return %arg0, %c0_i32, %c0_i32_0, %c0_i32_1 : i32, i32, i32, i32
  }
  func.func @transform_1(%arg0: i32) -> (i32, i32) {
    %c0_i32 = arith.constant 0 : i32
    %c0_i32_0 = arith.constant 0 : i32
    %c0_i32_1 = arith.constant 0 : i32
    return %c0_i32, %c0_i32_0 : i32, i32
  }
  func.func @transform_2(%arg0: i32) -> (i32, i32) {
    %c0_i32 = arith.constant 0 : i32
    %c0_i32_0 = arith.constant 0 : i32
    %c0_i32_1 = arith.constant 0 : i32
    return %c0_i32, %c0_i32_0 : i32, i32
  }
  func.func @transform_3(%arg0: i32) -> (i32, i32) {
    %c0_i32 = arith.constant 0 : i32
    %c0_i32_0 = arith.constant 0 : i32
    %c0_i32_1 = arith.constant 0 : i32
    return %c0_i32, %c0_i32_0 : i32, i32
  }
  func.func @transform_4(%arg0: i32) -> (i32, i32) {
    %c0_i32 = arith.constant 0 : i32
    %c0_i32_0 = arith.constant 0 : i32
    %c0_i32_1 = arith.constant 0 : i32
    return %c0_i32, %c0_i32_0 : i32, i32
  }
  func.func @transform_5(%arg0: i32) -> (i32, i32, i32) {
    %c0_i32 = arith.constant 0 : i32
    %c0_i32_0 = arith.constant 0 : i32
    %c0_i32_1 = arith.constant 0 : i32
    return %arg0, %c0_i32, %c0_i32_0 : i32, i32, i32
  }
}

module attributes {stable_mosaic.version = 11 : i64} {
  func.func @_stage4_tail_kernel(%arg0: i32, %arg1: memref<1x4x288x4xbf16, #tpu.memory_space<vmem>>, %arg2: memref<64x288xbf16, #tpu.memory_space<vmem>>, %arg3: memref<64x1xf32, #tpu.memory_space<vmem>>, %arg4: memref<64x64xbf16, #tpu.memory_space<vmem>>, %arg5: memref<64x1xf32, #tpu.memory_space<vmem>>, %arg6: memref<256x64xbf16, #tpu.memory_space<vmem>>, %arg7: memref<256x1xf32, #tpu.memory_space<vmem>>, %arg8: memref<256x256xbf16, #tpu.memory_space<vmem>>, %arg9: memref<256x1xf32, #tpu.memory_space<vmem>>, %arg10: memref<1x256xbf16, #tpu.memory_space<vmem>>, %arg11: memref<1x1xf32, #tpu.memory_space<vmem>>, %arg12: memref<1x1x4xf32, #tpu.memory_space<vmem>>) attributes {dimension_semantics = [#tpu.dimension_semantics<parallel>], iteration_bounds = array<i64: 4>, scalar_prefetch = 0 : i64, scratch_operands = 0 : i64, tpu.core_type = #tpu.core_type<tc>, window_params = [{transform_indices = @transform_0, window_bounds = array<i64: 1, 4, 288, 4>}, {pipeline_mode = #tpu.pipeline_mode<synchronous>, transform_indices = @transform_1, window_bounds = array<i64: 64, 288>}, {pipeline_mode = #tpu.pipeline_mode<synchronous>, transform_indices = @transform_2, window_bounds = array<i64: 64, 1>}, {pipeline_mode = #tpu.pipeline_mode<synchronous>, transform_indices = @transform_3, window_bounds = array<i64: 64, 64>}, {pipeline_mode = #tpu.pipeline_mode<synchronous>, transform_indices = @transform_4, window_bounds = array<i64: 64, 1>}, {pipeline_mode = #tpu.pipeline_mode<synchronous>, transform_indices = @transform_5, window_bounds = array<i64: 256, 64>}, {pipeline_mode = #tpu.pipeline_mode<synchronous>, transform_indices = @transform_6, window_bounds = array<i64: 256, 1>}, {pipeline_mode = #tpu.pipeline_mode<synchronous>, transform_indices = @transform_7, window_bounds = array<i64: 256, 256>}, {pipeline_mode = #tpu.pipeline_mode<synchronous>, transform_indices = @transform_8, window_bounds = array<i64: 256, 1>}, {pipeline_mode = #tpu.pipeline_mode<synchronous>, transform_indices = @transform_9, window_bounds = array<i64: 1, 256>}, {pipeline_mode = #tpu.pipeline_mode<synchronous>, transform_indices = @transform_10, window_bounds = array<i64: 1, 1>}, {transform_indices = @transform_11, window_bounds = array<i64: 1, 1, 4>}]} {
    %c0 = arith.constant 0 : index
    %c0_0 = arith.constant 0 : index
    %0 = vector.load %arg2[%c0, %c0_0] : memref<64x288xbf16, #tpu.memory_space<vmem>>, vector<64x288xbf16>
    %c0_1 = arith.constant 0 : index
    %c0_2 = arith.constant 0 : index
    %c0_3 = arith.constant 0 : index
    %c0_4 = arith.constant 0 : index
    %1 = vector.load %arg1[%c0_1, %c0_2, %c0_3, %c0_4] : memref<1x4x288x4xbf16, #tpu.memory_space<vmem>>, vector<1x1x288x4xbf16>
    %2 = vector.shape_cast %1 : vector<1x1x288x4xbf16> to vector<288x4xbf16>
    %cst = arith.constant dense<0.000000e+00> : vector<64x4xf32>
    %3 = tpu.matmul %0, %2, %cst {dimension_numbers = #tpu.dot_dimension_numbers<[1], [0], [0], [1], [0, 0, 1, 1], [], []>} : vector<64x288xbf16>, vector<288x4xbf16>, vector<64x4xf32> -> vector<64x4xf32>
    %c0_5 = arith.constant 0 : index
    %c0_6 = arith.constant 0 : index
    %4 = vector.load %arg3[%c0_5, %c0_6] : memref<64x1xf32, #tpu.memory_space<vmem>>, vector<64x1xf32>
    %5 = vector.broadcast %4 : vector<64x1xf32> to vector<64x4xf32>
    %6 = arith.addf %3, %5 : vector<64x4xf32>
    %c0_7 = arith.constant 0 : index
    %c0_8 = arith.constant 0 : index
    %7 = vector.load %arg4[%c0_7, %c0_8] : memref<64x64xbf16, #tpu.memory_space<vmem>>, vector<64x64xbf16>
    %8 = arith.mulf %6, %6 : vector<64x4xf32>
    %9 = arith.truncf %8 : vector<64x4xf32> to vector<64x4xbf16>
    %cst_9 = arith.constant dense<0.000000e+00> : vector<64x4xf32>
    %10 = tpu.matmul %7, %9, %cst_9 {dimension_numbers = #tpu.dot_dimension_numbers<[1], [0], [0], [1], [0, 0, 1, 1], [], []>} : vector<64x64xbf16>, vector<64x4xbf16>, vector<64x4xf32> -> vector<64x4xf32>
    %c0_10 = arith.constant 0 : index
    %c0_11 = arith.constant 0 : index
    %11 = vector.load %arg5[%c0_10, %c0_11] : memref<64x1xf32, #tpu.memory_space<vmem>>, vector<64x1xf32>
    %12 = vector.broadcast %11 : vector<64x1xf32> to vector<64x4xf32>
    %13 = arith.addf %10, %12 : vector<64x4xf32>
    %14 = math.rsqrt %13 : vector<64x4xf32>
    %15 = arith.mulf %6, %14 : vector<64x4xf32>
    %c0_12 = arith.constant 0 : index
    %c0_13 = arith.constant 0 : index
    %16 = vector.load %arg2[%c0_12, %c0_13] : memref<64x288xbf16, #tpu.memory_space<vmem>>, vector<64x288xbf16>
    %c0_14 = arith.constant 0 : index
    %c1 = arith.constant 1 : index
    %c0_15 = arith.constant 0 : index
    %c0_16 = arith.constant 0 : index
    %17 = vector.load %arg1[%c0_14, %c1, %c0_15, %c0_16] : memref<1x4x288x4xbf16, #tpu.memory_space<vmem>>, vector<1x1x288x4xbf16>
    %18 = vector.shape_cast %17 : vector<1x1x288x4xbf16> to vector<288x4xbf16>
    %cst_17 = arith.constant dense<0.000000e+00> : vector<64x4xf32>
    %19 = tpu.matmul %16, %18, %cst_17 {dimension_numbers = #tpu.dot_dimension_numbers<[1], [0], [0], [1], [0, 0, 1, 1], [], []>} : vector<64x288xbf16>, vector<288x4xbf16>, vector<64x4xf32> -> vector<64x4xf32>
    %c0_18 = arith.constant 0 : index
    %c0_19 = arith.constant 0 : index
    %20 = vector.load %arg3[%c0_18, %c0_19] : memref<64x1xf32, #tpu.memory_space<vmem>>, vector<64x1xf32>
    %21 = vector.broadcast %20 : vector<64x1xf32> to vector<64x4xf32>
    %22 = arith.addf %19, %21 : vector<64x4xf32>
    %c0_20 = arith.constant 0 : index
    %c0_21 = arith.constant 0 : index
    %23 = vector.load %arg4[%c0_20, %c0_21] : memref<64x64xbf16, #tpu.memory_space<vmem>>, vector<64x64xbf16>
    %24 = arith.mulf %22, %22 : vector<64x4xf32>
    %25 = arith.truncf %24 : vector<64x4xf32> to vector<64x4xbf16>
    %cst_22 = arith.constant dense<0.000000e+00> : vector<64x4xf32>
    %26 = tpu.matmul %23, %25, %cst_22 {dimension_numbers = #tpu.dot_dimension_numbers<[1], [0], [0], [1], [0, 0, 1, 1], [], []>} : vector<64x64xbf16>, vector<64x4xbf16>, vector<64x4xf32> -> vector<64x4xf32>
    %c0_23 = arith.constant 0 : index
    %c0_24 = arith.constant 0 : index
    %27 = vector.load %arg5[%c0_23, %c0_24] : memref<64x1xf32, #tpu.memory_space<vmem>>, vector<64x1xf32>
    %28 = vector.broadcast %27 : vector<64x1xf32> to vector<64x4xf32>
    %29 = arith.addf %26, %28 : vector<64x4xf32>
    %30 = math.rsqrt %29 : vector<64x4xf32>
    %31 = arith.mulf %22, %30 : vector<64x4xf32>
    %32 = arith.maximumf %15, %31 : vector<64x4xf32>
    %c0_25 = arith.constant 0 : index
    %c0_26 = arith.constant 0 : index
    %33 = vector.load %arg2[%c0_25, %c0_26] : memref<64x288xbf16, #tpu.memory_space<vmem>>, vector<64x288xbf16>
    %c0_27 = arith.constant 0 : index
    %c2 = arith.constant 2 : index
    %c0_28 = arith.constant 0 : index
    %c0_29 = arith.constant 0 : index
    %34 = vector.load %arg1[%c0_27, %c2, %c0_28, %c0_29] : memref<1x4x288x4xbf16, #tpu.memory_space<vmem>>, vector<1x1x288x4xbf16>
    %35 = vector.shape_cast %34 : vector<1x1x288x4xbf16> to vector<288x4xbf16>
    %cst_30 = arith.constant dense<0.000000e+00> : vector<64x4xf32>
    %36 = tpu.matmul %33, %35, %cst_30 {dimension_numbers = #tpu.dot_dimension_numbers<[1], [0], [0], [1], [0, 0, 1, 1], [], []>} : vector<64x288xbf16>, vector<288x4xbf16>, vector<64x4xf32> -> vector<64x4xf32>
    %c0_31 = arith.constant 0 : index
    %c0_32 = arith.constant 0 : index
    %37 = vector.load %arg3[%c0_31, %c0_32] : memref<64x1xf32, #tpu.memory_space<vmem>>, vector<64x1xf32>
    %38 = vector.broadcast %37 : vector<64x1xf32> to vector<64x4xf32>
    %39 = arith.addf %36, %38 : vector<64x4xf32>
    %c0_33 = arith.constant 0 : index
    %c0_34 = arith.constant 0 : index
    %40 = vector.load %arg4[%c0_33, %c0_34] : memref<64x64xbf16, #tpu.memory_space<vmem>>, vector<64x64xbf16>
    %41 = arith.mulf %39, %39 : vector<64x4xf32>
    %42 = arith.truncf %41 : vector<64x4xf32> to vector<64x4xbf16>
    %cst_35 = arith.constant dense<0.000000e+00> : vector<64x4xf32>
    %43 = tpu.matmul %40, %42, %cst_35 {dimension_numbers = #tpu.dot_dimension_numbers<[1], [0], [0], [1], [0, 0, 1, 1], [], []>} : vector<64x64xbf16>, vector<64x4xbf16>, vector<64x4xf32> -> vector<64x4xf32>
    %c0_36 = arith.constant 0 : index
    %c0_37 = arith.constant 0 : index
    %44 = vector.load %arg5[%c0_36, %c0_37] : memref<64x1xf32, #tpu.memory_space<vmem>>, vector<64x1xf32>
    %45 = vector.broadcast %44 : vector<64x1xf32> to vector<64x4xf32>
    %46 = arith.addf %43, %45 : vector<64x4xf32>
    %47 = math.rsqrt %46 : vector<64x4xf32>
    %48 = arith.mulf %39, %47 : vector<64x4xf32>
    %49 = arith.maximumf %32, %48 : vector<64x4xf32>
    %c0_38 = arith.constant 0 : index
    %c0_39 = arith.constant 0 : index
    %50 = vector.load %arg2[%c0_38, %c0_39] : memref<64x288xbf16, #tpu.memory_space<vmem>>, vector<64x288xbf16>
    %c0_40 = arith.constant 0 : index
    %c3 = arith.constant 3 : index
    %c0_41 = arith.constant 0 : index
    %c0_42 = arith.constant 0 : index
    %51 = vector.load %arg1[%c0_40, %c3, %c0_41, %c0_42] : memref<1x4x288x4xbf16, #tpu.memory_space<vmem>>, vector<1x1x288x4xbf16>
    %52 = vector.shape_cast %51 : vector<1x1x288x4xbf16> to vector<288x4xbf16>
    %cst_43 = arith.constant dense<0.000000e+00> : vector<64x4xf32>
    %53 = tpu.matmul %50, %52, %cst_43 {dimension_numbers = #tpu.dot_dimension_numbers<[1], [0], [0], [1], [0, 0, 1, 1], [], []>} : vector<64x288xbf16>, vector<288x4xbf16>, vector<64x4xf32> -> vector<64x4xf32>
    %c0_44 = arith.constant 0 : index
    %c0_45 = arith.constant 0 : index
    %54 = vector.load %arg3[%c0_44, %c0_45] : memref<64x1xf32, #tpu.memory_space<vmem>>, vector<64x1xf32>
    %55 = vector.broadcast %54 : vector<64x1xf32> to vector<64x4xf32>
    %56 = arith.addf %53, %55 : vector<64x4xf32>
    %c0_46 = arith.constant 0 : index
    %c0_47 = arith.constant 0 : index
    %57 = vector.load %arg4[%c0_46, %c0_47] : memref<64x64xbf16, #tpu.memory_space<vmem>>, vector<64x64xbf16>
    %58 = arith.mulf %56, %56 : vector<64x4xf32>
    %59 = arith.truncf %58 : vector<64x4xf32> to vector<64x4xbf16>
    %cst_48 = arith.constant dense<0.000000e+00> : vector<64x4xf32>
    %60 = tpu.matmul %57, %59, %cst_48 {dimension_numbers = #tpu.dot_dimension_numbers<[1], [0], [0], [1], [0, 0, 1, 1], [], []>} : vector<64x64xbf16>, vector<64x4xbf16>, vector<64x4xf32> -> vector<64x4xf32>
    %c0_49 = arith.constant 0 : index
    %c0_50 = arith.constant 0 : index
    %61 = vector.load %arg5[%c0_49, %c0_50] : memref<64x1xf32, #tpu.memory_space<vmem>>, vector<64x1xf32>
    %62 = vector.broadcast %61 : vector<64x1xf32> to vector<64x4xf32>
    %63 = arith.addf %60, %62 : vector<64x4xf32>
    %64 = math.rsqrt %63 : vector<64x4xf32>
    %65 = arith.mulf %56, %64 : vector<64x4xf32>
    %66 = arith.maximumf %49, %65 : vector<64x4xf32>
    %67 = arith.truncf %66 : vector<64x4xf32> to vector<64x4xbf16>
    %c0_51 = arith.constant 0 : index
    %c0_52 = arith.constant 0 : index
    %68 = vector.load %arg6[%c0_51, %c0_52] : memref<256x64xbf16, #tpu.memory_space<vmem>>, vector<256x64xbf16>
    %cst_53 = arith.constant dense<0.000000e+00> : vector<256x4xf32>
    %69 = tpu.matmul %68, %67, %cst_53 {dimension_numbers = #tpu.dot_dimension_numbers<[1], [0], [0], [1], [0, 0, 1, 1], [], []>} : vector<256x64xbf16>, vector<64x4xbf16>, vector<256x4xf32> -> vector<256x4xf32>
    %c0_54 = arith.constant 0 : index
    %c0_55 = arith.constant 0 : index
    %70 = vector.load %arg7[%c0_54, %c0_55] : memref<256x1xf32, #tpu.memory_space<vmem>>, vector<256x1xf32>
    %71 = vector.broadcast %70 : vector<256x1xf32> to vector<256x4xf32>
    %72 = arith.addf %69, %71 : vector<256x4xf32>
    %c0_56 = arith.constant 0 : index
    %c0_57 = arith.constant 0 : index
    %73 = vector.load %arg8[%c0_56, %c0_57] : memref<256x256xbf16, #tpu.memory_space<vmem>>, vector<256x256xbf16>
    %74 = arith.mulf %72, %72 : vector<256x4xf32>
    %75 = arith.truncf %74 : vector<256x4xf32> to vector<256x4xbf16>
    %cst_58 = arith.constant dense<0.000000e+00> : vector<256x4xf32>
    %76 = tpu.matmul %73, %75, %cst_58 {dimension_numbers = #tpu.dot_dimension_numbers<[1], [0], [0], [1], [0, 0, 1, 1], [], []>} : vector<256x256xbf16>, vector<256x4xbf16>, vector<256x4xf32> -> vector<256x4xf32>
    %c0_59 = arith.constant 0 : index
    %c0_60 = arith.constant 0 : index
    %77 = vector.load %arg9[%c0_59, %c0_60] : memref<256x1xf32, #tpu.memory_space<vmem>>, vector<256x1xf32>
    %78 = vector.broadcast %77 : vector<256x1xf32> to vector<256x4xf32>
    %79 = arith.addf %76, %78 : vector<256x4xf32>
    %80 = math.rsqrt %79 : vector<256x4xf32>
    %81 = arith.mulf %72, %80 : vector<256x4xf32>
    %82 = arith.truncf %81 : vector<256x4xf32> to vector<256x4xbf16>
    %c0_61 = arith.constant 0 : index
    %c0_62 = arith.constant 0 : index
    %83 = vector.load %arg10[%c0_61, %c0_62] : memref<1x256xbf16, #tpu.memory_space<vmem>>, vector<1x256xbf16>
    %cst_63 = arith.constant dense<0.000000e+00> : vector<1x4xf32>
    %84 = tpu.matmul %83, %82, %cst_63 {dimension_numbers = #tpu.dot_dimension_numbers<[1], [0], [0], [1], [0, 0, 1, 1], [], []>} : vector<1x256xbf16>, vector<256x4xbf16>, vector<1x4xf32> -> vector<1x4xf32>
    %c0_64 = arith.constant 0 : index
    %c0_65 = arith.constant 0 : index
    %85 = vector.load %arg11[%c0_64, %c0_65] : memref<1x1xf32, #tpu.memory_space<vmem>>, vector<1x1xf32>
    %86 = vector.broadcast %85 : vector<1x1xf32> to vector<1x4xf32>
    %87 = arith.addf %84, %86 : vector<1x4xf32>
    %c0_66 = arith.constant 0 : index
    %c0_67 = arith.constant 0 : index
    %c0_68 = arith.constant 0 : index
    %88 = vector.load %arg12[%c0_66, %c0_67, %c0_68] : memref<1x1x4xf32, #tpu.memory_space<vmem>>, vector<1x1x4xf32>
    %89 = vector.shape_cast %88 : vector<1x1x4xf32> to vector<1x4xf32>
    %90 = vector.shape_cast %87 : vector<1x4xf32> to vector<1x1x4xf32>
    tpu.vector_store %arg12[%c0_66, %c0_67, %c0_68], %90 {strides = array<i32>} : memref<1x1x4xf32, #tpu.memory_space<vmem>>, vector<1x1x4xf32>,
    return
  }
  func.func @transform_0(%arg0: i32) -> (i32, i32, i32, i32) {
    %c0_i32 = arith.constant 0 : i32
    %c0_i32_0 = arith.constant 0 : i32
    %c0_i32_1 = arith.constant 0 : i32
    %c0_i32_2 = arith.constant 0 : i32
    return %arg0, %c0_i32, %c0_i32_0, %c0_i32_1 : i32, i32, i32, i32
  }
  func.func @transform_1(%arg0: i32) -> (i32, i32) {
    %c0_i32 = arith.constant 0 : i32
    %c0_i32_0 = arith.constant 0 : i32
    %c0_i32_1 = arith.constant 0 : i32
    return %c0_i32, %c0_i32_0 : i32, i32
  }
  func.func @transform_2(%arg0: i32) -> (i32, i32) {
    %c0_i32 = arith.constant 0 : i32
    %c0_i32_0 = arith.constant 0 : i32
    %c0_i32_1 = arith.constant 0 : i32
    return %c0_i32, %c0_i32_0 : i32, i32
  }
  func.func @transform_3(%arg0: i32) -> (i32, i32) {
    %c0_i32 = arith.constant 0 : i32
    %c0_i32_0 = arith.constant 0 : i32
    %c0_i32_1 = arith.constant 0 : i32
    return %c0_i32, %c0_i32_0 : i32, i32
  }
  func.func @transform_4(%arg0: i32) -> (i32, i32) {
    %c0_i32 = arith.constant 0 : i32
    %c0_i32_0 = arith.constant 0 : i32
    %c0_i32_1 = arith.constant 0 : i32
    return %c0_i32, %c0_i32_0 : i32, i32
  }
  func.func @transform_5(%arg0: i32) -> (i32, i32) {
    %c0_i32 = arith.constant 0 : i32
    %c0_i32_0 = arith.constant 0 : i32
    %c0_i32_1 = arith.constant 0 : i32
    return %c0_i32, %c0_i32_0 : i32, i32
  }
  func.func @transform_6(%arg0: i32) -> (i32, i32) {
    %c0_i32 = arith.constant 0 : i32
    %c0_i32_0 = arith.constant 0 : i32
    %c0_i32_1 = arith.constant 0 : i32
    return %c0_i32, %c0_i32_0 : i32, i32
  }
  func.func @transform_7(%arg0: i32) -> (i32, i32) {
    %c0_i32 = arith.constant 0 : i32
    %c0_i32_0 = arith.constant 0 : i32
    %c0_i32_1 = arith.constant 0 : i32
    return %c0_i32, %c0_i32_0 : i32, i32
  }
  func.func @transform_8(%arg0: i32) -> (i32, i32) {
    %c0_i32 = arith.constant 0 : i32
    %c0_i32_0 = arith.constant 0 : i32
    %c0_i32_1 = arith.constant 0 : i32
    return %c0_i32, %c0_i32_0 : i32, i32
  }
  func.func @transform_9(%arg0: i32) -> (i32, i32) {
    %c0_i32 = arith.constant 0 : i32
    %c0_i32_0 = arith.constant 0 : i32
    %c0_i32_1 = arith.constant 0 : i32
    return %c0_i32, %c0_i32_0 : i32, i32
  }
  func.func @transform_10(%arg0: i32) -> (i32, i32) {
    %c0_i32 = arith.constant 0 : i32
    %c0_i32_0 = arith.constant 0 : i32
    %c0_i32_1 = arith.constant 0 : i32
    return %c0_i32, %c0_i32_0 : i32, i32
  }
  func.func @transform_11(%arg0: i32) -> (i32, i32, i32) {
    %c0_i32 = arith.constant 0 : i32
    %c0_i32_0 = arith.constant 0 : i32
    %c0_i32_1 = arith.constant 0 : i32
    return %arg0, %c0_i32, %c0_i32_0 : i32, i32, i32
  }
}

</mosaic_0001>

<bundles_post_ra>
// kernel: metric_model_forward.4
= control target key start
LH: loop header
LB: loop body
LE: loop exit
PB: predicated region body
PF: predicated region fallthrough
CT: control target
= control target key end

     0   :  { %s11562_s18 = smov 0   ;;  %s13866_s0 = inlined_call_operand.vmem [shape: bf16[4,4,80,3481], index: 0, kind: input, shape index: {}]   ;;  %s13867_s1 = inlined_call_operand.vmem [shape: bf16[8,80], index: 1, kind: input, shape index: {}]   ;;  %s13868_s2 = inlined_call_operand.vmem [shape: f32[8,1], index: 2, kind: input, shape index: {}]   ;;  %s13869_s3 = inlined_call_operand.vmem [shape: bf16[8,8], index: 3, kind: input, shape index: {}]   ;;  %s13870_s4 = inlined_call_operand.vmem [shape: f32[8,1], index: 4, kind: input, shape index: {}]   ;;  %s13871_s5 = inlined_call_operand.vmem [shape: bf16[4,8,3481], index: 5, kind: output, shape index: {}]  }
   0x1 LB: > { %s9255_s19 = sadd.s32 4294967295, %s11529_s18   ;;  %p9259_p0 = scmp.ge.s32.totalorder %s11529_s18, 1  ;;  %s11529_s18 = sphi %s11562_s18, %s15_s18  }
   0x2   : > { %p187_p1 = scmp.lt.s32.totalorder %s11529_s18, 5 }
   0x4   : > { %p188_p2 = pnand %p9259_p0, %p187_p1 }
   0x6   : > { %191 = sbr.rel (%p188_p2) target bundleno = 1707 (0x6ab), region = 40 }
   0xd   : > { %p215_p3 = scmp.lt.s32.totalorder %s9255_s19, 3  ;;  %v367_v0 = vld [vmem:[%s13868_s2] sm:$0xff]  ;;  %v13872_v1 = vmov 0   ;;  %vm1073_vm0 = vcmask 654336   ;;  %vm1718_vm1 = vcmask 1043456   ;;  %vm1714_vm2 = vcmask 64512  }
   0xe   : > { %1109 = vmatprep.mubr.bf16.mxu0 %v13872_v1  ;;  %1150 = vmatprep.mubr.bf16.mxu1 %v13872_v1  ;;  %v11609_v24 = vld [vmem:[%s13867_s1] sm:$0xf]  ;;  %vm9197_vm3 = vcmask 203780  }
   0xf   : > { %s14154_s19 = smov (!%p215_p3, %s9255_s19), 3  ;;  %10451 = vset.pattern.permute.xlu0 %v13872_v1  ;;  %vm9198_vm4 = vmor %vm9197_vm3, %vm1718_vm1 }
  0x10   : > { %370 = vperm.xlu0 %10451, %v367_v0   ;;  %s10440_s22 = smul.u32 4480, %s14154_s19 }
  0x11   : > { %s10441_s23 = smul.u32 112, %s14154_s19 }
  0x12   : > { %s11582_s25 = scalar_lea.vmem %s13866_s0, %s10440_s22 }
  0x13   : > { %v10452_v2 = vld [vmem:[%s11582_s25 + $0x4] ss:$112 sps:$4 sm:$0xff]   ;;  %v10454_v3 = vld [vmem:[%s11582_s25 + $0xc] ss:$112 sps:$4 sm:$0xff]   ;;  %v10456_v4 = vld [vmem:[%s11582_s25] ss:$112 sps:$4 sm:$0xff]   ;;  %s13773_s26 = scalar_lea.vmem %s13871_s5, %s10441_s23 }
  0x14   : > { %1077 = vmatprep.subr.bf16.mxu0 %v10452_v2  ;;  %v10457_v5 = vld [vmem:[%s11582_s25 + $0x8] ss:$112 sps:$4 sm:$0xff]   ;;  %1118 = vmatprep.subr.bf16.mxu1 %v10454_v3  ;;  %v10458_v6 = vld [vmem:[%s11582_s25 + $0xe4] ss:$112 sps:$4 sm:$0xff]   ;;  %v10460_v7 = vld [vmem:[%s11582_s25 + $0xec] ss:$112 sps:$4 sm:$0xff]  }
  0x15   : > { %1078 = vmatpush1.bf16.msra.mxu0 %v10456_v4  ;;  %1119 = vmatpush1.bf16.msra.mxu1 %v10457_v5  ;;  %v10462_v8 = vld [vmem:[%s11582_s25 + $0xe0] ss:$112 sps:$4 sm:$0xff]   ;;  %v10463_v9 = vld [vmem:[%s11582_s25 + $0xe8] ss:$112 sps:$4 sm:$0xff]   ;;  %v10464_v10 = vld [vmem:[%s11582_s25 + $0x1c4] ss:$112 sps:$4 sm:$0xff]  }
  0x16   : > { %1079 = vmatprep.subr.bf16.mxu0 %v10458_v6  ;;  %1120 = vmatprep.subr.bf16.mxu1 %v10460_v7  ;;  %v10466_v11 = vld [vmem:[%s11582_s25 + $0x1cc] ss:$112 sps:$4 sm:$0xff]   ;;  %v10468_v12 = vld [vmem:[%s11582_s25 + $0x1c0] ss:$112 sps:$4 sm:$0xff]   ;;  %v10469_v13 = vld [vmem:[%s11582_s25 + $0x1c8] ss:$112 sps:$4 sm:$0xff]  }
  0x17   : > { %v10470_v14 = vld [vmem:[%s11582_s25 + $0x2a4] ss:$112 sps:$4 sm:$0xff]   ;;  %v10472_v15 = vld [vmem:[%s11582_s25 + $0x2ac] ss:$112 sps:$4 sm:$0xff]   ;;  %v10474_v16 = vld [vmem:[%s11582_s25 + $0x2a0] ss:$112 sps:$4 sm:$0xff]  }
  0x18   : > { %v10475_v17 = vld [vmem:[%s11582_s25 + $0x2a8] ss:$112 sps:$4 sm:$0xff]   ;;  %v10476_v18 = vld [vmem:[%s11582_s25 + $0x384] ss:$112 sps:$4 sm:$0xff]   ;;  %v10478_v19 = vld [vmem:[%s11582_s25 + $0x38c] ss:$112 sps:$4 sm:$0xff]  }
  0x19   : > { %1080 = vmatpush1.bf16.msra.mxu0 %v10462_v8  ;;  %1121 = vmatpush1.bf16.msra.mxu1 %v10463_v9  ;;  %v10480_v20 = vld [vmem:[%s11582_s25 + $0x380] ss:$112 sps:$4 sm:$0xff]   ;;  %v10481_v21 = vld [vmem:[%s11582_s25 + $0x388] ss:$112 sps:$4 sm:$0xff]   ;;  %v10484_v22 = vld [vmem:[%s11582_s25 + $0x14] ss:$112 sps:$4 sm:$0xff]  }
  0x1a   : > { %1081 = vmatprep.subr.bf16.mxu0 %v10464_v10  ;;  %1122 = vmatprep.subr.bf16.mxu1 %v10466_v11  ;;  %v10487_v23 = vld [vmem:[%s11582_s25 + $0x1c] ss:$112 sps:$4 sm:$0xff]   ;;  %v10482_v25 = vld [vmem:[%s11582_s25 + $0x10] ss:$112 sps:$4 sm:$0xff]   ;;  %v10485_v26 = vld [vmem:[%s11582_s25 + $0x18] ss:$112 sps:$4 sm:$0xff]  }
  0x1b   : > { %v10490_v27 = vld [vmem:[%s11582_s25 + $0xf4] ss:$112 sps:$4 sm:$0xff]   ;;  %v10493_v28 = vld [vmem:[%s11582_s25 + $0xfc] ss:$112 sps:$4 sm:$0xff]   ;;  %v10488_v29 = vld [vmem:[%s11582_s25 + $0xf0] ss:$112 sps:$4 sm:$0xff]  }
  0x1c   : > { %v10491_v30 = vld [vmem:[%s11582_s25 + $0xf8] ss:$112 sps:$4 sm:$0xff]   ;;  %v10496_v31 = vld [vmem:[%s11582_s25 + $0x1d4] ss:$112 sps:$4 sm:$0xff]   ;;  %v10499_v32 = vld [vmem:[%s11582_s25 + $0x1dc] ss:$112 sps:$4 sm:$0xff]  }
  0x1d   : > { %1082 = vmatpush1.bf16.msra.mxu0 %v10468_v12  ;;  %1123 = vmatpush1.bf16.msra.mxu1 %v10469_v13  ;;  %v10494_v33 = vld [vmem:[%s11582_s25 + $0x1d0] ss:$112 sps:$4 sm:$0xff]   ;;  %v10497_v34 = vld [vmem:[%s11582_s25 + $0x1d8] ss:$112 sps:$4 sm:$0xff]   ;;  %v10502_v35 = vld [vmem:[%s11582_s25 + $0x2b4] ss:$112 sps:$4 sm:$0xff]  }
  0x1e   : > { %1083 = vmatprep.subr.bf16.mxu0 %v10470_v14  ;;  %1124 = vmatprep.subr.bf16.mxu1 %v10472_v15  ;;  %v10505_v36 = vld [vmem:[%s11582_s25 + $0x2bc] ss:$112 sps:$4 sm:$0xff]   ;;  %v10500_v37 = vld [vmem:[%s11582_s25 + $0x2b0] ss:$112 sps:$4 sm:$0xff]   ;;  %v10503_v38 = vld [vmem:[%s11582_s25 + $0x2b8] ss:$112 sps:$4 sm:$0xff]  }
  0x1f   : > { %v10508_v39 = vld [vmem:[%s11582_s25 + $0x394] ss:$112 sps:$4 sm:$0xff]   ;;  %v10511_v40 = vld [vmem:[%s11582_s25 + $0x39c] ss:$112 sps:$4 sm:$0xff]   ;;  %v10506_v41 = vld [vmem:[%s11582_s25 + $0x390] ss:$112 sps:$4 sm:$0xff]  }
  0x20   : > { %v10509_v42 = vld [vmem:[%s11582_s25 + $0x398] ss:$112 sps:$4 sm:$0xff]   ;;  %v10514_v43 = vld [vmem:[%s11582_s25 + $0x24] ss:$112 sps:$4 sm:$0xff]   ;;  %v10517_v44 = vld [vmem:[%s11582_s25 + $0x2c] ss:$112 sps:$4 sm:$0xff]  }
  0x21   : > { %1084 = vmatpush1.bf16.msra.mxu0 %v10474_v16  ;;  %1125 = vmatpush1.bf16.msra.mxu1 %v10475_v17  ;;  %v10512_v45 = vld [vmem:[%s11582_s25 + $0x20] ss:$112 sps:$4 sm:$0xff]   ;;  %v10515_v46 = vld [vmem:[%s11582_s25 + $0x28] ss:$112 sps:$4 sm:$0xff]   ;;  %v10520_v47 = vld [vmem:[%s11582_s25 + $0x104] ss:$112 sps:$4 sm:$0xff]  }
  0x22   : > { %1085 = vmatprep.subr.bf16.mxu0 %v10476_v18  ;;  %1126 = vmatprep.subr.bf16.mxu1 %v10478_v19  ;;  %v10523_v48 = vld [vmem:[%s11582_s25 + $0x10c] ss:$112 sps:$4 sm:$0xff]   ;;  %v10518_v49 = vld [vmem:[%s11582_s25 + $0x100] ss:$112 sps:$4 sm:$0xff]   ;;  %v10521_v50 = vld [vmem:[%s11582_s25 + $0x108] ss:$112 sps:$4 sm:$0xff]  }
  0x23   : > { %v10526_v51 = vld [vmem:[%s11582_s25 + $0x1e4] ss:$112 sps:$4 sm:$0xff]   ;;  %v10529_v52 = vld [vmem:[%s11582_s25 + $0x1ec] ss:$112 sps:$4 sm:$0xff]   ;;  %v10524_v53 = vld [vmem:[%s11582_s25 + $0x1e0] ss:$112 sps:$4 sm:$0xff]  }
  0x24   : > { %v10527_v54 = vld [vmem:[%s11582_s25 + $0x1e8] ss:$112 sps:$4 sm:$0xff]   ;;  %v10532_v55 = vld [vmem:[%s11582_s25 + $0x2c4] ss:$112 sps:$4 sm:$0xff]   ;;  %v10535_v56 = vld [vmem:[%s11582_s25 + $0x2cc] ss:$112 sps:$4 sm:$0xff]  }
  0x25   : > { %1086 = vmatpush1.bf16.msra.mxu0 %v10480_v20  ;;  %1127 = vmatpush1.bf16.msra.mxu1 %v10481_v21  ;;  %v10530_v57 = vld [vmem:[%s11582_s25 + $0x2c0] ss:$112 sps:$4 sm:$0xff]   ;;  %v10533_v58 = vld [vmem:[%s11582_s25 + $0x2c8] ss:$112 sps:$4 sm:$0xff]   ;;  %v10538_v59 = vld [vmem:[%s11582_s25 + $0x3a4] ss:$112 sps:$4 sm:$0xff]  }
  0x26   : > { %1159 = vmatprep.subr.bf16.mxu0 %v10484_v22  ;;  %1200 = vmatprep.subr.bf16.mxu1 %v10487_v23  ;;  %v10541_v60 = vld [vmem:[%s11582_s25 + $0x3ac] ss:$112 sps:$4 sm:$0xff]   ;;  %v10536_v61 = vld [vmem:[%s11582_s25 + $0x3a0] ss:$112 sps:$4 sm:$0xff]   ;;  %v10539_v62 = vld [vmem:[%s11582_s25 + $0x3a8] ss:$112 sps:$4 sm:$0xff]  }
  0x27   : > { %v10544_v63 = vld [vmem:[%s11582_s25 + $0x34] ss:$112 sps:$4 sm:$0xff]   ;;  %v10547_v0 = vld [vmem:[%s11582_s25 + $0x3c] ss:$112 sps:$4 sm:$0xff]   ;;  %v10542_v2 = vld [vmem:[%s11582_s25 + $0x30] ss:$112 sps:$4 sm:$0xff]  }
  0x28   : > { %9402 = vmatmul.mubr.msk.bf16.vlgmr.msra.gmra.mrb[0].mxu0 %vm1073_vm0, %v11609_v24  ;;  %9403 = vmatmul.mubr.msk.bf16.vlgmr.msra.gmra.mrb[0].mxu1 %vm1073_vm0, %v11609_v24  ;;  %v10545_v3 = vld [vmem:[%s11582_s25 + $0x38] ss:$112 sps:$4 sm:$0xff]   ;;  %v10550_v4 = vld [vmem:[%s11582_s25 + $0x114] ss:$112 sps:$4 sm:$0xff]   ;;  %v10553_v5 = vld [vmem:[%s11582_s25 + $0x11c] ss:$112 sps:$4 sm:$0xff]  }
  0x29   : > { %1160 = vmatpush1.bf16.msra.mxu0 %v10482_v25  ;;  %1201 = vmatpush1.bf16.msra.mxu1 %v10485_v26  ;;  %v10548_v6 = vld [vmem:[%s11582_s25 + $0x110] ss:$112 sps:$4 sm:$0xff]   ;;  %v10551_v7 = vld [vmem:[%s11582_s25 + $0x118] ss:$112 sps:$4 sm:$0xff]   ;;  %v10556_v8 = vld [vmem:[%s11582_s25 + $0x1f4] ss:$112 sps:$4 sm:$0xff]  }
  0x2a   : > { %1161 = vmatprep.subr.bf16.mxu0 %v10490_v27  ;;  %1202 = vmatprep.subr.bf16.mxu1 %v10493_v28  ;;  %v10559_v9 = vld [vmem:[%s11582_s25 + $0x1fc] ss:$112 sps:$4 sm:$0xff]   ;;  %v10554_v10 = vld [vmem:[%s11582_s25 + $0x1f0] ss:$112 sps:$4 sm:$0xff]   ;;  %v10557_v11 = vld [vmem:[%s11582_s25 + $0x1f8] ss:$112 sps:$4 sm:$0xff]  }
  0x2b   : > { %1191 = vmatprep.mubr.bf16.mxu0 %v13872_v1  ;;  %1232 = vmatprep.mubr.bf16.mxu1 %v13872_v1  ;;  %v10562_v12 = vld [vmem:[%s11582_s25 + $0x2d4] ss:$112 sps:$4 sm:$0xff]   ;;  %v10565_v13 = vld [vmem:[%s11582_s25 + $0x2dc] ss:$112 sps:$4 sm:$0xff]   ;;  %v10560_v14 = vld [vmem:[%s11582_s25 + $0x2d0] ss:$112 sps:$4 sm:$0xff]  }
  0x2c   : > { %v10563_v15 = vld [vmem:[%s11582_s25 + $0x2d8] ss:$112 sps:$4 sm:$0xff]   ;;  %v10568_v16 = vld [vmem:[%s11582_s25 + $0x3b4] ss:$112 sps:$4 sm:$0xff]   ;;  %v10571_v17 = vld [vmem:[%s11582_s25 + $0x3bc] ss:$112 sps:$4 sm:$0xff]  }
  0x2d   : > { %1162 = vmatpush1.bf16.msra.mxu0 %v10488_v29  ;;  %1203 = vmatpush1.bf16.msra.mxu1 %v10491_v30  ;;  %v10566_v18 = vld [vmem:[%s11582_s25 + $0x3b0] ss:$112 sps:$4 sm:$0xff]   ;;  %v10569_v19 = vld [vmem:[%s11582_s25 + $0x3b8] ss:$112 sps:$4 sm:$0xff]   ;;  %v10574_v20 = vld [vmem:[%s11582_s25 + $0x44] ss:$112 sps:$4 sm:$0xff]  }
  0x2e   : > { %1163 = vmatprep.subr.bf16.mxu0 %v10496_v31  ;;  %1204 = vmatprep.subr.bf16.mxu1 %v10499_v32  ;;  %v10577_v21 = vld [vmem:[%s11582_s25 + $0x4c] ss:$112 sps:$4 sm:$0xff]   ;;  %v10572_v22 = vld [vmem:[%s11582_s25 + $0x40] ss:$112 sps:$4 sm:$0xff]   ;;  %v10575_v23 = vld [vmem:[%s11582_s25 + $0x48] ss:$112 sps:$4 sm:$0xff]  }
  0x2f   : > { %v10580_v25 = vld [vmem:[%s11582_s25 + $0x124] ss:$112 sps:$4 sm:$0xff]   ;;  %v10583_v26 = vld [vmem:[%s11582_s25 + $0x12c] ss:$112 sps:$4 sm:$0xff]   ;;  %v10578_v27 = vld [vmem:[%s11582_s25 + $0x120] ss:$112 sps:$4 sm:$0xff]  }
  0x30   : > { %v10581_v28 = vld [vmem:[%s11582_s25 + $0x128] ss:$112 sps:$4 sm:$0xff]   ;;  %v10586_v29 = vld [vmem:[%s11582_s25 + $0x204] ss:$112 sps:$4 sm:$0xff]   ;;  %v10589_v30 = vld [vmem:[%s11582_s25 + $0x20c] ss:$112 sps:$4 sm:$0xff]  }
  0x31   : > { %1164 = vmatpush1.bf16.msra.mxu0 %v10494_v33  ;;  %1205 = vmatpush1.bf16.msra.mxu1 %v10497_v34  ;;  %v10584_v31 = vld [vmem:[%s11582_s25 + $0x200] ss:$112 sps:$4 sm:$0xff]   ;;  %v10587_v32 = vld [vmem:[%s11582_s25 + $0x208] ss:$112 sps:$4 sm:$0xff]   ;;  %v10592_v33 = vld [vmem:[%s11582_s25 + $0x2e4] ss:$112 sps:$4 sm:$0xff]  }
  0x32   : > { %1165 = vmatprep.subr.bf16.mxu0 %v10502_v35  ;;  %1206 = vmatprep.subr.bf16.mxu1 %v10505_v36  ;;  %v10595_v34 = vld [vmem:[%s11582_s25 + $0x2ec] ss:$112 sps:$4 sm:$0xff]   ;;  %v10590_v35 = vld [vmem:[%s11582_s25 + $0x2e0] ss:$112 sps:$4 sm:$0xff]   ;;  %v10593_v36 = vld [vmem:[%s11582_s25 + $0x2e8] ss:$112 sps:$4 sm:$0xff]  }
  0x35   : > { %1166 = vmatpush1.bf16.msra.mxu0 %v10500_v37  ;;  %1207 = vmatpush1.bf16.msra.mxu1 %v10503_v38  ;;  %v10598_v37 = vld [vmem:[%s11582_s25 + $0x3c4] ss:$112 sps:$4 sm:$0xff]   ;;  %v10601_v38 = vld [vmem:[%s11582_s25 + $0x3cc] ss:$112 sps:$4 sm:$0xff]  }
  0x36   : > { %1167 = vmatprep.subr.bf16.mxu0 %v10508_v39  ;;  %1208 = vmatprep.subr.bf16.mxu1 %v10511_v40  ;;  %v1708_v39 = vld [vmem:[%s13870_s4] sm:$0xff] }
  0x37   : > { %v10596_v40 = vld [vmem:[%s11582_s25 + $0x3c0] ss:$112 sps:$4 sm:$0xff]   ;;  %1711 = vperm.xlu0 %10451, %v1708_v39  }
  0x39   : > { %1168 = vmatpush1.bf16.msra.mxu0 %v10506_v41  ;;  %1209 = vmatpush1.bf16.msra.mxu1 %v10509_v42  ;;  %v10599_v41 = vld [vmem:[%s11582_s25 + $0x3c8] ss:$112 sps:$4 sm:$0xff]   ;;  %v10604_v42 = vld [vmem:[%s11582_s25 + $0x54] ss:$112 sps:$4 sm:$0xff]  }
  0x3a   : > { %1241 = vmatprep.subr.bf16.mxu0 %v10514_v43  ;;  %1282 = vmatprep.subr.bf16.mxu1 %v10517_v44  ;;  %v10607_v43 = vld [vmem:[%s11582_s25 + $0x5c] ss:$112 sps:$4 sm:$0xff]   ;;  %v10602_v44 = vld [vmem:[%s11582_s25 + $0x50] ss:$112 sps:$4 sm:$0xff]  }
  0x3c   : > { %9404 = vmatmul.mubr.msk.bf16.vlgmr.msra.gmra.mrb[4].mxu0 %vm1073_vm0, %v11609_v24  ;;  %9405 = vmatmul.mubr.msk.bf16.vlgmr.msra.gmra.mrb[4].mxu1 %vm1073_vm0, %v11609_v24 }
  0x3d   : > { %1242 = vmatpush1.bf16.msra.mxu0 %v10512_v45  ;;  %1283 = vmatpush1.bf16.msra.mxu1 %v10515_v46  ;;  %v10605_v45 = vld [vmem:[%s11582_s25 + $0x58] ss:$112 sps:$4 sm:$0xff]   ;;  %v10610_v46 = vld [vmem:[%s11582_s25 + $0x134] ss:$112 sps:$4 sm:$0xff]  }
  0x3e   : > { %1243 = vmatprep.subr.bf16.mxu0 %v10520_v47  ;;  %1284 = vmatprep.subr.bf16.mxu1 %v10523_v48  ;;  %v10613_v47 = vld [vmem:[%s11582_s25 + $0x13c] ss:$112 sps:$4 sm:$0xff]   ;;  %v10608_v48 = vld [vmem:[%s11582_s25 + $0x130] ss:$112 sps:$4 sm:$0xff]  }
  0x3f   : > { %1273 = vmatprep.mubr.bf16.mxu0 %v13872_v1  ;;  %1314 = vmatprep.mubr.bf16.mxu1 %v13872_v1 }
  0x41   : > { %1244 = vmatpush1.bf16.msra.mxu0 %v10518_v49  ;;  %1285 = vmatpush1.bf16.msra.mxu1 %v10521_v50  ;;  %v10611_v49 = vld [vmem:[%s11582_s25 + $0x138] ss:$112 sps:$4 sm:$0xff]   ;;  %v10616_v50 = vld [vmem:[%s11582_s25 + $0x214] ss:$112 sps:$4 sm:$0xff]  }
  0x42   : > { %1245 = vmatprep.subr.bf16.mxu0 %v10526_v51  ;;  %1286 = vmatprep.subr.bf16.mxu1 %v10529_v52  ;;  %v10619_v51 = vld [vmem:[%s11582_s25 + $0x21c] ss:$112 sps:$4 sm:$0xff]   ;;  %v10614_v52 = vld [vmem:[%s11582_s25 + $0x210] ss:$112 sps:$4 sm:$0xff]  }
  0x45   : > { %1246 = vmatpush1.bf16.msra.mxu0 %v10524_v53  ;;  %1287 = vmatpush1.bf16.msra.mxu1 %v10527_v54  ;;  %v10617_v53 = vld [vmem:[%s11582_s25 + $0x218] ss:$112 sps:$4 sm:$0xff]   ;;  %v10622_v54 = vld [vmem:[%s11582_s25 + $0x2f4] ss:$112 sps:$4 sm:$0xff]  }
  0x46   : > { %1247 = vmatprep.subr.bf16.mxu0 %v10532_v55  ;;  %1288 = vmatprep.subr.bf16.mxu1 %v10535_v56  ;;  %v10625_v55 = vld [vmem:[%s11582_s25 + $0x2fc] ss:$112 sps:$4 sm:$0xff]   ;;  %v10620_v56 = vld [vmem:[%s11582_s25 + $0x2f0] ss:$112 sps:$4 sm:$0xff]  }
  0x49   : > { %1248 = vmatpush1.bf16.msra.mxu0 %v10530_v57  ;;  %1289 = vmatpush1.bf16.msra.mxu1 %v10533_v58  ;;  %v10623_v57 = vld [vmem:[%s11582_s25 + $0x2f8] ss:$112 sps:$4 sm:$0xff]   ;;  %v10628_v58 = vld [vmem:[%s11582_s25 + $0x3d4] ss:$112 sps:$4 sm:$0xff]  }
  0x4a   : > { %1249 = vmatprep.subr.bf16.mxu0 %v10538_v59  ;;  %1290 = vmatprep.subr.bf16.mxu1 %v10541_v60  ;;  %v10631_v59 = vld [vmem:[%s11582_s25 + $0x3dc] ss:$112 sps:$4 sm:$0xff]   ;;  %v10626_v60 = vld [vmem:[%s11582_s25 + $0x3d0] ss:$112 sps:$4 sm:$0xff]  }
  0x4d   : > { %1250 = vmatpush1.bf16.msra.mxu0 %v10536_v61  ;;  %1291 = vmatpush1.bf16.msra.mxu1 %v10539_v62  ;;  %v10629_v61 = vld [vmem:[%s11582_s25 + $0x3d8] ss:$112 sps:$4 sm:$0xff]   ;;  %v10634_v62 = vld [vmem:[%s11582_s25 + $0x64] ss:$112 sps:$4 sm:$0xff]  }
  0x4e   : > { %1323 = vmatprep.subr.bf16.mxu0 %v10544_v63  ;;  %1364 = vmatprep.subr.bf16.mxu1 %v10547_v0  ;;  %v10637_v63 = vld [vmem:[%s11582_s25 + $0x6c] ss:$112 sps:$4 sm:$0xff]   ;;  %v10632_v0 = vld [vmem:[%s11582_s25 + $0x60] ss:$112 sps:$4 sm:$0xff]  }
  0x50   : > { %9406 = vmatmul.mubr.msk.bf16.vlgmr.msra.gmra.mrb[8].mxu0 %vm1073_vm0, %v11609_v24  ;;  %9407 = vmatmul.mubr.msk.bf16.vlgmr.msra.gmra.mrb[8].mxu1 %vm1073_vm0, %v11609_v24 }
  0x51   : > { %1324 = vmatpush1.bf16.msra.mxu0 %v10542_v2  ;;  %1365 = vmatpush1.bf16.msra.mxu1 %v10545_v3  ;;  %v10635_v2 = vld [vmem:[%s11582_s25 + $0x68] ss:$112 sps:$4 sm:$0xff]   ;;  %v10640_v3 = vld [vmem:[%s11582_s25 + $0x144] ss:$112 sps:$4 sm:$0xff]  }
  0x52   : > { %1325 = vmatprep.subr.bf16.mxu0 %v10550_v4  ;;  %1366 = vmatprep.subr.bf16.mxu1 %v10553_v5  ;;  %v10643_v4 = vld [vmem:[%s11582_s25 + $0x14c] ss:$112 sps:$4 sm:$0xff]   ;;  %v10638_v5 = vld [vmem:[%s11582_s25 + $0x140] ss:$112 sps:$4 sm:$0xff]  }
  0x53   : > { %1355 = vmatprep.mubr.bf16.mxu0 %v13872_v1  ;;  %1396 = vmatprep.mubr.bf16.mxu1 %v13872_v1 }
  0x55   : > { %1326 = vmatpush1.bf16.msra.mxu0 %v10548_v6  ;;  %1367 = vmatpush1.bf16.msra.mxu1 %v10551_v7  ;;  %v10641_v6 = vld [vmem:[%s11582_s25 + $0x148] ss:$112 sps:$4 sm:$0xff]   ;;  %v10646_v7 = vld [vmem:[%s11582_s25 + $0x224] ss:$112 sps:$4 sm:$0xff]  }
  0x56   : > { %1327 = vmatprep.subr.bf16.mxu0 %v10556_v8  ;;  %1368 = vmatprep.subr.bf16.mxu1 %v10559_v9  ;;  %v10649_v8 = vld [vmem:[%s11582_s25 + $0x22c] ss:$112 sps:$4 sm:$0xff]   ;;  %v10644_v9 = vld [vmem:[%s11582_s25 + $0x220] ss:$112 sps:$4 sm:$0xff]  }
  0x59   : > { %1328 = vmatpush1.bf16.msra.mxu0 %v10554_v10  ;;  %1369 = vmatpush1.bf16.msra.mxu1 %v10557_v11  ;;  %v10647_v10 = vld [vmem:[%s11582_s25 + $0x228] ss:$112 sps:$4 sm:$0xff]   ;;  %v10652_v11 = vld [vmem:[%s11582_s25 + $0x304] ss:$112 sps:$4 sm:$0xff]  }
  0x5a   : > { %1329 = vmatprep.subr.bf16.mxu0 %v10562_v12  ;;  %1370 = vmatprep.subr.bf16.mxu1 %v10565_v13  ;;  %v10650_v12 = vld [vmem:[%s11582_s25 + $0x300] ss:$112 sps:$4 sm:$0xff]   ;;  %v10653_v13 = vld [vmem:[%s11582_s25 + $0x308] ss:$112 sps:$4 sm:$0xff]  }
  0x5d   : > { %1330 = vmatpush1.bf16.msra.mxu0 %v10560_v14  ;;  %1371 = vmatpush1.bf16.msra.mxu1 %v10563_v15  ;;  %v10658_v14 = vld [vmem:[%s11582_s25 + $0x3e4] ss:$112 sps:$4 sm:$0xff]   ;;  %v10661_v15 = vld [vmem:[%s11582_s25 + $0x3ec] ss:$112 sps:$4 sm:$0xff]  }
  0x5e   : > { %1331 = vmatprep.subr.bf16.mxu0 %v10568_v16  ;;  %1372 = vmatprep.subr.bf16.mxu1 %v10571_v17  ;;  %v10656_v16 = vld [vmem:[%s11582_s25 + $0x3e0] ss:$112 sps:$4 sm:$0xff]   ;;  %v10659_v17 = vld [vmem:[%s11582_s25 + $0x3e8] ss:$112 sps:$4 sm:$0xff]  }
  0x61   : > { %1332 = vmatpush1.bf16.msra.mxu0 %v10566_v18  ;;  %1373 = vmatpush1.bf16.msra.mxu1 %v10569_v19  ;;  %v11516_v18 = vld [vmem:[%s13867_s1] sm:$0xf] }
  0x62   : > { %1405 = vmatprep.subr.bf16.mxu0 %v10574_v20  ;;  %1446 = vmatprep.subr.bf16.mxu1 %v10577_v21 }
  0x64   : > { %9408 = vmatmul.mubr.msk.bf16.vlgmr.msra.gmra.mrb[12].mxu0 %vm1073_vm0, %v11609_v24  ;;  %9409 = vmatmul.mubr.msk.bf16.vlgmr.msra.gmra.mrb[12].mxu1 %vm1073_vm0, %v11609_v24 }
  0x65   : > { %1406 = vmatpush1.bf16.msra.mxu0 %v10572_v22  ;;  %1447 = vmatpush1.bf16.msra.mxu1 %v10575_v23 }
  0x66   : > { %1407 = vmatprep.subr.bf16.mxu0 %v10580_v25  ;;  %1448 = vmatprep.subr.bf16.mxu1 %v10583_v26 }
  0x67   : > { %1437 = vmatprep.mubr.bf16.mxu0 %v13872_v1  ;;  %1478 = vmatprep.mubr.bf16.mxu1 %v13872_v1 }
  0x69   : > { %1408 = vmatpush1.bf16.msra.mxu0 %v10578_v27  ;;  %1449 = vmatpush1.bf16.msra.mxu1 %v10581_v28 }
  0x6a   : > { %1409 = vmatprep.subr.bf16.mxu0 %v10586_v29  ;;  %1450 = vmatprep.subr.bf16.mxu1 %v10589_v30 }
  0x6d   : > { %1410 = vmatpush1.bf16.msra.mxu0 %v10584_v31  ;;  %1451 = vmatpush1.bf16.msra.mxu1 %v10587_v32 }
  0x6e   : > { %1411 = vmatprep.subr.bf16.mxu0 %v10592_v33  ;;  %1452 = vmatprep.subr.bf16.mxu1 %v10595_v34 }
  0x71   : > { %1412 = vmatpush1.bf16.msra.mxu0 %v10590_v35  ;;  %1453 = vmatpush1.bf16.msra.mxu1 %v10593_v36 }
  0x72   : > { %1413 = vmatprep.subr.bf16.mxu0 %v10598_v37  ;;  %1454 = vmatprep.subr.bf16.mxu1 %v10601_v38 }
  0x75   : > { %1414 = vmatpush1.bf16.msra.mxu0 %v10596_v40  ;;  %1455 = vmatpush1.bf16.msra.mxu1 %v10599_v41 }
  0x76   : > { %1487 = vmatprep.subr.bf16.mxu0 %v10604_v42  ;;  %1528 = vmatprep.subr.bf16.mxu1 %v10607_v43  ;;  %v11804_v43 = vld [vmem:[%s13869_s3] sm:$0xf] }
  0x78   : > { %9410 = vmatmul.mubr.msk.bf16.vlgmr.msra.gmra.mrb[16].mxu0 %vm1073_vm0, %v11609_v24  ;;  %9411 = vmatmul.mubr.msk.bf16.vlgmr.msra.gmra.mrb[16].mxu1 %vm1073_vm0, %v11609_v24 }
  0x79   : > { %1488 = vmatpush1.bf16.msra.mxu0 %v10602_v44  ;;  %1529 = vmatpush1.bf16.msra.mxu1 %v10605_v45 }
  0x7a   : > { %1489 = vmatprep.subr.bf16.mxu0 %v10610_v46  ;;  %1530 = vmatprep.subr.bf16.mxu1 %v10613_v47 }
  0x7b   : > { %1519 = vmatprep.mubr.bf16.mxu0 %v13872_v1  ;;  %1560 = vmatprep.mubr.bf16.mxu1 %v13872_v1 }
  0x7d   : > { %1490 = vmatpush1.bf16.msra.mxu0 %v10608_v48  ;;  %1531 = vmatpush1.bf16.msra.mxu1 %v10611_v49 }
  0x7e   : > { %1491 = vmatprep.subr.bf16.mxu0 %v10616_v50  ;;  %1532 = vmatprep.subr.bf16.mxu1 %v10619_v51 }
  0x81   : > { %1492 = vmatpush1.bf16.msra.mxu0 %v10614_v52  ;;  %1533 = vmatpush1.bf16.msra.mxu1 %v10617_v53 }
  0x82   : > { %1493 = vmatprep.subr.bf16.mxu0 %v10622_v54  ;;  %1534 = vmatprep.subr.bf16.mxu1 %v10625_v55 }
  0x85   : > { %1494 = vmatpush1.bf16.msra.mxu0 %v10620_v56  ;;  %1535 = vmatpush1.bf16.msra.mxu1 %v10623_v57 }
  0x86   : > { %1495 = vmatprep.subr.bf16.mxu0 %v10628_v58  ;;  %1536 = vmatprep.subr.bf16.mxu1 %v10631_v59 }
  0x89   : > { %1496 = vmatpush1.bf16.msra.mxu0 %v10626_v60  ;;  %1537 = vmatpush1.bf16.msra.mxu1 %v10629_v61 }
  0x8a   : > { %1569 = vmatprep.subr.bf16.mxu0 %v10634_v62  ;;  %1610 = vmatprep.subr.bf16.mxu1 %v10637_v63 }
  0x8c   : > { %9412 = vmatmul.mubr.msk.bf16.vlgmr.msra.gmra.mrb[20].mxu0 %vm1073_vm0, %v11609_v24  ;;  %9413 = vmatmul.mubr.msk.bf16.vlgmr.msra.gmra.mrb[20].mxu1 %vm1073_vm0, %v11609_v24  ;;  %v10655_v24 = vld [vmem:[%s11582_s25 + $0x30c] ss:$112 sps:$4 sm:$0xff]  }
  0x8d   : > { %1570 = vmatpush1.bf16.msra.mxu0 %v10632_v0  ;;  %1611 = vmatpush1.bf16.msra.mxu1 %v10635_v2 }
  0x8e   : > { %1571 = vmatprep.subr.bf16.mxu0 %v10640_v3  ;;  %1612 = vmatprep.subr.bf16.mxu1 %v10643_v4 }
  0x8f   : > { %1601 = vmatprep.mubr.bf16.mxu0 %v13872_v1  ;;  %1642 = vmatprep.mubr.bf16.mxu1 %v13872_v1  ;;  %v11775_v19 = vpop.permute.xlu0 %370 }
  0x90   : > { %13947 = vst [vmem:[#allocation2_spill] sm:$0xff] %v11775_v19 }
  0x91   : > { %1572 = vmatpush1.bf16.msra.mxu0 %v10638_v5  ;;  %1613 = vmatpush1.bf16.msra.mxu1 %v10641_v6 }
  0x92   : > { %1573 = vmatprep.subr.bf16.mxu0 %v10646_v7  ;;  %1614 = vmatprep.subr.bf16.mxu1 %v10649_v8 }
  0x95   : > { %1574 = vmatpush1.bf16.msra.mxu0 %v10644_v9  ;;  %1615 = vmatpush1.bf16.msra.mxu1 %v10647_v10 }
  0x96   : > { %1575 = vmatprep.subr.bf16.mxu0 %v10652_v11  ;;  %1616 = vmatprep.subr.bf16.mxu1 %v10655_v24 }
  0x99   : > { %1576 = vmatpush1.bf16.msra.mxu0 %v10650_v12  ;;  %1617 = vmatpush1.bf16.msra.mxu1 %v10653_v13 }
  0x9a   : > { %1577 = vmatprep.subr.bf16.mxu0 %v10658_v14  ;;  %1618 = vmatprep.subr.bf16.mxu1 %v10661_v15 }
  0x9d   : > { %1578 = vmatpush1.bf16.msra.mxu0 %v10656_v16  ;;  %1619 = vmatpush1.bf16.msra.mxu1 %v10659_v17 }
  0xa0   : > { %9414 = vmatmul.mubr.msk.bf16.vlgmr.msra.gmra.mrb[24].mxu0 %vm1073_vm0, %v11516_v18  ;;  %9415 = vmatmul.mubr.msk.bf16.vlgmr.msra.gmra.mrb[24].mxu1 %vm1073_vm0, %v11516_v18 }
  0xa1   : > { %1835 = vmatprep.mubr.bf16.mxu0 %v13872_v1  ;;  %1876 = vmatprep.mubr.bf16.mxu1 %v13872_v1 }
  0xfb   : > { %v1111_v20 = vpop.f32.mrb[0].mxu0  ;;  %v1152_v21 = vpop.f32.mrb[0].mxu1 }
  0xfc   : > { %v1113_v22 = vpop.f32.mrb[1].mxu0  ;;  %v1154_v23 = vpop.f32.mrb[1].mxu1  ;;  %v11778_v25 = vadd.f32 %v1111_v20, %v11775_v19  ;;  %v11781_v26 = vadd.f32 %v1152_v21, %v11775_v19 }
  0xfd   : > { %v11784_v27 = vadd.f32 %v1113_v22, %v11775_v19  ;;  %v11787_v28 = vadd.f32 %v1154_v23, %v11775_v19  ;;  %v1115_v29 = vpop.f32.mrb[2].mxu0  ;;  %v1156_v30 = vpop.f32.mrb[2].mxu1 }
  0xfe   : > { %v1116_v31 = vpop.f32.mrb[3].mxu0  ;;  %v1157_v32 = vpop.f32.mrb[3].mxu1  ;;  %v1651_v33 = vmul.f32 %v11778_v25, %v11778_v25  ;;  %v1653_v34 = vmul.f32 %v11781_v26, %v11781_v26 }
  0xff   : > { %v1652_v35 = vmul.f32 %v11784_v27, %v11784_v27  ;;  %v1654_v36 = vmul.f32 %v11787_v28, %v11787_v28 }
 0x100   : > { %v1679_v37 = vpack.c.bf16 %v1651_v33, %v1651_v33  ;;  %v1681_v38 = vpack.c.bf16 %v1653_v34, %v1653_v34 }
 0x101   : > { %v1680_v39 = vpack.c.bf16 %v1652_v35, %v1652_v35  ;;  %v1682_v40 = vpack.c.bf16 %v1654_v36, %v1654_v36 }
 0x102   : > { %v1720_v41 = vsel %vm1718_vm1, %v1679_v37, 0  ;;  %v1726_v42 = vsel %vm1718_vm1, %v1681_v38, 0 }
 0x103   : > { %9416 = vmatprep.subr.msk.bf16.mxu0 %vm1718_vm1, %v1680_v39  ;;  %9418 = vmatprep.subr.msk.bf16.mxu1 %vm1718_vm1, %v1682_v40 }
 0x104   : > { %1804 = vmatpush1.bf16.msra.mxu0 %v1720_v41  ;;  %1845 = vmatpush1.bf16.msra.mxu1 %v1726_v42 }
 0x107   : > { %9417 = vmatmul.mubr.msk.bf16.vlgmr.msra.gmra.mrb[28].mxu0 %vm1714_vm2, %v11804_v43  ;;  %9419 = vmatmul.mubr.msk.bf16.vlgmr.msra.gmra.mrb[28].mxu1 %vm1714_vm2, %v11804_v43 }
 0x108   : > { %1917 = vmatprep.mubr.bf16.mxu0 %v13872_v1  ;;  %1958 = vmatprep.mubr.bf16.mxu1 %v13872_v1 }
 0x10f   : > { %v1193_v44 = vpop.f32.mrb[4].mxu0  ;;  %v1234_v45 = vpop.f32.mrb[4].mxu1 }
 0x110   : > { %v11813_v46 = vadd.f32 %v1193_v44, %v11775_v19  ;;  %v11816_v47 = vadd.f32 %v1234_v45, %v11775_v19  ;;  %v1195_v48 = vpop.f32.mrb[5].mxu0  ;;  %v1236_v49 = vpop.f32.mrb[5].mxu1 }
 0x111   : > { %v11819_v50 = vadd.f32 %v1195_v48, %v11775_v19  ;;  %v11822_v51 = vadd.f32 %v1236_v49, %v11775_v19  ;;  %v1197_v52 = vpop.f32.mrb[6].mxu0  ;;  %v1238_v53 = vpop.f32.mrb[6].mxu1 }
 0x112   : > { %v1655_v54 = vmul.f32 %v11813_v46, %v11813_v46  ;;  %v1657_v55 = vmul.f32 %v11816_v47, %v11816_v47  ;;  %v1198_v56 = vpop.f32.mrb[7].mxu0  ;;  %v1239_v57 = vpop.f32.mrb[7].mxu1 }
 0x113   : > { %v1656_v58 = vmul.f32 %v11819_v50, %v11819_v50  ;;  %v1658_v59 = vmul.f32 %v11822_v51, %v11822_v51 }
 0x114   : > { %v1683_v60 = vpack.c.bf16 %v1655_v54, %v1655_v54  ;;  %v1685_v61 = vpack.c.bf16 %v1657_v55, %v1657_v55 }
 0x115   : > { %v1684_v62 = vpack.c.bf16 %v1656_v58, %v1656_v58  ;;  %v1686_v63 = vpack.c.bf16 %v1658_v59, %v1658_v59 }
 0x116   : > { %v1732_v0 = vsel %vm1718_vm1, %v1683_v60, 0  ;;  %v1738_v2 = vsel %vm1718_vm1, %v1685_v61, 0 }
 0x117   : > { %9420 = vmatprep.subr.msk.bf16.mxu0 %vm1718_vm1, %v1684_v62  ;;  %9422 = vmatprep.subr.msk.bf16.mxu1 %vm1718_vm1, %v1686_v63 }
 0x118   : > { %1886 = vmatpush1.bf16.msra.mxu0 %v1732_v0  ;;  %1927 = vmatpush1.bf16.msra.mxu1 %v1738_v2 }
 0x11b   : > { %9421 = vmatmul.mubr.msk.bf16.vlgmr.msra.gmra.mrb[32].mxu0 %vm1714_vm2, %v11804_v43  ;;  %9423 = vmatmul.mubr.msk.bf16.vlgmr.msra.gmra.mrb[32].mxu1 %vm1714_vm2, %v11804_v43 }
 0x11c   : > { %1999 = vmatprep.mubr.bf16.mxu0 %v13872_v1  ;;  %2040 = vmatprep.mubr.bf16.mxu1 %v13872_v1 }
 0x123   : > { %v1275_v3 = vpop.f32.mrb[8].mxu0  ;;  %v1316_v4 = vpop.f32.mrb[8].mxu1 }
 0x124   : > { %v11843_v5 = vadd.f32 %v1275_v3, %v11775_v19  ;;  %v11846_v6 = vadd.f32 %v1316_v4, %v11775_v19  ;;  %v1277_v7 = vpop.f32.mrb[9].mxu0  ;;  %v1318_v8 = vpop.f32.mrb[9].mxu1 }
 0x125   : > { %v11849_v9 = vadd.f32 %v1277_v7, %v11775_v19  ;;  %v11852_v10 = vadd.f32 %v1318_v8, %v11775_v19  ;;  %v1279_v11 = vpop.f32.mrb[10].mxu0  ;;  %v1320_v24 = vpop.f32.mrb[10].mxu1 }
 0x126   : > { %v1659_v12 = vmul.f32 %v11843_v5, %v11843_v5  ;;  %v1661_v13 = vmul.f32 %v11846_v6, %v11846_v6  ;;  %v1280_v14 = vpop.f32.mrb[11].mxu0  ;;  %v1321_v15 = vpop.f32.mrb[11].mxu1 }
 0x127   : > { %v1660_v16 = vmul.f32 %v11849_v9, %v11849_v9  ;;  %v1662_v17 = vmul.f32 %v11852_v10, %v11852_v10 }
 0x128   : > { %v1687_v18 = vpack.c.bf16 %v1659_v12, %v1659_v12  ;;  %v1689_v20 = vpack.c.bf16 %v1661_v13, %v1661_v13 }
 0x129   : > { %v1688_v21 = vpack.c.bf16 %v1660_v16, %v1660_v16  ;;  %v1690_v22 = vpack.c.bf16 %v1662_v17, %v1662_v17 }
 0x12a   : > { %v1744_v23 = vsel %vm1718_vm1, %v1687_v18, 0  ;;  %v1750_v29 = vsel %vm1718_vm1, %v1689_v20, 0 }
 0x12b   : > { %9424 = vmatprep.subr.msk.bf16.mxu0 %vm1718_vm1, %v1688_v21  ;;  %9426 = vmatprep.subr.msk.bf16.mxu1 %vm1718_vm1, %v1690_v22 }
 0x12c   : > { %1968 = vmatpush1.bf16.msra.mxu0 %v1744_v23  ;;  %2009 = vmatpush1.bf16.msra.mxu1 %v1750_v29 }
 0x12f   : > { %9425 = vmatmul.mubr.msk.bf16.vlgmr.msra.gmra.mrb[36].mxu0 %vm1714_vm2, %v11804_v43  ;;  %9427 = vmatmul.mubr.msk.bf16.vlgmr.msra.gmra.mrb[36].mxu1 %vm1714_vm2, %v11804_v43 }
 0x130   : > { %2081 = vmatprep.mubr.bf16.mxu0 %v13872_v1  ;;  %2122 = vmatprep.mubr.bf16.mxu1 %v13872_v1 }
 0x137   : > { %v1357_v30 = vpop.f32.mrb[12].mxu0  ;;  %v1398_v31 = vpop.f32.mrb[12].mxu1 }
 0x138   : > { %v11873_v32 = vadd.f32 %v1357_v30, %v11775_v19  ;;  %v11876_v33 = vadd.f32 %v1398_v31, %v11775_v19  ;;  %v1359_v34 = vpop.f32.mrb[13].mxu0  ;;  %v1400_v35 = vpop.f32.mrb[13].mxu1 }
 0x139   : > { %v11879_v36 = vadd.f32 %v1359_v34, %v11775_v19  ;;  %v11882_v37 = vadd.f32 %v1400_v35, %v11775_v19  ;;  %v1361_v38 = vpop.f32.mrb[14].mxu0  ;;  %v1402_v39 = vpop.f32.mrb[14].mxu1 }
 0x13a   : > { %v1663_v40 = vmul.f32 %v11873_v32, %v11873_v32  ;;  %v1665_v41 = vmul.f32 %v11876_v33, %v11876_v33  ;;  %v1362_v42 = vpop.f32.mrb[15].mxu0  ;;  %v1403_v44 = vpop.f32.mrb[15].mxu1 }
 0x13b   : > { %13948 = vst [vmem:[#allocation3_spill] sm:$0xff] %v11879_v36  ;;  %13949 = vst [vmem:[#allocation4_spill] sm:$0xff] %v11882_v37  ;;  %v1664_v45 = vmul.f32 %v11879_v36, %v11879_v36  ;;  %v1666_v48 = vmul.f32 %v11882_v37, %v11882_v37 }
 0x13c   : > { %v1691_v49 = vpack.c.bf16 %v1663_v40, %v1663_v40  ;;  %v1693_v52 = vpack.c.bf16 %v1665_v41, %v1665_v41 }
 0x13d   : > { %v1692_v53 = vpack.c.bf16 %v1664_v45, %v1664_v45  ;;  %v1694_v54 = vpack.c.bf16 %v1666_v48, %v1666_v48 }
 0x13e   : > { %v1756_v55 = vsel %vm1718_vm1, %v1691_v49, 0  ;;  %v1762_v56 = vsel %vm1718_vm1, %v1693_v52, 0 }
 0x13f   : > { %9428 = vmatprep.subr.msk.bf16.mxu0 %vm1718_vm1, %v1692_v53  ;;  %9430 = vmatprep.subr.msk.bf16.mxu1 %vm1718_vm1, %v1694_v54 }
 0x140   : > { %2050 = vmatpush1.bf16.msra.mxu0 %v1756_v55  ;;  %2091 = vmatpush1.bf16.msra.mxu1 %v1762_v56 }
 0x143   : > { %9429 = vmatmul.mubr.msk.bf16.vlgmr.msra.gmra.mrb[40].mxu0 %vm1714_vm2, %v11804_v43  ;;  %9431 = vmatmul.mubr.msk.bf16.vlgmr.msra.gmra.mrb[40].mxu1 %vm1714_vm2, %v11804_v43 }
 0x144   : > { %2163 = vmatprep.mubr.bf16.mxu0 %v13872_v1  ;;  %2204 = vmatprep.mubr.bf16.mxu1 %v13872_v1 }
 0x14b   : > { %v1439_v57 = vpop.f32.mrb[16].mxu0  ;;  %v1480_v58 = vpop.f32.mrb[16].mxu1 }
 0x14c   : > { %v11903_v59 = vadd.f32 %v1439_v57, %v11775_v19  ;;  %v11906_v60 = vadd.f32 %v1480_v58, %v11775_v19  ;;  %v1441_v61 = vpop.f32.mrb[17].mxu0  ;;  %v1482_v62 = vpop.f32.mrb[17].mxu1 }
 0x14d   : > { %v11909_v63 = vadd.f32 %v1441_v61, %v11775_v19  ;;  %v11912_v0 = vadd.f32 %v1482_v62, %v11775_v19  ;;  %v1443_v2 = vpop.f32.mrb[18].mxu0  ;;  %v1484_v3 = vpop.f32.mrb[18].mxu1 }
 0x14e   : > { %13950 = vst [vmem:[#allocation5_spill] sm:$0xff] %v11903_v59  ;;  %13951 = vst [vmem:[#allocation6_spill] sm:$0xff] %v11906_v60  ;;  %v1667_v4 = vmul.f32 %v11903_v59, %v11903_v59  ;;  %v1669_v7 = vmul.f32 %v11906_v60, %v11906_v60  ;;  %v1444_v8 = vpop.f32.mrb[19].mxu0  ;;  %v1485_v11 = vpop.f32.mrb[19].mxu1 }
 0x14f   : > { %13952 = vst [vmem:[#allocation7_spill] sm:$0xff] %v11909_v63  ;;  %13953 = vst [vmem:[#allocation8_spill] sm:$0xff] %v11912_v0  ;;  %v1668_v24 = vmul.f32 %v11909_v63, %v11909_v63  ;;  %v1670_v12 = vmul.f32 %v11912_v0, %v11912_v0 }
 0x150   : > { %v1695_v13 = vpack.c.bf16 %v1667_v4, %v1667_v4  ;;  %v1697_v14 = vpack.c.bf16 %v1669_v7, %v1669_v7 }
 0x151   : > { %v1696_v15 = vpack.c.bf16 %v1668_v24, %v1668_v24  ;;  %v1698_v16 = vpack.c.bf16 %v1670_v12, %v1670_v12 }
 0x152   : > { %v1768_v17 = vsel %vm1718_vm1, %v1695_v13, 0  ;;  %v1774_v18 = vsel %vm1718_vm1, %v1697_v14, 0 }
 0x153   : > { %9432 = vmatprep.subr.msk.bf16.mxu0 %vm1718_vm1, %v1696_v15  ;;  %9434 = vmatprep.subr.msk.bf16.mxu1 %vm1718_vm1, %v1698_v16 }
 0x154   : > { %2132 = vmatpush1.bf16.msra.mxu0 %v1768_v17  ;;  %2173 = vmatpush1.bf16.msra.mxu1 %v1774_v18 }
 0x157   : > { %9433 = vmatmul.mubr.msk.bf16.vlgmr.msra.gmra.mrb[44].mxu0 %vm1714_vm2, %v11804_v43  ;;  %9435 = vmatmul.mubr.msk.bf16.vlgmr.msra.gmra.mrb[44].mxu1 %vm1714_vm2, %v11804_v43 }
 0x158   : > { %2245 = vmatprep.mubr.bf16.mxu0 %v13872_v1  ;;  %2286 = vmatprep.mubr.bf16.mxu1 %v13872_v1 }
 0x15f   : > { %v1521_v20 = vpop.f32.mrb[20].mxu0  ;;  %v1562_v21 = vpop.f32.mrb[20].mxu1 }
 0x160   : > { %v11933_v22 = vadd.f32 %v1521_v20, %v11775_v19  ;;  %v11936_v23 = vadd.f32 %v1562_v21, %v11775_v19  ;;  %v1523_v29 = vpop.f32.mrb[21].mxu0  ;;  %v1564_v30 = vpop.f32.mrb[21].mxu1  ;;  %v10664_v21 = vld [vmem:[%s11582_s25 + $0x464] ss:$112 sps:$4 sm:$0xff]  }
 0x161   : > { %v11939_v31 = vadd.f32 %v1523_v29, %v11775_v19  ;;  %v11942_v34 = vadd.f32 %v1564_v30, %v11775_v19  ;;  %v1525_v35 = vpop.f32.mrb[22].mxu0  ;;  %v1566_v38 = vpop.f32.mrb[22].mxu1  ;;  %v10667_v29 = vld [vmem:[%s11582_s25 + $0x46c] ss:$112 sps:$4 sm:$0xff]  }
 0x162   : > { %13954 = vst [vmem:[#allocation9_spill] sm:$0xff] %v11933_v22  ;;  %13955 = vst [vmem:[#allocation10_spill] sm:$0xff] %v11936_v23  ;;  %v1671_v39 = vmul.f32 %v11933_v22, %v11933_v22  ;;  %v1673_v40 = vmul.f32 %v11936_v23, %v11936_v23  ;;  %v1526_v41 = vpop.f32.mrb[23].mxu0  ;;  %v1567_v42 = vpop.f32.mrb[23].mxu1  ;;  %v10662_v38 = vld [vmem:[%s11582_s25 + $0x460] ss:$112 sps:$4 sm:$0xff]  }
 0x163   : > { %13956 = vst [vmem:[#allocation11_spill] sm:$0xff] %v11939_v31  ;;  %13957 = vst [vmem:[#allocation12_spill] sm:$0xff] %v11942_v34  ;;  %v1672_v44 = vmul.f32 %v11939_v31, %v11939_v31  ;;  %v1674_v45 = vmul.f32 %v11942_v34, %v11942_v34  ;;  %v10673_v41 = vld [vmem:[%s11582_s25 + $0x54c] ss:$112 sps:$4 sm:$0xff]   ;;  %v10668_v42 = vld [vmem:[%s11582_s25 + $0x540] ss:$112 sps:$4 sm:$0xff]  }
 0x164   : > { %v1699_v48 = vpack.c.bf16 %v1671_v39, %v1671_v39  ;;  %v1701_v49 = vpack.c.bf16 %v1673_v40, %v1673_v40  ;;  %v10665_v39 = vld [vmem:[%s11582_s25 + $0x468] ss:$112 sps:$4 sm:$0xff]   ;;  %v10670_v40 = vld [vmem:[%s11582_s25 + $0x544] ss:$112 sps:$4 sm:$0xff]  }
 0x165   : > { %v1700_v52 = vpack.c.bf16 %v1672_v44, %v1672_v44  ;;  %v1702_v53 = vpack.c.bf16 %v1674_v45, %v1674_v45  ;;  %v10671_v44 = vld [vmem:[%s11582_s25 + $0x548] ss:$112 sps:$4 sm:$0xff]   ;;  %v10676_v45 = vld [vmem:[%s11582_s25 + $0x624] ss:$112 sps:$4 sm:$0xff]  }
 0x166   : > { %v1780_v54 = vsel %vm1718_vm1, %v1699_v48, 0  ;;  %v1786_v55 = vsel %vm1718_vm1, %v1701_v49, 0  ;;  %v10679_v48 = vld [vmem:[%s11582_s25 + $0x62c] ss:$112 sps:$4 sm:$0xff]   ;;  %v10677_v49 = vld [vmem:[%s11582_s25 + $0x628] ss:$112 sps:$4 sm:$0xff]  }
 0x167   : > { %9436 = vmatprep.subr.msk.bf16.mxu0 %vm1718_vm1, %v1700_v52  ;;  %9438 = vmatprep.subr.msk.bf16.mxu1 %vm1718_vm1, %v1702_v53  ;;  %v10682_v52 = vld [vmem:[%s11582_s25 + $0x704] ss:$112 sps:$4 sm:$0xff]   ;;  %v10685_v53 = vld [vmem:[%s11582_s25 + $0x70c] ss:$112 sps:$4 sm:$0xff]  }
 0x168   : > { %2214 = vmatpush1.bf16.msra.mxu0 %v1780_v54  ;;  %2255 = vmatpush1.bf16.msra.mxu1 %v1786_v55  ;;  %v10680_v54 = vld [vmem:[%s11582_s25 + $0x700] ss:$112 sps:$4 sm:$0xff]   ;;  %v10683_v55 = vld [vmem:[%s11582_s25 + $0x708] ss:$112 sps:$4 sm:$0xff]  }
 0x16b   : > { %9437 = vmatmul.mubr.msk.bf16.vlgmr.msra.gmra.mrb[48].mxu0 %vm1714_vm2, %v11804_v43  ;;  %9439 = vmatmul.mubr.msk.bf16.vlgmr.msra.gmra.mrb[48].mxu1 %vm1714_vm2, %v11804_v43 }
 0x16c   : > { %2327 = vmatprep.mubr.bf16.mxu0 %v13872_v1  ;;  %2368 = vmatprep.mubr.bf16.mxu1 %v13872_v1 }
 0x173   : > { %v1603_v56 = vpop.f32.mrb[24].mxu0  ;;  %v1644_v57 = vpop.f32.mrb[24].mxu1 }
 0x174   : > { %v11963_v58 = vadd.f32 %v1603_v56, %v11775_v19  ;;  %v11966_v61 = vadd.f32 %v1644_v57, %v11775_v19  ;;  %v1605_v62 = vpop.f32.mrb[25].mxu0  ;;  %v1646_v2 = vpop.f32.mrb[25].mxu1  ;;  %v10688_v56 = vld [vmem:[%s11582_s25 + $0x7e4] ss:$112 sps:$4 sm:$0xff]   ;;  %v10691_v57 = vld [vmem:[%s11582_s25 + $0x7ec] ss:$112 sps:$4 sm:$0xff]  }
 0x175   : > { %v11969_v3 = vadd.f32 %v1605_v62, %v11775_v19  ;;  %v11972_v4 = vadd.f32 %v1646_v2, %v11775_v19  ;;  %v1607_v7 = vpop.f32.mrb[26].mxu0  ;;  %v1648_v8 = vpop.f32.mrb[26].mxu1  ;;  %v10686_v62 = vld [vmem:[%s11582_s25 + $0x7e0] ss:$112 sps:$4 sm:$0xff]   ;;  %v10689_v2 = vld [vmem:[%s11582_s25 + $0x7e8] ss:$112 sps:$4 sm:$0xff]  }
 0x176   : > { %13958 = vst [vmem:[#allocation13_spill] sm:$0xff] %v11963_v58  ;;  %13959 = vst [vmem:[#allocation14_spill] sm:$0xff] %v11966_v61  ;;  %v1675_v11 = vmul.f32 %v11963_v58, %v11963_v58  ;;  %v1677_v24 = vmul.f32 %v11966_v61, %v11966_v61  ;;  %v1608_v12 = vpop.f32.mrb[27].mxu0  ;;  %v1649_v13 = vpop.f32.mrb[27].mxu1  ;;  %v10694_v7 = vld [vmem:[%s11582_s25 + $0x474] ss:$112 sps:$4 sm:$0xff]  }
 0x177   : > { %13960 = vst [vmem:[#allocation15_spill] sm:$0xff] %v11969_v3  ;;  %13961 = vst [vmem:[#allocation16_spill] sm:$0xff] %v11972_v4  ;;  %v1676_v14 = vmul.f32 %v11969_v3, %v11969_v3  ;;  %v1678_v15 = vmul.f32 %v11972_v4, %v11972_v4  ;;  %v10697_v8 = vld [vmem:[%s11582_s25 + $0x47c] ss:$112 sps:$4 sm:$0xff]   ;;  %v10700_v12 = vld [vmem:[%s11582_s25 + $0x554] ss:$112 sps:$4 sm:$0xff]  }
 0x178   : > { %v1703_v16 = vpack.c.bf16 %v1675_v11, %v1675_v11  ;;  %v1705_v17 = vpack.c.bf16 %v1677_v24, %v1677_v24  ;;  %v10692_v11 = vld [vmem:[%s11582_s25 + $0x470] ss:$112 sps:$4 sm:$0xff]   ;;  %v10695_v24 = vld [vmem:[%s11582_s25 + $0x478] ss:$112 sps:$4 sm:$0xff]   ;;  %v10703_v13 = vld [vmem:[%s11582_s25 + $0x55c] ss:$112 sps:$4 sm:$0xff]  }
 0x179   : > { %v1704_v18 = vpack.c.bf16 %v1676_v14, %v1676_v14  ;;  %v1706_v20 = vpack.c.bf16 %v1678_v15, %v1678_v15  ;;  %v12021_v14 = vld [vmem:[%s13867_s1] sm:$0xf] }
 0x17a   : > { %v1792_v30 = vsel %vm1718_vm1, %v1703_v16, 0  ;;  %v1798_v35 = vsel %vm1718_vm1, %v1705_v17, 0  ;;  %v10698_v15 = vld [vmem:[%s11582_s25 + $0x550] ss:$112 sps:$4 sm:$0xff]   ;;  %v10701_v16 = vld [vmem:[%s11582_s25 + $0x558] ss:$112 sps:$4 sm:$0xff]  }
 0x17b   : > { %9440 = vmatprep.subr.msk.bf16.mxu0 %vm1718_vm1, %v1704_v18  ;;  %9442 = vmatprep.subr.msk.bf16.mxu1 %vm1718_vm1, %v1706_v20  ;;  %v10706_v17 = vld [vmem:[%s11582_s25 + $0x634] ss:$112 sps:$4 sm:$0xff]   ;;  %v10709_v18 = vld [vmem:[%s11582_s25 + $0x63c] ss:$112 sps:$4 sm:$0xff]   ;;  %v10704_v20 = vld [vmem:[%s11582_s25 + $0x630] ss:$112 sps:$4 sm:$0xff]  }
 0x17c   : > { %2296 = vmatpush1.bf16.msra.mxu0 %v1792_v30  ;;  %2337 = vmatpush1.bf16.msra.mxu1 %v1798_v35  ;;  %v10715_v30 = vld [vmem:[%s11582_s25 + $0x71c] ss:$112 sps:$4 sm:$0xff]   ;;  %v10710_v35 = vld [vmem:[%s11582_s25 + $0x710] ss:$112 sps:$4 sm:$0xff]  }
 0x17d   : > { %3274 = vmatprep.subr.bf16.mxu0 %v10664_v21  ;;  %3315 = vmatprep.subr.bf16.mxu1 %v10667_v29  ;;  %v10707_v21 = vld [vmem:[%s11582_s25 + $0x638] ss:$112 sps:$4 sm:$0xff]   ;;  %v10712_v29 = vld [vmem:[%s11582_s25 + $0x714] ss:$112 sps:$4 sm:$0xff]  }
 0x17f   : > { %9441 = vmatmul.mubr.msk.bf16.vlgmr.msra.gmra.mrb[52].mxu0 %vm1714_vm2, %v11804_v43  ;;  %9443 = vmatmul.mubr.msk.bf16.vlgmr.msra.gmra.mrb[52].mxu1 %vm1714_vm2, %v11804_v43  ;;  %v10674_v43 = vld [vmem:[%s11582_s25 + $0x620] ss:$112 sps:$4 sm:$0xff]  }
 0x180   : > { %3275 = vmatpush1.bf16.msra.mxu0 %v10662_v38  ;;  %3316 = vmatpush1.bf16.msra.mxu1 %v10665_v39  ;;  %v10713_v38 = vld [vmem:[%s11582_s25 + $0x718] ss:$112 sps:$4 sm:$0xff]   ;;  %v10718_v39 = vld [vmem:[%s11582_s25 + $0x7f4] ss:$112 sps:$4 sm:$0xff]  }
 0x181   : > { %3276 = vmatprep.subr.bf16.mxu0 %v10670_v40  ;;  %3317 = vmatprep.subr.bf16.mxu1 %v10673_v41  ;;  %v10721_v40 = vld [vmem:[%s11582_s25 + $0x7fc] ss:$112 sps:$4 sm:$0xff]   ;;  %v10716_v41 = vld [vmem:[%s11582_s25 + $0x7f0] ss:$112 sps:$4 sm:$0xff]  }
 0x182   : > { %3306 = vmatprep.mubr.bf16.mxu0 %v13872_v1  ;;  %3347 = vmatprep.mubr.bf16.mxu1 %v13872_v1 }
 0x184   : > { %3277 = vmatpush1.bf16.msra.mxu0 %v10668_v42  ;;  %3318 = vmatpush1.bf16.msra.mxu1 %v10671_v44  ;;  %v10719_v42 = vld [vmem:[%s11582_s25 + $0x7f8] ss:$112 sps:$4 sm:$0xff]   ;;  %v10724_v44 = vld [vmem:[%s11582_s25 + $0x484] ss:$112 sps:$4 sm:$0xff]  }
 0x185   : > { %3278 = vmatprep.subr.bf16.mxu0 %v10676_v45  ;;  %3319 = vmatprep.subr.bf16.mxu1 %v10679_v48  ;;  %v10727_v45 = vld [vmem:[%s11582_s25 + $0x48c] ss:$112 sps:$4 sm:$0xff]   ;;  %v10722_v48 = vld [vmem:[%s11582_s25 + $0x480] ss:$112 sps:$4 sm:$0xff]  }
 0x188   : > { %3279 = vmatpush1.bf16.msra.mxu0 %v10674_v43  ;;  %3320 = vmatpush1.bf16.msra.mxu1 %v10677_v49  ;;  %v10725_v43 = vld [vmem:[%s11582_s25 + $0x488] ss:$112 sps:$4 sm:$0xff]   ;;  %v10730_v49 = vld [vmem:[%s11582_s25 + $0x564] ss:$112 sps:$4 sm:$0xff]  }
 0x189   : > { %3280 = vmatprep.subr.bf16.mxu0 %v10682_v52  ;;  %3321 = vmatprep.subr.bf16.mxu1 %v10685_v53  ;;  %v10733_v52 = vld [vmem:[%s11582_s25 + $0x56c] ss:$112 sps:$4 sm:$0xff]   ;;  %v10728_v53 = vld [vmem:[%s11582_s25 + $0x560] ss:$112 sps:$4 sm:$0xff]  }
 0x18c   : > { %3281 = vmatpush1.bf16.msra.mxu0 %v10680_v54  ;;  %3322 = vmatpush1.bf16.msra.mxu1 %v10683_v55  ;;  %v10731_v54 = vld [vmem:[%s11582_s25 + $0x568] ss:$112 sps:$4 sm:$0xff]   ;;  %v10736_v55 = vld [vmem:[%s11582_s25 + $0x644] ss:$112 sps:$4 sm:$0xff]  }
 0x18d   : > { %3282 = vmatprep.subr.bf16.mxu0 %v10688_v56  ;;  %3323 = vmatprep.subr.bf16.mxu1 %v10691_v57  ;;  %v10739_v56 = vld [vmem:[%s11582_s25 + $0x64c] ss:$112 sps:$4 sm:$0xff]   ;;  %v10734_v57 = vld [vmem:[%s11582_s25 + $0x640] ss:$112 sps:$4 sm:$0xff]  }
 0x190   : > { %3283 = vmatpush1.bf16.msra.mxu0 %v10686_v62  ;;  %3324 = vmatpush1.bf16.msra.mxu1 %v10689_v2  ;;  %v10737_v62 = vld [vmem:[%s11582_s25 + $0x648] ss:$112 sps:$4 sm:$0xff]   ;;  %v10742_v2 = vld [vmem:[%s11582_s25 + $0x724] ss:$112 sps:$4 sm:$0xff]  }
 0x191   : > { %3356 = vmatprep.subr.bf16.mxu0 %v10694_v7  ;;  %3397 = vmatprep.subr.bf16.mxu1 %v10697_v8  ;;  %v10745_v7 = vld [vmem:[%s11582_s25 + $0x72c] ss:$112 sps:$4 sm:$0xff]   ;;  %v10740_v8 = vld [vmem:[%s11582_s25 + $0x720] ss:$112 sps:$4 sm:$0xff]  }
 0x193   : > { %9724 = vmatmul.mubr.msk.bf16.vlgmr.msra.gmra.mrb[56].mxu0 %vm1073_vm0, %v12021_v14  ;;  %9725 = vmatmul.mubr.msk.bf16.vlgmr.msra.gmra.mrb[56].mxu1 %vm1073_vm0, %v12021_v14 }
 0x194   : > { %3357 = vmatpush1.bf16.msra.mxu0 %v10692_v11  ;;  %3398 = vmatpush1.bf16.msra.mxu1 %v10695_v24  ;;  %v10743_v11 = vld [vmem:[%s11582_s25 + $0x728] ss:$112 sps:$4 sm:$0xff]   ;;  %v10748_v24 = vld [vmem:[%s11582_s25 + $0x804] ss:$112 sps:$4 sm:$0xff]  }
 0x195   : > { %3358 = vmatprep.subr.bf16.mxu0 %v10700_v12  ;;  %3399 = vmatprep.subr.bf16.mxu1 %v10703_v13  ;;  %v10751_v12 = vld [vmem:[%s11582_s25 + $0x80c] ss:$112 sps:$4 sm:$0xff]   ;;  %v10746_v13 = vld [vmem:[%s11582_s25 + $0x800] ss:$112 sps:$4 sm:$0xff]  }
 0x196   : > { %3388 = vmatprep.mubr.bf16.mxu0 %v13872_v1  ;;  %3429 = vmatprep.mubr.bf16.mxu1 %v13872_v1 }
 0x198   : > { %3359 = vmatpush1.bf16.msra.mxu0 %v10698_v15  ;;  %3400 = vmatpush1.bf16.msra.mxu1 %v10701_v16  ;;  %v10749_v15 = vld [vmem:[%s11582_s25 + $0x808] ss:$112 sps:$4 sm:$0xff]   ;;  %v10754_v16 = vld [vmem:[%s11582_s25 + $0x494] ss:$112 sps:$4 sm:$0xff]  }
 0x199   : > { %3360 = vmatprep.subr.bf16.mxu0 %v10706_v17  ;;  %3401 = vmatprep.subr.bf16.mxu1 %v10709_v18  ;;  %v10757_v17 = vld [vmem:[%s11582_s25 + $0x49c] ss:$112 sps:$4 sm:$0xff]   ;;  %v10752_v18 = vld [vmem:[%s11582_s25 + $0x490] ss:$112 sps:$4 sm:$0xff]  }
 0x19c   : > { %3361 = vmatpush1.bf16.msra.mxu0 %v10704_v20  ;;  %3402 = vmatpush1.bf16.msra.mxu1 %v10707_v21  ;;  %v10755_v20 = vld [vmem:[%s11582_s25 + $0x498] ss:$112 sps:$4 sm:$0xff]   ;;  %v10760_v21 = vld [vmem:[%s11582_s25 + $0x574] ss:$112 sps:$4 sm:$0xff]  }
 0x19d   : > { %3362 = vmatprep.subr.bf16.mxu0 %v10712_v29  ;;  %3403 = vmatprep.subr.bf16.mxu1 %v10715_v30  ;;  %v10763_v29 = vld [vmem:[%s11582_s25 + $0x57c] ss:$112 sps:$4 sm:$0xff]   ;;  %v10758_v30 = vld [vmem:[%s11582_s25 + $0x570] ss:$112 sps:$4 sm:$0xff]  }
 0x1a0   : > { %3363 = vmatpush1.bf16.msra.mxu0 %v10710_v35  ;;  %3404 = vmatpush1.bf16.msra.mxu1 %v10713_v38  ;;  %v10761_v35 = vld [vmem:[%s11582_s25 + $0x578] ss:$112 sps:$4 sm:$0xff]   ;;  %v10766_v38 = vld [vmem:[%s11582_s25 + $0x654] ss:$112 sps:$4 sm:$0xff]  }
 0x1a1   : > { %3364 = vmatprep.subr.bf16.mxu0 %v10718_v39  ;;  %3405 = vmatprep.subr.bf16.mxu1 %v10721_v40  ;;  %v10769_v39 = vld [vmem:[%s11582_s25 + $0x65c] ss:$112 sps:$4 sm:$0xff]   ;;  %v10764_v40 = vld [vmem:[%s11582_s25 + $0x650] ss:$112 sps:$4 sm:$0xff]  }
 0x1a4   : > { %3365 = vmatpush1.bf16.msra.mxu0 %v10716_v41  ;;  %3406 = vmatpush1.bf16.msra.mxu1 %v10719_v42  ;;  %v10767_v41 = vld [vmem:[%s11582_s25 + $0x658] ss:$112 sps:$4 sm:$0xff]   ;;  %v10772_v42 = vld [vmem:[%s11582_s25 + $0x734] ss:$112 sps:$4 sm:$0xff]  }
 0x1a5   : > { %3438 = vmatprep.subr.bf16.mxu0 %v10724_v44  ;;  %3479 = vmatprep.subr.bf16.mxu1 %v10727_v45  ;;  %v10775_v44 = vld [vmem:[%s11582_s25 + $0x73c] ss:$112 sps:$4 sm:$0xff]   ;;  %v10770_v45 = vld [vmem:[%s11582_s25 + $0x730] ss:$112 sps:$4 sm:$0xff]  }
 0x1a7   : > { %9726 = vmatmul.mubr.msk.bf16.vlgmr.msra.gmra.mrb[60].mxu0 %vm1073_vm0, %v12021_v14  ;;  %9727 = vmatmul.mubr.msk.bf16.vlgmr.msra.gmra.mrb[60].mxu1 %vm1073_vm0, %v12021_v14 }
 0x1a8   : > { %3439 = vmatpush1.bf16.msra.mxu0 %v10722_v48  ;;  %3480 = vmatpush1.bf16.msra.mxu1 %v10725_v43  ;;  %v10773_v48 = vld [vmem:[%s11582_s25 + $0x738] ss:$112 sps:$4 sm:$0xff]   ;;  %v10778_v43 = vld [vmem:[%s11582_s25 + $0x814] ss:$112 sps:$4 sm:$0xff]  }
 0x1a9   : > { %3440 = vmatprep.subr.bf16.mxu0 %v10730_v49  ;;  %3481 = vmatprep.subr.bf16.mxu1 %v10733_v52  ;;  %v10781_v49 = vld [vmem:[%s11582_s25 + $0x81c] ss:$112 sps:$4 sm:$0xff]   ;;  %v10776_v52 = vld [vmem:[%s11582_s25 + $0x810] ss:$112 sps:$4 sm:$0xff]  }
 0x1aa   : > { %3470 = vmatprep.mubr.bf16.mxu0 %v13872_v1  ;;  %3511 = vmatprep.mubr.bf16.mxu1 %v13872_v1 }
 0x1ac   : > { %3441 = vmatpush1.bf16.msra.mxu0 %v10728_v53  ;;  %3482 = vmatpush1.bf16.msra.mxu1 %v10731_v54  ;;  %v10779_v53 = vld [vmem:[%s11582_s25 + $0x818] ss:$112 sps:$4 sm:$0xff]   ;;  %v10784_v54 = vld [vmem:[%s11582_s25 + $0x4a4] ss:$112 sps:$4 sm:$0xff]  }
 0x1ad   : > { %3442 = vmatprep.subr.bf16.mxu0 %v10736_v55  ;;  %3483 = vmatprep.subr.bf16.mxu1 %v10739_v56  ;;  %v10787_v55 = vld [vmem:[%s11582_s25 + $0x4ac] ss:$112 sps:$4 sm:$0xff]   ;;  %v10782_v56 = vld [vmem:[%s11582_s25 + $0x4a0] ss:$112 sps:$4 sm:$0xff]  }
 0x1b0   : > { %3443 = vmatpush1.bf16.msra.mxu0 %v10734_v57  ;;  %3484 = vmatpush1.bf16.msra.mxu1 %v10737_v62  ;;  %v10785_v57 = vld [vmem:[%s11582_s25 + $0x4a8] ss:$112 sps:$4 sm:$0xff]   ;;  %v10790_v62 = vld [vmem:[%s11582_s25 + $0x584] ss:$112 sps:$4 sm:$0xff]  }
 0x1b1   : > { %3444 = vmatprep.subr.bf16.mxu0 %v10742_v2  ;;  %3485 = vmatprep.subr.bf16.mxu1 %v10745_v7  ;;  %v10793_v2 = vld [vmem:[%s11582_s25 + $0x58c] ss:$112 sps:$4 sm:$0xff]   ;;  %v10788_v7 = vld [vmem:[%s11582_s25 + $0x580] ss:$112 sps:$4 sm:$0xff]  }
 0x1b4   : > { %3445 = vmatpush1.bf16.msra.mxu0 %v10740_v8  ;;  %3486 = vmatpush1.bf16.msra.mxu1 %v10743_v11  ;;  %v10791_v8 = vld [vmem:[%s11582_s25 + $0x588] ss:$112 sps:$4 sm:$0xff]   ;;  %v10796_v11 = vld [vmem:[%s11582_s25 + $0x664] ss:$112 sps:$4 sm:$0xff]  }
 0x1b5   : > { %3446 = vmatprep.subr.bf16.mxu0 %v10748_v24  ;;  %3487 = vmatprep.subr.bf16.mxu1 %v10751_v12  ;;  %v10799_v24 = vld [vmem:[%s11582_s25 + $0x66c] ss:$112 sps:$4 sm:$0xff]   ;;  %v10794_v12 = vld [vmem:[%s11582_s25 + $0x660] ss:$112 sps:$4 sm:$0xff]  }
 0x1b8   : > { %3447 = vmatpush1.bf16.msra.mxu0 %v10746_v13  ;;  %3488 = vmatpush1.bf16.msra.mxu1 %v10749_v15  ;;  %v10797_v13 = vld [vmem:[%s11582_s25 + $0x668] ss:$112 sps:$4 sm:$0xff]   ;;  %v10802_v15 = vld [vmem:[%s11582_s25 + $0x744] ss:$112 sps:$4 sm:$0xff]  }
 0x1b9   : > { %3520 = vmatprep.subr.bf16.mxu0 %v10754_v16  ;;  %3561 = vmatprep.subr.bf16.mxu1 %v10757_v17  ;;  %v10805_v16 = vld [vmem:[%s11582_s25 + $0x74c] ss:$112 sps:$4 sm:$0xff]   ;;  %v10800_v17 = vld [vmem:[%s11582_s25 + $0x740] ss:$112 sps:$4 sm:$0xff]  }
 0x1bb   : > { %9728 = vmatmul.mubr.msk.bf16.vlgmr.msra.gmra.mrb[64].mxu0 %vm1073_vm0, %v12021_v14  ;;  %9729 = vmatmul.mubr.msk.bf16.vlgmr.msra.gmra.mrb[64].mxu1 %vm1073_vm0, %v12021_v14 }
 0x1bc   : > { %3521 = vmatpush1.bf16.msra.mxu0 %v10752_v18  ;;  %3562 = vmatpush1.bf16.msra.mxu1 %v10755_v20  ;;  %v10803_v18 = vld [vmem:[%s11582_s25 + $0x748] ss:$112 sps:$4 sm:$0xff]   ;;  %v10808_v20 = vld [vmem:[%s11582_s25 + $0x824] ss:$112 sps:$4 sm:$0xff]  }
 0x1bd   : > { %3522 = vmatprep.subr.bf16.mxu0 %v10760_v21  ;;  %3563 = vmatprep.subr.bf16.mxu1 %v10763_v29  ;;  %v10811_v21 = vld [vmem:[%s11582_s25 + $0x82c] ss:$112 sps:$4 sm:$0xff]  }
 0x1be   : > { %3552 = vmatprep.mubr.bf16.mxu0 %v13872_v1  ;;  %3593 = vmatprep.mubr.bf16.mxu1 %v13872_v1 }
 0x1c0   : > { %3523 = vmatpush1.bf16.msra.mxu0 %v10758_v30  ;;  %3564 = vmatpush1.bf16.msra.mxu1 %v10761_v35 }
 0x1c1   : > { %3524 = vmatprep.subr.bf16.mxu0 %v10766_v38  ;;  %3565 = vmatprep.subr.bf16.mxu1 %v10769_v39  ;;  %v10806_v39 = vld [vmem:[%s11582_s25 + $0x820] ss:$112 sps:$4 sm:$0xff]  }
 0x1c4   : > { %3525 = vmatpush1.bf16.msra.mxu0 %v10764_v40  ;;  %3566 = vmatpush1.bf16.msra.mxu1 %v10767_v41  ;;  %v10809_v40 = vld [vmem:[%s11582_s25 + $0x828] ss:$112 sps:$4 sm:$0xff]  }
 0x1c5   : > { %3526 = vmatprep.subr.bf16.mxu0 %v10772_v42  ;;  %3567 = vmatprep.subr.bf16.mxu1 %v10775_v44  ;;  %v10814_v44 = vld [vmem:[%s11582_s25 + $0x4b4] ss:$112 sps:$4 sm:$0xff]  }
 0x1c8   : > { %3527 = vmatpush1.bf16.msra.mxu0 %v10770_v45  ;;  %3568 = vmatpush1.bf16.msra.mxu1 %v10773_v48  ;;  %v10817_v45 = vld [vmem:[%s11582_s25 + $0x4bc] ss:$112 sps:$4 sm:$0xff]  }
 0x1c9   : > { %3528 = vmatprep.subr.bf16.mxu0 %v10778_v43  ;;  %3569 = vmatprep.subr.bf16.mxu1 %v10781_v49  ;;  %v10812_v49 = vld [vmem:[%s11582_s25 + $0x4b0] ss:$112 sps:$4 sm:$0xff]  }
 0x1cc   : > { %3529 = vmatpush1.bf16.msra.mxu0 %v10776_v52  ;;  %3570 = vmatpush1.bf16.msra.mxu1 %v10779_v53  ;;  %v10815_v52 = vld [vmem:[%s11582_s25 + $0x4b8] ss:$112 sps:$4 sm:$0xff]   ;;  %v10820_v53 = vld [vmem:[%s11582_s25 + $0x594] ss:$112 sps:$4 sm:$0xff]  }
 0x1cd   : > { %3602 = vmatprep.subr.bf16.mxu0 %v10784_v54  ;;  %3643 = vmatprep.subr.bf16.mxu1 %v10787_v55  ;;  %v10823_v54 = vld [vmem:[%s11582_s25 + $0x59c] ss:$112 sps:$4 sm:$0xff]   ;;  %v10818_v55 = vld [vmem:[%s11582_s25 + $0x590] ss:$112 sps:$4 sm:$0xff]  }
 0x1cf   : > { %9730 = vmatmul.mubr.msk.bf16.vlgmr.msra.gmra.mrb[68].mxu0 %vm1073_vm0, %v12021_v14  ;;  %9731 = vmatmul.mubr.msk.bf16.vlgmr.msra.gmra.mrb[68].mxu1 %vm1073_vm0, %v12021_v14 }
 0x1d0   : > { %3603 = vmatpush1.bf16.msra.mxu0 %v10782_v56  ;;  %3644 = vmatpush1.bf16.msra.mxu1 %v10785_v57  ;;  %v10821_v56 = vld [vmem:[%s11582_s25 + $0x598] ss:$112 sps:$4 sm:$0xff]   ;;  %v10826_v57 = vld [vmem:[%s11582_s25 + $0x674] ss:$112 sps:$4 sm:$0xff]  }
 0x1d1   : > { %3604 = vmatprep.subr.bf16.mxu0 %v10790_v62  ;;  %3645 = vmatprep.subr.bf16.mxu1 %v10793_v2  ;;  %v10829_v62 = vld [vmem:[%s11582_s25 + $0x67c] ss:$112 sps:$4 sm:$0xff]   ;;  %v10824_v2 = vld [vmem:[%s11582_s25 + $0x670] ss:$112 sps:$4 sm:$0xff]  }
 0x1d2   : > { %3634 = vmatprep.mubr.bf16.mxu0 %v13872_v1  ;;  %3675 = vmatprep.mubr.bf16.mxu1 %v13872_v1 }
 0x1d4   : > { %3605 = vmatpush1.bf16.msra.mxu0 %v10788_v7  ;;  %3646 = vmatpush1.bf16.msra.mxu1 %v10791_v8  ;;  %v10827_v7 = vld [vmem:[%s11582_s25 + $0x678] ss:$112 sps:$4 sm:$0xff]   ;;  %v10832_v8 = vld [vmem:[%s11582_s25 + $0x754] ss:$112 sps:$4 sm:$0xff]  }
 0x1d5   : > { %3606 = vmatprep.subr.bf16.mxu0 %v10796_v11  ;;  %3647 = vmatprep.subr.bf16.mxu1 %v10799_v24  ;;  %v10835_v11 = vld [vmem:[%s11582_s25 + $0x75c] ss:$112 sps:$4 sm:$0xff]   ;;  %v10830_v24 = vld [vmem:[%s11582_s25 + $0x750] ss:$112 sps:$4 sm:$0xff]  }
 0x1d8   : > { %3607 = vmatpush1.bf16.msra.mxu0 %v10794_v12  ;;  %3648 = vmatpush1.bf16.msra.mxu1 %v10797_v13  ;;  %v10833_v12 = vld [vmem:[%s11582_s25 + $0x758] ss:$112 sps:$4 sm:$0xff]   ;;  %v10838_v13 = vld [vmem:[%s11582_s25 + $0x834] ss:$112 sps:$4 sm:$0xff]  }
 0x1d9   : > { %3608 = vmatprep.subr.bf16.mxu0 %v10802_v15  ;;  %3649 = vmatprep.subr.bf16.mxu1 %v10805_v16  ;;  %v10841_v15 = vld [vmem:[%s11582_s25 + $0x83c] ss:$112 sps:$4 sm:$0xff]  }
 0x1da   : > { %v12119_v29 = vpop.f32.mrb[28].mxu0  ;;  %v12121_v30 = vpop.f32.mrb[28].mxu1 }
 0x1db   : > { %v12123_v35 = vpop.f32.mrb[29].mxu0  ;;  %v12125_v38 = vpop.f32.mrb[29].mxu1 }
 0x1dc   : > { %3609 = vmatpush1.bf16.msra.mxu0 %v10800_v17  ;;  %3650 = vmatpush1.bf16.msra.mxu1 %v10803_v18  ;;  %v1841_v41 = vpop.f32.mrb[30].mxu0  ;;  %v1882_v42 = vpop.f32.mrb[30].mxu1 }
 0x1dd   : > { %3610 = vmatprep.subr.bf16.mxu0 %v10808_v20  ;;  %3651 = vmatprep.subr.bf16.mxu1 %v10811_v21  ;;  %v1842_v48 = vpop.f32.mrb[31].mxu0  ;;  %v1883_v43 = vpop.f32.mrb[31].mxu1  ;;  %v10836_v21 = vld [vmem:[%s11582_s25 + $0x830] ss:$112 sps:$4 sm:$0xff]   ;;  %v10844_v42 = vld [vmem:[%s11582_s25 + $0x4c4] ss:$112 sps:$4 sm:$0xff]  }
 0x1de   : > { %v10842_v43 = vld [vmem:[%s11582_s25 + $0x4c0] ss:$112 sps:$4 sm:$0xff]  }
 0x1e0   : > { %3611 = vmatpush1.bf16.msra.mxu0 %v10806_v39  ;;  %3652 = vmatpush1.bf16.msra.mxu1 %v10809_v40  ;;  %v10839_v39 = vld [vmem:[%s11582_s25 + $0x838] ss:$112 sps:$4 sm:$0xff]  }
 0x1e1   : > { %3684 = vmatprep.subr.bf16.mxu0 %v10814_v44  ;;  %3725 = vmatprep.subr.bf16.mxu1 %v10817_v45  ;;  %v10847_v44 = vld [vmem:[%s11582_s25 + $0x4cc] ss:$112 sps:$4 sm:$0xff]  }
 0x1e3   : > { %9732 = vmatmul.mubr.msk.bf16.vlgmr.msra.gmra.mrb[72].mxu0 %vm1073_vm0, %v12021_v14  ;;  %9733 = vmatmul.mubr.msk.bf16.vlgmr.msra.gmra.mrb[72].mxu1 %vm1073_vm0, %v12021_v14 }
 0x1e4   : > { %3685 = vmatpush1.bf16.msra.mxu0 %v10812_v49  ;;  %3726 = vmatpush1.bf16.msra.mxu1 %v10815_v52  ;;  %v10845_v49 = vld [vmem:[%s11582_s25 + $0x4c8] ss:$112 sps:$4 sm:$0xff]   ;;  %v10850_v52 = vld [vmem:[%s11582_s25 + $0x5a4] ss:$112 sps:$4 sm:$0xff]  }
 0x1e5   : > { %3686 = vmatprep.subr.bf16.mxu0 %v10820_v53  ;;  %3727 = vmatprep.subr.bf16.mxu1 %v10823_v54  ;;  %v10853_v53 = vld [vmem:[%s11582_s25 + $0x5ac] ss:$112 sps:$4 sm:$0xff]   ;;  %v10848_v54 = vld [vmem:[%s11582_s25 + $0x5a0] ss:$112 sps:$4 sm:$0xff]  }
 0x1e6   : > { %3716 = vmatprep.mubr.bf16.mxu0 %v13872_v1  ;;  %3757 = vmatprep.mubr.bf16.mxu1 %v13872_v1 }
 0x1e8   : > { %3687 = vmatpush1.bf16.msra.mxu0 %v10818_v55  ;;  %3728 = vmatpush1.bf16.msra.mxu1 %v10821_v56  ;;  %v10851_v55 = vld [vmem:[%s11582_s25 + $0x5a8] ss:$112 sps:$4 sm:$0xff]   ;;  %v10856_v56 = vld [vmem:[%s11582_s25 + $0x684] ss:$112 sps:$4 sm:$0xff]  }
 0x1e9   : > { %3688 = vmatprep.subr.bf16.mxu0 %v10826_v57  ;;  %3729 = vmatprep.subr.bf16.mxu1 %v10829_v62  ;;  %v10859_v57 = vld [vmem:[%s11582_s25 + $0x68c] ss:$112 sps:$4 sm:$0xff]   ;;  %v10854_v62 = vld [vmem:[%s11582_s25 + $0x680] ss:$112 sps:$4 sm:$0xff]  }
 0x1ec   : > { %3689 = vmatpush1.bf16.msra.mxu0 %v10824_v2  ;;  %3730 = vmatpush1.bf16.msra.mxu1 %v10827_v7  ;;  %v10857_v2 = vld [vmem:[%s11582_s25 + $0x688] ss:$112 sps:$4 sm:$0xff]   ;;  %v10862_v7 = vld [vmem:[%s11582_s25 + $0x764] ss:$112 sps:$4 sm:$0xff]  }
 0x1ed   : > { %3690 = vmatprep.subr.bf16.mxu0 %v10832_v8  ;;  %3731 = vmatprep.subr.bf16.mxu1 %v10835_v11  ;;  %v10865_v8 = vld [vmem:[%s11582_s25 + $0x76c] ss:$112 sps:$4 sm:$0xff]   ;;  %v10860_v11 = vld [vmem:[%s11582_s25 + $0x760] ss:$112 sps:$4 sm:$0xff]  }
 0x1ee   : > { %v12153_v16 = vpop.f32.mrb[32].mxu0  ;;  %v12155_v17 = vpop.f32.mrb[32].mxu1 }
 0x1ef   : > { %v12157_v18 = vpop.f32.mrb[33].mxu0  ;;  %v12159_v20 = vpop.f32.mrb[33].mxu1 }
 0x1f0   : > { %3691 = vmatpush1.bf16.msra.mxu0 %v10830_v24  ;;  %3732 = vmatpush1.bf16.msra.mxu1 %v10833_v12  ;;  %v1923_v40 = vpop.f32.mrb[34].mxu0  ;;  %v1964_v41 = vpop.f32.mrb[34].mxu1  ;;  %v10863_v24 = vld [vmem:[%s11582_s25 + $0x768] ss:$112 sps:$4 sm:$0xff]   ;;  %v10868_v12 = vld [vmem:[%s11582_s25 + $0x844] ss:$112 sps:$4 sm:$0xff]  }
 0x1f1   : > { %3692 = vmatprep.subr.bf16.mxu0 %v10838_v13  ;;  %3733 = vmatprep.subr.bf16.mxu1 %v10841_v15  ;;  %v1924_v45 = vpop.f32.mrb[35].mxu0  ;;  %v1965_v48 = vpop.f32.mrb[35].mxu1  ;;  %v10871_v13 = vld [vmem:[%s11582_s25 + $0x84c] ss:$112 sps:$4 sm:$0xff]   ;;  %v10866_v41 = vld [vmem:[%s11582_s25 + $0x840] ss:$112 sps:$4 sm:$0xff]  }
 0x1f4   : > { %3693 = vmatpush1.bf16.msra.mxu0 %v10836_v21  ;;  %3734 = vmatpush1.bf16.msra.mxu1 %v10839_v39 }
 0x1f5   : > { %3766 = vmatprep.subr.bf16.mxu0 %v10844_v42  ;;  %3807 = vmatprep.subr.bf16.mxu1 %v10847_v44  ;;  %v10869_v42 = vld [vmem:[%s11582_s25 + $0x848] ss:$112 sps:$4 sm:$0xff]  }
 0x1f7   : > { %9734 = vmatmul.mubr.msk.bf16.vlgmr.msra.gmra.mrb[76].mxu0 %vm1073_vm0, %v12021_v14  ;;  %9735 = vmatmul.mubr.msk.bf16.vlgmr.msra.gmra.mrb[76].mxu1 %vm1073_vm0, %v12021_v14 }
 0x1f8   : > { %3767 = vmatpush1.bf16.msra.mxu0 %v10842_v43  ;;  %3808 = vmatpush1.bf16.msra.mxu1 %v10845_v49 }
 0x1f9   : > { %3768 = vmatprep.subr.bf16.mxu0 %v10850_v52  ;;  %3809 = vmatprep.subr.bf16.mxu1 %v10853_v53 }
 0x1fa   : > { %3798 = vmatprep.mubr.bf16.mxu0 %v13872_v1  ;;  %3839 = vmatprep.mubr.bf16.mxu1 %v13872_v1 }
 0x1fc   : > { %3769 = vmatpush1.bf16.msra.mxu0 %v10848_v54  ;;  %3810 = vmatpush1.bf16.msra.mxu1 %v10851_v55 }
 0x1fd   : > { %3770 = vmatprep.subr.bf16.mxu0 %v10856_v56  ;;  %3811 = vmatprep.subr.bf16.mxu1 %v10859_v57 }
 0x200   : > { %3771 = vmatpush1.bf16.msra.mxu0 %v10854_v62  ;;  %3812 = vmatpush1.bf16.msra.mxu1 %v10857_v2 }
 0x201   : > { %3772 = vmatprep.subr.bf16.mxu0 %v10862_v7  ;;  %3813 = vmatprep.subr.bf16.mxu1 %v10865_v8 }
 0x202   : > { %v12187_v15 = vpop.f32.mrb[36].mxu0  ;;  %v12189_v21 = vpop.f32.mrb[36].mxu1 }
 0x203   : > { %v12191_v39 = vpop.f32.mrb[37].mxu0  ;;  %v12193_v40 = vpop.f32.mrb[37].mxu1 }
 0x204   : > { %3773 = vmatpush1.bf16.msra.mxu0 %v10860_v11  ;;  %3814 = vmatpush1.bf16.msra.mxu1 %v10863_v24  ;;  %v2005_v44 = vpop.f32.mrb[38].mxu0  ;;  %v2046_v45 = vpop.f32.mrb[38].mxu1 }
 0x205   : > { %3774 = vmatprep.subr.bf16.mxu0 %v10868_v12  ;;  %3815 = vmatprep.subr.bf16.mxu1 %v10871_v13  ;;  %v2006_v48 = vpop.f32.mrb[39].mxu0  ;;  %v2047_v43 = vpop.f32.mrb[39].mxu1 }
 0x208   : > { %3775 = vmatpush1.bf16.msra.mxu0 %v10866_v41  ;;  %3816 = vmatpush1.bf16.msra.mxu1 %v10869_v42 }
 0x20b   : > { %9736 = vmatmul.mubr.msk.bf16.vlgmr.msra.gmra.mrb[80].mxu0 %vm1073_vm0, %v12021_v14  ;;  %9737 = vmatmul.mubr.msk.bf16.vlgmr.msra.gmra.mrb[80].mxu1 %vm1073_vm0, %v12021_v14 }
 0x20c   : > { %4020 = vmatprep.mubr.bf16.mxu0 %v13872_v1  ;;  %4061 = vmatprep.mubr.bf16.mxu1 %v13872_v1 }
 0x216   : > { %v12203_v49 = vpop.f32.mrb[40].mxu0  ;;  %v12205_v52 = vpop.f32.mrb[40].mxu1 }
 0x217   : > { %v12207_v53 = vpop.f32.mrb[41].mxu0  ;;  %v12209_v54 = vpop.f32.mrb[41].mxu1 }
 0x218   : > { %v2087_v55 = vpop.f32.mrb[42].mxu0  ;;  %v2128_v56 = vpop.f32.mrb[42].mxu1 }
 0x219   : > { %v2088_v57 = vpop.f32.mrb[43].mxu0  ;;  %v2129_v62 = vpop.f32.mrb[43].mxu1 }
 0x22a   : > { %v12211_v2 = vpop.f32.mrb[44].mxu0  ;;  %v12213_v7 = vpop.f32.mrb[44].mxu1 }
 0x22b   : > { %13962 = vst [vmem:[#allocation17_spill] sm:$0xff] %v12213_v7  ;;  %v12215_v14 = vpop.f32.mrb[45].mxu0  ;;  %v12217_v8 = vpop.f32.mrb[45].mxu1 }
 0x22c   : > { %13963 = vst [vmem:[#allocation18_spill] sm:$0xff] %v12215_v14  ;;  %13964 = vst [vmem:[#allocation19_spill] sm:$0xff] %v12217_v8  ;;  %v2169_v11 = vpop.f32.mrb[46].mxu0  ;;  %v2210_v24 = vpop.f32.mrb[46].mxu1 }
 0x22d   : > { %v2170_v12 = vpop.f32.mrb[47].mxu0  ;;  %v2211_v13 = vpop.f32.mrb[47].mxu1 }
 0x23e   : > { %v12219_v41 = vpop.f32.mrb[48].mxu0  ;;  %v12221_v42 = vpop.f32.mrb[48].mxu1 }
 0x23f   : > { %13965 = vst [vmem:[#allocation20_spill] sm:$0xff] %v12219_v41  ;;  %13966 = vst [vmem:[#allocation21_spill] sm:$0xff] %v12221_v42  ;;  %v12223_v44 = vpop.f32.mrb[49].mxu0  ;;  %v12225_v45 = vpop.f32.mrb[49].mxu1 }
 0x240   : > { %13967 = vst [vmem:[#allocation22_spill] sm:$0xff] %v12223_v44  ;;  %13968 = vst [vmem:[#allocation23_spill] sm:$0xff] %v12225_v45  ;;  %v2251_v48 = vpop.f32.mrb[50].mxu0  ;;  %v2292_v43 = vpop.f32.mrb[50].mxu1 }
 0x241   : > { %v2252_v55 = vpop.f32.mrb[51].mxu0  ;;  %v2293_v56 = vpop.f32.mrb[51].mxu1 }
 0x252   : > { %v12227_v57 = vpop.f32.mrb[52].mxu0  ;;  %v12229_v62 = vpop.f32.mrb[52].mxu1 }
 0x253   : > { %13969 = vst [vmem:[#allocation24_spill] sm:$0xff] %v12227_v57  ;;  %13970 = vst [vmem:[#allocation25_spill] sm:$0xff] %v12229_v62  ;;  %v12231_v11 = vpop.f32.mrb[53].mxu0  ;;  %v12233_v24 = vpop.f32.mrb[53].mxu1 }
 0x254   : > { %13971 = vst [vmem:[#allocation26_spill] sm:$0xff] %v12231_v11  ;;  %13972 = vst [vmem:[#allocation27_spill] sm:$0xff] %v12233_v24  ;;  %v2333_v12 = vpop.f32.mrb[54].mxu0  ;;  %v2374_v13 = vpop.f32.mrb[54].mxu1 }
 0x255   : > { %v2334_v1 = vpop.f32.mrb[55].mxu0  ;;  %v2375_v4 = vpop.f32.mrb[55].mxu1 }
 0x266   : > { %v3308_v3 = vpop.f32.mrb[56].mxu0  ;;  %v3349_v61 = vpop.f32.mrb[56].mxu1 }
 0x267   : > { %v12236_v58 = vadd.f32 %v3308_v3, %v11775_v19  ;;  %v12239_v48 = vadd.f32 %v3349_v61, %v11775_v19  ;;  %v3310_v43 = vpop.f32.mrb[57].mxu0  ;;  %v3351_v55 = vpop.f32.mrb[57].mxu1 }
 0x268   : > { %v12242_v56 = vadd.f32 %v3310_v43, %v11775_v19  ;;  %v12245_v11 = vadd.f32 %v3351_v55, %v11775_v19  ;;  %v3312_v12 = vpop.f32.mrb[58].mxu0  ;;  %v3353_v13 = vpop.f32.mrb[58].mxu1 }
 0x269   : > { %v3848_v1 = vmul.f32 %v12236_v58, %v12236_v58  ;;  %v3850_v3 = vmul.f32 %v12239_v48, %v12239_v48  ;;  %v3313_v4 = vpop.f32.mrb[59].mxu0  ;;  %v3354_v24 = vpop.f32.mrb[59].mxu1 }
 0x26a   : > { %v3849_v61 = vmul.f32 %v12242_v56, %v12242_v56  ;;  %v3851_v43 = vmul.f32 %v12245_v11, %v12245_v11  ;;  %v12262_v24 = vld [vmem:[%s13869_s3] sm:$0xf] }
 0x26b   : > { %v3876_v34 = vpack.c.bf16 %v3848_v1, %v3848_v1  ;;  %v3878_v62 = vpack.c.bf16 %v3850_v3, %v3850_v3 }
 0x26c   : > { %v3877_v55 = vpack.c.bf16 %v3849_v61, %v3849_v61  ;;  %v3879_v31 = vpack.c.bf16 %v3851_v43, %v3851_v43 }
 0x26d   : > { %v3905_v12 = vsel %vm1718_vm1, %v3876_v34, 0  ;;  %v3911_v13 = vsel %vm1718_vm1, %v3878_v62, 0  ;;  %v13973_v34 = vmov 0  }
 0x26e   : > { %9738 = vmatprep.subr.msk.bf16.mxu0 %vm1718_vm1, %v3877_v55  ;;  %9740 = vmatprep.subr.msk.bf16.mxu1 %vm1718_vm1, %v3879_v31 }
 0x26f   : > { %3989 = vmatpush1.bf16.msra.mxu0 %v3905_v12  ;;  %4030 = vmatpush1.bf16.msra.mxu1 %v3911_v13 }
 0x272   : > { %9739 = vmatmul.mubr.msk.bf16.vlgmr.msra.gmra.mrb[84].mxu0 %vm1714_vm2, %v12262_v24  ;;  %9741 = vmatmul.mubr.msk.bf16.vlgmr.msra.gmra.mrb[84].mxu1 %vm1714_vm2, %v12262_v24 }
 0x273   : > { %4102 = vmatprep.mubr.bf16.mxu0 %v13973_v34  ;;  %4143 = vmatprep.mubr.bf16.mxu1 %v13973_v34 }
 0x27a   : > { %v3390_v62 = vpop.f32.mrb[60].mxu0  ;;  %v3431_v1 = vpop.f32.mrb[60].mxu1 }
 0x27b   : > { %v12271_v31 = vadd.f32 %v3390_v62, %v11775_v19  ;;  %v12274_v3 = vadd.f32 %v3431_v1, %v11775_v19  ;;  %v3392_v4 = vpop.f32.mrb[61].mxu0  ;;  %v3433_v61 = vpop.f32.mrb[61].mxu1 }
 0x27c   : > { %v12277_v43 = vadd.f32 %v3392_v4, %v11775_v19  ;;  %v12280_v55 = vadd.f32 %v3433_v61, %v11775_v19  ;;  %v3394_v12 = vpop.f32.mrb[62].mxu0  ;;  %v3435_v13 = vpop.f32.mrb[62].mxu1 }
 0x27d   : > { %v3852_v57 = vmul.f32 %v12271_v31, %v12271_v31  ;;  %v3854_v62 = vmul.f32 %v12274_v3, %v12274_v3  ;;  %v3395_v23 = vpop.f32.mrb[63].mxu0  ;;  %v3436_v22 = vpop.f32.mrb[63].mxu1 }
 0x27e   : > { %v3853_v1 = vmul.f32 %v12277_v43, %v12277_v43  ;;  %v3855_v4 = vmul.f32 %v12280_v55, %v12280_v55 }
 0x27f   : > { %v3880_v45 = vpack.c.bf16 %v3852_v57, %v3852_v57  ;;  %v3882_v44 = vpack.c.bf16 %v3854_v62, %v3854_v62 }
 0x280   : > { %v3881_v61 = vpack.c.bf16 %v3853_v1, %v3853_v1  ;;  %v3883_v0 = vpack.c.bf16 %v3855_v4, %v3855_v4 }
 0x281   : > { %v3917_v12 = vsel %vm1718_vm1, %v3880_v45, 0  ;;  %v3923_v13 = vsel %vm1718_vm1, %v3882_v44, 0 }
 0x282   : > { %9742 = vmatprep.subr.msk.bf16.mxu0 %vm1718_vm1, %v3881_v61  ;;  %9744 = vmatprep.subr.msk.bf16.mxu1 %vm1718_vm1, %v3883_v0 }
 0x283   : > { %4071 = vmatpush1.bf16.msra.mxu0 %v3917_v12  ;;  %4112 = vmatpush1.bf16.msra.mxu1 %v3923_v13 }
 0x286   : > { %9743 = vmatmul.mubr.msk.bf16.vlgmr.msra.gmra.mrb[88].mxu0 %vm1714_vm2, %v12262_v24  ;;  %9745 = vmatmul.mubr.msk.bf16.vlgmr.msra.gmra.mrb[88].mxu1 %vm1714_vm2, %v12262_v24 }
 0x287   : > { %4184 = vmatprep.mubr.bf16.mxu0 %v13973_v34  ;;  %4225 = vmatprep.mubr.bf16.mxu1 %v13973_v34 }
 0x28e   : > { %v3472_v22 = vpop.f32.mrb[64].mxu0  ;;  %v3513_v23 = vpop.f32.mrb[64].mxu1 }
 0x28f   : > { %v12301_v44 = vadd.f32 %v3472_v22, %v11775_v19  ;;  %v12304_v45 = vadd.f32 %v3513_v23, %v11775_v19  ;;  %v3474_v0 = vpop.f32.mrb[65].mxu0  ;;  %v3515_v57 = vpop.f32.mrb[65].mxu1 }
 0x290   : > { %v12307_v62 = vadd.f32 %v3474_v0, %v11775_v19  ;;  %v12310_v1 = vadd.f32 %v3515_v57, %v11775_v19  ;;  %v3476_v4 = vpop.f32.mrb[66].mxu0  ;;  %v3517_v61 = vpop.f32.mrb[66].mxu1 }
 0x291   : > { %v3856_v12 = vmul.f32 %v12301_v44, %v12301_v44  ;;  %v3858_v13 = vmul.f32 %v12304_v45, %v12304_v45  ;;  %v3477_v22 = vpop.f32.mrb[67].mxu0  ;;  %v3518_v42 = vpop.f32.mrb[67].mxu1 }
 0x292   : > { %v3857_v23 = vmul.f32 %v12307_v62, %v12307_v62  ;;  %v3859_v0 = vmul.f32 %v12310_v1, %v12310_v1 }
 0x293   : > { %v3884_v63 = vpack.c.bf16 %v3856_v12, %v3856_v12  ;;  %v3886_v41 = vpack.c.bf16 %v3858_v13, %v3858_v13 }
 0x294   : > { %v3885_v57 = vpack.c.bf16 %v3857_v23, %v3857_v23  ;;  %v3887_v60 = vpack.c.bf16 %v3859_v0, %v3859_v0 }
 0x295   : > { %v3929_v4 = vsel %vm1718_vm1, %v3884_v63, 0  ;;  %v3935_v61 = vsel %vm1718_vm1, %v3886_v41, 0 }
 0x296   : > { %9746 = vmatprep.subr.msk.bf16.mxu0 %vm1718_vm1, %v3885_v57  ;;  %9748 = vmatprep.subr.msk.bf16.mxu1 %vm1718_vm1, %v3887_v60 }
 0x297   : > { %4153 = vmatpush1.bf16.msra.mxu0 %v3929_v4  ;;  %4194 = vmatpush1.bf16.msra.mxu1 %v3935_v61 }
 0x29a   : > { %9747 = vmatmul.mubr.msk.bf16.vlgmr.msra.gmra.mrb[92].mxu0 %vm1714_vm2, %v12262_v24  ;;  %9749 = vmatmul.mubr.msk.bf16.vlgmr.msra.gmra.mrb[92].mxu1 %vm1714_vm2, %v12262_v24 }
 0x29b   : > { %4266 = vmatprep.mubr.bf16.mxu0 %v13973_v34  ;;  %4307 = vmatprep.mubr.bf16.mxu1 %v13973_v34 }
 0x2a2   : > { %v3554_v42 = vpop.f32.mrb[68].mxu0  ;;  %v3595_v63 = vpop.f32.mrb[68].mxu1 }
 0x2a3   : > { %v12331_v41 = vadd.f32 %v3554_v42, %v11775_v19  ;;  %v12334_v12 = vadd.f32 %v3595_v63, %v11775_v19  ;;  %v3556_v60 = vpop.f32.mrb[69].mxu0  ;;  %v3597_v13 = vpop.f32.mrb[69].mxu1 }
 0x2a4   : > { %v12337_v22 = vadd.f32 %v3556_v60, %v11775_v19  ;;  %v12340_v23 = vadd.f32 %v3597_v13, %v11775_v19  ;;  %v3558_v0 = vpop.f32.mrb[70].mxu0  ;;  %v3599_v57 = vpop.f32.mrb[70].mxu1 }
 0x2a5   : > { %v3860_v4 = vmul.f32 %v12331_v41, %v12331_v41  ;;  %v3862_v61 = vmul.f32 %v12334_v12, %v12334_v12  ;;  %v3559_v42 = vpop.f32.mrb[71].mxu0  ;;  %v3600_v59 = vpop.f32.mrb[71].mxu1 }
 0x2a6   : > { %13974 = vst [vmem:[#allocation28_spill] sm:$0xff] %v12337_v22  ;;  %13975 = vst [vmem:[#allocation29_spill] sm:$0xff] %v12340_v23  ;;  %v3861_v63 = vmul.f32 %v12337_v22, %v12337_v22  ;;  %v3863_v60 = vmul.f32 %v12340_v23, %v12340_v23 }
 0x2a7   : > { %v3888_v8 = vpack.c.bf16 %v3860_v4, %v3860_v4  ;;  %v3890_v14 = vpack.c.bf16 %v3862_v61, %v3862_v61 }
 0x2a8   : > { %v3889_v13 = vpack.c.bf16 %v3861_v63, %v3861_v63  ;;  %v3891_v37 = vpack.c.bf16 %v3863_v60, %v3863_v60 }
 0x2a9   : > { %v3941_v0 = vsel %vm1718_vm1, %v3888_v8, 0  ;;  %v3947_v57 = vsel %vm1718_vm1, %v3890_v14, 0 }
 0x2aa   : > { %9750 = vmatprep.subr.msk.bf16.mxu0 %vm1718_vm1, %v3889_v13  ;;  %9752 = vmatprep.subr.msk.bf16.mxu1 %vm1718_vm1, %v3891_v37 }
 0x2ab   : > { %4235 = vmatpush1.bf16.msra.mxu0 %v3941_v0  ;;  %4276 = vmatpush1.bf16.msra.mxu1 %v3947_v57 }
 0x2ae   : > { %9751 = vmatmul.mubr.msk.bf16.vlgmr.msra.gmra.mrb[96].mxu0 %vm1714_vm2, %v12262_v24  ;;  %9753 = vmatmul.mubr.msk.bf16.vlgmr.msra.gmra.mrb[96].mxu1 %vm1714_vm2, %v12262_v24 }
 0x2af   : > { %4348 = vmatprep.mubr.bf16.mxu0 %v13973_v34  ;;  %4389 = vmatprep.mubr.bf16.mxu1 %v13973_v34 }
 0x2b6   : > { %v3636_v59 = vpop.f32.mrb[72].mxu0  ;;  %v3677_v8 = vpop.f32.mrb[72].mxu1 }
 0x2b7   : > { %v12361_v14 = vadd.f32 %v3636_v59, %v11775_v19  ;;  %v12364_v4 = vadd.f32 %v3677_v8, %v11775_v19  ;;  %v3638_v37 = vpop.f32.mrb[73].mxu0  ;;  %v3679_v61 = vpop.f32.mrb[73].mxu1 }
 0x2b8   : > { %v12367_v42 = vadd.f32 %v3638_v37, %v11775_v19  ;;  %v12370_v63 = vadd.f32 %v3679_v61, %v11775_v19  ;;  %v3640_v60 = vpop.f32.mrb[74].mxu0  ;;  %v3681_v13 = vpop.f32.mrb[74].mxu1 }
 0x2b9   : > { %13976 = vst [vmem:[#allocation30_spill] sm:$0xff] %v12361_v14  ;;  %13977 = vst [vmem:[#allocation31_spill] sm:$0xff] %v12364_v4  ;;  %v3864_v0 = vmul.f32 %v12361_v14, %v12361_v14  ;;  %v3866_v57 = vmul.f32 %v12364_v4, %v12364_v4  ;;  %v3641_v59 = vpop.f32.mrb[75].mxu0  ;;  %v3682_v23 = vpop.f32.mrb[75].mxu1 }
 0x2ba   : > { %13978 = vst [vmem:[#allocation32_spill] sm:$0xff] %v12367_v42  ;;  %13979 = vst [vmem:[#allocation33_spill] sm:$0xff] %v12370_v63  ;;  %v3865_v8 = vmul.f32 %v12367_v42, %v12367_v42  ;;  %v3867_v37 = vmul.f32 %v12370_v63, %v12370_v63 }
 0x2bb   : > { %v3892_v22 = vpack.c.bf16 %v3864_v0, %v3864_v0  ;;  %v3894_v7 = vpack.c.bf16 %v3866_v57, %v3866_v57 }
 0x2bc   : > { %v3893_v61 = vpack.c.bf16 %v3865_v8, %v3865_v8  ;;  %v3895_v36 = vpack.c.bf16 %v3867_v37, %v3867_v37 }
 0x2bd   : > { %v3953_v60 = vsel %vm1718_vm1, %v3892_v22, 0  ;;  %v3959_v13 = vsel %vm1718_vm1, %v3894_v7, 0 }
 0x2be   : > { %9754 = vmatprep.subr.msk.bf16.mxu0 %vm1718_vm1, %v3893_v61  ;;  %9756 = vmatprep.subr.msk.bf16.mxu1 %vm1718_vm1, %v3895_v36 }
 0x2bf   : > { %4317 = vmatpush1.bf16.msra.mxu0 %v3953_v60  ;;  %4358 = vmatpush1.bf16.msra.mxu1 %v3959_v13 }
 0x2c2   : > { %9755 = vmatmul.mubr.msk.bf16.vlgmr.msra.gmra.mrb[100].mxu0 %vm1714_vm2, %v12262_v24  ;;  %9757 = vmatmul.mubr.msk.bf16.vlgmr.msra.gmra.mrb[100].mxu1 %vm1714_vm2, %v12262_v24 }
 0x2c3   : > { %4430 = vmatprep.mubr.bf16.mxu0 %v13973_v34  ;;  %4471 = vmatprep.mubr.bf16.mxu1 %v13973_v34 }
 0x2ca   : > { %v3718_v23 = vpop.f32.mrb[76].mxu0  ;;  %v3759_v22 = vpop.f32.mrb[76].mxu1 }
 0x2cb   : > { %v12391_v7 = vadd.f32 %v3718_v23, %v11775_v19  ;;  %v12394_v0 = vadd.f32 %v3759_v22, %v11775_v19  ;;  %v3720_v36 = vpop.f32.mrb[77].mxu0  ;;  %v3761_v57 = vpop.f32.mrb[77].mxu1 }
 0x2cc   : > { %v12397_v59 = vadd.f32 %v3720_v36, %v11775_v19  ;;  %v12400_v8 = vadd.f32 %v3761_v57, %v11775_v19  ;;  %v3722_v37 = vpop.f32.mrb[78].mxu0  ;;  %v3763_v61 = vpop.f32.mrb[78].mxu1 }
 0x2cd   : > { %v3868_v60 = vmul.f32 %v12391_v7, %v12391_v7  ;;  %v3870_v13 = vmul.f32 %v12394_v0, %v12394_v0  ;;  %v3723_v23 = vpop.f32.mrb[79].mxu0  ;;  %v3764_v63 = vpop.f32.mrb[79].mxu1 }
 0x2ce   : > { %13980 = vst [vmem:[#allocation34_spill] sm:$0xff] %v12397_v59  ;;  %13981 = vst [vmem:[#allocation35_spill] sm:$0xff] %v12400_v8  ;;  %v3869_v22 = vmul.f32 %v12397_v59, %v12397_v59  ;;  %v3871_v36 = vmul.f32 %v12400_v8, %v12400_v8  ;;  %v10877_v59 = vld [vmem:[%s11582_s25 + $0x8cc] ss:$112 sps:$4 sm:$0xff]  }
 0x2cf   : > { %v3896_v42 = vpack.c.bf16 %v3868_v60, %v3868_v60  ;;  %v3898_v4 = vpack.c.bf16 %v3870_v13, %v3870_v13 }
 0x2d0   : > { %v3897_v57 = vpack.c.bf16 %v3869_v22, %v3869_v22  ;;  %v3899_v14 = vpack.c.bf16 %v3871_v36, %v3871_v36 }
 0x2d1   : > { %v3965_v37 = vsel %vm1718_vm1, %v3896_v42, 0  ;;  %v3971_v61 = vsel %vm1718_vm1, %v3898_v4, 0 }
 0x2d2   : > { %9758 = vmatprep.subr.msk.bf16.mxu0 %vm1718_vm1, %v3897_v57  ;;  %9760 = vmatprep.subr.msk.bf16.mxu1 %vm1718_vm1, %v3899_v14 }
 0x2d3   : > { %4399 = vmatpush1.bf16.msra.mxu0 %v3965_v37  ;;  %4440 = vmatpush1.bf16.msra.mxu1 %v3971_v61 }
 0x2d6   : > { %9759 = vmatmul.mubr.msk.bf16.vlgmr.msra.gmra.mrb[104].mxu0 %vm1714_vm2, %v12262_v24  ;;  %9761 = vmatmul.mubr.msk.bf16.vlgmr.msra.gmra.mrb[104].mxu1 %vm1714_vm2, %v12262_v24 }
 0x2d7   : > { %4512 = vmatprep.mubr.bf16.mxu0 %v13973_v34  ;;  %4553 = vmatprep.mubr.bf16.mxu1 %v13973_v34 }
 0x2de   : > { %v3800_v63 = vpop.f32.mrb[80].mxu0  ;;  %v3841_v42 = vpop.f32.mrb[80].mxu1 }
 0x2df   : > { %v12421_v4 = vadd.f32 %v3800_v63, %v11775_v19  ;;  %v12424_v60 = vadd.f32 %v3841_v42, %v11775_v19  ;;  %v3802_v14 = vpop.f32.mrb[81].mxu0  ;;  %v3843_v13 = vpop.f32.mrb[81].mxu1 }
 0x2e0   : > { %v12427_v23 = vadd.f32 %v3802_v14, %v11775_v19  ;;  %v12430_v22 = vadd.f32 %v3843_v13, %v11775_v19  ;;  %v3804_v36 = vpop.f32.mrb[82].mxu0  ;;  %v3845_v57 = vpop.f32.mrb[82].mxu1 }
 0x2e1   : > { %13982 = vst [vmem:[#allocation36_spill] sm:$0xff] %v12421_v4  ;;  %13983 = vst [vmem:[#allocation37_spill] sm:$0xff] %v12424_v60  ;;  %v3872_v37 = vmul.f32 %v12421_v4, %v12421_v4  ;;  %v3874_v61 = vmul.f32 %v12424_v60, %v12424_v60  ;;  %v3805_v63 = vpop.f32.mrb[83].mxu0  ;;  %v3846_v42 = vpop.f32.mrb[83].mxu1  ;;  %v10874_v4 = vld [vmem:[%s11582_s25 + $0x8c4] ss:$112 sps:$4 sm:$0xff]  }
 0x2e2   : > { %13984 = vst [vmem:[#allocation38_spill] sm:$0xff] %v12427_v23  ;;  %13985 = vst [vmem:[#allocation39_spill] sm:$0xff] %v12430_v22  ;;  %v3873_v8 = vmul.f32 %v12427_v23, %v12427_v23  ;;  %v3875_v14 = vmul.f32 %v12430_v22, %v12430_v22  ;;  %v10883_v42 = vld [vmem:[%s11582_s25 + $0x9ac] ss:$112 sps:$4 sm:$0xff]  }
 0x2e3   : > { %v3900_v13 = vpack.c.bf16 %v3872_v37, %v3872_v37  ;;  %v3902_v36 = vpack.c.bf16 %v3874_v61, %v3874_v61  ;;  %v10872_v37 = vld [vmem:[%s11582_s25 + $0x8c0] ss:$112 sps:$4 sm:$0xff]   ;;  %v10875_v61 = vld [vmem:[%s11582_s25 + $0x8c8] ss:$112 sps:$4 sm:$0xff]  }
 0x2e4   : > { %v3901_v57 = vpack.c.bf16 %v3873_v8, %v3873_v8  ;;  %v3903_v19 = vpack.c.bf16 %v3875_v14, %v3875_v14  ;;  %v10880_v8 = vld [vmem:[%s11582_s25 + $0x9a4] ss:$112 sps:$4 sm:$0xff]   ;;  %v10887_v14 = vld [vmem:[%s11582_s25 + $0xa88] ss:$112 sps:$4 sm:$0xff]  }
 0x2e5   : > { %v3977_v60 = vsel %vm1718_vm1, %v3900_v13, 0  ;;  %v3983_v63 = vsel %vm1718_vm1, %v3902_v36, 0  ;;  %v10892_v13 = vld [vmem:[%s11582_s25 + $0xb64] ss:$112 sps:$4 sm:$0xff]   ;;  %v10895_v36 = vld [vmem:[%s11582_s25 + $0xb6c] ss:$112 sps:$4 sm:$0xff]  }
 0x2e6   : > { %9762 = vmatprep.subr.msk.bf16.mxu0 %vm1718_vm1, %v3901_v57  ;;  %9764 = vmatprep.subr.msk.bf16.mxu1 %vm1718_vm1, %v3903_v19  ;;  %v10878_v19 = vld [vmem:[%s11582_s25 + $0x9a0] ss:$112 sps:$4 sm:$0xff]  }
 0x2e7   : > { %4481 = vmatpush1.bf16.msra.mxu0 %v3977_v60  ;;  %4522 = vmatpush1.bf16.msra.mxu1 %v3983_v63  ;;  %v10881_v60 = vld [vmem:[%s11582_s25 + $0x9a8] ss:$112 sps:$4 sm:$0xff]   ;;  %v10890_v57 = vld [vmem:[%s11582_s25 + $0xb60] ss:$112 sps:$4 sm:$0xff]  }
 0x2e8   : > { %5487 = vmatprep.subr.bf16.mxu0 %v10874_v4  ;;  %5528 = vmatprep.subr.bf16.mxu1 %v10877_v59  ;;  %v10886_v59 = vld [vmem:[%s11582_s25 + $0xa84] ss:$112 sps:$4 sm:$0xff]   ;;  %v10889_v4 = vld [vmem:[%s11582_s25 + $0xa8c] ss:$112 sps:$4 sm:$0xff]   ;;  %v10893_v63 = vld [vmem:[%s11582_s25 + $0xb68] ss:$112 sps:$4 sm:$0xff]  }
 0x2ea   : > { %9763 = vmatmul.mubr.msk.bf16.vlgmr.msra.gmra.mrb[108].mxu0 %vm1714_vm2, %v12262_v24  ;;  %9765 = vmatmul.mubr.msk.bf16.vlgmr.msra.gmra.mrb[108].mxu1 %vm1714_vm2, %v12262_v24  ;;  %v10884_v24 = vld [vmem:[%s11582_s25 + $0xa80] ss:$112 sps:$4 sm:$0xff]  }
 0x2eb   : > { %5488 = vmatpush1.bf16.msra.mxu0 %v10872_v37  ;;  %5529 = vmatpush1.bf16.msra.mxu1 %v10875_v61  ;;  %v10898_v37 = vld [vmem:[%s11582_s25 + $0xc44] ss:$112 sps:$4 sm:$0xff]   ;;  %v10901_v61 = vld [vmem:[%s11582_s25 + $0xc4c] ss:$112 sps:$4 sm:$0xff]  }
 0x2ec   : > { %5489 = vmatprep.subr.bf16.mxu0 %v10880_v8  ;;  %5530 = vmatprep.subr.bf16.mxu1 %v10883_v42  ;;  %v10896_v8 = vld [vmem:[%s11582_s25 + $0xc40] ss:$112 sps:$4 sm:$0xff]   ;;  %v10899_v42 = vld [vmem:[%s11582_s25 + $0xc48] ss:$112 sps:$4 sm:$0xff]  }
 0x2ed   : > { %5519 = vmatprep.mubr.bf16.mxu0 %v13973_v34  ;;  %5560 = vmatprep.mubr.bf16.mxu1 %v13973_v34 }
 0x2ef   : > { %5490 = vmatpush1.bf16.msra.mxu0 %v10878_v19  ;;  %5531 = vmatpush1.bf16.msra.mxu1 %v10881_v60  ;;  %v10904_v19 = vld [vmem:[%s11582_s25 + $0x8d4] ss:$112 sps:$4 sm:$0xff]   ;;  %v10907_v60 = vld [vmem:[%s11582_s25 + $0x8dc] ss:$112 sps:$4 sm:$0xff]  }
 0x2f0   : > { %5491 = vmatprep.subr.bf16.mxu0 %v10886_v59  ;;  %5532 = vmatprep.subr.bf16.mxu1 %v10889_v4  ;;  %v10902_v59 = vld [vmem:[%s11582_s25 + $0x8d0] ss:$112 sps:$4 sm:$0xff]   ;;  %v10905_v4 = vld [vmem:[%s11582_s25 + $0x8d8] ss:$112 sps:$4 sm:$0xff]  }
 0x2f3   : > { %5492 = vmatpush1.bf16.msra.mxu0 %v10884_v24  ;;  %5533 = vmatpush1.bf16.msra.mxu1 %v10887_v14  ;;  %v10910_v24 = vld [vmem:[%s11582_s25 + $0x9b4] ss:$112 sps:$4 sm:$0xff]   ;;  %v10913_v14 = vld [vmem:[%s11582_s25 + $0x9bc] ss:$112 sps:$4 sm:$0xff]  }
 0x2f4   : > { %5493 = vmatprep.subr.bf16.mxu0 %v10892_v13  ;;  %5534 = vmatprep.subr.bf16.mxu1 %v10895_v36  ;;  %v12479_v13 = vld [vmem:[%s13867_s1] sm:$0xf] }
 0x2f5   : > { %v10908_v36 = vld [vmem:[%s11582_s25 + $0x9b0] ss:$112 sps:$4 sm:$0xff]  }
 0x2f7   : > { %5494 = vmatpush1.bf16.msra.mxu0 %v10890_v57  ;;  %5535 = vmatpush1.bf16.msra.mxu1 %v10893_v63  ;;  %v10911_v57 = vld [vmem:[%s11582_s25 + $0x9b8] ss:$112 sps:$4 sm:$0xff]   ;;  %v10916_v63 = vld [vmem:[%s11582_s25 + $0xa94] ss:$112 sps:$4 sm:$0xff]  }
 0x2f8   : > { %5495 = vmatprep.subr.bf16.mxu0 %v10898_v37  ;;  %5536 = vmatprep.subr.bf16.mxu1 %v10901_v61  ;;  %v10919_v37 = vld [vmem:[%s11582_s25 + $0xa9c] ss:$112 sps:$4 sm:$0xff]   ;;  %v10914_v61 = vld [vmem:[%s11582_s25 + $0xa90] ss:$112 sps:$4 sm:$0xff]  }
 0x2fb   : > { %5496 = vmatpush1.bf16.msra.mxu0 %v10896_v8  ;;  %5537 = vmatpush1.bf16.msra.mxu1 %v10899_v42  ;;  %v10917_v8 = vld [vmem:[%s11582_s25 + $0xa98] ss:$112 sps:$4 sm:$0xff]   ;;  %v10922_v42 = vld [vmem:[%s11582_s25 + $0xb74] ss:$112 sps:$4 sm:$0xff]  }
 0x2fc   : > { %5569 = vmatprep.subr.bf16.mxu0 %v10904_v19  ;;  %5610 = vmatprep.subr.bf16.mxu1 %v10907_v60  ;;  %v10925_v19 = vld [vmem:[%s11582_s25 + $0xb7c] ss:$112 sps:$4 sm:$0xff]   ;;  %v10920_v60 = vld [vmem:[%s11582_s25 + $0xb70] ss:$112 sps:$4 sm:$0xff]  }
 0x2fe   : > { %10046 = vmatmul.mubr.msk.bf16.vlgmr.msra.gmra.mrb[112].mxu0 %vm1073_vm0, %v12479_v13  ;;  %10047 = vmatmul.mubr.msk.bf16.vlgmr.msra.gmra.mrb[112].mxu1 %vm1073_vm0, %v12479_v13 }
 0x2ff   : > { %5570 = vmatpush1.bf16.msra.mxu0 %v10902_v59  ;;  %5611 = vmatpush1.bf16.msra.mxu1 %v10905_v4  ;;  %v10923_v59 = vld [vmem:[%s11582_s25 + $0xb78] ss:$112 sps:$4 sm:$0xff]   ;;  %v10928_v4 = vld [vmem:[%s11582_s25 + $0xc54] ss:$112 sps:$4 sm:$0xff]  }
 0x300   : > { %5571 = vmatprep.subr.bf16.mxu0 %v10910_v24  ;;  %5612 = vmatprep.subr.bf16.mxu1 %v10913_v14  ;;  %v10931_v24 = vld [vmem:[%s11582_s25 + $0xc5c] ss:$112 sps:$4 sm:$0xff]   ;;  %v10926_v14 = vld [vmem:[%s11582_s25 + $0xc50] ss:$112 sps:$4 sm:$0xff]  }
 0x301   : > { %5601 = vmatprep.mubr.bf16.mxu0 %v13973_v34  ;;  %5642 = vmatprep.mubr.bf16.mxu1 %v13973_v34 }
 0x303   : > { %5572 = vmatpush1.bf16.msra.mxu0 %v10908_v36  ;;  %5613 = vmatpush1.bf16.msra.mxu1 %v10911_v57  ;;  %v10929_v36 = vld [vmem:[%s11582_s25 + $0xc58] ss:$112 sps:$4 sm:$0xff]   ;;  %v10934_v57 = vld [vmem:[%s11582_s25 + $0x8e4] ss:$112 sps:$4 sm:$0xff]  }
 0x304   : > { %5573 = vmatprep.subr.bf16.mxu0 %v10916_v63  ;;  %5614 = vmatprep.subr.bf16.mxu1 %v10919_v37  ;;  %v10937_v63 = vld [vmem:[%s11582_s25 + $0x8ec] ss:$112 sps:$4 sm:$0xff]   ;;  %v10932_v37 = vld [vmem:[%s11582_s25 + $0x8e0] ss:$112 sps:$4 sm:$0xff]  }
 0x307   : > { %5574 = vmatpush1.bf16.msra.mxu0 %v10914_v61  ;;  %5615 = vmatpush1.bf16.msra.mxu1 %v10917_v8  ;;  %v10935_v61 = vld [vmem:[%s11582_s25 + $0x8e8] ss:$112 sps:$4 sm:$0xff]   ;;  %v10940_v8 = vld [vmem:[%s11582_s25 + $0x9c4] ss:$112 sps:$4 sm:$0xff]  }
 0x308   : > { %5575 = vmatprep.subr.bf16.mxu0 %v10922_v42  ;;  %5616 = vmatprep.subr.bf16.mxu1 %v10925_v19  ;;  %v10943_v42 = vld [vmem:[%s11582_s25 + $0x9cc] ss:$112 sps:$4 sm:$0xff]   ;;  %v10938_v19 = vld [vmem:[%s11582_s25 + $0x9c0] ss:$112 sps:$4 sm:$0xff]  }
 0x30b   : > { %5576 = vmatpush1.bf16.msra.mxu0 %v10920_v60  ;;  %5617 = vmatpush1.bf16.msra.mxu1 %v10923_v59  ;;  %v10941_v60 = vld [vmem:[%s11582_s25 + $0x9c8] ss:$112 sps:$4 sm:$0xff]   ;;  %v10946_v59 = vld [vmem:[%s11582_s25 + $0xaa4] ss:$112 sps:$4 sm:$0xff]  }
 0x30c   : > { %5577 = vmatprep.subr.bf16.mxu0 %v10928_v4  ;;  %5618 = vmatprep.subr.bf16.mxu1 %v10931_v24  ;;  %v10949_v4 = vld [vmem:[%s11582_s25 + $0xaac] ss:$112 sps:$4 sm:$0xff]   ;;  %v10944_v24 = vld [vmem:[%s11582_s25 + $0xaa0] ss:$112 sps:$4 sm:$0xff]  }
 0x30f   : > { %5578 = vmatpush1.bf16.msra.mxu0 %v10926_v14  ;;  %5619 = vmatpush1.bf16.msra.mxu1 %v10929_v36  ;;  %v10947_v14 = vld [vmem:[%s11582_s25 + $0xaa8] ss:$112 sps:$4 sm:$0xff]   ;;  %v10952_v36 = vld [vmem:[%s11582_s25 + $0xb84] ss:$112 sps:$4 sm:$0xff]  }
 0x310   : > { %5651 = vmatprep.subr.bf16.mxu0 %v10934_v57  ;;  %5692 = vmatprep.subr.bf16.mxu1 %v10937_v63  ;;  %v10955_v57 = vld [vmem:[%s11582_s25 + $0xb8c] ss:$112 sps:$4 sm:$0xff]   ;;  %v10950_v63 = vld [vmem:[%s11582_s25 + $0xb80] ss:$112 sps:$4 sm:$0xff]  }
 0x312   : > { %10048 = vmatmul.mubr.msk.bf16.vlgmr.msra.gmra.mrb[116].mxu0 %vm1073_vm0, %v12479_v13  ;;  %10049 = vmatmul.mubr.msk.bf16.vlgmr.msra.gmra.mrb[116].mxu1 %vm1073_vm0, %v12479_v13 }
 0x313   : > { %5652 = vmatpush1.bf16.msra.mxu0 %v10932_v37  ;;  %5693 = vmatpush1.bf16.msra.mxu1 %v10935_v61  ;;  %v10953_v37 = vld [vmem:[%s11582_s25 + $0xb88] ss:$112 sps:$4 sm:$0xff]   ;;  %v10958_v61 = vld [vmem:[%s11582_s25 + $0xc64] ss:$112 sps:$4 sm:$0xff]  }
 0x314   : > { %5653 = vmatprep.subr.bf16.mxu0 %v10940_v8  ;;  %5694 = vmatprep.subr.bf16.mxu1 %v10943_v42  ;;  %v10961_v8 = vld [vmem:[%s11582_s25 + $0xc6c] ss:$112 sps:$4 sm:$0xff]   ;;  %v10956_v42 = vld [vmem:[%s11582_s25 + $0xc60] ss:$112 sps:$4 sm:$0xff]  }
 0x315   : > { %5683 = vmatprep.mubr.bf16.mxu0 %v13973_v34  ;;  %5724 = vmatprep.mubr.bf16.mxu1 %v13973_v34 }
 0x317   : > { %5654 = vmatpush1.bf16.msra.mxu0 %v10938_v19  ;;  %5695 = vmatpush1.bf16.msra.mxu1 %v10941_v60  ;;  %v10959_v19 = vld [vmem:[%s11582_s25 + $0xc68] ss:$112 sps:$4 sm:$0xff]   ;;  %v10964_v60 = vld [vmem:[%s11582_s25 + $0x8f4] ss:$112 sps:$4 sm:$0xff]  }
 0x318   : > { %5655 = vmatprep.subr.bf16.mxu0 %v10946_v59  ;;  %5696 = vmatprep.subr.bf16.mxu1 %v10949_v4  ;;  %v10967_v59 = vld [vmem:[%s11582_s25 + $0x8fc] ss:$112 sps:$4 sm:$0xff]   ;;  %v10962_v4 = vld [vmem:[%s11582_s25 + $0x8f0] ss:$112 sps:$4 sm:$0xff]  }
 0x31b   : > { %5656 = vmatpush1.bf16.msra.mxu0 %v10944_v24  ;;  %5697 = vmatpush1.bf16.msra.mxu1 %v10947_v14  ;;  %v10965_v24 = vld [vmem:[%s11582_s25 + $0x8f8] ss:$112 sps:$4 sm:$0xff]   ;;  %v10970_v14 = vld [vmem:[%s11582_s25 + $0x9d4] ss:$112 sps:$4 sm:$0xff]  }
 0x31c   : > { %5657 = vmatprep.subr.bf16.mxu0 %v10952_v36  ;;  %5698 = vmatprep.subr.bf16.mxu1 %v10955_v57  ;;  %v10973_v36 = vld [vmem:[%s11582_s25 + $0x9dc] ss:$112 sps:$4 sm:$0xff]   ;;  %v10968_v57 = vld [vmem:[%s11582_s25 + $0x9d0] ss:$112 sps:$4 sm:$0xff]  }
 0x31f   : > { %5658 = vmatpush1.bf16.msra.mxu0 %v10950_v63  ;;  %5699 = vmatpush1.bf16.msra.mxu1 %v10953_v37  ;;  %v10971_v63 = vld [vmem:[%s11582_s25 + $0x9d8] ss:$112 sps:$4 sm:$0xff]   ;;  %v10976_v37 = vld [vmem:[%s11582_s25 + $0xab4] ss:$112 sps:$4 sm:$0xff]  }
 0x320   : > { %5659 = vmatprep.subr.bf16.mxu0 %v10958_v61  ;;  %5700 = vmatprep.subr.bf16.mxu1 %v10961_v8  ;;  %v10979_v61 = vld [vmem:[%s11582_s25 + $0xabc] ss:$112 sps:$4 sm:$0xff]   ;;  %v10974_v8 = vld [vmem:[%s11582_s25 + $0xab0] ss:$112 sps:$4 sm:$0xff]  }
 0x323   : > { %5660 = vmatpush1.bf16.msra.mxu0 %v10956_v42  ;;  %5701 = vmatpush1.bf16.msra.mxu1 %v10959_v19  ;;  %v10977_v42 = vld [vmem:[%s11582_s25 + $0xab8] ss:$112 sps:$4 sm:$0xff]   ;;  %v10982_v19 = vld [vmem:[%s11582_s25 + $0xb94] ss:$112 sps:$4 sm:$0xff]  }
 0x324   : > { %5733 = vmatprep.subr.bf16.mxu0 %v10964_v60  ;;  %5774 = vmatprep.subr.bf16.mxu1 %v10967_v59  ;;  %v10985_v60 = vld [vmem:[%s11582_s25 + $0xb9c] ss:$112 sps:$4 sm:$0xff]   ;;  %v10980_v59 = vld [vmem:[%s11582_s25 + $0xb90] ss:$112 sps:$4 sm:$0xff]  }
 0x326   : > { %10050 = vmatmul.mubr.msk.bf16.vlgmr.msra.gmra.mrb[120].mxu0 %vm1073_vm0, %v12479_v13  ;;  %10051 = vmatmul.mubr.msk.bf16.vlgmr.msra.gmra.mrb[120].mxu1 %vm1073_vm0, %v12479_v13 }
 0x327   : > { %5734 = vmatpush1.bf16.msra.mxu0 %v10962_v4  ;;  %5775 = vmatpush1.bf16.msra.mxu1 %v10965_v24  ;;  %v10983_v4 = vld [vmem:[%s11582_s25 + $0xb98] ss:$112 sps:$4 sm:$0xff]   ;;  %v10988_v24 = vld [vmem:[%s11582_s25 + $0xc74] ss:$112 sps:$4 sm:$0xff]  }
 0x328   : > { %5735 = vmatprep.subr.bf16.mxu0 %v10970_v14  ;;  %5776 = vmatprep.subr.bf16.mxu1 %v10973_v36  ;;  %v10991_v14 = vld [vmem:[%s11582_s25 + $0xc7c] ss:$112 sps:$4 sm:$0xff]   ;;  %v10986_v36 = vld [vmem:[%s11582_s25 + $0xc70] ss:$112 sps:$4 sm:$0xff]  }
 0x329   : > { %5765 = vmatprep.mubr.bf16.mxu0 %v13973_v34  ;;  %5806 = vmatprep.mubr.bf16.mxu1 %v13973_v34 }
 0x32b   : > { %5736 = vmatpush1.bf16.msra.mxu0 %v10968_v57  ;;  %5777 = vmatpush1.bf16.msra.mxu1 %v10971_v63  ;;  %v10989_v57 = vld [vmem:[%s11582_s25 + $0xc78] ss:$112 sps:$4 sm:$0xff]   ;;  %v10994_v63 = vld [vmem:[%s11582_s25 + $0x904] ss:$112 sps:$4 sm:$0xff]  }
 0x32c   : > { %5737 = vmatprep.subr.bf16.mxu0 %v10976_v37  ;;  %5778 = vmatprep.subr.bf16.mxu1 %v10979_v61  ;;  %v10997_v37 = vld [vmem:[%s11582_s25 + $0x90c] ss:$112 sps:$4 sm:$0xff]   ;;  %v10992_v61 = vld [vmem:[%s11582_s25 + $0x900] ss:$112 sps:$4 sm:$0xff]  }
 0x32f   : > { %5738 = vmatpush1.bf16.msra.mxu0 %v10974_v8  ;;  %5779 = vmatpush1.bf16.msra.mxu1 %v10977_v42  ;;  %v10995_v8 = vld [vmem:[%s11582_s25 + $0x908] ss:$112 sps:$4 sm:$0xff]   ;;  %v11000_v42 = vld [vmem:[%s11582_s25 + $0x9e4] ss:$112 sps:$4 sm:$0xff]  }
 0x330   : > { %5739 = vmatprep.subr.bf16.mxu0 %v10982_v19  ;;  %5780 = vmatprep.subr.bf16.mxu1 %v10985_v60  ;;  %v11003_v19 = vld [vmem:[%s11582_s25 + $0x9ec] ss:$112 sps:$4 sm:$0xff]   ;;  %v10998_v60 = vld [vmem:[%s11582_s25 + $0x9e0] ss:$112 sps:$4 sm:$0xff]  }
 0x333   : > { %5740 = vmatpush1.bf16.msra.mxu0 %v10980_v59  ;;  %5781 = vmatpush1.bf16.msra.mxu1 %v10983_v4  ;;  %v11001_v59 = vld [vmem:[%s11582_s25 + $0x9e8] ss:$112 sps:$4 sm:$0xff]   ;;  %v11006_v4 = vld [vmem:[%s11582_s25 + $0xac4] ss:$112 sps:$4 sm:$0xff]  }
 0x334   : > { %5741 = vmatprep.subr.bf16.mxu0 %v10988_v24  ;;  %5782 = vmatprep.subr.bf16.mxu1 %v10991_v14  ;;  %v11009_v24 = vld [vmem:[%s11582_s25 + $0xacc] ss:$112 sps:$4 sm:$0xff]   ;;  %v12569_v14 = vpop.permute.xlu0 %1711 }
 0x337   : > { %5742 = vmatpush1.bf16.msra.mxu0 %v10986_v36  ;;  %5783 = vmatpush1.bf16.msra.mxu1 %v10989_v57  ;;  %v11004_v36 = vld [vmem:[%s11582_s25 + $0xac0] ss:$112 sps:$4 sm:$0xff]   ;;  %v11007_v57 = vld [vmem:[%s11582_s25 + $0xac8] ss:$112 sps:$4 sm:$0xff]  }
 0x338   : > { %5815 = vmatprep.subr.bf16.mxu0 %v10994_v63  ;;  %5856 = vmatprep.subr.bf16.mxu1 %v10997_v37  ;;  %v1838_v63 = vadd.f32 %v12119_v29, %v12569_v14  ;;  %v11012_v37 = vld [vmem:[%s11582_s25 + $0xba4] ss:$112 sps:$4 sm:$0xff]  }
 0x339   : > { %v11018_v29 = vld [vmem:[%s11582_s25 + $0xc84] ss:$112 sps:$4 sm:$0xff]  }
 0x33a   : > { %10052 = vmatmul.mubr.msk.bf16.vlgmr.msra.gmra.mrb[124].mxu0 %vm1073_vm0, %v12479_v13  ;;  %10053 = vmatmul.mubr.msk.bf16.vlgmr.msra.gmra.mrb[124].mxu1 %vm1073_vm0, %v12479_v13  ;;  %11292 = vrsqrt.f32 %v1838_v63 }
 0x33b   : > { %5816 = vmatpush1.bf16.msra.mxu0 %v10992_v61  ;;  %5857 = vmatpush1.bf16.msra.mxu1 %v10995_v8  ;;  %v11015_v61 = vld [vmem:[%s11582_s25 + $0xbac] ss:$112 sps:$4 sm:$0xff]   ;;  %v1879_v8 = vadd.f32 %v12121_v30, %v12569_v14 }
 0x33c   : > { %5817 = vmatprep.subr.bf16.mxu0 %v11000_v42  ;;  %5858 = vmatprep.subr.bf16.mxu1 %v11003_v19  ;;  %v1840_v42 = vadd.f32 %v12123_v35, %v12569_v14  ;;  %v1881_v19 = vadd.f32 %v12125_v38, %v12569_v14 }
 0x33d   : > { %5847 = vmatprep.mubr.bf16.mxu0 %v13973_v34  ;;  %5888 = vmatprep.mubr.bf16.mxu1 %v13973_v34  ;;  %11294 = vrsqrt.f32 %v1879_v8  ;;  %v11019_v8 = vld [vmem:[%s11582_s25 + $0xc88] ss:$112 sps:$4 sm:$0xff]  }
 0x33e   : > { %11296 = vrsqrt.f32 %v1840_v42 }
 0x33f   : > { %5818 = vmatpush1.bf16.msra.mxu0 %v10998_v60  ;;  %5859 = vmatpush1.bf16.msra.mxu1 %v11001_v59  ;;  %v11010_v60 = vld [vmem:[%s11582_s25 + $0xba0] ss:$112 sps:$4 sm:$0xff]   ;;  %v11013_v59 = vld [vmem:[%s11582_s25 + $0xba8] ss:$112 sps:$4 sm:$0xff]   ;;  %11298 = vrsqrt.f32 %v1881_v19 }
 0x340   : > { %5819 = vmatprep.subr.bf16.mxu0 %v11006_v4  ;;  %5860 = vmatprep.subr.bf16.mxu1 %v11009_v24  ;;  %v11021_v4 = vld [vmem:[%s11582_s25 + $0xc8c] ss:$112 sps:$4 sm:$0xff]  }
 0x343   : > { %5820 = vmatpush1.bf16.msra.mxu0 %v11004_v36  ;;  %5861 = vmatpush1.bf16.msra.mxu1 %v11007_v57 }
 0x344   : > { %5821 = vmatprep.subr.bf16.mxu0 %v11012_v37  ;;  %5862 = vmatprep.subr.bf16.mxu1 %v11015_v61  ;;  %v11016_v61 = vld [vmem:[%s11582_s25 + $0xc80] ss:$112 sps:$4 sm:$0xff]  }
 0x345   : > { %v4022_v24 = vpop.f32.mrb[84].mxu0  ;;  %v4063_v30 = vpop.f32.mrb[84].mxu1 }
 0x346   : > { %v4023_v35 = vadd.f32 %v4022_v24, %v12569_v14  ;;  %v4064_v38 = vadd.f32 %v4063_v30, %v12569_v14  ;;  %v4024_v36 = vpop.f32.mrb[85].mxu0  ;;  %v4065_v57 = vpop.f32.mrb[85].mxu1  ;;  %v11024_v24 = vld [vmem:[%s11582_s25 + $0x914] ss:$112 sps:$4 sm:$0xff]   ;;  %v11027_v30 = vld [vmem:[%s11582_s25 + $0x91c] ss:$112 sps:$4 sm:$0xff]  }
 0x347   : > { %v4025_v63 = vadd.f32 %v4024_v36, %v12569_v14  ;;  %v4066_v37 = vadd.f32 %v4065_v57, %v12569_v14  ;;  %5822 = vmatpush1.bf16.msra.mxu0 %v11010_v60  ;;  %5863 = vmatpush1.bf16.msra.mxu1 %v11013_v59  ;;  %v4026_v42 = vpop.f32.mrb[86].mxu0  ;;  %v4067_v22 = vpop.f32.mrb[86].mxu1  ;;  %v11022_v60 = vld [vmem:[%s11582_s25 + $0x910] ss:$112 sps:$4 sm:$0xff]   ;;  %v11025_v59 = vld [vmem:[%s11582_s25 + $0x918] ss:$112 sps:$4 sm:$0xff]  }
 0x348   : > { %11300 = vrsqrt.f32 %v4023_v35  ;;  %5823 = vmatprep.subr.bf16.mxu0 %v11018_v29  ;;  %5864 = vmatprep.subr.bf16.mxu1 %v11021_v4  ;;  %v4027_v19 = vpop.f32.mrb[87].mxu0  ;;  %v4068_v23 = vpop.f32.mrb[87].mxu1  ;;  %v11030_v22 = vld [vmem:[%s11582_s25 + $0x9f4] ss:$112 sps:$4 sm:$0xff]   ;;  %v11033_v29 = vld [vmem:[%s11582_s25 + $0x9fc] ss:$112 sps:$4 sm:$0xff]  }
 0x349   : > { %11302 = vrsqrt.f32 %v4064_v38  ;;  %v11293_v4 = vpop.eup %11292  ;;  %v11028_v35 = vld [vmem:[%s11582_s25 + $0x9f0] ss:$112 sps:$4 sm:$0xff]   ;;  %v11031_v38 = vld [vmem:[%s11582_s25 + $0x9f8] ss:$112 sps:$4 sm:$0xff]   ;;  %v11036_v57 = vld [vmem:[%s11582_s25 + $0xad4] ss:$112 sps:$4 sm:$0xff]  }
 0x34a   : > { %11304 = vrsqrt.f32 %v4025_v63  ;;  %v11295_v23 = vpop.eup %11294  ;;  %v11039_v63 = vld [vmem:[%s11582_s25 + $0xadc] ss:$112 sps:$4 sm:$0xff]   ;;  %v12610_v42 = vmul.f32 %v11293_v4, %v11778_v25  ;;  %v11037_v19 = vld [vmem:[%s11582_s25 + $0xad8] ss:$112 sps:$4 sm:$0xff]   ;;  %v11042_v25 = vld [vmem:[%s11582_s25 + $0xbb4] ss:$112 sps:$4 sm:$0xff]  }
 0x34b   : > { %11306 = vrsqrt.f32 %v4066_v37  ;;  %5824 = vmatpush1.bf16.msra.mxu0 %v11016_v61  ;;  %5865 = vmatpush1.bf16.msra.mxu1 %v11019_v8  ;;  %v11297_v36 = vpop.eup %11296 }
 0x34c   : > { %5897 = vmatprep.subr.bf16.mxu0 %v11024_v24  ;;  %5938 = vmatprep.subr.bf16.mxu1 %v11027_v30  ;;  %v11299_v37 = vpop.eup %11298  ;;  %v11034_v30 = vld [vmem:[%s11582_s25 + $0xad0] ss:$112 sps:$4 sm:$0xff]  }
 0x34e   : > { %10054 = vmatmul.mubr.msk.bf16.vlgmr.msra.gmra.mrb[128].mxu0 %vm1073_vm0, %v12479_v13  ;;  %10055 = vmatmul.mubr.msk.bf16.vlgmr.msra.gmra.mrb[128].mxu1 %vm1073_vm0, %v12479_v13 }
 0x34f   : > { %5898 = vmatpush1.bf16.msra.mxu0 %v11022_v60  ;;  %5939 = vmatpush1.bf16.msra.mxu1 %v11025_v59  ;;  %v12618_v59 = vmul.f32 %v11295_v23, %v11781_v26  ;;  %v1961_v26 = vadd.f32 %v12155_v17, %v12569_v14  ;;  %v1963_v17 = vadd.f32 %v12159_v20, %v12569_v14 }
 0x350   : > { %5899 = vmatprep.subr.bf16.mxu0 %v11030_v22  ;;  %5940 = vmatprep.subr.bf16.mxu1 %v11033_v29  ;;  %v1920_v22 = vadd.f32 %v12153_v16, %v12569_v14 }
 0x351   : > { %5929 = vmatprep.mubr.bf16.mxu0 %v13973_v34  ;;  %5970 = vmatprep.mubr.bf16.mxu1 %v13973_v34 }
 0x352   : > { %v11301_v61 = vpop.eup %11300  ;;  %11308 = vrsqrt.f32 %v1920_v22 }
 0x353   : > { %v11303_v8 = vpop.eup %11302  ;;  %v12613_v24 = vmul.f32 %v11301_v61, %v12236_v58  ;;  %5900 = vmatpush1.bf16.msra.mxu0 %v11028_v35  ;;  %5941 = vmatpush1.bf16.msra.mxu1 %v11031_v38  ;;  %v11045_v58 = vld [vmem:[%s11582_s25 + $0xbbc] ss:$112 sps:$4 sm:$0xff]   ;;  %v12628_v35 = vmul.f32 %v11297_v36, %v11784_v27  ;;  %v1922_v38 = vadd.f32 %v12157_v18, %v12569_v14  ;;  %11310 = vrsqrt.f32 %v1961_v26 }
 0x354   : > { %v11305_v60 = vpop.eup %11304  ;;  %v12623_v29 = vmul.f32 %v11303_v8, %v12239_v48  ;;  %5901 = vmatprep.subr.bf16.mxu0 %v11036_v57  ;;  %5942 = vmatprep.subr.bf16.mxu1 %v11039_v63  ;;  %v12638_v48 = vmul.f32 %v11299_v37, %v11787_v28  ;;  %v11040_v57 = vld [vmem:[%s11582_s25 + $0xbb0] ss:$112 sps:$4 sm:$0xff]   ;;  %v11043_v28 = vld [vmem:[%s11582_s25 + $0xbb8] ss:$112 sps:$4 sm:$0xff]   ;;  %v11048_v63 = vld [vmem:[%s11582_s25 + $0xc94] ss:$112 sps:$4 sm:$0xff]  }
 0x355   : > { %v11307_v4 = vpop.eup %11306  ;;  %v12635_v16 = vmul.f32 %v11305_v60, %v12242_v56  ;;  %11312 = vrsqrt.f32 %v1922_v38  ;;  %v11054_v38 = vld [vmem:[%s11582_s25 + $0x924] ss:$112 sps:$4 sm:$0xff]   ;;  %v14017_v56 = vld [vmem:[#allocation9_spill] sm:$0xff] }
 0x356   : > { %v12645_v36 = vmul.f32 %v11307_v4, %v12245_v11  ;;  %v11051_v11 = vld [vmem:[%s11582_s25 + $0xc9c] ss:$112 sps:$4 sm:$0xff]   ;;  %11314 = vrsqrt.f32 %v1963_v17 }
 0x357   : > { %5902 = vmatpush1.bf16.msra.mxu0 %v11034_v30  ;;  %5943 = vmatpush1.bf16.msra.mxu1 %v11037_v19 }
 0x358   : > { %5903 = vmatprep.subr.bf16.mxu0 %v11042_v25  ;;  %5944 = vmatprep.subr.bf16.mxu1 %v11045_v58  ;;  %v11046_v25 = vld [vmem:[%s11582_s25 + $0xc90] ss:$112 sps:$4 sm:$0xff]   ;;  %v11049_v58 = vld [vmem:[%s11582_s25 + $0xc98] ss:$112 sps:$4 sm:$0xff]  }
 0x359   : > { %v4104_v37 = vpop.f32.mrb[88].mxu0  ;;  %v4145_v20 = vpop.f32.mrb[88].mxu1 }
 0x35a   : > { %v4105_v61 = vadd.f32 %v4104_v37, %v12569_v14  ;;  %v4146_v8 = vadd.f32 %v4145_v20, %v12569_v14  ;;  %v4106_v30 = vpop.f32.mrb[89].mxu0  ;;  %v4147_v19 = vpop.f32.mrb[89].mxu1  ;;  %v11057_v37 = vld [vmem:[%s11582_s25 + $0x92c] ss:$112 sps:$4 sm:$0xff]  }
 0x35b   : > { %v4107_v60 = vadd.f32 %v4106_v30, %v12569_v14  ;;  %v4148_v22 = vadd.f32 %v4147_v19, %v12569_v14  ;;  %5904 = vmatpush1.bf16.msra.mxu0 %v11040_v57  ;;  %5945 = vmatpush1.bf16.msra.mxu1 %v11043_v28  ;;  %v4108_v4 = vpop.f32.mrb[90].mxu0  ;;  %v4149_v26 = vpop.f32.mrb[90].mxu1  ;;  %v11052_v57 = vld [vmem:[%s11582_s25 + $0x920] ss:$112 sps:$4 sm:$0xff]   ;;  %v11055_v28 = vld [vmem:[%s11582_s25 + $0x928] ss:$112 sps:$4 sm:$0xff]  }
 0x35c   : > { %11316 = vrsqrt.f32 %v4105_v61  ;;  %5905 = vmatprep.subr.bf16.mxu0 %v11048_v63  ;;  %5946 = vmatprep.subr.bf16.mxu1 %v11051_v11  ;;  %v4109_v17 = vpop.f32.mrb[91].mxu0  ;;  %v4150_v20 = vpop.f32.mrb[91].mxu1  ;;  %v11060_v63 = vld [vmem:[%s11582_s25 + $0xa04] ss:$112 sps:$4 sm:$0xff]   ;;  %v11063_v61 = vld [vmem:[%s11582_s25 + $0xa0c] ss:$112 sps:$4 sm:$0xff]  }
 0x35d   : > { %11318 = vrsqrt.f32 %v4146_v8  ;;  %v11309_v11 = vpop.eup %11308  ;;  %v11058_v30 = vld [vmem:[%s11582_s25 + $0xa00] ss:$112 sps:$4 sm:$0xff]   ;;  %v11061_v19 = vld [vmem:[%s11582_s25 + $0xa08] ss:$112 sps:$4 sm:$0xff]  }
 0x35e   : > { %11320 = vrsqrt.f32 %v4107_v60  ;;  %v11311_v8 = vpop.eup %11310  ;;  %v11064_v17 = vld [vmem:[%s11582_s25 + $0xae0] ss:$112 sps:$4 sm:$0xff]   ;;  %v11067_v20 = vld [vmem:[%s11582_s25 + $0xae8] ss:$112 sps:$4 sm:$0xff]  }
 0x35f   : > { %11322 = vrsqrt.f32 %v4148_v22  ;;  %5906 = vmatpush1.bf16.msra.mxu0 %v11046_v25  ;;  %5947 = vmatpush1.bf16.msra.mxu1 %v11049_v58  ;;  %v11313_v60 = vpop.eup %11312  ;;  %v11066_v22 = vld [vmem:[%s11582_s25 + $0xae4] ss:$112 sps:$4 sm:$0xff]   ;;  %v11069_v25 = vld [vmem:[%s11582_s25 + $0xaec] ss:$112 sps:$4 sm:$0xff]  }
 0x360   : > { %5979 = vmatprep.subr.bf16.mxu0 %v11054_v38  ;;  %6020 = vmatprep.subr.bf16.mxu1 %v11057_v37  ;;  %v11315_v58 = vpop.eup %11314  ;;  %v12680_v38 = vmul.f32 %v11309_v11, %v11813_v46  ;;  %v11072_v46 = vld [vmem:[%s11582_s25 + $0xbc4] ss:$112 sps:$4 sm:$0xff]  }
 0x362   : > { %10056 = vmatmul.mubr.msk.bf16.vlgmr.msra.gmra.mrb[132].mxu0 %vm1073_vm0, %v12479_v13  ;;  %10057 = vmatmul.mubr.msk.bf16.vlgmr.msra.gmra.mrb[132].mxu1 %vm1073_vm0, %v12479_v13 }
 0x363   : > { %5980 = vmatpush1.bf16.msra.mxu0 %v11052_v57  ;;  %6021 = vmatpush1.bf16.msra.mxu1 %v11055_v28  ;;  %v12688_v28 = vmul.f32 %v11311_v8, %v11816_v47  ;;  %v2043_v47 = vadd.f32 %v12189_v21, %v12569_v14  ;;  %v2045_v21 = vadd.f32 %v12193_v40, %v12569_v14 }
 0x364   : > { %5981 = vmatprep.subr.bf16.mxu0 %v11060_v63  ;;  %6022 = vmatprep.subr.bf16.mxu1 %v11063_v61  ;;  %v2002_v63 = vadd.f32 %v12187_v15, %v12569_v14 }
 0x365   : > { %6011 = vmatprep.mubr.bf16.mxu0 %v13973_v34  ;;  %6052 = vmatprep.mubr.bf16.mxu1 %v13973_v34 }
 0x366   : > { %v11317_v4 = vpop.eup %11316  ;;  %11324 = vrsqrt.f32 %v2002_v63 }
 0x367   : > { %v11319_v26 = vpop.eup %11318  ;;  %v12683_v37 = vmul.f32 %v11317_v4, %v12271_v31  ;;  %5982 = vmatpush1.bf16.msra.mxu0 %v11058_v30  ;;  %6023 = vmatpush1.bf16.msra.mxu1 %v11061_v19  ;;  %v11075_v31 = vld [vmem:[%s11582_s25 + $0xbcc] ss:$112 sps:$4 sm:$0xff]   ;;  %v12698_v30 = vmul.f32 %v11313_v60, %v11819_v50  ;;  %v2004_v19 = vadd.f32 %v12191_v39, %v12569_v14  ;;  %11326 = vrsqrt.f32 %v2043_v47 }
 0x368   : > { %v11321_v57 = vpop.eup %11320  ;;  %v12693_v61 = vmul.f32 %v11319_v26, %v12274_v3  ;;  %5983 = vmatprep.subr.bf16.mxu0 %v11066_v22  ;;  %6024 = vmatprep.subr.bf16.mxu1 %v11069_v25  ;;  %v12708_v3 = vmul.f32 %v11315_v58, %v11822_v51  ;;  %v11070_v22 = vld [vmem:[%s11582_s25 + $0xbc0] ss:$112 sps:$4 sm:$0xff]   ;;  %v11073_v51 = vld [vmem:[%s11582_s25 + $0xbc8] ss:$112 sps:$4 sm:$0xff]   ;;  %v11078_v25 = vld [vmem:[%s11582_s25 + $0xca4] ss:$112 sps:$4 sm:$0xff]  }
 0x369   : > { %v11323_v11 = vpop.eup %11322  ;;  %v12705_v15 = vmul.f32 %v11321_v57, %v12277_v43  ;;  %11328 = vrsqrt.f32 %v2004_v19 }
 0x36a   : > { %v12715_v60 = vmul.f32 %v11323_v11, %v12280_v55  ;;  %v11081_v55 = vld [vmem:[%s11582_s25 + $0xcac] ss:$112 sps:$4 sm:$0xff]   ;;  %11330 = vrsqrt.f32 %v2045_v21 }
 0x36b   : > { %5984 = vmatpush1.bf16.msra.mxu0 %v11064_v17  ;;  %6025 = vmatpush1.bf16.msra.mxu1 %v11067_v20 }
 0x36c   : > { %5985 = vmatprep.subr.bf16.mxu0 %v11072_v46  ;;  %6026 = vmatprep.subr.bf16.mxu1 %v11075_v31  ;;  %v11076_v46 = vld [vmem:[%s11582_s25 + $0xca0] ss:$112 sps:$4 sm:$0xff]   ;;  %v11079_v31 = vld [vmem:[%s11582_s25 + $0xca8] ss:$112 sps:$4 sm:$0xff]  }
 0x36d   : > { %v4186_v58 = vpop.f32.mrb[92].mxu0  ;;  %v4227_v40 = vpop.f32.mrb[92].mxu1 }
 0x36e   : > { %v4187_v4 = vadd.f32 %v4186_v58, %v12569_v14  ;;  %v4228_v26 = vadd.f32 %v4227_v40, %v12569_v14  ;;  %v4188_v17 = vpop.f32.mrb[93].mxu0  ;;  %v4229_v20 = vpop.f32.mrb[93].mxu1 }
 0x36f   : > { %v4189_v57 = vadd.f32 %v4188_v17, %v12569_v14  ;;  %v4230_v63 = vadd.f32 %v4229_v20, %v12569_v14  ;;  %5986 = vmatpush1.bf16.msra.mxu0 %v11070_v22  ;;  %6027 = vmatpush1.bf16.msra.mxu1 %v11073_v51  ;;  %v4190_v11 = vpop.f32.mrb[94].mxu0  ;;  %v4231_v47 = vpop.f32.mrb[94].mxu1 }
 0x370   : > { %11332 = vrsqrt.f32 %v4187_v4  ;;  %5987 = vmatprep.subr.bf16.mxu0 %v11078_v25  ;;  %6028 = vmatprep.subr.bf16.mxu1 %v11081_v55  ;;  %v4191_v19 = vpop.f32.mrb[95].mxu0  ;;  %v4232_v58 = vpop.f32.mrb[95].mxu1  ;;  %v13997_v11 = vld [vmem:[#allocation5_spill] sm:$0xff] }
 0x371   : > { %11334 = vrsqrt.f32 %v4228_v26  ;;  %v11325_v21 = vpop.eup %11324 }
 0x372   : > { %11336 = vrsqrt.f32 %v4189_v57  ;;  %v11327_v22 = vpop.eup %11326  ;;  %v12740_v4 = vmul.f32 %v11325_v21, %v11843_v5  ;;  %v2125_v5 = vadd.f32 %v12205_v52, %v12569_v14  ;;  %v2127_v52 = vadd.f32 %v12209_v54, %v12569_v14 }
 0x373   : > { %11338 = vrsqrt.f32 %v4230_v63  ;;  %5988 = vmatpush1.bf16.msra.mxu0 %v11076_v46  ;;  %6029 = vmatpush1.bf16.msra.mxu1 %v11079_v31  ;;  %v11329_v51 = vpop.eup %11328  ;;  %v12746_v20 = vmul.f32 %v11327_v22, %v11846_v6 }
 0x374   : > { %v11331_v25 = vpop.eup %11330  ;;  %v12754_v46 = vmul.f32 %v11329_v51, %v11849_v9 }
 0x375   : > { %v12764_v6 = vmul.f32 %v11331_v25, %v11852_v10 }
 0x376   : > { %10058 = vmatmul.mubr.msk.bf16.vlgmr.msra.gmra.mrb[136].mxu0 %vm1073_vm0, %v12479_v13  ;;  %10059 = vmatmul.mubr.msk.bf16.vlgmr.msra.gmra.mrb[136].mxu1 %vm1073_vm0, %v12479_v13  ;;  %v2084_v13 = vadd.f32 %v12203_v49, %v12569_v14  ;;  %v2086_v49 = vadd.f32 %v12207_v53, %v12569_v14 }
 0x377   : > { %6233 = vmatprep.mubr.bf16.mxu0 %v13973_v34  ;;  %6274 = vmatprep.mubr.bf16.mxu1 %v13973_v34 }
 0x378   : > { %11340 = vrsqrt.f32 %v2084_v13 }
 0x379   : > { %11342 = vrsqrt.f32 %v2125_v5 }
 0x37a   : > { %v11333_v55 = vpop.eup %11332  ;;  %11344 = vrsqrt.f32 %v2086_v49 }
 0x37b   : > { %v11335_v40 = vpop.eup %11334  ;;  %v12743_v26 = vmul.f32 %v11333_v55, %v12301_v44  ;;  %11346 = vrsqrt.f32 %v2127_v52 }
 0x37c   : > { %v11337_v17 = vpop.eup %11336  ;;  %v12751_v57 = vmul.f32 %v11335_v40, %v12304_v45 }
 0x37d   : > { %v11339_v63 = vpop.eup %11338  ;;  %v12761_v31 = vmul.f32 %v11337_v17, %v12307_v62 }
 0x37e   : > { %v12771_v9 = vmul.f32 %v11339_v63, %v12310_v1 }
 0x381   : > { %v4268_v62 = vpop.f32.mrb[96].mxu0  ;;  %v4309_v47 = vpop.f32.mrb[96].mxu1 }
 0x382   : > { %v4269_v53 = vadd.f32 %v4268_v62, %v12569_v14  ;;  %v4310_v19 = vadd.f32 %v4309_v47, %v12569_v14  ;;  %v4270_v1 = vpop.f32.mrb[97].mxu0  ;;  %v4311_v58 = vpop.f32.mrb[97].mxu1 }
 0x383   : > { %v4271_v54 = vadd.f32 %v4270_v1, %v12569_v14  ;;  %v4312_v21 = vadd.f32 %v4311_v58, %v12569_v14  ;;  %v4272_v22 = vpop.f32.mrb[98].mxu0  ;;  %v4313_v51 = vpop.f32.mrb[98].mxu1 }
 0x384   : > { %11348 = vrsqrt.f32 %v4269_v53  ;;  %v4273_v25 = vpop.f32.mrb[99].mxu0  ;;  %v4314_v55 = vpop.f32.mrb[99].mxu1  ;;  %v13989_v51 = vld [vmem:[#allocation28_spill] sm:$0xff] }
 0x385   : > { %11350 = vrsqrt.f32 %v4310_v19  ;;  %v11341_v40 = vpop.eup %11340  ;;  %v2166_v19 = vadd.f32 %v12211_v2, %v12569_v14  ;;  %v13993_v2 = vld [vmem:[#allocation18_spill] sm:$0xff] }
 0x386   : > { %11352 = vrsqrt.f32 %v4271_v54  ;;  %v11343_v17 = vpop.eup %11342  ;;  %v12784_v52 = vmul.f32 %v11341_v40, %v11873_v32  ;;  %v13986_v54 = vld [vmem:[#allocation3_spill] sm:$0xff]  ;;  %v13988_v32 = vld [vmem:[#allocation17_spill] sm:$0xff] }
 0x387   : > { %11354 = vrsqrt.f32 %v4312_v21  ;;  %v11345_v13 = vpop.eup %11344  ;;  %v12790_v53 = vmul.f32 %v11343_v17, %v11876_v33  ;;  %v2207_v22 = vadd.f32 %v13988_v32, %v12569_v14  ;;  %v13991_v33 = vld [vmem:[#allocation4_spill] sm:$0xff]  ;;  %v13994_v17 = vld [vmem:[#allocation29_spill] sm:$0xff] }
 0x388   : > { %v11347_v63 = vpop.eup %11346  ;;  %v12798_v21 = vmul.f32 %v11345_v13, %v13986_v54  ;;  %11356 = vrsqrt.f32 %v2166_v19 }
 0x389   : > { %v12808_v55 = vmul.f32 %v11347_v63, %v13991_v33  ;;  %11358 = vrsqrt.f32 %v2207_v22 }
 0x38a   : > { %13987 = vst [vmem:[#allocation3_spill] sm:$0xff] %v12798_v21 }
 0x38b   : > { %13992 = vst [vmem:[#allocation28_spill] sm:$0xff] %v12808_v55 }
 0x38e   : > { %v11349_v5 = vpop.eup %11348 }
 0x38f   : > { %v11351_v49 = vpop.eup %11350  ;;  %v12787_v62 = vmul.f32 %v11349_v5, %v12331_v41  ;;  %v13996_v5 = vld [vmem:[#allocation19_spill] sm:$0xff] }
 0x390   : > { %v11353_v47 = vpop.eup %11352  ;;  %v12795_v1 = vmul.f32 %v11351_v49, %v12334_v12  ;;  %v2168_v12 = vadd.f32 %v13993_v2, %v12569_v14  ;;  %v2209_v49 = vadd.f32 %v13996_v5, %v12569_v14 }
 0x391   : > { %v11355_v58 = vpop.eup %11354  ;;  %v12805_v25 = vmul.f32 %v11353_v47, %v13989_v51 }
 0x392   : > { %v12815_v13 = vmul.f32 %v11355_v58, %v13994_v17  ;;  %11360 = vrsqrt.f32 %v2168_v12  ;;  %v11357_v22 = vpop.eup %11356 }
 0x393   : > { %13990 = vst [vmem:[#allocation17_spill] sm:$0xff] %v12805_v25  ;;  %11362 = vrsqrt.f32 %v2209_v49  ;;  %v11359_v12 = vpop.eup %11358  ;;  %v12828_v49 = vmul.f32 %v11357_v22, %v13997_v11  ;;  %v14008_v11 = vld [vmem:[#allocation21_spill] sm:$0xff] }
 0x394   : > { %13995 = vst [vmem:[#allocation4_spill] sm:$0xff] %v12815_v13  ;;  %v2289_v22 = vadd.f32 %v14008_v11, %v12569_v14  ;;  %v14016_v11 = vld [vmem:[#allocation23_spill] sm:$0xff] }
 0x395   : > { %v4350_v47 = vpop.f32.mrb[100].mxu0  ;;  %v4391_v32 = vpop.f32.mrb[100].mxu1  ;;  %13998 = vst [vmem:[#allocation18_spill] sm:$0xff] %v12828_v49  ;;  %v2291_v43 = vadd.f32 %v14016_v11, %v12569_v14 }
 0x396   : > { %v4351_v51 = vadd.f32 %v4350_v47, %v12569_v14  ;;  %v4392_v33 = vadd.f32 %v4391_v32, %v12569_v14  ;;  %v4352_v58 = vpop.f32.mrb[101].mxu0  ;;  %v4393_v2 = vpop.f32.mrb[101].mxu1 }
 0x397   : > { %v4353_v17 = vadd.f32 %v4352_v58, %v12569_v14  ;;  %v4394_v5 = vadd.f32 %v4393_v2, %v12569_v14  ;;  %v4354_v54 = vpop.f32.mrb[102].mxu0  ;;  %v4395_v19 = vpop.f32.mrb[102].mxu1  ;;  %v13999_v58 = vld [vmem:[#allocation30_spill] sm:$0xff] }
 0x398   : > { %11364 = vrsqrt.f32 %v4351_v51  ;;  %v4355_v40 = vpop.f32.mrb[103].mxu0  ;;  %v4396_v63 = vpop.f32.mrb[103].mxu1  ;;  %v14001_v2 = vld [vmem:[#allocation6_spill] sm:$0xff]  ;;  %v14006_v19 = vld [vmem:[#allocation7_spill] sm:$0xff] }
 0x399   : > { %11366 = vrsqrt.f32 %v4392_v33  ;;  %v12834_v51 = vmul.f32 %v11359_v12, %v14001_v2  ;;  %v14003_v40 = vld [vmem:[#allocation20_spill] sm:$0xff]  ;;  %v14004_v33 = vld [vmem:[#allocation31_spill] sm:$0xff] }
 0x39a   : > { %11368 = vrsqrt.f32 %v4353_v17  ;;  %v2248_v63 = vadd.f32 %v14003_v40, %v12569_v14  ;;  %v14011_v12 = vld [vmem:[#allocation8_spill] sm:$0xff]  ;;  %v14013_v40 = vld [vmem:[#allocation22_spill] sm:$0xff] }
 0x39b   : > { %11370 = vrsqrt.f32 %v4394_v5  ;;  %14002 = vst [vmem:[#allocation19_spill] sm:$0xff] %v12834_v51 }
 0x39c   : > { %v11361_v47 = vpop.eup %11360  ;;  %11372 = vrsqrt.f32 %v2248_v63 }
 0x39d   : > { %v11363_v41 = vpop.eup %11362  ;;  %v12842_v44 = vmul.f32 %v11361_v47, %v14006_v19  ;;  %v14014_v47 = vld [vmem:[#allocation33_spill] sm:$0xff]  ;;  %11374 = vrsqrt.f32 %v2289_v22 }
 0x39e   : > { %v12852_v2 = vmul.f32 %v11363_v41, %v14011_v12 }
 0x39f   : > { %14007 = vst [vmem:[#allocation30_spill] sm:$0xff] %v12842_v44 }
 0x3a0   : > { %14012 = vst [vmem:[#allocation20_spill] sm:$0xff] %v12852_v2 }
 0x3a2   : > { %v11365_v32 = vpop.eup %11364 }
 0x3a3   : > { %v11367_v10 = vpop.eup %11366  ;;  %v12831_v45 = vmul.f32 %v11365_v32, %v13999_v58  ;;  %v14009_v58 = vld [vmem:[#allocation32_spill] sm:$0xff] }
 0x3a4   : > { %v11369_v54 = vpop.eup %11368  ;;  %v12839_v17 = vmul.f32 %v11367_v10, %v14004_v33  ;;  %v2250_v10 = vadd.f32 %v14013_v40, %v12569_v14 }
 0x3a5   : > { %14000 = vst [vmem:[#allocation29_spill] sm:$0xff] %v12831_v45  ;;  %v11371_v5 = vpop.eup %11370  ;;  %v12849_v39 = vmul.f32 %v11369_v54, %v14009_v58 }
 0x3a6   : > { %14005 = vst [vmem:[#allocation5_spill] sm:$0xff] %v12839_v17  ;;  %v12859_v19 = vmul.f32 %v11371_v5, %v14014_v47  ;;  %11376 = vrsqrt.f32 %v2250_v10  ;;  %v11373_v22 = vpop.eup %11372 }
 0x3a7   : > { %14010 = vst [vmem:[#allocation6_spill] sm:$0xff] %v12849_v39  ;;  %11378 = vrsqrt.f32 %v2291_v43  ;;  %v11375_v10 = vpop.eup %11374  ;;  %v12872_v43 = vmul.f32 %v11373_v22, %v14017_v56  ;;  %v14026_v56 = vld [vmem:[#allocation25_spill] sm:$0xff] }
 0x3a8   : > { %14015 = vst [vmem:[#allocation31_spill] sm:$0xff] %v12859_v19  ;;  %v2371_v22 = vadd.f32 %v14026_v56, %v12569_v14  ;;  %v14034_v56 = vld [vmem:[#allocation27_spill] sm:$0xff] }
 0x3a9   : > { %v4432_v54 = vpop.f32.mrb[104].mxu0  ;;  %v4473_v58 = vpop.f32.mrb[104].mxu1  ;;  %14018 = vst [vmem:[#allocation7_spill] sm:$0xff] %v12872_v43  ;;  %v2373_v23 = vadd.f32 %v14034_v56, %v12569_v14 }
 0x3aa   : > { %v4433_v12 = vadd.f32 %v4432_v54, %v12569_v14  ;;  %v4474_v40 = vadd.f32 %v4473_v58, %v12569_v14  ;;  %v4434_v5 = vpop.f32.mrb[105].mxu0  ;;  %v4475_v47 = vpop.f32.mrb[105].mxu1 }
 0x3ab   : > { %v4435_v11 = vadd.f32 %v4434_v5, %v12569_v14  ;;  %v4476_v33 = vadd.f32 %v4475_v47, %v12569_v14  ;;  %v4436_v32 = vpop.f32.mrb[106].mxu0  ;;  %v4477_v63 = vpop.f32.mrb[106].mxu1  ;;  %v14020_v47 = vld [vmem:[#allocation10_spill] sm:$0xff] }
 0x3ac   : > { %11380 = vrsqrt.f32 %v4433_v12  ;;  %v4437_v50 = vpop.f32.mrb[107].mxu0  ;;  %v4478_v41 = vpop.f32.mrb[107].mxu1  ;;  %v12878_v12 = vmul.f32 %v11375_v10, %v14020_v47  ;;  %v14029_v10 = vld [vmem:[#allocation12_spill] sm:$0xff] }
 0x3ad   : > { %11382 = vrsqrt.f32 %v4474_v40  ;;  %v14022_v50 = vld [vmem:[#allocation24_spill] sm:$0xff] }
 0x3ae   : > { %11384 = vrsqrt.f32 %v4435_v11  ;;  %14021 = vst [vmem:[#allocation32_spill] sm:$0xff] %v12878_v12  ;;  %v2330_v41 = vadd.f32 %v14022_v50, %v12569_v14  ;;  %v14024_v11 = vld [vmem:[#allocation11_spill] sm:$0xff]  ;;  %v14031_v50 = vld [vmem:[#allocation26_spill] sm:$0xff] }
 0x3af   : > { %11386 = vrsqrt.f32 %v4476_v33  ;;  %v14045_v12 = vld [vmem:[#allocation38_spill] sm:$0xff] }
 0x3b0   : > { %v11377_v54 = vpop.eup %11376  ;;  %11388 = vrsqrt.f32 %v2330_v41 }
 0x3b1   : > { %v11379_v8 = vpop.eup %11378  ;;  %v12886_v63 = vmul.f32 %v11377_v54, %v14024_v11  ;;  %v14032_v54 = vld [vmem:[#allocation35_spill] sm:$0xff]  ;;  %11390 = vrsqrt.f32 %v2371_v22 }
 0x3b2   : > { %v12896_v47 = vmul.f32 %v11379_v8, %v14029_v10 }
 0x3b3   : > { %14025 = vst [vmem:[#allocation22_spill] sm:$0xff] %v12886_v63  ;;  %v14035_v63 = vld [vmem:[#allocation13_spill] sm:$0xff] }
 0x3b4   : > { %14030 = vst [vmem:[#allocation23_spill] sm:$0xff] %v12896_v47 }
 0x3b6   : > { %v11381_v58 = vpop.eup %11380 }
 0x3b7   : > { %v11383_v18 = vpop.eup %11382  ;;  %v12875_v5 = vmul.f32 %v11381_v58, %v12391_v7  ;;  %v14027_v58 = vld [vmem:[#allocation34_spill] sm:$0xff] }
 0x3b8   : > { %v11385_v32 = vpop.eup %11384  ;;  %v12883_v33 = vmul.f32 %v11383_v18, %v12394_v0  ;;  %v2332_v0 = vadd.f32 %v14031_v50, %v12569_v14 }
 0x3b9   : > { %14019 = vst [vmem:[#allocation21_spill] sm:$0xff] %v12875_v5  ;;  %v11387_v40 = vpop.eup %11386  ;;  %v12893_v27 = vmul.f32 %v11385_v32, %v14027_v58 }
 0x3ba   : > { %14023 = vst [vmem:[#allocation8_spill] sm:$0xff] %v12883_v33  ;;  %v12903_v11 = vmul.f32 %v11387_v40, %v14032_v54  ;;  %11392 = vrsqrt.f32 %v2332_v0  ;;  %v11389_v22 = vpop.eup %11388 }
 0x3bb   : > { %14028 = vst [vmem:[#allocation33_spill] sm:$0xff] %v12893_v27  ;;  %11394 = vrsqrt.f32 %v2373_v23  ;;  %v11391_v0 = vpop.eup %11390  ;;  %v12916_v23 = vmul.f32 %v11389_v22, %v14035_v63  ;;  %v14047_v22 = vld [vmem:[#allocation16_spill] sm:$0xff] }
 0x3bc   : > { %14033 = vst [vmem:[#allocation9_spill] sm:$0xff] %v12903_v11 }
 0x3bd   : > { %v4514_v32 = vpop.f32.mrb[108].mxu0  ;;  %v4555_v58 = vpop.f32.mrb[108].mxu1  ;;  %14036 = vst [vmem:[#allocation10_spill] sm:$0xff] %v12916_v23 }
 0x3be   : > { %v4515_v10 = vadd.f32 %v4514_v32, %v12569_v14  ;;  %v4556_v50 = vadd.f32 %v4555_v58, %v12569_v14  ;;  %v4516_v40 = vpop.f32.mrb[109].mxu0  ;;  %v4557_v54 = vpop.f32.mrb[109].mxu1 }
 0x3bf   : > { %v4517_v56 = vadd.f32 %v4516_v40, %v12569_v14  ;;  %v4558_v18 = vadd.f32 %v4557_v54, %v12569_v14  ;;  %v4518_v7 = vpop.f32.mrb[110].mxu0  ;;  %v4559_v41 = vpop.f32.mrb[110].mxu1  ;;  %v14037_v40 = vld [vmem:[#allocation36_spill] sm:$0xff]  ;;  %v14039_v54 = vld [vmem:[#allocation14_spill] sm:$0xff] }
 0x3c0   : > { %11396 = vrsqrt.f32 %v4515_v10  ;;  %v4519_v27 = vpop.f32.mrb[111].mxu0  ;;  %v4560_v8 = vpop.f32.mrb[111].mxu1  ;;  %v12922_v10 = vmul.f32 %v11391_v0, %v14039_v54  ;;  %v14051_v41 = vld [vmem:[#allocation2_spill] sm:$0xff] }
 0x3c1   : > { %11398 = vrsqrt.f32 %v4556_v50  ;;  %v14041_v27 = vld [vmem:[#allocation37_spill] sm:$0xff]  ;;  %v14043_v50 = vld [vmem:[#allocation15_spill] sm:$0xff] }
 0x3c2   : > { %11400 = vrsqrt.f32 %v4517_v56  ;;  %14040 = vst [vmem:[#allocation11_spill] sm:$0xff] %v12922_v10 }
 0x3c3   : > { %11402 = vrsqrt.f32 %v4558_v18 }
 0x3c4   : > { %v11393_v32 = vpop.eup %11392 }
 0x3c5   : > { %v11395_v11 = vpop.eup %11394  ;;  %v12928_v56 = vmul.f32 %v11393_v32, %v14043_v50 }
 0x3c7   : > { %14044 = vst [vmem:[#allocation34_spill] sm:$0xff] %v12928_v56 }
 0x3ca   : > { %v11397_v58 = vpop.eup %11396 }
 0x3cb   : > { %v11399_v47 = vpop.eup %11398  ;;  %v12919_v33 = vmul.f32 %v11397_v58, %v14037_v40  ;;  %v12936_v58 = vmul.f32 %v11395_v11, %v14047_v22  ;;  %v14049_v40 = vld [vmem:[#allocation39_spill] sm:$0xff] }
 0x3cc   : > { %v11401_v7 = vpop.eup %11400  ;;  %v12925_v8 = vmul.f32 %v11399_v47, %v14041_v27 }
 0x3cd   : > { %14038 = vst [vmem:[#allocation24_spill] sm:$0xff] %v12919_v33  ;;  %v11403_v18 = vpop.eup %11402  ;;  %v12933_v63 = vmul.f32 %v11401_v7, %v14045_v12  ;;  %14048 = vst [vmem:[#allocation26_spill] sm:$0xff] %v12936_v58 }
 0x3ce   : > { %14042 = vst [vmem:[#allocation25_spill] sm:$0xff] %v12925_v8  ;;  %v12941_v54 = vmul.f32 %v11403_v18, %v14049_v40 }
 0x3cf   : > { %14046 = vst [vmem:[#allocation12_spill] sm:$0xff] %v12933_v63 }
 0x3d0   : > { %14050 = vst [vmem:[#allocation35_spill] sm:$0xff] %v12941_v54 }
 0x3d1   : > { %v5521_v27 = vpop.f32.mrb[112].mxu0  ;;  %v5562_v50 = vpop.f32.mrb[112].mxu1 }
 0x3d2   : > { %v12948_v12 = vadd.f32 %v5521_v27, %v14051_v41  ;;  %v12951_v11 = vadd.f32 %v5562_v50, %v14051_v41  ;;  %v5523_v7 = vpop.f32.mrb[113].mxu0  ;;  %v5564_v22 = vpop.f32.mrb[113].mxu1 }
 0x3d3   : > { %v12954_v0 = vadd.f32 %v5523_v7, %v14051_v41  ;;  %v12957_v18 = vadd.f32 %v5564_v22, %v14051_v41  ;;  %v5525_v40 = vpop.f32.mrb[114].mxu0  ;;  %v5566_v47 = vpop.f32.mrb[114].mxu1 }
 0x3d4   : > { %v6061_v32 = vmul.f32 %v12948_v12, %v12948_v12  ;;  %v6063_v27 = vmul.f32 %v12951_v11, %v12951_v11  ;;  %v5526_v54 = vpop.f32.mrb[115].mxu0  ;;  %v5567_v58 = vpop.f32.mrb[115].mxu1 }
 0x3d5   : > { %v6062_v50 = vmul.f32 %v12954_v0, %v12954_v0  ;;  %v6064_v7 = vmul.f32 %v12957_v18, %v12957_v18  ;;  %v12974_v58 = vld [vmem:[%s13869_s3] sm:$0xf] }
 0x3d6   : > { %v6089_v63 = vpack.c.bf16 %v6061_v32, %v6061_v32  ;;  %v6091_v56 = vpack.c.bf16 %v6063_v27, %v6063_v27 }
 0x3d7   : > { %v6090_v22 = vpack.c.bf16 %v6062_v50, %v6062_v50  ;;  %v6092_v8 = vpack.c.bf16 %v6064_v7, %v6064_v7 }
 0x3d8   : > { %v6118_v47 = vsel %vm1718_vm1, %v6089_v63, 0  ;;  %v6124_v40 = vsel %vm1718_vm1, %v6091_v56, 0 }
 0x3d9   : > { %10060 = vmatprep.subr.msk.bf16.mxu0 %vm1718_vm1, %v6090_v22  ;;  %10062 = vmatprep.subr.msk.bf16.mxu1 %vm1718_vm1, %v6092_v8 }
 0x3da   : > { %6202 = vmatpush1.bf16.msra.mxu0 %v6118_v47  ;;  %6243 = vmatpush1.bf16.msra.mxu1 %v6124_v40 }
 0x3dd   : > { %10061 = vmatmul.mubr.msk.bf16.vlgmr.msra.gmra.mrb[140].mxu0 %vm1714_vm2, %v12974_v58  ;;  %10063 = vmatmul.mubr.msk.bf16.vlgmr.msra.gmra.mrb[140].mxu1 %vm1714_vm2, %v12974_v58 }
 0x3de   : > { %6315 = vmatprep.mubr.bf16.mxu0 %v13973_v34  ;;  %6356 = vmatprep.mubr.bf16.mxu1 %v13973_v34 }
 0x3e5   : > { %v5603_v56 = vpop.f32.mrb[116].mxu0  ;;  %v5644_v63 = vpop.f32.mrb[116].mxu1 }
 0x3e6   : > { %v12983_v8 = vadd.f32 %v5603_v56, %v14051_v41  ;;  %v12986_v54 = vadd.f32 %v5644_v63, %v14051_v41  ;;  %v5605_v32 = vpop.f32.mrb[117].mxu0  ;;  %v5646_v27 = vpop.f32.mrb[117].mxu1 }
 0x3e7   : > { %v12989_v50 = vadd.f32 %v5605_v32, %v14051_v41  ;;  %v12992_v7 = vadd.f32 %v5646_v27, %v14051_v41  ;;  %v5607_v22 = vpop.f32.mrb[118].mxu0  ;;  %v5648_v47 = vpop.f32.mrb[118].mxu1 }
 0x3e8   : > { %v6065_v40 = vmul.f32 %v12983_v8, %v12983_v8  ;;  %v6067_v56 = vmul.f32 %v12986_v54, %v12986_v54  ;;  %v5608_v10 = vpop.f32.mrb[119].mxu0  ;;  %v5649_v33 = vpop.f32.mrb[119].mxu1 }
 0x3e9   : > { %v6066_v63 = vmul.f32 %v12989_v50, %v12989_v50  ;;  %v6068_v32 = vmul.f32 %v12992_v7, %v12992_v7 }
 0x3ea   : > { %v6093_v23 = vpack.c.bf16 %v6065_v40, %v6065_v40  ;;  %v6095_v5 = vpack.c.bf16 %v6067_v56, %v6067_v56 }
 0x3eb   : > { %v6094_v27 = vpack.c.bf16 %v6066_v63, %v6066_v63  ;;  %v6096_v43 = vpack.c.bf16 %v6068_v32, %v6068_v32 }
 0x3ec   : > { %v6130_v22 = vsel %vm1718_vm1, %v6093_v23, 0  ;;  %v6136_v47 = vsel %vm1718_vm1, %v6095_v5, 0 }
 0x3ed   : > { %10064 = vmatprep.subr.msk.bf16.mxu0 %vm1718_vm1, %v6094_v27  ;;  %10066 = vmatprep.subr.msk.bf16.mxu1 %vm1718_vm1, %v6096_v43 }
 0x3ee   : > { %6284 = vmatpush1.bf16.msra.mxu0 %v6130_v22  ;;  %6325 = vmatpush1.bf16.msra.mxu1 %v6136_v47 }
 0x3f1   : > { %10065 = vmatmul.mubr.msk.bf16.vlgmr.msra.gmra.mrb[144].mxu0 %vm1714_vm2, %v12974_v58  ;;  %10067 = vmatmul.mubr.msk.bf16.vlgmr.msra.gmra.mrb[144].mxu1 %vm1714_vm2, %v12974_v58 }
 0x3f2   : > { %6397 = vmatprep.mubr.bf16.mxu0 %v13973_v34  ;;  %6438 = vmatprep.mubr.bf16.mxu1 %v13973_v34 }
 0x3f9   : > { %v5685_v33 = vpop.f32.mrb[120].mxu0  ;;  %v5726_v23 = vpop.f32.mrb[120].mxu1 }
 0x3fa   : > { %v13013_v5 = vadd.f32 %v5685_v33, %v14051_v41  ;;  %v13016_v10 = vadd.f32 %v5726_v23, %v14051_v41  ;;  %v5687_v43 = vpop.f32.mrb[121].mxu0  ;;  %v5728_v40 = vpop.f32.mrb[121].mxu1 }
 0x3fb   : > { %v13019_v56 = vadd.f32 %v5687_v43, %v14051_v41  ;;  %v13022_v63 = vadd.f32 %v5728_v40, %v14051_v41  ;;  %v5689_v32 = vpop.f32.mrb[122].mxu0  ;;  %v5730_v27 = vpop.f32.mrb[122].mxu1 }
 0x3fc   : > { %v6069_v22 = vmul.f32 %v13013_v5, %v13013_v5  ;;  %v6071_v47 = vmul.f32 %v13016_v10, %v13016_v10  ;;  %v5690_v33 = vpop.f32.mrb[123].mxu0  ;;  %v5731_v19 = vpop.f32.mrb[123].mxu1 }
 0x3fd   : > { %v6070_v23 = vmul.f32 %v13019_v56, %v13019_v56  ;;  %v6072_v43 = vmul.f32 %v13022_v63, %v13022_v63 }
 0x3fe   : > { %v6097_v2 = vpack.c.bf16 %v6069_v22, %v6069_v22  ;;  %v6099_v39 = vpack.c.bf16 %v6071_v47, %v6071_v47 }
 0x3ff   : > { %v6098_v40 = vpack.c.bf16 %v6070_v23, %v6070_v23  ;;  %v6100_v44 = vpack.c.bf16 %v6072_v43, %v6072_v43 }
 0x400   : > { %v6142_v32 = vsel %vm1718_vm1, %v6097_v2, 0  ;;  %v6148_v27 = vsel %vm1718_vm1, %v6099_v39, 0 }
 0x401   : > { %10068 = vmatprep.subr.msk.bf16.mxu0 %vm1718_vm1, %v6098_v40  ;;  %10070 = vmatprep.subr.msk.bf16.mxu1 %vm1718_vm1, %v6100_v44 }
 0x402   : > { %6366 = vmatpush1.bf16.msra.mxu0 %v6142_v32  ;;  %6407 = vmatpush1.bf16.msra.mxu1 %v6148_v27 }
 0x405   : > { %10069 = vmatmul.mubr.msk.bf16.vlgmr.msra.gmra.mrb[148].mxu0 %vm1714_vm2, %v12974_v58  ;;  %10071 = vmatmul.mubr.msk.bf16.vlgmr.msra.gmra.mrb[148].mxu1 %vm1714_vm2, %v12974_v58 }
 0x406   : > { %6479 = vmatprep.mubr.bf16.mxu0 %v13973_v34  ;;  %6520 = vmatprep.mubr.bf16.mxu1 %v13973_v34 }
 0x40d   : > { %v5767_v19 = vpop.f32.mrb[124].mxu0  ;;  %v5808_v2 = vpop.f32.mrb[124].mxu1 }
 0x40e   : > { %v13043_v39 = vadd.f32 %v5767_v19, %v14051_v41  ;;  %v13046_v22 = vadd.f32 %v5808_v2, %v14051_v41  ;;  %v5769_v44 = vpop.f32.mrb[125].mxu0  ;;  %v5810_v47 = vpop.f32.mrb[125].mxu1 }
 0x40f   : > { %v13049_v33 = vadd.f32 %v5769_v44, %v14051_v41  ;;  %v13052_v23 = vadd.f32 %v5810_v47, %v14051_v41  ;;  %v5771_v43 = vpop.f32.mrb[126].mxu0  ;;  %v5812_v40 = vpop.f32.mrb[126].mxu1 }
 0x410   : > { %v6073_v32 = vmul.f32 %v13043_v39, %v13043_v39  ;;  %v6075_v27 = vmul.f32 %v13046_v22, %v13046_v22  ;;  %v5772_v19 = vpop.f32.mrb[127].mxu0  ;;  %v5813_v17 = vpop.f32.mrb[127].mxu1 }
 0x411   : > { %14052 = vst [vmem:[#allocation27_spill] sm:$0xff] %v13052_v23  ;;  %v6074_v2 = vmul.f32 %v13049_v33, %v13049_v33  ;;  %v6076_v44 = vmul.f32 %v13052_v23, %v13052_v23 }
 0x412   : > { %v6101_v51 = vpack.c.bf16 %v6073_v32, %v6073_v32  ;;  %v6103_v45 = vpack.c.bf16 %v6075_v27, %v6075_v27 }
 0x413   : > { %v6102_v47 = vpack.c.bf16 %v6074_v2, %v6074_v2  ;;  %v6104_v49 = vpack.c.bf16 %v6076_v44, %v6076_v44 }
 0x414   : > { %v6154_v43 = vsel %vm1718_vm1, %v6101_v51, 0  ;;  %v6160_v40 = vsel %vm1718_vm1, %v6103_v45, 0 }
 0x415   : > { %10072 = vmatprep.subr.msk.bf16.mxu0 %vm1718_vm1, %v6102_v47  ;;  %10074 = vmatprep.subr.msk.bf16.mxu1 %vm1718_vm1, %v6104_v49 }
 0x416   : > { %6448 = vmatpush1.bf16.msra.mxu0 %v6154_v43  ;;  %6489 = vmatpush1.bf16.msra.mxu1 %v6160_v40 }
 0x419   : > { %10073 = vmatmul.mubr.msk.bf16.vlgmr.msra.gmra.mrb[152].mxu0 %vm1714_vm2, %v12974_v58  ;;  %10075 = vmatmul.mubr.msk.bf16.vlgmr.msra.gmra.mrb[152].mxu1 %vm1714_vm2, %v12974_v58 }
 0x41a   : > { %6561 = vmatprep.mubr.bf16.mxu0 %v13973_v34  ;;  %6602 = vmatprep.mubr.bf16.mxu1 %v13973_v34 }
 0x421   : > { %v5849_v17 = vpop.f32.mrb[128].mxu0  ;;  %v5890_v51 = vpop.f32.mrb[128].mxu1 }
 0x422   : > { %v13073_v45 = vadd.f32 %v5849_v17, %v14051_v41  ;;  %v13076_v32 = vadd.f32 %v5890_v51, %v14051_v41  ;;  %v5851_v49 = vpop.f32.mrb[129].mxu0  ;;  %v5892_v27 = vpop.f32.mrb[129].mxu1 }
 0x423   : > { %v13079_v19 = vadd.f32 %v5851_v49, %v14051_v41  ;;  %v13082_v2 = vadd.f32 %v5892_v27, %v14051_v41  ;;  %v5853_v44 = vpop.f32.mrb[130].mxu0  ;;  %v5894_v47 = vpop.f32.mrb[130].mxu1 }
 0x424   : > { %14053 = vst [vmem:[#allocation13_spill] sm:$0xff] %v13073_v45  ;;  %14054 = vst [vmem:[#allocation36_spill] sm:$0xff] %v13076_v32  ;;  %v6077_v43 = vmul.f32 %v13073_v45, %v13073_v45  ;;  %v6079_v40 = vmul.f32 %v13076_v32, %v13076_v32  ;;  %v5854_v17 = vpop.f32.mrb[131].mxu0  ;;  %v5895_v13 = vpop.f32.mrb[131].mxu1 }
 0x425   : > { %14055 = vst [vmem:[#allocation14_spill] sm:$0xff] %v13079_v19  ;;  %14056 = vst [vmem:[#allocation37_spill] sm:$0xff] %v13082_v2  ;;  %v6078_v51 = vmul.f32 %v13079_v19, %v13079_v19  ;;  %v6080_v49 = vmul.f32 %v13082_v2, %v13082_v2 }
 0x426   : > { %v6105_v55 = vpack.c.bf16 %v6077_v43, %v6077_v43  ;;  %v6107_v25 = vpack.c.bf16 %v6079_v40, %v6079_v40 }
 0x427   : > { %v6106_v27 = vpack.c.bf16 %v6078_v51, %v6078_v51  ;;  %v6108_v21 = vpack.c.bf16 %v6080_v49, %v6080_v49 }
 0x428   : > { %v6166_v44 = vsel %vm1718_vm1, %v6105_v55, 0  ;;  %v6172_v47 = vsel %vm1718_vm1, %v6107_v25, 0 }
 0x429   : > { %10076 = vmatprep.subr.msk.bf16.mxu0 %vm1718_vm1, %v6106_v27  ;;  %10078 = vmatprep.subr.msk.bf16.mxu1 %vm1718_vm1, %v6108_v21 }
 0x42a   : > { %6530 = vmatpush1.bf16.msra.mxu0 %v6166_v44  ;;  %6571 = vmatpush1.bf16.msra.mxu1 %v6172_v47 }
 0x42d   : > { %10077 = vmatmul.mubr.msk.bf16.vlgmr.msra.gmra.mrb[156].mxu0 %vm1714_vm2, %v12974_v58  ;;  %10079 = vmatmul.mubr.msk.bf16.vlgmr.msra.gmra.mrb[156].mxu1 %vm1714_vm2, %v12974_v58 }
 0x42e   : > { %6643 = vmatprep.mubr.bf16.mxu0 %v13973_v34  ;;  %6684 = vmatprep.mubr.bf16.mxu1 %v13973_v34 }
 0x435   : > { %v5931_v13 = vpop.f32.mrb[132].mxu0  ;;  %v5972_v55 = vpop.f32.mrb[132].mxu1 }
 0x436   : > { %v13103_v25 = vadd.f32 %v5931_v13, %v14051_v41  ;;  %v13106_v43 = vadd.f32 %v5972_v55, %v14051_v41  ;;  %v5933_v21 = vpop.f32.mrb[133].mxu0  ;;  %v5974_v40 = vpop.f32.mrb[133].mxu1 }
 0x437   : > { %v13109_v17 = vadd.f32 %v5933_v21, %v14051_v41  ;;  %v13112_v51 = vadd.f32 %v5974_v40, %v14051_v41  ;;  %v5935_v49 = vpop.f32.mrb[134].mxu0  ;;  %v5976_v27 = vpop.f32.mrb[134].mxu1 }
 0x438   : > { %14057 = vst [vmem:[#allocation15_spill] sm:$0xff] %v13103_v25  ;;  %14058 = vst [vmem:[#allocation38_spill] sm:$0xff] %v13106_v43  ;;  %v6081_v44 = vmul.f32 %v13103_v25, %v13103_v25  ;;  %v6083_v47 = vmul.f32 %v13106_v43, %v13106_v43  ;;  %v5936_v13 = vpop.f32.mrb[135].mxu0  ;;  %v5977_v2 = vpop.f32.mrb[135].mxu1 }
 0x439   : > { %14059 = vst [vmem:[#allocation16_spill] sm:$0xff] %v13109_v17  ;;  %14060 = vst [vmem:[#allocation39_spill] sm:$0xff] %v13112_v51  ;;  %v6082_v55 = vmul.f32 %v13109_v17, %v13109_v17  ;;  %v6084_v21 = vmul.f32 %v13112_v51, %v13112_v51  ;;  %v11087_v17 = vld [vmem:[%s11582_s25 + $0xd2c] ss:$112 sps:$4 sm:$0xff]  }
 0x43a   : > { %v6109_v19 = vpack.c.bf16 %v6081_v44, %v6081_v44  ;;  %v6111_v32 = vpack.c.bf16 %v6083_v47, %v6083_v47 }
 0x43b   : > { %v6110_v40 = vpack.c.bf16 %v6082_v55, %v6082_v55  ;;  %v6112_v45 = vpack.c.bf16 %v6084_v21, %v6084_v21 }
 0x43c   : > { %v6178_v49 = vsel %vm1718_vm1, %v6109_v19, 0  ;;  %v6184_v27 = vsel %vm1718_vm1, %v6111_v32, 0 }
 0x43d   : > { %10080 = vmatprep.subr.msk.bf16.mxu0 %vm1718_vm1, %v6110_v40  ;;  %10082 = vmatprep.subr.msk.bf16.mxu1 %vm1718_vm1, %v6112_v45 }
 0x43e   : > { %6612 = vmatpush1.bf16.msra.mxu0 %v6178_v49  ;;  %6653 = vmatpush1.bf16.msra.mxu1 %v6184_v27 }
 0x441   : > { %10081 = vmatmul.mubr.msk.bf16.vlgmr.msra.gmra.mrb[160].mxu0 %vm1714_vm2, %v12974_v58  ;;  %10083 = vmatmul.mubr.msk.bf16.vlgmr.msra.gmra.mrb[160].mxu1 %vm1714_vm2, %v12974_v58 }
 0x442   : > { %6725 = vmatprep.mubr.bf16.mxu0 %v13973_v34  ;;  %6766 = vmatprep.mubr.bf16.mxu1 %v13973_v34 }
 0x449   : > { %v6013_v2 = vpop.f32.mrb[136].mxu0  ;;  %v6054_v19 = vpop.f32.mrb[136].mxu1 }
 0x44a   : > { %v13133_v32 = vadd.f32 %v6013_v2, %v14051_v41  ;;  %v13136_v44 = vadd.f32 %v6054_v19, %v14051_v41  ;;  %v6015_v45 = vpop.f32.mrb[137].mxu0  ;;  %v6056_v47 = vpop.f32.mrb[137].mxu1 }
 0x44b   : > { %v13139_v13 = vadd.f32 %v6015_v45, %v14051_v41  ;;  %v13142_v55 = vadd.f32 %v6056_v47, %v14051_v41  ;;  %v6017_v21 = vpop.f32.mrb[138].mxu0  ;;  %v6058_v40 = vpop.f32.mrb[138].mxu1 }
 0x44c   : > { %14061 = vst [vmem:[#allocation40_spill] sm:$0xff] %v13133_v32  ;;  %14062 = vst [vmem:[#allocation41_spill] sm:$0xff] %v13136_v44  ;;  %v6085_v49 = vmul.f32 %v13133_v32, %v13133_v32  ;;  %v6087_v27 = vmul.f32 %v13136_v44, %v13136_v44  ;;  %v6018_v2 = vpop.f32.mrb[139].mxu0  ;;  %v6059_v19 = vpop.f32.mrb[139].mxu1  ;;  %v11084_v32 = vld [vmem:[%s11582_s25 + $0xd24] ss:$112 sps:$4 sm:$0xff]  }
 0x44d   : > { %14063 = vst [vmem:[#allocation42_spill] sm:$0xff] %v13139_v13  ;;  %14064 = vst [vmem:[#allocation43_spill] sm:$0xff] %v13142_v55  ;;  %v6086_v51 = vmul.f32 %v13139_v13, %v13139_v13  ;;  %v6088_v45 = vmul.f32 %v13142_v55, %v13142_v55  ;;  %v11093_v19 = vld [vmem:[%s11582_s25 + $0xe0c] ss:$112 sps:$4 sm:$0xff]  }
 0x44e   : > { %v6113_v47 = vpack.c.bf16 %v6085_v49, %v6085_v49  ;;  %v6115_v21 = vpack.c.bf16 %v6087_v27, %v6087_v27  ;;  %v11082_v49 = vld [vmem:[%s11582_s25 + $0xd20] ss:$112 sps:$4 sm:$0xff]   ;;  %v11085_v27 = vld [vmem:[%s11582_s25 + $0xd28] ss:$112 sps:$4 sm:$0xff]  }
 0x44f   : > { %v6114_v40 = vpack.c.bf16 %v6086_v51, %v6086_v51  ;;  %v6116_v41 = vpack.c.bf16 %v6088_v45, %v6088_v45  ;;  %v11090_v51 = vld [vmem:[%s11582_s25 + $0xe04] ss:$112 sps:$4 sm:$0xff]   ;;  %v11097_v45 = vld [vmem:[%s11582_s25 + $0xee8] ss:$112 sps:$4 sm:$0xff]  }
 0x450   : > { %v6190_v44 = vsel %vm1718_vm1, %v6113_v47, 0  ;;  %v6196_v2 = vsel %vm1718_vm1, %v6115_v21, 0  ;;  %v11102_v47 = vld [vmem:[%s11582_s25 + $0xfc4] ss:$112 sps:$4 sm:$0xff]   ;;  %v11105_v21 = vld [vmem:[%s11582_s25 + $0xfcc] ss:$112 sps:$4 sm:$0xff]  }
 0x451   : > { %10084 = vmatprep.subr.msk.bf16.mxu0 %vm1718_vm1, %v6114_v40  ;;  %10086 = vmatprep.subr.msk.bf16.mxu1 %vm1718_vm1, %v6116_v41  ;;  %v11088_v41 = vld [vmem:[%s11582_s25 + $0xe00] ss:$112 sps:$4 sm:$0xff]  }
 0x452   : > { %6694 = vmatpush1.bf16.msra.mxu0 %v6190_v44  ;;  %6735 = vmatpush1.bf16.msra.mxu1 %v6196_v2  ;;  %v11091_v44 = vld [vmem:[%s11582_s25 + $0xe08] ss:$112 sps:$4 sm:$0xff]   ;;  %v11100_v40 = vld [vmem:[%s11582_s25 + $0xfc0] ss:$112 sps:$4 sm:$0xff]  }
 0x453   : > { %7700 = vmatprep.subr.bf16.mxu0 %v11084_v32  ;;  %7741 = vmatprep.subr.bf16.mxu1 %v11087_v17  ;;  %v11096_v17 = vld [vmem:[%s11582_s25 + $0xee4] ss:$112 sps:$4 sm:$0xff]   ;;  %v11099_v32 = vld [vmem:[%s11582_s25 + $0xeec] ss:$112 sps:$4 sm:$0xff]   ;;  %v11103_v2 = vld [vmem:[%s11582_s25 + $0xfc8] ss:$112 sps:$4 sm:$0xff]  }
 0x455   : > { %10085 = vmatmul.mubr.msk.bf16.vlgmr.msra.gmra.mrb[164].mxu0 %vm1714_vm2, %v12974_v58  ;;  %10087 = vmatmul.mubr.msk.bf16.vlgmr.msra.gmra.mrb[164].mxu1 %vm1714_vm2, %v12974_v58  ;;  %v11094_v58 = vld [vmem:[%s11582_s25 + $0xee0] ss:$112 sps:$4 sm:$0xff]  }
 0x456   : > { %7701 = vmatpush1.bf16.msra.mxu0 %v11082_v49  ;;  %7742 = vmatpush1.bf16.msra.mxu1 %v11085_v27  ;;  %v11108_v49 = vld [vmem:[%s11582_s25 + $0x10a4] ss:$112 sps:$4 sm:$0xff]   ;;  %v11111_v27 = vld [vmem:[%s11582_s25 + $0x10ac] ss:$112 sps:$4 sm:$0xff]  }
 0x457   : > { %7702 = vmatprep.subr.bf16.mxu0 %v11090_v51  ;;  %7743 = vmatprep.subr.bf16.mxu1 %v11093_v19  ;;  %v11106_v51 = vld [vmem:[%s11582_s25 + $0x10a0] ss:$112 sps:$4 sm:$0xff]   ;;  %v11109_v19 = vld [vmem:[%s11582_s25 + $0x10a8] ss:$112 sps:$4 sm:$0xff]  }
 0x458   : > { %7732 = vmatprep.mubr.bf16.mxu0 %v13973_v34  ;;  %7773 = vmatprep.mubr.bf16.mxu1 %v13973_v34 }
 0x45a   : > { %7703 = vmatpush1.bf16.msra.mxu0 %v11088_v41  ;;  %7744 = vmatpush1.bf16.msra.mxu1 %v11091_v44  ;;  %v11114_v41 = vld [vmem:[%s11582_s25 + $0xd34] ss:$112 sps:$4 sm:$0xff]   ;;  %v11117_v44 = vld [vmem:[%s11582_s25 + $0xd3c] ss:$112 sps:$4 sm:$0xff]  }
 0x45b   : > { %7704 = vmatprep.subr.bf16.mxu0 %v11096_v17  ;;  %7745 = vmatprep.subr.bf16.mxu1 %v11099_v32  ;;  %v11112_v17 = vld [vmem:[%s11582_s25 + $0xd30] ss:$112 sps:$4 sm:$0xff]   ;;  %v11115_v32 = vld [vmem:[%s11582_s25 + $0xd38] ss:$112 sps:$4 sm:$0xff]  }
 0x45e   : > { %7705 = vmatpush1.bf16.msra.mxu0 %v11094_v58  ;;  %7746 = vmatpush1.bf16.msra.mxu1 %v11097_v45  ;;  %v11120_v58 = vld [vmem:[%s11582_s25 + $0xe14] ss:$112 sps:$4 sm:$0xff]   ;;  %v11123_v45 = vld [vmem:[%s11582_s25 + $0xe1c] ss:$112 sps:$4 sm:$0xff]  }
 0x45f   : > { %7706 = vmatprep.subr.bf16.mxu0 %v11102_v47  ;;  %7747 = vmatprep.subr.bf16.mxu1 %v11105_v21  ;;  %v13191_v47 = vld [vmem:[%s13867_s1] sm:$0xf] }
 0x460   : > { %v11118_v21 = vld [vmem:[%s11582_s25 + $0xe10] ss:$112 sps:$4 sm:$0xff]  }
 0x462   : > { %7707 = vmatpush1.bf16.msra.mxu0 %v11100_v40  ;;  %7748 = vmatpush1.bf16.msra.mxu1 %v11103_v2  ;;  %v11121_v40 = vld [vmem:[%s11582_s25 + $0xe18] ss:$112 sps:$4 sm:$0xff]   ;;  %v11126_v2 = vld [vmem:[%s11582_s25 + $0xef4] ss:$112 sps:$4 sm:$0xff]  }
 0x463   : > { %7708 = vmatprep.subr.bf16.mxu0 %v11108_v49  ;;  %7749 = vmatprep.subr.bf16.mxu1 %v11111_v27  ;;  %v11129_v49 = vld [vmem:[%s11582_s25 + $0xefc] ss:$112 sps:$4 sm:$0xff]   ;;  %v11124_v27 = vld [vmem:[%s11582_s25 + $0xef0] ss:$112 sps:$4 sm:$0xff]  }
 0x466   : > { %7709 = vmatpush1.bf16.msra.mxu0 %v11106_v51  ;;  %7750 = vmatpush1.bf16.msra.mxu1 %v11109_v19  ;;  %v11127_v51 = vld [vmem:[%s11582_s25 + $0xef8] ss:$112 sps:$4 sm:$0xff]   ;;  %v11132_v19 = vld [vmem:[%s11582_s25 + $0xfd4] ss:$112 sps:$4 sm:$0xff]  }
 0x467   : > { %7782 = vmatprep.subr.bf16.mxu0 %v11114_v41  ;;  %7823 = vmatprep.subr.bf16.mxu1 %v11117_v44  ;;  %v11135_v41 = vld [vmem:[%s11582_s25 + $0xfdc] ss:$112 sps:$4 sm:$0xff]   ;;  %v11130_v44 = vld [vmem:[%s11582_s25 + $0xfd0] ss:$112 sps:$4 sm:$0xff]  }
 0x469   : > { %10368 = vmatmul.mubr.msk.bf16.vlgmr.msra.gmra.mrb[168].mxu0 %vm1073_vm0, %v13191_v47  ;;  %10369 = vmatmul.mubr.msk.bf16.vlgmr.msra.gmra.mrb[168].mxu1 %vm1073_vm0, %v13191_v47 }
 0x46a   : > { %7783 = vmatpush1.bf16.msra.mxu0 %v11112_v17  ;;  %7824 = vmatpush1.bf16.msra.mxu1 %v11115_v32  ;;  %v11133_v17 = vld [vmem:[%s11582_s25 + $0xfd8] ss:$112 sps:$4 sm:$0xff]   ;;  %v11138_v32 = vld [vmem:[%s11582_s25 + $0x10b4] ss:$112 sps:$4 sm:$0xff]  }
 0x46b   : > { %7784 = vmatprep.subr.bf16.mxu0 %v11120_v58  ;;  %7825 = vmatprep.subr.bf16.mxu1 %v11123_v45  ;;  %v11141_v58 = vld [vmem:[%s11582_s25 + $0x10bc] ss:$112 sps:$4 sm:$0xff]   ;;  %v11136_v45 = vld [vmem:[%s11582_s25 + $0x10b0] ss:$112 sps:$4 sm:$0xff]  }
 0x46c   : > { %7814 = vmatprep.mubr.bf16.mxu0 %v13973_v34  ;;  %7855 = vmatprep.mubr.bf16.mxu1 %v13973_v34 }
 0x46e   : > { %7785 = vmatpush1.bf16.msra.mxu0 %v11118_v21  ;;  %7826 = vmatpush1.bf16.msra.mxu1 %v11121_v40  ;;  %v11139_v21 = vld [vmem:[%s11582_s25 + $0x10b8] ss:$112 sps:$4 sm:$0xff]   ;;  %v11144_v40 = vld [vmem:[%s11582_s25 + $0xd44] ss:$112 sps:$4 sm:$0xff]  }
 0x46f   : > { %7786 = vmatprep.subr.bf16.mxu0 %v11126_v2  ;;  %7827 = vmatprep.subr.bf16.mxu1 %v11129_v49  ;;  %v11147_v2 = vld [vmem:[%s11582_s25 + $0xd4c] ss:$112 sps:$4 sm:$0xff]   ;;  %v11142_v49 = vld [vmem:[%s11582_s25 + $0xd40] ss:$112 sps:$4 sm:$0xff]  }
 0x472   : > { %7787 = vmatpush1.bf16.msra.mxu0 %v11124_v27  ;;  %7828 = vmatpush1.bf16.msra.mxu1 %v11127_v51  ;;  %v11145_v27 = vld [vmem:[%s11582_s25 + $0xd48] ss:$112 sps:$4 sm:$0xff]   ;;  %v11150_v51 = vld [vmem:[%s11582_s25 + $0xe24] ss:$112 sps:$4 sm:$0xff]  }
 0x473   : > { %7788 = vmatprep.subr.bf16.mxu0 %v11132_v19  ;;  %7829 = vmatprep.subr.bf16.mxu1 %v11135_v41  ;;  %v11153_v19 = vld [vmem:[%s11582_s25 + $0xe2c] ss:$112 sps:$4 sm:$0xff]   ;;  %v11148_v41 = vld [vmem:[%s11582_s25 + $0xe20] ss:$112 sps:$4 sm:$0xff]  }
 0x476   : > { %7789 = vmatpush1.bf16.msra.mxu0 %v11130_v44  ;;  %7830 = vmatpush1.bf16.msra.mxu1 %v11133_v17  ;;  %v11151_v44 = vld [vmem:[%s11582_s25 + $0xe28] ss:$112 sps:$4 sm:$0xff]   ;;  %v11156_v17 = vld [vmem:[%s11582_s25 + $0xf04] ss:$112 sps:$4 sm:$0xff]  }
 0x477   : > { %7790 = vmatprep.subr.bf16.mxu0 %v11138_v32  ;;  %7831 = vmatprep.subr.bf16.mxu1 %v11141_v58  ;;  %v11159_v32 = vld [vmem:[%s11582_s25 + $0xf0c] ss:$112 sps:$4 sm:$0xff]   ;;  %v11154_v58 = vld [vmem:[%s11582_s25 + $0xf00] ss:$112 sps:$4 sm:$0xff]  }
 0x47a   : > { %7791 = vmatpush1.bf16.msra.mxu0 %v11136_v45  ;;  %7832 = vmatpush1.bf16.msra.mxu1 %v11139_v21  ;;  %v11157_v45 = vld [vmem:[%s11582_s25 + $0xf08] ss:$112 sps:$4 sm:$0xff]   ;;  %v11162_v21 = vld [vmem:[%s11582_s25 + $0xfe4] ss:$112 sps:$4 sm:$0xff]  }
 0x47b   : > { %7864 = vmatprep.subr.bf16.mxu0 %v11144_v40  ;;  %7905 = vmatprep.subr.bf16.mxu1 %v11147_v2  ;;  %v11165_v40 = vld [vmem:[%s11582_s25 + $0xfec] ss:$112 sps:$4 sm:$0xff]   ;;  %v11160_v2 = vld [vmem:[%s11582_s25 + $0xfe0] ss:$112 sps:$4 sm:$0xff]  }
 0x47d   : > { %10370 = vmatmul.mubr.msk.bf16.vlgmr.msra.gmra.mrb[172].mxu0 %vm1073_vm0, %v13191_v47  ;;  %10371 = vmatmul.mubr.msk.bf16.vlgmr.msra.gmra.mrb[172].mxu1 %vm1073_vm0, %v13191_v47 }
 0x47e   : > { %7865 = vmatpush1.bf16.msra.mxu0 %v11142_v49  ;;  %7906 = vmatpush1.bf16.msra.mxu1 %v11145_v27  ;;  %v11163_v49 = vld [vmem:[%s11582_s25 + $0xfe8] ss:$112 sps:$4 sm:$0xff]   ;;  %v11168_v27 = vld [vmem:[%s11582_s25 + $0x10c4] ss:$112 sps:$4 sm:$0xff]  }
 0x47f   : > { %7866 = vmatprep.subr.bf16.mxu0 %v11150_v51  ;;  %7907 = vmatprep.subr.bf16.mxu1 %v11153_v19  ;;  %v11171_v51 = vld [vmem:[%s11582_s25 + $0x10cc] ss:$112 sps:$4 sm:$0xff]   ;;  %v11166_v19 = vld [vmem:[%s11582_s25 + $0x10c0] ss:$112 sps:$4 sm:$0xff]  }
 0x480   : > { %7896 = vmatprep.mubr.bf16.mxu0 %v13973_v34  ;;  %7937 = vmatprep.mubr.bf16.mxu1 %v13973_v34 }
 0x482   : > { %7867 = vmatpush1.bf16.msra.mxu0 %v11148_v41  ;;  %7908 = vmatpush1.bf16.msra.mxu1 %v11151_v44  ;;  %v11169_v41 = vld [vmem:[%s11582_s25 + $0x10c8] ss:$112 sps:$4 sm:$0xff]   ;;  %v11174_v44 = vld [vmem:[%s11582_s25 + $0xd54] ss:$112 sps:$4 sm:$0xff]  }
 0x483   : > { %7868 = vmatprep.subr.bf16.mxu0 %v11156_v17  ;;  %7909 = vmatprep.subr.bf16.mxu1 %v11159_v32  ;;  %v11177_v17 = vld [vmem:[%s11582_s25 + $0xd5c] ss:$112 sps:$4 sm:$0xff]   ;;  %v11172_v32 = vld [vmem:[%s11582_s25 + $0xd50] ss:$112 sps:$4 sm:$0xff]  }
 0x486   : > { %7869 = vmatpush1.bf16.msra.mxu0 %v11154_v58  ;;  %7910 = vmatpush1.bf16.msra.mxu1 %v11157_v45  ;;  %v11175_v58 = vld [vmem:[%s11582_s25 + $0xd58] ss:$112 sps:$4 sm:$0xff]   ;;  %v11180_v45 = vld [vmem:[%s11582_s25 + $0xe34] ss:$112 sps:$4 sm:$0xff]  }
 0x487   : > { %7870 = vmatprep.subr.bf16.mxu0 %v11162_v21  ;;  %7911 = vmatprep.subr.bf16.mxu1 %v11165_v40  ;;  %v11183_v21 = vld [vmem:[%s11582_s25 + $0xe3c] ss:$112 sps:$4 sm:$0xff]   ;;  %v11178_v40 = vld [vmem:[%s11582_s25 + $0xe30] ss:$112 sps:$4 sm:$0xff]  }
 0x48a   : > { %7871 = vmatpush1.bf16.msra.mxu0 %v11160_v2  ;;  %7912 = vmatpush1.bf16.msra.mxu1 %v11163_v49  ;;  %v11181_v2 = vld [vmem:[%s11582_s25 + $0xe38] ss:$112 sps:$4 sm:$0xff]   ;;  %v11186_v49 = vld [vmem:[%s11582_s25 + $0xf14] ss:$112 sps:$4 sm:$0xff]  }
 0x48b   : > { %7872 = vmatprep.subr.bf16.mxu0 %v11168_v27  ;;  %7913 = vmatprep.subr.bf16.mxu1 %v11171_v51  ;;  %v11189_v27 = vld [vmem:[%s11582_s25 + $0xf1c] ss:$112 sps:$4 sm:$0xff]   ;;  %v11184_v51 = vld [vmem:[%s11582_s25 + $0xf10] ss:$112 sps:$4 sm:$0xff]  }
 0x48e   : > { %7873 = vmatpush1.bf16.msra.mxu0 %v11166_v19  ;;  %7914 = vmatpush1.bf16.msra.mxu1 %v11169_v41  ;;  %v11187_v19 = vld [vmem:[%s11582_s25 + $0xf18] ss:$112 sps:$4 sm:$0xff]   ;;  %v11192_v41 = vld [vmem:[%s11582_s25 + $0xff4] ss:$112 sps:$4 sm:$0xff]  }
 0x48f   : > { %7946 = vmatprep.subr.bf16.mxu0 %v11174_v44  ;;  %7987 = vmatprep.subr.bf16.mxu1 %v11177_v17  ;;  %v11195_v44 = vld [vmem:[%s11582_s25 + $0xffc] ss:$112 sps:$4 sm:$0xff]   ;;  %v11190_v17 = vld [vmem:[%s11582_s25 + $0xff0] ss:$112 sps:$4 sm:$0xff]  }
 0x491   : > { %10372 = vmatmul.mubr.msk.bf16.vlgmr.msra.gmra.mrb[176].mxu0 %vm1073_vm0, %v13191_v47  ;;  %10373 = vmatmul.mubr.msk.bf16.vlgmr.msra.gmra.mrb[176].mxu1 %vm1073_vm0, %v13191_v47 }
 0x492   : > { %7947 = vmatpush1.bf16.msra.mxu0 %v11172_v32  ;;  %7988 = vmatpush1.bf16.msra.mxu1 %v11175_v58  ;;  %v11193_v32 = vld [vmem:[%s11582_s25 + $0xff8] ss:$112 sps:$4 sm:$0xff]   ;;  %v11198_v58 = vld [vmem:[%s11582_s25 + $0x10d4] ss:$112 sps:$4 sm:$0xff]  }
 0x493   : > { %7948 = vmatprep.subr.bf16.mxu0 %v11180_v45  ;;  %7989 = vmatprep.subr.bf16.mxu1 %v11183_v21  ;;  %v11201_v45 = vld [vmem:[%s11582_s25 + $0x10dc] ss:$112 sps:$4 sm:$0xff]   ;;  %v11196_v21 = vld [vmem:[%s11582_s25 + $0x10d0] ss:$112 sps:$4 sm:$0xff]  }
 0x494   : > { %7978 = vmatprep.mubr.bf16.mxu0 %v13973_v34  ;;  %8019 = vmatprep.mubr.bf16.mxu1 %v13973_v34 }
 0x496   : > { %7949 = vmatpush1.bf16.msra.mxu0 %v11178_v40  ;;  %7990 = vmatpush1.bf16.msra.mxu1 %v11181_v2  ;;  %v11199_v40 = vld [vmem:[%s11582_s25 + $0x10d8] ss:$112 sps:$4 sm:$0xff]   ;;  %v11204_v2 = vld [vmem:[%s11582_s25 + $0xd64] ss:$112 sps:$4 sm:$0xff]  }
 0x497   : > { %7950 = vmatprep.subr.bf16.mxu0 %v11186_v49  ;;  %7991 = vmatprep.subr.bf16.mxu1 %v11189_v27  ;;  %v11207_v49 = vld [vmem:[%s11582_s25 + $0xd6c] ss:$112 sps:$4 sm:$0xff]   ;;  %v11202_v27 = vld [vmem:[%s11582_s25 + $0xd60] ss:$112 sps:$4 sm:$0xff]  }
 0x49a   : > { %7951 = vmatpush1.bf16.msra.mxu0 %v11184_v51  ;;  %7992 = vmatpush1.bf16.msra.mxu1 %v11187_v19  ;;  %v11205_v51 = vld [vmem:[%s11582_s25 + $0xd68] ss:$112 sps:$4 sm:$0xff]   ;;  %v11210_v19 = vld [vmem:[%s11582_s25 + $0xe44] ss:$112 sps:$4 sm:$0xff]  }
 0x49b   : > { %7952 = vmatprep.subr.bf16.mxu0 %v11192_v41  ;;  %7993 = vmatprep.subr.bf16.mxu1 %v11195_v44  ;;  %v11213_v41 = vld [vmem:[%s11582_s25 + $0xe4c] ss:$112 sps:$4 sm:$0xff]   ;;  %v11208_v44 = vld [vmem:[%s11582_s25 + $0xe40] ss:$112 sps:$4 sm:$0xff]  }
 0x49e   : > { %7953 = vmatpush1.bf16.msra.mxu0 %v11190_v17  ;;  %7994 = vmatpush1.bf16.msra.mxu1 %v11193_v32  ;;  %v11211_v17 = vld [vmem:[%s11582_s25 + $0xe48] ss:$112 sps:$4 sm:$0xff]   ;;  %v11216_v32 = vld [vmem:[%s11582_s25 + $0xf24] ss:$112 sps:$4 sm:$0xff]  }
 0x49f   : > { %7954 = vmatprep.subr.bf16.mxu0 %v11198_v58  ;;  %7995 = vmatprep.subr.bf16.mxu1 %v11201_v45  ;;  %v11219_v58 = vld [vmem:[%s11582_s25 + $0xf2c] ss:$112 sps:$4 sm:$0xff]   ;;  %v11214_v45 = vld [vmem:[%s11582_s25 + $0xf20] ss:$112 sps:$4 sm:$0xff]  }
 0x4a2   : > { %7955 = vmatpush1.bf16.msra.mxu0 %v11196_v21  ;;  %7996 = vmatpush1.bf16.msra.mxu1 %v11199_v40  ;;  %v11217_v21 = vld [vmem:[%s11582_s25 + $0xf28] ss:$112 sps:$4 sm:$0xff]   ;;  %v11222_v40 = vld [vmem:[%s11582_s25 + $0x1004] ss:$112 sps:$4 sm:$0xff]  }
 0x4a3   : > { %8028 = vmatprep.subr.bf16.mxu0 %v11204_v2  ;;  %8069 = vmatprep.subr.bf16.mxu1 %v11207_v49  ;;  %v11225_v2 = vld [vmem:[%s11582_s25 + $0x100c] ss:$112 sps:$4 sm:$0xff]   ;;  %v11220_v49 = vld [vmem:[%s11582_s25 + $0x1000] ss:$112 sps:$4 sm:$0xff]  }
 0x4a5   : > { %10374 = vmatmul.mubr.msk.bf16.vlgmr.msra.gmra.mrb[180].mxu0 %vm1073_vm0, %v13191_v47  ;;  %10375 = vmatmul.mubr.msk.bf16.vlgmr.msra.gmra.mrb[180].mxu1 %vm1073_vm0, %v13191_v47 }
 0x4a6   : > { %8029 = vmatpush1.bf16.msra.mxu0 %v11202_v27  ;;  %8070 = vmatpush1.bf16.msra.mxu1 %v11205_v51  ;;  %v11223_v27 = vld [vmem:[%s11582_s25 + $0x1008] ss:$112 sps:$4 sm:$0xff]   ;;  %v11228_v51 = vld [vmem:[%s11582_s25 + $0x10e4] ss:$112 sps:$4 sm:$0xff]  }
 0x4a7   : > { %8030 = vmatprep.subr.bf16.mxu0 %v11210_v19  ;;  %8071 = vmatprep.subr.bf16.mxu1 %v11213_v41  ;;  %v11231_v19 = vld [vmem:[%s11582_s25 + $0x10ec] ss:$112 sps:$4 sm:$0xff]  }
 0x4a8   : > { %8060 = vmatprep.mubr.bf16.mxu0 %v13973_v34  ;;  %8101 = vmatprep.mubr.bf16.mxu1 %v13973_v34 }
 0x4aa   : > { %8031 = vmatpush1.bf16.msra.mxu0 %v11208_v44  ;;  %8072 = vmatpush1.bf16.msra.mxu1 %v11211_v17 }
 0x4ab   : > { %8032 = vmatprep.subr.bf16.mxu0 %v11216_v32  ;;  %8073 = vmatprep.subr.bf16.mxu1 %v11219_v58 }
 0x4ae   : > { %8033 = vmatpush1.bf16.msra.mxu0 %v11214_v45  ;;  %8074 = vmatpush1.bf16.msra.mxu1 %v11217_v21 }
 0x4af   : > { %8034 = vmatprep.subr.bf16.mxu0 %v11222_v40  ;;  %8075 = vmatprep.subr.bf16.mxu1 %v11225_v2  ;;  %v11226_v40 = vld [vmem:[%s11582_s25 + $0x10e0] ss:$112 sps:$4 sm:$0xff]   ;;  %v11229_v2 = vld [vmem:[%s11582_s25 + $0x10e8] ss:$112 sps:$4 sm:$0xff]  }
 0x4b0   : > { %v6235_v41 = vpop.f32.mrb[140].mxu0  ;;  %v6276_v55 = vpop.f32.mrb[140].mxu1 }
 0x4b1   : > { %v6236_v44 = vadd.f32 %v6235_v41, %v12569_v14  ;;  %v6277_v17 = vadd.f32 %v6276_v55, %v12569_v14  ;;  %v6237_v32 = vpop.f32.mrb[141].mxu0  ;;  %v6278_v58 = vpop.f32.mrb[141].mxu1  ;;  %v11234_v55 = vld [vmem:[%s11582_s25 + $0xd74] ss:$112 sps:$4 sm:$0xff]   ;;  %v11237_v41 = vld [vmem:[%s11582_s25 + $0xd7c] ss:$112 sps:$4 sm:$0xff]  }
 0x4b2   : > { %v6238_v45 = vadd.f32 %v6237_v32, %v12569_v14  ;;  %v6279_v21 = vadd.f32 %v6278_v58, %v12569_v14  ;;  %8035 = vmatpush1.bf16.msra.mxu0 %v11220_v49  ;;  %8076 = vmatpush1.bf16.msra.mxu1 %v11223_v27  ;;  %v6239_v13 = vpop.f32.mrb[142].mxu0  ;;  %v6280_v43 = vpop.f32.mrb[142].mxu1  ;;  %v11240_v49 = vld [vmem:[%s11582_s25 + $0xe54] ss:$112 sps:$4 sm:$0xff]   ;;  %v11243_v27 = vld [vmem:[%s11582_s25 + $0xe5c] ss:$112 sps:$4 sm:$0xff]  }
 0x4b3   : > { %11404 = vrsqrt.f32 %v6236_v44  ;;  %8036 = vmatprep.subr.bf16.mxu0 %v11228_v51  ;;  %8077 = vmatprep.subr.bf16.mxu1 %v11231_v19  ;;  %v6240_v25 = vpop.f32.mrb[143].mxu0  ;;  %v6281_v23 = vpop.f32.mrb[143].mxu1  ;;  %v11232_v13 = vld [vmem:[%s11582_s25 + $0xd70] ss:$112 sps:$4 sm:$0xff]   ;;  %v11235_v43 = vld [vmem:[%s11582_s25 + $0xd78] ss:$112 sps:$4 sm:$0xff]  }
 0x4b4   : > { %11406 = vrsqrt.f32 %v6277_v17  ;;  %v11238_v23 = vld [vmem:[%s11582_s25 + $0xe50] ss:$112 sps:$4 sm:$0xff]   ;;  %v11241_v25 = vld [vmem:[%s11582_s25 + $0xe58] ss:$112 sps:$4 sm:$0xff]   ;;  %v11246_v51 = vld [vmem:[%s11582_s25 + $0xf34] ss:$112 sps:$4 sm:$0xff]  }
 0x4b5   : > { %11408 = vrsqrt.f32 %v6238_v45  ;;  %v11249_v19 = vld [vmem:[%s11582_s25 + $0xf3c] ss:$112 sps:$4 sm:$0xff]   ;;  %v11244_v58 = vld [vmem:[%s11582_s25 + $0xf30] ss:$112 sps:$4 sm:$0xff]   ;;  %v11247_v45 = vld [vmem:[%s11582_s25 + $0xf38] ss:$112 sps:$4 sm:$0xff]  }
 0x4b6   : > { %11410 = vrsqrt.f32 %v6279_v21  ;;  %8037 = vmatpush1.bf16.msra.mxu0 %v11226_v40  ;;  %8078 = vmatpush1.bf16.msra.mxu1 %v11229_v2  ;;  %v11252_v2 = vld [vmem:[%s11582_s25 + $0x1014] ss:$112 sps:$4 sm:$0xff]  }
 0x4b7   : > { %8110 = vmatprep.subr.bf16.mxu0 %v11234_v55  ;;  %8151 = vmatprep.subr.bf16.mxu1 %v11237_v41  ;;  %v11255_v55 = vld [vmem:[%s11582_s25 + $0x101c] ss:$112 sps:$4 sm:$0xff]  }
 0x4b9   : > { %10376 = vmatmul.mubr.msk.bf16.vlgmr.msra.gmra.mrb[184].mxu0 %vm1073_vm0, %v13191_v47  ;;  %10377 = vmatmul.mubr.msk.bf16.vlgmr.msra.gmra.mrb[184].mxu1 %vm1073_vm0, %v13191_v47 }
 0x4ba   : > { %8111 = vmatpush1.bf16.msra.mxu0 %v11232_v13  ;;  %8152 = vmatpush1.bf16.msra.mxu1 %v11235_v43  ;;  %v14065_v13 = vmax.f32 %v12610_v42, %v12613_v24  ;;  %v11253_v42 = vld [vmem:[%s11582_s25 + $0x1018] ss:$112 sps:$4 sm:$0xff]   ;;  %v14068_v24 = vmax.f32 %v12638_v48, %v12645_v36 }
 0x4bb   : > { %8112 = vmatprep.subr.bf16.mxu0 %v11240_v49  ;;  %8153 = vmatprep.subr.bf16.mxu1 %v11243_v27  ;;  %v14066_v49 = vmax.f32 %v12618_v59, %v12623_v29  ;;  %v11258_v59 = vld [vmem:[%s11582_s25 + $0x10f4] ss:$112 sps:$4 sm:$0xff]   ;;  %v11261_v29 = vld [vmem:[%s11582_s25 + $0x10fc] ss:$112 sps:$4 sm:$0xff]  }
 0x4bc   : > { %8142 = vmatprep.mubr.bf16.mxu0 %v13973_v34  ;;  %8183 = vmatprep.mubr.bf16.mxu1 %v13973_v34 }
 0x4bd   : > { %v11405_v44 = vpop.eup %11404 }
 0x4be   : > { %v11407_v17 = vpop.eup %11406  ;;  %v6803_v32 = vmul.f32 %v11405_v44, %v12948_v12  ;;  %8113 = vmatpush1.bf16.msra.mxu0 %v11238_v23  ;;  %8154 = vmatpush1.bf16.msra.mxu1 %v11241_v25  ;;  %v14067_v23 = vmax.f32 %v12628_v35, %v12635_v16 }
 0x4bf   : > { %v11409_v21 = vpop.eup %11408  ;;  %v6805_v40 = vmul.f32 %v11407_v17, %v12951_v11  ;;  %8114 = vmatprep.subr.bf16.mxu0 %v11246_v51  ;;  %8155 = vmatprep.subr.bf16.mxu1 %v11249_v19  ;;  %v11250_v51 = vld [vmem:[%s11582_s25 + $0x1010] ss:$112 sps:$4 sm:$0xff]  }
 0x4c0   : > { %v11411_v41 = vpop.eup %11410  ;;  %v13320_v12 = vmax.f32 %v14065_v13, %v6803_v32  ;;  %v6804_v43 = vmul.f32 %v11409_v21, %v12954_v0  ;;  %v11256_v32 = vld [vmem:[%s11582_s25 + $0x10f0] ss:$112 sps:$4 sm:$0xff]  }
 0x4c1   : > { %v13326_v27 = vmax.f32 %v14066_v49, %v6805_v40  ;;  %v6806_v11 = vmul.f32 %v11411_v41, %v12957_v18  ;;  %v11264_v40 = vld [vmem:[%s11582_s25 + $0xd84] ss:$112 sps:$4 sm:$0xff]   ;;  %v11262_v13 = vld [vmem:[%s11582_s25 + $0xd80] ss:$112 sps:$4 sm:$0xff]  }
 0x4c2   : > { %v13332_v25 = vmax.f32 %v14067_v23, %v6804_v43  ;;  %8115 = vmatpush1.bf16.msra.mxu0 %v11244_v58  ;;  %8156 = vmatpush1.bf16.msra.mxu1 %v11247_v45  ;;  %v11259_v58 = vld [vmem:[%s11582_s25 + $0x10f8] ss:$112 sps:$4 sm:$0xff]   ;;  %v11270_v49 = vld [vmem:[%s11582_s25 + $0xe64] ss:$112 sps:$4 sm:$0xff]   ;;  %v11268_v23 = vld [vmem:[%s11582_s25 + $0xe60] ss:$112 sps:$4 sm:$0xff]  }
 0x4c3   : > { %v13339_v0 = vmax.f32 %v14068_v24, %v6806_v11  ;;  %8116 = vmatprep.subr.bf16.mxu0 %v11252_v2  ;;  %8157 = vmatprep.subr.bf16.mxu1 %v11255_v55  ;;  %v11267_v2 = vld [vmem:[%s11582_s25 + $0xd8c] ss:$112 sps:$4 sm:$0xff]   ;;  %v11265_v43 = vld [vmem:[%s11582_s25 + $0xd88] ss:$112 sps:$4 sm:$0xff]  }
 0x4c4   : > { %v6317_v18 = vpop.f32.mrb[144].mxu0  ;;  %v6358_v19 = vpop.f32.mrb[144].mxu1  ;;  %v11273_v11 = vld [vmem:[%s11582_s25 + $0xe6c] ss:$112 sps:$4 sm:$0xff]  }
 0x4c5   : > { %v6318_v35 = vadd.f32 %v6317_v18, %v12569_v14  ;;  %v6359_v16 = vadd.f32 %v6358_v19, %v12569_v14  ;;  %v6319_v44 = vpop.f32.mrb[145].mxu0  ;;  %v6360_v17 = vpop.f32.mrb[145].mxu1  ;;  %v11279_v24 = vld [vmem:[%s11582_s25 + $0xf4c] ss:$112 sps:$4 sm:$0xff]   ;;  %v11274_v19 = vld [vmem:[%s11582_s25 + $0xf40] ss:$112 sps:$4 sm:$0xff]  }
 0x4c6   : > { %v6320_v48 = vadd.f32 %v6319_v44, %v12569_v14  ;;  %v6361_v36 = vadd.f32 %v6360_v17, %v12569_v14  ;;  %8117 = vmatpush1.bf16.msra.mxu0 %v11250_v51  ;;  %8158 = vmatpush1.bf16.msra.mxu1 %v11253_v42  ;;  %v6321_v45 = vpop.f32.mrb[146].mxu0  ;;  %v6362_v21 = vpop.f32.mrb[146].mxu1  ;;  %v11271_v51 = vld [vmem:[%s11582_s25 + $0xe68] ss:$112 sps:$4 sm:$0xff]   ;;  %v11276_v42 = vld [vmem:[%s11582_s25 + $0xf44] ss:$112 sps:$4 sm:$0xff]  }
 0x4c7   : > { %11412 = vrsqrt.f32 %v6318_v35  ;;  %8118 = vmatprep.subr.bf16.mxu0 %v11258_v59  ;;  %8159 = vmatprep.subr.bf16.mxu1 %v11261_v29  ;;  %v6322_v55 = vpop.f32.mrb[147].mxu0  ;;  %v6363_v41 = vpop.f32.mrb[147].mxu1  ;;  %v11277_v35 = vld [vmem:[%s11582_s25 + $0xf48] ss:$112 sps:$4 sm:$0xff]   ;;  %v11282_v17 = vld [vmem:[%s11582_s25 + $0x1024] ss:$112 sps:$4 sm:$0xff]   ;;  %v14070_v45 = vmax.f32 %v12688_v28, %v12693_v61 }
 0x4c8   : > { %11414 = vrsqrt.f32 %v6359_v16  ;;  %v11280_v55 = vld [vmem:[%s11582_s25 + $0x1020] ss:$112 sps:$4 sm:$0xff]   ;;  %v11288_v28 = vld [vmem:[%s11582_s25 + $0x1104] ss:$112 sps:$4 sm:$0xff]   ;;  %v11291_v61 = vld [vmem:[%s11582_s25 + $0x110c] ss:$112 sps:$4 sm:$0xff]  }
 0x4c9   : > { %11416 = vrsqrt.f32 %v6320_v48  ;;  %v11285_v48 = vld [vmem:[%s11582_s25 + $0x102c] ss:$112 sps:$4 sm:$0xff]  }
 0x4ca   : > { %11418 = vrsqrt.f32 %v6361_v36  ;;  %8119 = vmatpush1.bf16.msra.mxu0 %v11256_v32  ;;  %8160 = vmatpush1.bf16.msra.mxu1 %v11259_v58  ;;  %v14069_v32 = vmax.f32 %v12680_v38, %v12683_v37  ;;  %v11283_v38 = vld [vmem:[%s11582_s25 + $0x1028] ss:$112 sps:$4 sm:$0xff]   ;;  %v14072_v37 = vmax.f32 %v12708_v3, %v12715_v60  ;;  %v11286_v60 = vld [vmem:[%s11582_s25 + $0x1100] ss:$112 sps:$4 sm:$0xff]  }
 0x4cb   : > { %8192 = vmatprep.subr.bf16.mxu0 %v11264_v40  ;;  %8233 = vmatprep.subr.bf16.mxu1 %v11267_v2  ;;  %v14071_v40 = vmax.f32 %v12698_v30, %v12705_v15 }
 0x4cd   : > { %10378 = vmatmul.mubr.msk.bf16.vlgmr.msra.gmra.mrb[188].mxu0 %vm1073_vm0, %v13191_v47  ;;  %10379 = vmatmul.mubr.msk.bf16.vlgmr.msra.gmra.mrb[188].mxu1 %vm1073_vm0, %v13191_v47 }
 0x4ce   : > { %8193 = vmatpush1.bf16.msra.mxu0 %v11262_v13  ;;  %8234 = vmatpush1.bf16.msra.mxu1 %v11265_v43 }
 0x4cf   : > { %8194 = vmatprep.subr.bf16.mxu0 %v11270_v49  ;;  %8235 = vmatprep.subr.bf16.mxu1 %v11273_v11  ;;  %v11289_v11 = vld [vmem:[%s11582_s25 + $0x1108] ss:$112 sps:$4 sm:$0xff]  }
 0x4d0   : > { %8224 = vmatprep.mubr.bf16.mxu0 %v13973_v34  ;;  %8265 = vmatprep.mubr.bf16.mxu1 %v13973_v34 }
 0x4d1   : > { %v11413_v59 = vpop.eup %11412 }
 0x4d2   : > { %v11415_v29 = vpop.eup %11414  ;;  %v6807_v18 = vmul.f32 %v11413_v59, %v12983_v8  ;;  %8195 = vmatpush1.bf16.msra.mxu0 %v11268_v23  ;;  %8236 = vmatpush1.bf16.msra.mxu1 %v11271_v51 }
 0x4d3   : > { %v11417_v16 = vpop.eup %11416  ;;  %v6809_v44 = vmul.f32 %v11415_v29, %v12986_v54  ;;  %8196 = vmatprep.subr.bf16.mxu0 %v11276_v42  ;;  %8237 = vmatprep.subr.bf16.mxu1 %v11279_v24 }
 0x4d4   : > { %v11419_v36 = vpop.eup %11418  ;;  %v13374_v8 = vmax.f32 %v14069_v32, %v6807_v18  ;;  %v6808_v58 = vmul.f32 %v11417_v16, %v12989_v50 }
 0x4d5   : > { %v13380_v21 = vmax.f32 %v14070_v45, %v6809_v44  ;;  %v6810_v54 = vmul.f32 %v11419_v36, %v12992_v7  ;;  %v14073_v44 = vmax.f32 %v12740_v4, %v12743_v26 }
 0x4d6   : > { %v13386_v2 = vmax.f32 %v14071_v40, %v6808_v58  ;;  %8197 = vmatpush1.bf16.msra.mxu0 %v11274_v19  ;;  %8238 = vmatpush1.bf16.msra.mxu1 %v11277_v35 }
 0x4d7   : > { %v13393_v50 = vmax.f32 %v14072_v37, %v6810_v54  ;;  %8198 = vmatprep.subr.bf16.mxu0 %v11282_v17  ;;  %8239 = vmatprep.subr.bf16.mxu1 %v11285_v48 }
 0x4d8   : > { %v6399_v7 = vpop.f32.mrb[148].mxu0  ;;  %v6440_v41 = vpop.f32.mrb[148].mxu1 }
 0x4d9   : > { %v6400_v30 = vadd.f32 %v6399_v7, %v12569_v14  ;;  %v6441_v15 = vadd.f32 %v6440_v41, %v12569_v14  ;;  %v6401_v13 = vpop.f32.mrb[149].mxu0  ;;  %v6442_v43 = vpop.f32.mrb[149].mxu1  ;;  %v14077_v41 = vmax.f32 %v12784_v52, %v12787_v62 }
 0x4da   : > { %v6402_v49 = vadd.f32 %v6401_v13, %v12569_v14  ;;  %v6443_v3 = vadd.f32 %v6442_v43, %v12569_v14  ;;  %8199 = vmatpush1.bf16.msra.mxu0 %v11280_v55  ;;  %8240 = vmatpush1.bf16.msra.mxu1 %v11283_v38  ;;  %v6403_v23 = vpop.f32.mrb[150].mxu0  ;;  %v6444_v51 = vpop.f32.mrb[150].mxu1  ;;  %v14078_v13 = vmax.f32 %v12790_v53, %v12795_v1 }
 0x4db   : > { %11420 = vrsqrt.f32 %v6400_v30  ;;  %8200 = vmatprep.subr.bf16.mxu0 %v11288_v28  ;;  %8241 = vmatprep.subr.bf16.mxu1 %v11291_v61  ;;  %v6404_v42 = vpop.f32.mrb[151].mxu0  ;;  %v6445_v24 = vpop.f32.mrb[151].mxu1  ;;  %v14084_v51 = vld [vmem:[#allocation4_spill] sm:$0xff] }
 0x4dc   : > { %11422 = vrsqrt.f32 %v6441_v15 }
 0x4dd   : > { %11424 = vrsqrt.f32 %v6402_v49  ;;  %v14079_v49 = vld [vmem:[#allocation27_spill] sm:$0xff] }
 0x4de   : > { %11426 = vrsqrt.f32 %v6443_v3  ;;  %8201 = vmatpush1.bf16.msra.mxu0 %v11286_v60  ;;  %8242 = vmatpush1.bf16.msra.mxu1 %v11289_v11  ;;  %v14080_v60 = vld [vmem:[#allocation3_spill] sm:$0xff] }
 0x4e1   : > { %10380 = vmatmul.mubr.msk.bf16.vlgmr.msra.gmra.mrb[192].mxu0 %vm1073_vm0, %v13191_v47  ;;  %10381 = vmatmul.mubr.msk.bf16.vlgmr.msra.gmra.mrb[192].mxu1 %vm1073_vm0, %v13191_v47  ;;  %v14074_v47 = vmax.f32 %v12746_v20, %v12751_v57 }
 0x4e2   : > { %8446 = vmatprep.mubr.bf16.mxu0 %v13973_v34  ;;  %8487 = vmatprep.mubr.bf16.mxu1 %v13973_v34 }
 0x4e5   : > { %v11421_v59 = vpop.eup %11420 }
 0x4e6   : > { %v11423_v29 = vpop.eup %11422  ;;  %v6811_v18 = vmul.f32 %v11421_v59, %v13013_v5  ;;  %v14075_v5 = vmax.f32 %v12754_v46, %v12761_v31 }
 0x4e7   : > { %v11425_v19 = vpop.eup %11424  ;;  %v6813_v35 = vmul.f32 %v11423_v29, %v13016_v10  ;;  %v14076_v10 = vmax.f32 %v12764_v6, %v12771_v9 }
 0x4e8   : > { %v11427_v16 = vpop.eup %11426  ;;  %v13414_v17 = vmax.f32 %v14073_v44, %v6811_v18  ;;  %v6812_v48 = vmul.f32 %v11425_v19, %v13019_v56 }
 0x4e9   : > { %v13420_v36 = vmax.f32 %v14074_v47, %v6813_v35  ;;  %v6814_v32 = vmul.f32 %v11427_v16, %v13022_v63 }
 0x4ea   : > { %v13426_v58 = vmax.f32 %v14075_v5, %v6812_v48 }
 0x4eb   : > { %v13431_v4 = vmax.f32 %v14076_v10, %v6814_v32  ;;  %v14086_v32 = vld [vmem:[#allocation13_spill] sm:$0xff] }
 0x4ec   : > { %v6481_v26 = vpop.f32.mrb[152].mxu0  ;;  %v6522_v45 = vpop.f32.mrb[152].mxu1 }
 0x4ed   : > { %v6482_v56 = vadd.f32 %v6481_v26, %v12569_v14  ;;  %v6523_v20 = vadd.f32 %v6522_v45, %v12569_v14  ;;  %v6483_v57 = vpop.f32.mrb[153].mxu0  ;;  %v6524_v54 = vpop.f32.mrb[153].mxu1  ;;  %v14087_v26 = vld [vmem:[#allocation36_spill] sm:$0xff] }
 0x4ee   : > { %v6484_v63 = vadd.f32 %v6483_v57, %v12569_v14  ;;  %v6525_v40 = vadd.f32 %v6524_v54, %v12569_v14  ;;  %v6485_v46 = vpop.f32.mrb[154].mxu0  ;;  %v6526_v31 = vpop.f32.mrb[154].mxu1  ;;  %v14089_v57 = vld [vmem:[#allocation29_spill] sm:$0xff] }
 0x4ef   : > { %11428 = vrsqrt.f32 %v6482_v56  ;;  %v6486_v55 = vpop.f32.mrb[155].mxu0  ;;  %v6527_v38 = vpop.f32.mrb[155].mxu1  ;;  %v14092_v31 = vld [vmem:[#allocation19_spill] sm:$0xff] }
 0x4f0   : > { %11430 = vrsqrt.f32 %v6523_v20  ;;  %v14088_v20 = vld [vmem:[#allocation18_spill] sm:$0xff]  ;;  %v14093_v55 = vld [vmem:[#allocation5_spill] sm:$0xff] }
 0x4f1   : > { %11432 = vrsqrt.f32 %v6484_v63  ;;  %v14090_v54 = vmax.f32 %v14088_v20, %v14089_v57  ;;  %v14094_v38 = vmax.f32 %v14092_v31, %v14093_v55  ;;  %v14108_v20 = vld [vmem:[#allocation32_spill] sm:$0xff]  ;;  %v14112_v55 = vld [vmem:[#allocation22_spill] sm:$0xff] }
 0x4f2   : > { %11434 = vrsqrt.f32 %v6525_v40  ;;  %v14091_v40 = vld [vmem:[#allocation14_spill] sm:$0xff]  ;;  %v14109_v57 = vld [vmem:[#allocation8_spill] sm:$0xff] }
 0x4f9   : > { %v11429_v6 = vpop.eup %11428 }
 0x4fa   : > { %v11431_v9 = vpop.eup %11430  ;;  %v6815_v37 = vmul.f32 %v11429_v6, %v13043_v39  ;;  %v14081_v39 = vld [vmem:[#allocation17_spill] sm:$0xff] }
 0x4fb   : > { %v11433_v28 = vpop.eup %11432  ;;  %v6817_v61 = vmul.f32 %v11431_v9, %v13046_v22  ;;  %v14082_v11 = vmax.f32 %v14080_v60, %v14081_v39  ;;  %v14083_v22 = vld [vmem:[#allocation28_spill] sm:$0xff]  ;;  %v14095_v9 = vld [vmem:[#allocation37_spill] sm:$0xff] }
 0x4fc   : > { %v11435_v7 = vpop.eup %11434  ;;  %v13442_v30 = vmax.f32 %v14077_v41, %v6815_v37  ;;  %v6816_v15 = vmul.f32 %v11433_v28, %v13049_v33  ;;  %v14085_v42 = vmax.f32 %v14083_v22, %v14084_v51  ;;  %v14096_v28 = vld [vmem:[#allocation30_spill] sm:$0xff] }
 0x4fd   : > { %v13448_v43 = vmax.f32 %v14078_v13, %v6817_v61  ;;  %v6818_v3 = vmul.f32 %v11435_v7, %v14079_v49  ;;  %v14097_v61 = vld [vmem:[#allocation6_spill] sm:$0xff]  ;;  %v14100_v13 = vld [vmem:[#allocation31_spill] sm:$0xff] }
 0x4fe   : > { %v13454_v23 = vmax.f32 %v14082_v11, %v6816_v15  ;;  %v14098_v7 = vmax.f32 %v14096_v28, %v14097_v61  ;;  %v14099_v15 = vld [vmem:[#allocation20_spill] sm:$0xff]  ;;  %v14116_v28 = vld [vmem:[#allocation23_spill] sm:$0xff]  ;;  %v14117_v61 = vld [vmem:[#allocation9_spill] sm:$0xff] }
 0x4ff   : > { %v13459_v52 = vmax.f32 %v14085_v42, %v6818_v3  ;;  %v14101_v49 = vmax.f32 %v14099_v15, %v14100_v13 }
 0x500   : > { %v6563_v62 = vpop.f32.mrb[156].mxu0  ;;  %v6604_v24 = vpop.f32.mrb[156].mxu1 }
 0x501   : > { %v6564_v33 = vadd.f32 %v6563_v62, %v12569_v14  ;;  %v6605_v53 = vadd.f32 %v6604_v24, %v12569_v14  ;;  %v6565_v1 = vpop.f32.mrb[157].mxu0  ;;  %v6606_v59 = vpop.f32.mrb[157].mxu1 }
 0x502   : > { %v6566_v29 = vadd.f32 %v6565_v1, %v12569_v14  ;;  %v6607_v18 = vadd.f32 %v6606_v59, %v12569_v14  ;;  %v6567_v19 = vpop.f32.mrb[158].mxu0  ;;  %v6608_v35 = vpop.f32.mrb[158].mxu1 }
 0x503   : > { %11436 = vrsqrt.f32 %v6564_v33  ;;  %v6568_v16 = vpop.f32.mrb[159].mxu0  ;;  %v6609_v44 = vpop.f32.mrb[159].mxu1  ;;  %v14102_v19 = vld [vmem:[#allocation15_spill] sm:$0xff] }
 0x504   : > { %11438 = vrsqrt.f32 %v6605_v53  ;;  %v14103_v44 = vld [vmem:[#allocation38_spill] sm:$0xff] }
 0x505   : > { %11440 = vrsqrt.f32 %v6566_v29 }
 0x506   : > { %11442 = vrsqrt.f32 %v6607_v18 }
 0x50d   : > { %v11437_v48 = vpop.eup %11436 }
 0x50e   : > { %v11439_v47 = vpop.eup %11438  ;;  %v6819_v5 = vmul.f32 %v11437_v48, %v14086_v32  ;;  %v14104_v32 = vld [vmem:[#allocation7_spill] sm:$0xff] }
 0x50f   : > { %v11441_v10 = vpop.eup %11440  ;;  %v6821_v45 = vmul.f32 %v11439_v47, %v14087_v26 }
 0x510   : > { %v11443_v56 = vpop.eup %11442  ;;  %v13470_v63 = vmax.f32 %v14090_v54, %v6819_v5  ;;  %v6820_v46 = vmul.f32 %v11441_v10, %v14091_v40  ;;  %v14105_v5 = vld [vmem:[#allocation21_spill] sm:$0xff]  ;;  %v14110_v54 = vmax.f32 %v14108_v20, %v14109_v57 }
 0x511   : > { %v13476_v6 = vmax.f32 %v14094_v38, %v6821_v45  ;;  %v6822_v37 = vmul.f32 %v11443_v56, %v14095_v9  ;;  %v14106_v10 = vmax.f32 %v14104_v32, %v14105_v5  ;;  %v14107_v45 = vld [vmem:[#allocation16_spill] sm:$0xff]  ;;  %v14113_v38 = vld [vmem:[#allocation33_spill] sm:$0xff] }
 0x512   : > { %v13482_v41 = vmax.f32 %v14098_v7, %v6820_v46  ;;  %v14111_v46 = vld [vmem:[#allocation39_spill] sm:$0xff]  ;;  %v14114_v9 = vmax.f32 %v14112_v55, %v14113_v38  ;;  %v14118_v7 = vmax.f32 %v14116_v28, %v14117_v61  ;;  %v14128_v20 = vld [vmem:[#allocation25_spill] sm:$0xff]  ;;  %v14132_v55 = vld [vmem:[#allocation34_spill] sm:$0xff] }
 0x513   : > { %v13487_v3 = vmax.f32 %v14101_v49, %v6822_v37  ;;  %v14133_v38 = vld [vmem:[#allocation12_spill] sm:$0xff]  ;;  %v14136_v61 = vld [vmem:[#allocation26_spill] sm:$0xff] }
 0x514   : > { %v6645_v60 = vpop.f32.mrb[160].mxu0  ;;  %v6686_v39 = vpop.f32.mrb[160].mxu1 }
 0x515   : > { %v6646_v11 = vadd.f32 %v6645_v60, %v12569_v14  ;;  %v6687_v22 = vadd.f32 %v6686_v39, %v12569_v14  ;;  %v6647_v51 = vpop.f32.mrb[161].mxu0  ;;  %v6688_v42 = vpop.f32.mrb[161].mxu1 }
 0x516   : > { %v6648_v62 = vadd.f32 %v6647_v51, %v12569_v14  ;;  %v6689_v24 = vadd.f32 %v6688_v42, %v12569_v14  ;;  %v6649_v33 = vpop.f32.mrb[162].mxu0  ;;  %v6690_v53 = vpop.f32.mrb[162].mxu1 }
 0x517   : > { %11444 = vrsqrt.f32 %v6646_v11  ;;  %v6650_v1 = vpop.f32.mrb[163].mxu0  ;;  %v6691_v59 = vpop.f32.mrb[163].mxu1 }
 0x518   : > { %11446 = vrsqrt.f32 %v6687_v22 }
 0x519   : > { %11448 = vrsqrt.f32 %v6648_v62 }
 0x51a   : > { %11450 = vrsqrt.f32 %v6689_v24 }
 0x521   : > { %v11445_v29 = vpop.eup %11444 }
 0x522   : > { %v11447_v18 = vpop.eup %11446  ;;  %v6823_v35 = vmul.f32 %v11445_v29, %v14102_v19  ;;  %v14120_v29 = vld [vmem:[#allocation40_spill] sm:$0xff] }
 0x523   : > { %v11449_v16 = vpop.eup %11448  ;;  %v6825_v48 = vmul.f32 %v11447_v18, %v14103_v44 }
 0x524   : > { %v11451_v47 = vpop.eup %11450  ;;  %v13498_v26 = vmax.f32 %v14106_v10, %v6823_v35  ;;  %v6824_v56 = vmul.f32 %v11449_v16, %v14107_v45  ;;  %v14121_v35 = vld [vmem:[#allocation41_spill] sm:$0xff]  ;;  %v14126_v10 = vld [vmem:[#allocation42_spill] sm:$0xff] }
 0x525   : > { %v13504_v40 = vmax.f32 %v14110_v54, %v6825_v48  ;;  %v6826_v31 = vmul.f32 %v11451_v47, %v14111_v46  ;;  %v14122_v48 = vld [vmem:[#allocation10_spill] sm:$0xff]  ;;  %v14123_v47 = vld [vmem:[#allocation24_spill] sm:$0xff]  ;;  %v14131_v46 = vld [vmem:[#allocation43_spill] sm:$0xff] }
 0x526   : > { %v13510_v37 = vmax.f32 %v14114_v9, %v6824_v56  ;;  %v14124_v32 = vmax.f32 %v14122_v48, %v14123_v47  ;;  %v14127_v56 = vld [vmem:[#allocation11_spill] sm:$0xff]  ;;  %v14134_v9 = vmax.f32 %v14132_v55, %v14133_v38 }
 0x527   : > { %v13515_v15 = vmax.f32 %v14118_v7, %v6826_v31  ;;  %v14129_v57 = vmax.f32 %v14127_v56, %v14128_v20  ;;  %v14137_v7 = vld [vmem:[#allocation35_spill] sm:$0xff]  ;;  %v13572_v56 = vld [vmem:[%s13869_s3] sm:$0xf] }
 0x528   : > { %14115 = vst [vmem:[#allocation27_spill] sm:$0xff] %v13510_v37  ;;  %v6727_v13 = vpop.f32.mrb[164].mxu0  ;;  %v6768_v49 = vpop.f32.mrb[164].mxu1 }
 0x529   : > { %14119 = vst [vmem:[#allocation3_spill] sm:$0xff] %v13515_v15  ;;  %v6728_v60 = vadd.f32 %v6727_v13, %v12569_v14  ;;  %v6769_v39 = vadd.f32 %v6768_v49, %v12569_v14  ;;  %v6729_v11 = vpop.f32.mrb[165].mxu0  ;;  %v6770_v22 = vpop.f32.mrb[165].mxu1  ;;  %v14138_v13 = vmax.f32 %v14136_v61, %v14137_v7 }
 0x52a   : > { %v6730_v51 = vadd.f32 %v6729_v11, %v12569_v14  ;;  %v6771_v42 = vadd.f32 %v6770_v22, %v12569_v14  ;;  %v6731_v62 = vpop.f32.mrb[166].mxu0  ;;  %v6772_v24 = vpop.f32.mrb[166].mxu1  ;;  %v14140_v11 = vld [vmem:[#allocation2_spill] sm:$0xff] }
 0x52b   : > { %11452 = vrsqrt.f32 %v6728_v60  ;;  %v6732_v33 = vpop.f32.mrb[167].mxu0  ;;  %v6773_v53 = vpop.f32.mrb[167].mxu1 }
 0x52c   : > { %11454 = vrsqrt.f32 %v6769_v39 }
 0x52d   : > { %11456 = vrsqrt.f32 %v6730_v51 }
 0x52e   : > { %11458 = vrsqrt.f32 %v6771_v42 }
 0x535   : > { %v11453_v1 = vpop.eup %11452 }
 0x536   : > { %v11455_v59 = vpop.eup %11454  ;;  %v6827_v18 = vmul.f32 %v11453_v1, %v14120_v29 }
 0x537   : > { %v11457_v19 = vpop.eup %11456  ;;  %v6829_v16 = vmul.f32 %v11455_v59, %v14121_v35 }
 0x538   : > { %v11459_v44 = vpop.eup %11458  ;;  %v13526_v5 = vmax.f32 %v14124_v32, %v6827_v18  ;;  %v6828_v45 = vmul.f32 %v11457_v19, %v14126_v10 }
 0x539   : > { %v13532_v54 = vmax.f32 %v14129_v57, %v6829_v16  ;;  %v6830_v31 = vmul.f32 %v11459_v44, %v14131_v46 }
 0x53a   : > { %14125 = vst [vmem:[#allocation17_spill] sm:$0xff] %v13526_v5  ;;  %v13538_v28 = vmax.f32 %v14134_v9, %v6828_v45 }
 0x53b   : > { %14130 = vst [vmem:[#allocation28_spill] sm:$0xff] %v13532_v54  ;;  %v13543_v49 = vmax.f32 %v14138_v13, %v6830_v31 }
 0x53c   : > { %14135 = vst [vmem:[#allocation4_spill] sm:$0xff] %v13538_v28  ;;  %v7734_v60 = vpop.f32.mrb[168].mxu0  ;;  %v7775_v39 = vpop.f32.mrb[168].mxu1 }
 0x53d   : > { %14139 = vst [vmem:[#allocation13_spill] sm:$0xff] %v13543_v49  ;;  %v13546_v22 = vadd.f32 %v7734_v60, %v14140_v11  ;;  %v13549_v51 = vadd.f32 %v7775_v39, %v14140_v11  ;;  %v7736_v42 = vpop.f32.mrb[169].mxu0  ;;  %v7777_v62 = vpop.f32.mrb[169].mxu1 }
 0x53e   : > { %v13552_v24 = vadd.f32 %v7736_v42, %v14140_v11  ;;  %v13555_v33 = vadd.f32 %v7777_v62, %v14140_v11  ;;  %v7738_v53 = vpop.f32.mrb[170].mxu0  ;;  %v7779_v1 = vpop.f32.mrb[170].mxu1 }
 0x53f   : > { %v8274_v59 = vmul.f32 %v13546_v22, %v13546_v22  ;;  %v8276_v29 = vmul.f32 %v13549_v51, %v13549_v51  ;;  %v7739_v18 = vpop.f32.mrb[171].mxu0  ;;  %v7780_v19 = vpop.f32.mrb[171].mxu1 }
 0x540   : > { %v8275_v35 = vmul.f32 %v13552_v24, %v13552_v24  ;;  %v8277_v16 = vmul.f32 %v13555_v33, %v13555_v33 }
 0x541   : > { %v8302_v44 = vpack.c.bf16 %v8274_v59, %v8274_v59  ;;  %v8304_v48 = vpack.c.bf16 %v8276_v29, %v8276_v29 }
 0x542   : > { %v8303_v47 = vpack.c.bf16 %v8275_v35, %v8275_v35  ;;  %v8305_v32 = vpack.c.bf16 %v8277_v16, %v8277_v16 }
 0x543   : > { %v8331_v10 = vsel %vm1718_vm1, %v8302_v44, 0  ;;  %v8337_v45 = vsel %vm1718_vm1, %v8304_v48, 0 }
 0x544   : > { %10382 = vmatprep.subr.msk.bf16.mxu0 %vm1718_vm1, %v8303_v47  ;;  %10384 = vmatprep.subr.msk.bf16.mxu1 %vm1718_vm1, %v8305_v32 }
 0x545   : > { %8415 = vmatpush1.bf16.msra.mxu0 %v8331_v10  ;;  %8456 = vmatpush1.bf16.msra.mxu1 %v8337_v45 }
 0x548   : > { %10383 = vmatmul.mubr.msk.bf16.vlgmr.msra.gmra.mrb[196].mxu0 %vm1714_vm2, %v13572_v56  ;;  %10385 = vmatmul.mubr.msk.bf16.vlgmr.msra.gmra.mrb[196].mxu1 %vm1714_vm2, %v13572_v56 }
 0x549   : > { %8528 = vmatprep.mubr.bf16.mxu0 %v13973_v34  ;;  %8569 = vmatprep.mubr.bf16.mxu1 %v13973_v34 }
 0x550   : > { %v7816_v20 = vpop.f32.mrb[172].mxu0  ;;  %v7857_v57 = vpop.f32.mrb[172].mxu1 }
 0x551   : > { %v13581_v46 = vadd.f32 %v7816_v20, %v14140_v11  ;;  %v13584_v31 = vadd.f32 %v7857_v57, %v14140_v11  ;;  %v7818_v55 = vpop.f32.mrb[173].mxu0  ;;  %v7859_v38 = vpop.f32.mrb[173].mxu1 }
 0x552   : > { %v13587_v9 = vadd.f32 %v7818_v55, %v14140_v11  ;;  %v13590_v61 = vadd.f32 %v7859_v38, %v14140_v11  ;;  %v7820_v7 = vpop.f32.mrb[174].mxu0  ;;  %v7861_v13 = vpop.f32.mrb[174].mxu1 }
 0x553   : > { %v8278_v60 = vmul.f32 %v13581_v46, %v13581_v46  ;;  %v8280_v39 = vmul.f32 %v13584_v31, %v13584_v31  ;;  %v7821_v42 = vpop.f32.mrb[175].mxu0  ;;  %v7862_v62 = vpop.f32.mrb[175].mxu1 }
 0x554   : > { %v8279_v53 = vmul.f32 %v13587_v9, %v13587_v9  ;;  %v8281_v1 = vmul.f32 %v13590_v61, %v13590_v61 }
 0x555   : > { %v8306_v59 = vpack.c.bf16 %v8278_v60, %v8278_v60  ;;  %v8308_v29 = vpack.c.bf16 %v8280_v39, %v8280_v39 }
 0x556   : > { %v8307_v18 = vpack.c.bf16 %v8279_v53, %v8279_v53  ;;  %v8309_v19 = vpack.c.bf16 %v8281_v1, %v8281_v1 }
 0x557   : > { %v8343_v35 = vsel %vm1718_vm1, %v8306_v59, 0  ;;  %v8349_v16 = vsel %vm1718_vm1, %v8308_v29, 0 }
 0x558   : > { %10386 = vmatprep.subr.msk.bf16.mxu0 %vm1718_vm1, %v8307_v18  ;;  %10388 = vmatprep.subr.msk.bf16.mxu1 %vm1718_vm1, %v8309_v19 }
 0x559   : > { %8497 = vmatpush1.bf16.msra.mxu0 %v8343_v35  ;;  %8538 = vmatpush1.bf16.msra.mxu1 %v8349_v16 }
 0x55c   : > { %10387 = vmatmul.mubr.msk.bf16.vlgmr.msra.gmra.mrb[200].mxu0 %vm1714_vm2, %v13572_v56  ;;  %10389 = vmatmul.mubr.msk.bf16.vlgmr.msra.gmra.mrb[200].mxu1 %vm1714_vm2, %v13572_v56 }
 0x55d   : > { %8610 = vmatprep.mubr.bf16.mxu0 %v13973_v34  ;;  %8651 = vmatprep.mubr.bf16.mxu1 %v13973_v34 }
 0x564   : > { %v7898_v44 = vpop.f32.mrb[176].mxu0  ;;  %v7939_v48 = vpop.f32.mrb[176].mxu1 }
 0x565   : > { %v13611_v47 = vadd.f32 %v7898_v44, %v14140_v11  ;;  %v13614_v32 = vadd.f32 %v7939_v48, %v14140_v11  ;;  %v7900_v10 = vpop.f32.mrb[177].mxu0  ;;  %v7941_v45 = vpop.f32.mrb[177].mxu1 }
 0x566   : > { %v13617_v20 = vadd.f32 %v7900_v10, %v14140_v11  ;;  %v13620_v57 = vadd.f32 %v7941_v45, %v14140_v11  ;;  %v7902_v55 = vpop.f32.mrb[178].mxu0  ;;  %v7943_v38 = vpop.f32.mrb[178].mxu1 }
 0x567   : > { %v8282_v7 = vmul.f32 %v13611_v47, %v13611_v47  ;;  %v8284_v13 = vmul.f32 %v13614_v32, %v13614_v32  ;;  %v7903_v60 = vpop.f32.mrb[179].mxu0  ;;  %v7944_v39 = vpop.f32.mrb[179].mxu1 }
 0x568   : > { %v8283_v42 = vmul.f32 %v13617_v20, %v13617_v20  ;;  %v8285_v62 = vmul.f32 %v13620_v57, %v13620_v57 }
 0x569   : > { %v8310_v53 = vpack.c.bf16 %v8282_v7, %v8282_v7  ;;  %v8312_v1 = vpack.c.bf16 %v8284_v13, %v8284_v13 }
 0x56a   : > { %v8311_v59 = vpack.c.bf16 %v8283_v42, %v8283_v42  ;;  %v8313_v29 = vpack.c.bf16 %v8285_v62, %v8285_v62 }
 0x56b   : > { %v8355_v18 = vsel %vm1718_vm1, %v8310_v53, 0  ;;  %v8361_v19 = vsel %vm1718_vm1, %v8312_v1, 0 }
 0x56c   : > { %10390 = vmatprep.subr.msk.bf16.mxu0 %vm1718_vm1, %v8311_v59  ;;  %10392 = vmatprep.subr.msk.bf16.mxu1 %vm1718_vm1, %v8313_v29 }
 0x56d   : > { %8579 = vmatpush1.bf16.msra.mxu0 %v8355_v18  ;;  %8620 = vmatpush1.bf16.msra.mxu1 %v8361_v19 }
 0x570   : > { %10391 = vmatmul.mubr.msk.bf16.vlgmr.msra.gmra.mrb[204].mxu0 %vm1714_vm2, %v13572_v56  ;;  %10393 = vmatmul.mubr.msk.bf16.vlgmr.msra.gmra.mrb[204].mxu1 %vm1714_vm2, %v13572_v56 }
 0x571   : > { %8692 = vmatprep.mubr.bf16.mxu0 %v13973_v34  ;;  %8733 = vmatprep.mubr.bf16.mxu1 %v13973_v34 }
 0x578   : > { %v7980_v35 = vpop.f32.mrb[180].mxu0  ;;  %v8021_v16 = vpop.f32.mrb[180].mxu1 }
 0x579   : > { %v13641_v44 = vadd.f32 %v7980_v35, %v14140_v11  ;;  %v13644_v48 = vadd.f32 %v8021_v16, %v14140_v11  ;;  %v7982_v10 = vpop.f32.mrb[181].mxu0  ;;  %v8023_v45 = vpop.f32.mrb[181].mxu1 }
 0x57a   : > { %v13647_v55 = vadd.f32 %v7982_v10, %v14140_v11  ;;  %v13650_v38 = vadd.f32 %v8023_v45, %v14140_v11  ;;  %v7984_v7 = vpop.f32.mrb[182].mxu0  ;;  %v8025_v13 = vpop.f32.mrb[182].mxu1 }
 0x57b   : > { %v8286_v60 = vmul.f32 %v13641_v44, %v13641_v44  ;;  %v8288_v39 = vmul.f32 %v13644_v48, %v13644_v48  ;;  %v7985_v42 = vpop.f32.mrb[183].mxu0  ;;  %v8026_v62 = vpop.f32.mrb[183].mxu1 }
 0x57c   : > { %v8287_v53 = vmul.f32 %v13647_v55, %v13647_v55  ;;  %v8289_v1 = vmul.f32 %v13650_v38, %v13650_v38 }
 0x57d   : > { %v8314_v59 = vpack.c.bf16 %v8286_v60, %v8286_v60  ;;  %v8316_v29 = vpack.c.bf16 %v8288_v39, %v8288_v39 }
 0x57e   : > { %v8315_v18 = vpack.c.bf16 %v8287_v53, %v8287_v53  ;;  %v8317_v19 = vpack.c.bf16 %v8289_v1, %v8289_v1 }
 0x57f   : > { %v8367_v35 = vsel %vm1718_vm1, %v8314_v59, 0  ;;  %v8373_v16 = vsel %vm1718_vm1, %v8316_v29, 0 }
 0x580   : > { %10394 = vmatprep.subr.msk.bf16.mxu0 %vm1718_vm1, %v8315_v18  ;;  %10396 = vmatprep.subr.msk.bf16.mxu1 %vm1718_vm1, %v8317_v19 }
 0x581   : > { %8661 = vmatpush1.bf16.msra.mxu0 %v8367_v35  ;;  %8702 = vmatpush1.bf16.msra.mxu1 %v8373_v16 }
 0x584   : > { %10395 = vmatmul.mubr.msk.bf16.vlgmr.msra.gmra.mrb[208].mxu0 %vm1714_vm2, %v13572_v56  ;;  %10397 = vmatmul.mubr.msk.bf16.vlgmr.msra.gmra.mrb[208].mxu1 %vm1714_vm2, %v13572_v56 }
 0x585   : > { %8774 = vmatprep.mubr.bf16.mxu0 %v13973_v34  ;;  %8815 = vmatprep.mubr.bf16.mxu1 %v13973_v34 }
 0x58c   : > { %v8062_v10 = vpop.f32.mrb[184].mxu0  ;;  %v8103_v45 = vpop.f32.mrb[184].mxu1 }
 0x58d   : > { %v13671_v7 = vadd.f32 %v8062_v10, %v14140_v11  ;;  %v13674_v13 = vadd.f32 %v8103_v45, %v14140_v11  ;;  %v8064_v60 = vpop.f32.mrb[185].mxu0  ;;  %v8105_v39 = vpop.f32.mrb[185].mxu1 }
 0x58e   : > { %v13677_v42 = vadd.f32 %v8064_v60, %v14140_v11  ;;  %v13680_v62 = vadd.f32 %v8105_v39, %v14140_v11  ;;  %v8066_v53 = vpop.f32.mrb[186].mxu0  ;;  %v8107_v1 = vpop.f32.mrb[186].mxu1 }
 0x58f   : > { %v8290_v59 = vmul.f32 %v13671_v7, %v13671_v7  ;;  %v8292_v29 = vmul.f32 %v13674_v13, %v13674_v13  ;;  %v8067_v18 = vpop.f32.mrb[187].mxu0  ;;  %v8108_v19 = vpop.f32.mrb[187].mxu1 }
 0x590   : > { %v8291_v35 = vmul.f32 %v13677_v42, %v13677_v42  ;;  %v8293_v16 = vmul.f32 %v13680_v62, %v13680_v62 }
 0x591   : > { %v8318_v10 = vpack.c.bf16 %v8290_v59, %v8290_v59  ;;  %v8320_v45 = vpack.c.bf16 %v8292_v29, %v8292_v29 }
 0x592   : > { %v8319_v60 = vpack.c.bf16 %v8291_v35, %v8291_v35  ;;  %v8321_v39 = vpack.c.bf16 %v8293_v16, %v8293_v16 }
 0x593   : > { %v8379_v53 = vsel %vm1718_vm1, %v8318_v10, 0  ;;  %v8385_v1 = vsel %vm1718_vm1, %v8320_v45, 0 }
 0x594   : > { %10398 = vmatprep.subr.msk.bf16.mxu0 %vm1718_vm1, %v8319_v60  ;;  %10400 = vmatprep.subr.msk.bf16.mxu1 %vm1718_vm1, %v8321_v39 }
 0x595   : > { %8743 = vmatpush1.bf16.msra.mxu0 %v8379_v53  ;;  %8784 = vmatpush1.bf16.msra.mxu1 %v8385_v1 }
 0x598   : > { %10399 = vmatmul.mubr.msk.bf16.vlgmr.msra.gmra.mrb[212].mxu0 %vm1714_vm2, %v13572_v56  ;;  %10401 = vmatmul.mubr.msk.bf16.vlgmr.msra.gmra.mrb[212].mxu1 %vm1714_vm2, %v13572_v56 }
 0x599   : > { %8856 = vmatprep.mubr.bf16.mxu0 %v13973_v34  ;;  %8897 = vmatprep.mubr.bf16.mxu1 %v13973_v34 }
 0x5a0   : > { %v8144_v59 = vpop.f32.mrb[188].mxu0  ;;  %v8185_v29 = vpop.f32.mrb[188].mxu1 }
 0x5a1   : > { %v13701_v18 = vadd.f32 %v8144_v59, %v14140_v11  ;;  %v13704_v19 = vadd.f32 %v8185_v29, %v14140_v11  ;;  %v8146_v35 = vpop.f32.mrb[189].mxu0  ;;  %v8187_v16 = vpop.f32.mrb[189].mxu1 }
 0x5a2   : > { %v13707_v10 = vadd.f32 %v8146_v35, %v14140_v11  ;;  %v13710_v45 = vadd.f32 %v8187_v16, %v14140_v11  ;;  %v8148_v60 = vpop.f32.mrb[190].mxu0  ;;  %v8189_v39 = vpop.f32.mrb[190].mxu1 }
 0x5a3   : > { %v8294_v53 = vmul.f32 %v13701_v18, %v13701_v18  ;;  %v8296_v1 = vmul.f32 %v13704_v19, %v13704_v19  ;;  %v8149_v59 = vpop.f32.mrb[191].mxu0  ;;  %v8190_v49 = vpop.f32.mrb[191].mxu1 }
 0x5a4   : > { %v8295_v29 = vmul.f32 %v13707_v10, %v13707_v10  ;;  %v8297_v35 = vmul.f32 %v13710_v45, %v13710_v45 }
 0x5a5   : > { %v8322_v28 = vpack.c.bf16 %v8294_v53, %v8294_v53  ;;  %v8324_v54 = vpack.c.bf16 %v8296_v1, %v8296_v1 }
 0x5a6   : > { %v8323_v16 = vpack.c.bf16 %v8295_v29, %v8295_v29  ;;  %v8325_v5 = vpack.c.bf16 %v8297_v35, %v8297_v35 }
 0x5a7   : > { %v8391_v60 = vsel %vm1718_vm1, %v8322_v28, 0  ;;  %v8397_v39 = vsel %vm1718_vm1, %v8324_v54, 0 }
 0x5a8   : > { %10402 = vmatprep.subr.msk.bf16.mxu0 %vm1718_vm1, %v8323_v16  ;;  %10404 = vmatprep.subr.msk.bf16.mxu1 %vm1718_vm1, %v8325_v5 }
 0x5a9   : > { %8825 = vmatpush1.bf16.msra.mxu0 %v8391_v60  ;;  %8866 = vmatpush1.bf16.msra.mxu1 %v8397_v39 }
 0x5ac   : > { %10403 = vmatmul.mubr.msk.bf16.vlgmr.msra.gmra.mrb[216].mxu0 %vm1714_vm2, %v13572_v56  ;;  %10405 = vmatmul.mubr.msk.bf16.vlgmr.msra.gmra.mrb[216].mxu1 %vm1714_vm2, %v13572_v56 }
 0x5ad   : > { %8938 = vmatprep.mubr.bf16.mxu0 %v13973_v34  ;;  %8979 = vmatprep.mubr.bf16.mxu1 %v13973_v34 }
 0x5b4   : > { %v8226_v49 = vpop.f32.mrb[192].mxu0  ;;  %v8267_v28 = vpop.f32.mrb[192].mxu1 }
 0x5b5   : > { %v13731_v54 = vadd.f32 %v8226_v49, %v14140_v11  ;;  %v13734_v53 = vadd.f32 %v8267_v28, %v14140_v11  ;;  %v8228_v5 = vpop.f32.mrb[193].mxu0  ;;  %v8269_v1 = vpop.f32.mrb[193].mxu1 }
 0x5b6   : > { %v13737_v59 = vadd.f32 %v8228_v5, %v14140_v11  ;;  %v13740_v29 = vadd.f32 %v8269_v1, %v14140_v11  ;;  %v8230_v35 = vpop.f32.mrb[194].mxu0  ;;  %v8271_v16 = vpop.f32.mrb[194].mxu1 }
 0x5b7   : > { %14141 = vst [vmem:[#allocation36_spill] sm:$0xff] %v13734_v53  ;;  %v8298_v34 = vmul.f32 %v13731_v54, %v13731_v54  ;;  %v8300_v60 = vmul.f32 %v13734_v53, %v13734_v53  ;;  %v8231_v39 = vpop.f32.mrb[195].mxu0  ;;  %v8272_v49 = vpop.f32.mrb[195].mxu1 }
 0x5b8   : > { %14142 = vst [vmem:[#allocation18_spill] sm:$0xff] %v13737_v59  ;;  %14143 = vst [vmem:[#allocation29_spill] sm:$0xff] %v13740_v29  ;;  %v8299_v28 = vmul.f32 %v13737_v59, %v13737_v59  ;;  %v8301_v5 = vmul.f32 %v13740_v29, %v13740_v29 }
 0x5b9   : > { %v8326_v15 = vpack.c.bf16 %v8298_v34, %v8298_v34  ;;  %v8328_v37 = vpack.c.bf16 %v8300_v60, %v8300_v60 }
 0x5ba   : > { %v8327_v11 = vpack.c.bf16 %v8299_v28, %v8299_v28  ;;  %v8329_v1 = vpack.c.bf16 %v8301_v5, %v8301_v5 }
 0x5bb   : > { %v8403_v35 = vsel %vm1718_vm1, %v8326_v15, 0  ;;  %v8409_v16 = vsel %vm1718_vm1, %v8328_v37, 0 }
 0x5bc   : > { %10406 = vmatprep.subr.msk.bf16.mxu0 %vm1718_vm1, %v8327_v11  ;;  %10408 = vmatprep.subr.msk.bf16.mxu1 %vm1718_vm1, %v8329_v1 }
 0x5bd   : > { %8907 = vmatpush1.bf16.msra.mxu0 %v8403_v35  ;;  %8948 = vmatpush1.bf16.msra.mxu1 %v8409_v16 }
 0x5c0   : > { %10407 = vmatmul.mubr.msk.bf16.vlgmr.msra.gmra.mrb[220].mxu0 %vm1714_vm2, %v13572_v56  ;;  %10409 = vmatmul.mubr.msk.bf16.vlgmr.msra.gmra.mrb[220].mxu1 %vm1714_vm2, %v13572_v56 }
 0x61b   : > { %v8448_v34 = vpop.f32.mrb[196].mxu0  ;;  %v8489_v60 = vpop.f32.mrb[196].mxu1 }
 0x61c   : > { %v8449_v39 = vadd.f32 %v8448_v34, %v12569_v14  ;;  %v8490_v15 = vadd.f32 %v8489_v60, %v12569_v14  ;;  %v8450_v49 = vpop.f32.mrb[197].mxu0  ;;  %v8491_v37 = vpop.f32.mrb[197].mxu1 }
 0x61d   : > { %v8451_v28 = vadd.f32 %v8450_v49, %v12569_v14  ;;  %v8492_v5 = vadd.f32 %v8491_v37, %v12569_v14  ;;  %v8452_v11 = vpop.f32.mrb[198].mxu0  ;;  %v8493_v1 = vpop.f32.mrb[198].mxu1 }
 0x61e   : > { %11460 = vrsqrt.f32 %v8449_v39  ;;  %v8453_v35 = vpop.f32.mrb[199].mxu0  ;;  %v8494_v16 = vpop.f32.mrb[199].mxu1 }
 0x61f   : > { %11462 = vrsqrt.f32 %v8490_v15 }
 0x620   : > { %11464 = vrsqrt.f32 %v8451_v28 }
 0x621   : > { %11466 = vrsqrt.f32 %v8492_v5 }
 0x628   : > { %v11461_v56 = vpop.eup %11460 }
 0x629   : > { %v11463_v29 = vpop.eup %11462  ;;  %v9016_v34 = vmul.f32 %v11461_v56, %v13546_v22 }
 0x62a   : > { %v11465_v60 = vpop.eup %11464  ;;  %v9018_v59 = vmul.f32 %v11463_v29, %v13549_v51 }
 0x62b   : > { %v11467_v53 = vpop.eup %11466  ;;  %v9044_v49 = vmax.f32 %v13320_v12, %v9016_v34  ;;  %v9017_v37 = vmul.f32 %v11465_v60, %v13552_v24 }
 0x62c   : > { %v9046_v39 = vmax.f32 %v13326_v27, %v9018_v59  ;;  %v9019_v11 = vmul.f32 %v11467_v53, %v13555_v33 }
 0x62d   : > { %v9045_v15 = vmax.f32 %v13332_v25, %v9017_v37 }
 0x62e   : > { %v9047_v22 = vmax.f32 %v13339_v0, %v9019_v11 }
 0x62f   : > { %v10426_v51 = vpack.c.bf16 %v9045_v15, %v9044_v49  ;;  %v8530_v29 = vpop.f32.mrb[200].mxu0  ;;  %v8571_v12 = vpop.f32.mrb[200].mxu1 }
 0x630   : > { %v10427_v28 = vpack.c.bf16 %v9047_v22, %v9046_v39  ;;  %v8531_v24 = vadd.f32 %v8530_v29, %v12569_v14  ;;  %v8572_v27 = vadd.f32 %v8571_v12, %v12569_v14  ;;  %v8532_v33 = vpop.f32.mrb[201].mxu0  ;;  %v8573_v53 = vpop.f32.mrb[201].mxu1 }
 0x631   : > { %9184 = vst [vmem:[%s13773_s26] sm:$0xff] %v10426_v51  ;;  %v8533_v25 = vadd.f32 %v8532_v33, %v12569_v14  ;;  %v8574_v59 = vadd.f32 %v8573_v53, %v12569_v14  ;;  %v8534_v5 = vpop.f32.mrb[202].mxu0  ;;  %v8575_v1 = vpop.f32.mrb[202].mxu1 }
 0x632   : > { %9185 = vst [vmem:[%s13773_s26 + $0x8] sm:$0xff] %v10427_v28  ;;  %11468 = vrsqrt.f32 %v8531_v24  ;;  %v8535_v0 = vpop.f32.mrb[203].mxu0  ;;  %v8576_v35 = vpop.f32.mrb[203].mxu1 }
 0x633   : > { %11470 = vrsqrt.f32 %v8572_v27 }
 0x634   : > { %11472 = vrsqrt.f32 %v8533_v25 }
 0x635   : > { %11474 = vrsqrt.f32 %v8574_v59 }
 0x63c   : > { %v11469_v16 = vpop.eup %11468 }
 0x63d   : > { %v11471_v56 = vpop.eup %11470  ;;  %v9020_v34 = vmul.f32 %v11469_v16, %v13581_v46 }
 0x63e   : > { %v11473_v60 = vpop.eup %11472  ;;  %v9022_v49 = vmul.f32 %v11471_v56, %v13584_v31 }
 0x63f   : > { %v11475_v37 = vpop.eup %11474  ;;  %v9048_v39 = vmax.f32 %v13374_v8, %v9020_v34  ;;  %v9021_v11 = vmul.f32 %v11473_v60, %v13587_v9 }
 0x640   : > { %v9050_v15 = vmax.f32 %v13380_v21, %v9022_v49  ;;  %v9023_v22 = vmul.f32 %v11475_v37, %v13590_v61 }
 0x641   : > { %v9049_v51 = vmax.f32 %v13386_v2, %v9021_v11 }
 0x642   : > { %v9051_v29 = vmax.f32 %v13393_v50, %v9023_v22 }
 0x643   : > { %v10428_v12 = vpack.c.bf16 %v9049_v51, %v9048_v39  ;;  %v8612_v46 = vpop.f32.mrb[204].mxu0  ;;  %v8653_v28 = vpop.f32.mrb[204].mxu1 }
 0x644   : > { %v10429_v24 = vpack.c.bf16 %v9051_v29, %v9050_v15  ;;  %v8613_v31 = vadd.f32 %v8612_v46, %v12569_v14  ;;  %v8654_v27 = vadd.f32 %v8653_v28, %v12569_v14  ;;  %v8614_v8 = vpop.f32.mrb[205].mxu0  ;;  %v8655_v33 = vpop.f32.mrb[205].mxu1 }
 0x645   : > { %9186 = vst [vmem:[%s13773_s26 + $0x10] sm:$0xff] %v10428_v12  ;;  %v8615_v21 = vadd.f32 %v8614_v8, %v12569_v14  ;;  %v8656_v9 = vadd.f32 %v8655_v33, %v12569_v14  ;;  %v8616_v61 = vpop.f32.mrb[206].mxu0  ;;  %v8657_v53 = vpop.f32.mrb[206].mxu1 }
 0x646   : > { %9187 = vst [vmem:[%s13773_s26 + $0x18] sm:$0xff] %v10429_v24  ;;  %11476 = vrsqrt.f32 %v8613_v31  ;;  %v8617_v2 = vpop.f32.mrb[207].mxu0  ;;  %v8658_v50 = vpop.f32.mrb[207].mxu1 }
 0x647   : > { %11478 = vrsqrt.f32 %v8654_v27 }
 0x648   : > { %11480 = vrsqrt.f32 %v8615_v21 }
 0x649   : > { %11482 = vrsqrt.f32 %v8656_v9 }
 0x650   : > { %v11477_v25 = vpop.eup %11476 }
 0x651   : > { %v11479_v59 = vpop.eup %11478  ;;  %v9024_v5 = vmul.f32 %v11477_v25, %v13611_v47 }
 0x652   : > { %v11481_v1 = vpop.eup %11480  ;;  %v9026_v0 = vmul.f32 %v11479_v59, %v13614_v32 }
 0x653   : > { %v11483_v35 = vpop.eup %11482  ;;  %v9052_v16 = vmax.f32 %v13414_v17, %v9024_v5  ;;  %v9025_v56 = vmul.f32 %v11481_v1, %v13617_v20 }
 0x654   : > { %v9054_v34 = vmax.f32 %v13420_v36, %v9026_v0  ;;  %v9027_v60 = vmul.f32 %v11483_v35, %v13620_v57 }
 0x655   : > { %v9053_v49 = vmax.f32 %v13426_v58, %v9025_v56 }
 0x656   : > { %v9055_v37 = vmax.f32 %v13431_v4, %v9027_v60 }
 0x657   : > { %v10430_v39 = vpack.c.bf16 %v9053_v49, %v9052_v16  ;;  %v8694_v47 = vpop.f32.mrb[208].mxu0  ;;  %v8735_v11 = vpop.f32.mrb[208].mxu1 }
 0x658   : > { %v10431_v15 = vpack.c.bf16 %v9055_v37, %v9054_v34  ;;  %v8695_v32 = vadd.f32 %v8694_v47, %v12569_v14  ;;  %v8736_v22 = vadd.f32 %v8735_v11, %v12569_v14  ;;  %v8696_v17 = vpop.f32.mrb[209].mxu0  ;;  %v8737_v51 = vpop.f32.mrb[209].mxu1 }
 0x659   : > { %9188 = vst [vmem:[%s13773_s26 + $0x20] sm:$0xff] %v10430_v39  ;;  %v8697_v36 = vadd.f32 %v8696_v17, %v12569_v14  ;;  %v8738_v20 = vadd.f32 %v8737_v51, %v12569_v14  ;;  %v8698_v57 = vpop.f32.mrb[210].mxu0  ;;  %v8739_v29 = vpop.f32.mrb[210].mxu1 }
 0x65a   : > { %9189 = vst [vmem:[%s13773_s26 + $0x28] sm:$0xff] %v10431_v15  ;;  %11484 = vrsqrt.f32 %v8695_v32  ;;  %v8699_v58 = vpop.f32.mrb[211].mxu0  ;;  %v8740_v4 = vpop.f32.mrb[211].mxu1 }
 0x65b   : > { %11486 = vrsqrt.f32 %v8736_v22 }
 0x65c   : > { %11488 = vrsqrt.f32 %v8697_v36 }
 0x65d   : > { %11490 = vrsqrt.f32 %v8738_v20 }
 0x664   : > { %v11485_v12 = vpop.eup %11484 }
 0x665   : > { %v11487_v46 = vpop.eup %11486  ;;  %v9028_v28 = vmul.f32 %v11485_v12, %v13641_v44 }
 0x666   : > { %v11489_v24 = vpop.eup %11488  ;;  %v9030_v31 = vmul.f32 %v11487_v46, %v13644_v48 }
 0x667   : > { %v11491_v27 = vpop.eup %11490  ;;  %v9056_v8 = vmax.f32 %v13442_v30, %v9028_v28  ;;  %v9029_v33 = vmul.f32 %v11489_v24, %v13647_v55 }
 0x668   : > { %v9058_v21 = vmax.f32 %v13448_v43, %v9030_v31  ;;  %v9031_v9 = vmul.f32 %v11491_v27, %v13650_v38 }
 0x669   : > { %v9057_v61 = vmax.f32 %v13454_v23, %v9029_v33 }
 0x66a   : > { %v9059_v53 = vmax.f32 %v13459_v52, %v9031_v9 }
 0x66b   : > { %v10432_v2 = vpack.c.bf16 %v9057_v61, %v9056_v8  ;;  %v8776_v44 = vpop.f32.mrb[212].mxu0  ;;  %v8817_v50 = vpop.f32.mrb[212].mxu1  ;;  %v14144_v8 = vld [vmem:[#allocation27_spill] sm:$0xff] }
 0x66c   : > { %v10433_v25 = vpack.c.bf16 %v9059_v53, %v9058_v21  ;;  %v8777_v48 = vadd.f32 %v8776_v44, %v12569_v14  ;;  %v8818_v59 = vadd.f32 %v8817_v50, %v12569_v14  ;;  %v8778_v30 = vpop.f32.mrb[213].mxu0  ;;  %v8819_v5 = vpop.f32.mrb[213].mxu1  ;;  %v14145_v21 = vld [vmem:[#allocation3_spill] sm:$0xff] }
 0x66d   : > { %9190 = vst [vmem:[%s13773_s26 + $0x30] sm:$0xff] %v10432_v2  ;;  %v8779_v43 = vadd.f32 %v8778_v30, %v12569_v14  ;;  %v8820_v55 = vadd.f32 %v8819_v5, %v12569_v14  ;;  %v8780_v38 = vpop.f32.mrb[214].mxu0  ;;  %v8821_v1 = vpop.f32.mrb[214].mxu1 }
 0x66e   : > { %9191 = vst [vmem:[%s13773_s26 + $0x38] sm:$0xff] %v10433_v25  ;;  %11492 = vrsqrt.f32 %v8777_v48  ;;  %v8781_v23 = vpop.f32.mrb[215].mxu0  ;;  %v8822_v52 = vpop.f32.mrb[215].mxu1  ;;  %v14146_v38 = vld [vmem:[#allocation36_spill] sm:$0xff] }
 0x66f   : > { %11494 = vrsqrt.f32 %v8818_v59 }
 0x670   : > { %11496 = vrsqrt.f32 %v8779_v43 }
 0x671   : > { %11498 = vrsqrt.f32 %v8820_v55 }
 0x678   : > { %v11493_v0 = vpop.eup %11492 }
 0x679   : > { %v11495_v35 = vpop.eup %11494  ;;  %v9032_v16 = vmul.f32 %v11493_v0, %v13671_v7  ;;  %v14148_v0 = vld [vmem:[#allocation18_spill] sm:$0xff] }
 0x67a   : > { %v11497_v56 = vpop.eup %11496  ;;  %v9034_v34 = vmul.f32 %v11495_v35, %v13674_v13 }
 0x67b   : > { %v11499_v60 = vpop.eup %11498  ;;  %v9060_v49 = vmax.f32 %v13470_v63, %v9032_v16  ;;  %v9033_v37 = vmul.f32 %v11497_v56, %v13677_v42  ;;  %v14149_v16 = vld [vmem:[#allocation28_spill] sm:$0xff] }
 0x67c   : > { %v9062_v39 = vmax.f32 %v13476_v6, %v9034_v34  ;;  %v9035_v47 = vmul.f32 %v11499_v60, %v13680_v62  ;;  %v14150_v34 = vld [vmem:[#allocation29_spill] sm:$0xff] }
 0x67d   : > { %v9061_v11 = vmax.f32 %v13482_v41, %v9033_v37 }
 0x67e   : > { %v9063_v15 = vmax.f32 %v13487_v3, %v9035_v47 }
 0x67f   : > { %v10434_v32 = vpack.c.bf16 %v9061_v11, %v9060_v49  ;;  %v8858_v7 = vpop.f32.mrb[216].mxu0  ;;  %v8899_v22 = vpop.f32.mrb[216].mxu1  ;;  %v14151_v49 = vld [vmem:[#allocation4_spill] sm:$0xff] }
 0x680   : > { %v10435_v17 = vpack.c.bf16 %v9063_v15, %v9062_v39  ;;  %v8859_v13 = vadd.f32 %v8858_v7, %v12569_v14  ;;  %v8900_v51 = vadd.f32 %v8899_v22, %v12569_v14  ;;  %v8860_v63 = vpop.f32.mrb[217].mxu0  ;;  %v8901_v36 = vpop.f32.mrb[217].mxu1  ;;  %v14152_v39 = vld [vmem:[#allocation13_spill] sm:$0xff] }
 0x681   : > { %9192 = vst [vmem:[%s13773_s26 + $0x40] sm:$0xff] %v10434_v32  ;;  %v8861_v6 = vadd.f32 %v8860_v63, %v12569_v14  ;;  %v8902_v42 = vadd.f32 %v8901_v36, %v12569_v14  ;;  %v8862_v62 = vpop.f32.mrb[218].mxu0  ;;  %v8903_v20 = vpop.f32.mrb[218].mxu1 }
 0x682   : > { %9193 = vst [vmem:[%s13773_s26 + $0x48] sm:$0xff] %v10435_v17  ;;  %11500 = vrsqrt.f32 %v8859_v13  ;;  %v8863_v41 = vpop.f32.mrb[219].mxu0  ;;  %v8904_v3 = vpop.f32.mrb[219].mxu1 }
 0x683   : > { %11502 = vrsqrt.f32 %v8900_v51 }
 0x684   : > { %11504 = vrsqrt.f32 %v8861_v6 }
 0x685   : > { %11506 = vrsqrt.f32 %v8902_v42 }
 0x68c   : > { %v11501_v57 = vpop.eup %11500 }
 0x68d   : > { %v11503_v29 = vpop.eup %11502  ;;  %v9036_v58 = vmul.f32 %v11501_v57, %v13701_v18 }
 0x68e   : > { %v11505_v4 = vpop.eup %11504  ;;  %v9038_v12 = vmul.f32 %v11503_v29, %v13704_v19 }
 0x68f   : > { %v11507_v46 = vpop.eup %11506  ;;  %v9064_v28 = vmax.f32 %v13498_v26, %v9036_v58  ;;  %v9037_v24 = vmul.f32 %v11505_v4, %v13707_v10 }
 0x690   : > { %v9066_v31 = vmax.f32 %v13504_v40, %v9038_v12  ;;  %v9039_v27 = vmul.f32 %v11507_v46, %v13710_v45 }
 0x691   : > { %v9065_v33 = vmax.f32 %v14144_v8, %v9037_v24 }
 0x692   : > { %v9067_v9 = vmax.f32 %v14145_v21, %v9039_v27 }
 0x693   : > { %v10436_v61 = vpack.c.bf16 %v9065_v33, %v9064_v28  ;;  %v8940_v18 = vpop.f32.mrb[220].mxu0  ;;  %v8981_v53 = vpop.f32.mrb[220].mxu1 }
 0x694   : > { %v10437_v2 = vpack.c.bf16 %v9067_v9, %v9066_v31  ;;  %v8941_v19 = vadd.f32 %v8940_v18, %v12569_v14  ;;  %v8982_v44 = vadd.f32 %v8981_v53, %v12569_v14  ;;  %v8942_v26 = vpop.f32.mrb[221].mxu0  ;;  %v8983_v50 = vpop.f32.mrb[221].mxu1 }
 0x695   : > { %9194 = vst [vmem:[%s13773_s26 + $0x50] sm:$0xff] %v10436_v61  ;;  %v8943_v40 = vadd.f32 %v8942_v26, %v12569_v14  ;;  %v8984_v10 = vadd.f32 %v8983_v50, %v12569_v14  ;;  %v8944_v45 = vpop.f32.mrb[222].mxu0  ;;  %v8985_v25 = vpop.f32.mrb[222].mxu1  ;;  %v14147_v14 = vld [vmem:[#allocation17_spill] sm:$0xff] }
 0x696   : > { %9195 = vst [vmem:[%s13773_s26 + $0x58] sm:$0xff] %v10437_v2  ;;  %11508 = vrsqrt.f32 %v8941_v19  ;;  %v8945_v48 = vpop.f32.mrb[223].mxu0  ;;  %v8986_v59 = vpop.f32.mrb[223].mxu1 }
 0x697   : > { %11510 = vrsqrt.f32 %v8982_v44 }
 0x698   : > { %11512 = vrsqrt.f32 %v8943_v40 }
 0x699   : > { %11514 = vrsqrt.f32 %v8984_v10 }
 0x6a0   : > { %v11509_v30 = vpop.eup %11508 }
 0x6a1   : > { %v11511_v5 = vpop.eup %11510  ;;  %v9040_v43 = vmul.f32 %v11509_v30, %v13731_v54 }
 0x6a2   : > { %v11513_v55 = vpop.eup %11512  ;;  %v9042_v1 = vmul.f32 %v11511_v5, %v14146_v38 }
 0x6a3   : > { %v11515_v23 = vpop.eup %11514  ;;  %v9068_v52 = vmax.f32 %v14147_v14, %v9040_v43  ;;  %v9041_v35 = vmul.f32 %v11513_v55, %v14148_v0 }
 0x6a4   : > { %v9070_v56 = vmax.f32 %v14149_v16, %v9042_v1  ;;  %v9043_v60 = vmul.f32 %v11515_v23, %v14150_v34 }
 0x6a5   : > { %v9069_v37 = vmax.f32 %v14151_v49, %v9041_v35 }
 0x6a6   : > { %v9071_v47 = vmax.f32 %v14152_v39, %v9043_v60 }
 0x6a7   : > { %v10438_v11 = vpack.c.bf16 %v9069_v37, %v9068_v52 }
 0x6a8   : > { %v10439_v54 = vpack.c.bf16 %v9071_v47, %v9070_v56 }
 0x6a9   : > { %9196 = vst [vmem:[%s13773_s26 + $0x60] sm:$0xff] %v10438_v11 }
 0x6aa   : > { %9199 = vst.msk [vmem:[%s13773_s26 + $0x68] sm:$0xff] %vm9198_vm4, %v10439_v54 }
 0x6ab PF: > { %s15_s18 = sadd.s32 1, %s11529_s18  }
 0x6ac   : > { %p12_p4 = scmp.ge.s32.totalorder %s15_s18, 6  }
 0x6ae   :  { %14 = sbr.rel (!%p12_p4) target bundleno = 1 (0x1), region = 73 }

// kernel: metric_model_forward.5
= control target key start
LH: loop header
LB: loop body
LE: loop exit
PB: predicated region body
PF: predicated region fallthrough
CT: control target
= control target key end

     0   :  { %s1835_s18 = smov 0   ;;  %s2132_s0 = inlined_call_operand.vmem [shape: bf16[4,4,200,225], index: 0, kind: input, shape index: {}]   ;;  %s2133_s1 = inlined_call_operand.vmem [shape: bf16[16,200], index: 1, kind: input, shape index: {}]   ;;  %s2134_s2 = inlined_call_operand.vmem [shape: f32[16,1], index: 2, kind: input, shape index: {}]   ;;  %s2135_s3 = inlined_call_operand.vmem [shape: bf16[16,16], index: 3, kind: input, shape index: {}]   ;;  %s2136_s4 = inlined_call_operand.vmem [shape: f32[16,1], index: 4, kind: input, shape index: {}]   ;;  %s2137_s5 = inlined_call_operand.vmem [shape: bf16[4,16,225], index: 5, kind: output, shape index: {}]  }
   0x1 LB: > { %s1387_s19 = sadd.s32 4294967295, %s1802_s18   ;;  %p1391_p0 = scmp.ge.s32.totalorder %s1802_s18, 1  ;;  %s1802_s18 = sphi %s1835_s18, %s15_s18  }
   0x2   : > { %p187_p1 = scmp.lt.s32.totalorder %s1802_s18, 5 }
   0x4   : > { %p188_p2 = pnand %p1391_p0, %p187_p1 }
   0x5   : > { %p215_p3 = scmp.lt.s32.totalorder (!%p188_p2), %s1387_s19, 3  ;;  %v1846_v0 = vld [vmem:[%s2133_s1 + $0x4] ss:$8 sps:$4 sm:$0xff] (!%p188_p2)   ;;  %vm399_vm0 = vcmask (!%p188_p2), 588800   ;;  %v1804_v2 = vmov (!%p188_p2), 0   ;;  %vm403_vm1 = vcmask (!%p188_p2), 1043456  }
   0x6   : > { %191 = sbr.rel (%p188_p2) target bundleno = 1136 (0x470), region = 40  ;;  %v253_v1 = vld [vmem:[%s2134_s2] sm:$0xff] (!%p188_p2)  ;;  %1424 = vmatprep.mubr.msk.bf16.mxu0 (!%p188_p2), %vm399_vm0, %v1846_v0  ;;  %1606 = vset.pattern.permute.xlu0 (!%p188_p2), %v1804_v2  ;;  %v254_v3 = vld [vmem:[%s2134_s2 + $0x8] sm:$0xff] (!%p188_p2)  ;;  %vm478_vm2 = vcmask (!%p188_p2), 130048   ;;  %vm1328_vm3 = vcmask (!%p188_p2), 793604  }
   0x7   : > { %257 = vperm.xlu0 (!%p188_p2), %1606, %v253_v1   ;;  %514 = vmatprep.mubr.bf16.mxu1 (!%p188_p2), %v1804_v2  ;;  %v1897_v32 = vld [vmem:[%s2133_s1] ss:$8 sps:$4 sm:$0xff] (!%p188_p2)   ;;  %vm1329_vm4 = vmor (!%p188_p2), %vm1328_vm3, %vm403_vm1 }
   0x8   : > { %1607 = vset.pattern.permute.xlu1 (!%p188_p2), %v1804_v2  ;;  %v461_v33 = vld [vmem:[%s2136_s4] sm:$0xff] (!%p188_p2)  ;;  %v462_v34 = vld [vmem:[%s2136_s4 + $0x8] sm:$0xff] (!%p188_p2) }
   0x9   : > { %465 = vperm.xlu1 (!%p188_p2), %1607, %v461_v33   ;;  %v1935_v52 = vld [vmem:[%s2135_s3] sm:$0xff] (!%p188_p2)  }
   0xb   : > { %262 = vperm.xlu0 (!%p188_p2), %1606, %v254_v3  }
   0xd   : > { %s2139_s19 = smov (!%p215_p3, %s1387_s19), 3  ;;  %470 = vperm.xlu1 %1607, %v462_v34  }
   0xe   : > { %s1596_s24 = smul.u32 800, %s2139_s19  ;;  %s1593_s13 = sshll.u32 %s2139_s19, 4 }
   0xf   : > { %s224_s16 = scalar_lea.vmem %s2137_s5, %s1593_s13 }
  0x10   : > { %s1865_s29 = scalar_lea.vmem %s2132_s0, %s1596_s24 }
  0x11   : > { %v1608_v4 = vld [vmem:[%s1865_s29 + $0x4] ss:$8 sps:$4 sm:$0xff]   ;;  %v1610_v5 = vld [vmem:[%s1865_s29] ss:$8 sps:$4 sm:$0xff]   ;;  %v1611_v6 = vld [vmem:[%s1865_s29 + $0x14] ss:$8 sps:$4 sm:$0xff]  }
  0x12   : > { %410 = vmatprep.subr.bf16.mxu0 %v1608_v4  ;;  %v1613_v7 = vld [vmem:[%s1865_s29 + $0x10] ss:$8 sps:$4 sm:$0xff]   ;;  %v1614_v8 = vld [vmem:[%s1865_s29 + $0x24] ss:$8 sps:$4 sm:$0xff]   ;;  %v1616_v9 = vld [vmem:[%s1865_s29 + $0x20] ss:$8 sps:$4 sm:$0xff]  }
  0x13   : > { %411 = vmatpush1.bf16.msra.mxu0 %v1610_v5  ;;  %v1617_v10 = vld [vmem:[%s1865_s29 + $0x34] ss:$8 sps:$4 sm:$0xff]   ;;  %v1619_v11 = vld [vmem:[%s1865_s29 + $0x30] ss:$8 sps:$4 sm:$0xff]   ;;  %v1620_v12 = vld [vmem:[%s1865_s29 + $0x44] ss:$8 sps:$4 sm:$0xff]  }
  0x14   : > { %412 = vmatprep.subr.bf16.mxu0 %v1611_v6  ;;  %v1622_v13 = vld [vmem:[%s1865_s29 + $0x40] ss:$8 sps:$4 sm:$0xff]   ;;  %v1623_v14 = vld [vmem:[%s1865_s29 + $0x54] ss:$8 sps:$4 sm:$0xff]   ;;  %v1625_v15 = vld [vmem:[%s1865_s29 + $0x50] ss:$8 sps:$4 sm:$0xff]  }
  0x15   : > { %v1626_v16 = vld [vmem:[%s1865_s29 + $0x64] ss:$8 sps:$4 sm:$0xff]   ;;  %v1628_v17 = vld [vmem:[%s1865_s29 + $0x60] ss:$8 sps:$4 sm:$0xff]   ;;  %v1629_v18 = vld [vmem:[%s1865_s29 + $0x74] ss:$8 sps:$4 sm:$0xff]  }
  0x16   : > { %v1631_v19 = vld [vmem:[%s1865_s29 + $0x70] ss:$8 sps:$4 sm:$0xff]   ;;  %v1632_v20 = vld [vmem:[%s1865_s29 + $0x84] ss:$8 sps:$4 sm:$0xff]   ;;  %v1634_v21 = vld [vmem:[%s1865_s29 + $0x80] ss:$8 sps:$4 sm:$0xff]  }
  0x17   : > { %413 = vmatpush1.bf16.msra.mxu0 %v1613_v7  ;;  %v1635_v22 = vld [vmem:[%s1865_s29 + $0x94] ss:$8 sps:$4 sm:$0xff]   ;;  %v1637_v23 = vld [vmem:[%s1865_s29 + $0x90] ss:$8 sps:$4 sm:$0xff]   ;;  %v1638_v24 = vld [vmem:[%s1865_s29 + $0xa4] ss:$8 sps:$4 sm:$0xff]  }
  0x18   : > { %414 = vmatprep.subr.bf16.mxu0 %v1614_v8  ;;  %v1640_v25 = vld [vmem:[%s1865_s29 + $0xa0] ss:$8 sps:$4 sm:$0xff]   ;;  %v1641_v26 = vld [vmem:[%s1865_s29 + $0xb4] ss:$8 sps:$4 sm:$0xff]   ;;  %v1643_v28 = vld [vmem:[%s1865_s29 + $0xb0] ss:$8 sps:$4 sm:$0xff]  }
  0x19   : > { %v252_v27 = vld [vmem:[%s1865_s29 + $0xc0] sm:$0xff]  ;;  %v1652_v50 = vld [vmem:[%s1865_s29 + $0xcc] ss:$8 sps:$4 sm:$0xff]   ;;  %v1650_v53 = vld [vmem:[%s1865_s29 + $0xc8] ss:$8 sps:$4 sm:$0xff]  }
  0x1a   : > { %v1422_v29 = vcombine.high %v252_v27, %v252_v27  ;;  %v1421_v30 = vcombine.low %v252_v27, %v252_v27  ;;  %v1655_v54 = vld [vmem:[%s1865_s29 + $0xdc] ss:$8 sps:$4 sm:$0xff]   ;;  %v1653_v55 = vld [vmem:[%s1865_s29 + $0xd8] ss:$8 sps:$4 sm:$0xff]   ;;  %v1658_v56 = vld [vmem:[%s1865_s29 + $0xec] ss:$8 sps:$4 sm:$0xff]  }
  0x1b   : > { %415 = vmatpush1.bf16.msra.mxu0 %v1616_v9  ;;  %v1656_v57 = vld [vmem:[%s1865_s29 + $0xe8] ss:$8 sps:$4 sm:$0xff]   ;;  %v1661_v58 = vld [vmem:[%s1865_s29 + $0xfc] ss:$8 sps:$4 sm:$0xff]   ;;  %v1659_v59 = vld [vmem:[%s1865_s29 + $0xf8] ss:$8 sps:$4 sm:$0xff]  }
  0x1c   : > { %416 = vmatprep.subr.bf16.mxu0 %v1617_v10  ;;  %v405_v31 = vsel %vm403_vm1, %v1421_v30, 0  ;;  %v1664_v60 = vld [vmem:[%s1865_s29 + $0x10c] ss:$8 sps:$4 sm:$0xff]   ;;  %v1662_v61 = vld [vmem:[%s1865_s29 + $0x108] ss:$8 sps:$4 sm:$0xff]  }
  0x1d   : > { %v1667_v62 = vld [vmem:[%s1865_s29 + $0x11c] ss:$8 sps:$4 sm:$0xff]   ;;  %v1665_v63 = vld [vmem:[%s1865_s29 + $0x118] ss:$8 sps:$4 sm:$0xff]   ;;  %v1670_v1 = vld [vmem:[%s1865_s29 + $0x12c] ss:$8 sps:$4 sm:$0xff]  }
  0x1e   : > { %v1668_v3 = vld [vmem:[%s1865_s29 + $0x128] ss:$8 sps:$4 sm:$0xff]   ;;  %v1673_v4 = vld [vmem:[%s1865_s29 + $0x13c] ss:$8 sps:$4 sm:$0xff]   ;;  %v1671_v5 = vld [vmem:[%s1865_s29 + $0x138] ss:$8 sps:$4 sm:$0xff]  }
  0x1f   : > { %417 = vmatpush1.bf16.msra.mxu0 %v1619_v11  ;;  %v1676_v6 = vld [vmem:[%s1865_s29 + $0x14c] ss:$8 sps:$4 sm:$0xff]   ;;  %v1674_v7 = vld [vmem:[%s1865_s29 + $0x148] ss:$8 sps:$4 sm:$0xff]   ;;  %v1679_v8 = vld [vmem:[%s1865_s29 + $0x15c] ss:$8 sps:$4 sm:$0xff]  }
  0x20   : > { %418 = vmatprep.subr.bf16.mxu0 %v1620_v12  ;;  %v1677_v9 = vld [vmem:[%s1865_s29 + $0x158] ss:$8 sps:$4 sm:$0xff]   ;;  %v1682_v10 = vld [vmem:[%s1865_s29 + $0x16c] ss:$8 sps:$4 sm:$0xff]   ;;  %v1680_v11 = vld [vmem:[%s1865_s29 + $0x168] ss:$8 sps:$4 sm:$0xff]  }
  0x21   : > { %v1685_v12 = vld [vmem:[%s1865_s29 + $0x17c] ss:$8 sps:$4 sm:$0xff]   ;;  %v1700_v27 = vld [vmem:[%s1865_s29 + $0x1d0] ss:$8 sps:$4 sm:$0xff]   ;;  %v1709_v34 = vld [vmem:[%s1865_s29 + $0x200] ss:$8 sps:$4 sm:$0xff]  }
  0x22   : > { %v1708_v30 = vld [vmem:[%s1865_s29 + $0x1f4] ss:$8 sps:$4 sm:$0xff]   ;;  %v1711_v33 = vld [vmem:[%s1865_s29 + $0x204] ss:$8 sps:$4 sm:$0xff]  }
  0x23   : > { %419 = vmatpush1.bf16.msra.mxu0 %v1622_v13  ;;  %v1451_v13 = vld [vmem:[%s1865_s29 + $0x188] sm:$0xff] }
  0x24   : > { %420 = vmatprep.subr.bf16.mxu0 %v1623_v14  ;;  %v1683_v14 = vld [vmem:[%s1865_s29 + $0x178] ss:$8 sps:$4 sm:$0xff]  }
  0x27   : > { %421 = vmatpush1.bf16.msra.mxu0 %v1625_v15  ;;  %v1477_v15 = vcombine.high %v1451_v13, %v1451_v13 }
  0x28   : > { %422 = vmatprep.subr.bf16.mxu0 %v1626_v16  ;;  %v1476_v16 = vcombine.low %v1451_v13, %v1451_v13 }
  0x2b   : > { %423 = vmatpush1.bf16.msra.mxu0 %v1628_v17  ;;  %v685_v17 = vsel %vm403_vm1, %v1476_v16, 0 }
  0x2c   : > { %424 = vmatprep.subr.bf16.mxu0 %v1629_v18  ;;  %v1690_v18 = vld [vmem:[%s1865_s29 + $0x194] ss:$8 sps:$4 sm:$0xff]  }
  0x2f   : > { %425 = vmatpush1.bf16.msra.mxu0 %v1631_v19  ;;  %v1688_v19 = vld [vmem:[%s1865_s29 + $0x190] ss:$8 sps:$4 sm:$0xff]  }
  0x30   : > { %426 = vmatprep.subr.bf16.mxu0 %v1632_v20  ;;  %v1693_v20 = vld [vmem:[%s1865_s29 + $0x1a4] ss:$8 sps:$4 sm:$0xff]  }
  0x33   : > { %427 = vmatpush1.bf16.msra.mxu0 %v1634_v21  ;;  %v1691_v21 = vld [vmem:[%s1865_s29 + $0x1a0] ss:$8 sps:$4 sm:$0xff]  }
  0x34   : > { %428 = vmatprep.subr.bf16.mxu0 %v1635_v22  ;;  %v1696_v22 = vld [vmem:[%s1865_s29 + $0x1b4] ss:$8 sps:$4 sm:$0xff]  }
  0x37   : > { %429 = vmatpush1.bf16.msra.mxu0 %v1637_v23  ;;  %v1694_v23 = vld [vmem:[%s1865_s29 + $0x1b0] ss:$8 sps:$4 sm:$0xff]  }
  0x38   : > { %430 = vmatprep.subr.bf16.mxu0 %v1638_v24  ;;  %v1699_v24 = vld [vmem:[%s1865_s29 + $0x1c4] ss:$8 sps:$4 sm:$0xff]  }
  0x3b   : > { %431 = vmatpush1.bf16.msra.mxu0 %v1640_v25  ;;  %v1697_v25 = vld [vmem:[%s1865_s29 + $0x1c0] ss:$8 sps:$4 sm:$0xff]  }
  0x3c   : > { %432 = vmatprep.subr.bf16.mxu0 %v1641_v26  ;;  %v1702_v26 = vld [vmem:[%s1865_s29 + $0x1d4] ss:$8 sps:$4 sm:$0xff]  }
  0x3f   : > { %433 = vmatpush1.bf16.msra.mxu0 %v1643_v28  ;;  %v1705_v28 = vld [vmem:[%s1865_s29 + $0x1e4] ss:$8 sps:$4 sm:$0xff]  }
  0x40   : > { %1423 = vmatprep.subr.msk.bf16.mxu0 %vm403_vm1, %v1422_v29  ;;  %v1703_v29 = vld [vmem:[%s1865_s29 + $0x1e0] ss:$8 sps:$4 sm:$0xff]  }
  0x43   : > { %435 = vmatpush1.bf16.msra.mxu0 %v405_v31  ;;  %v1706_v31 = vld [vmem:[%s1865_s29 + $0x1f0] ss:$8 sps:$4 sm:$0xff]  }
  0x46   : > { %443 = vmatmul.mubr.bf16.vlgmr.msra.gmra.mrb[0].mxu0 %v1897_v32 }
  0x47   : > { %771 = vmatprep.mubr.bf16.mxu0 %v1804_v2 }
  0x86   : > { %v1907_v35 = vpop.permute.xlu0 %257 }
  0x8a   : > { %v1909_v38 = vpop.permute.xlu0 %262 }
 0x119   : > { %v444_v36 = vpop.f32.mrb[0].mxu0 }
 0x11a   : > { %v446_v37 = vpop.f32.mrb[1].mxu0  ;;  %v1915_v41 = vadd.f32 %v444_v36, %v1907_v35  ;;  %v1714_v36 = vld [vmem:[%s1865_s29 + $0x214] ss:$8 sps:$4 sm:$0xff]  }
 0x11b   : > { %v1912_v39 = vadd.f32 %v446_v37, %v1907_v35  ;;  %v448_v40 = vpop.f32.mrb[2].mxu0  ;;  %v1712_v37 = vld [vmem:[%s1865_s29 + $0x210] ss:$8 sps:$4 sm:$0xff]  }
 0x11c   : > { %v1918_v42 = vadd.f32 %v448_v40, %v1909_v38  ;;  %v450_v43 = vpop.f32.mrb[3].mxu0  ;;  %v453_v48 = vmul.f32 %v1915_v41, %v1915_v41  ;;  %v1717_v40 = vld [vmem:[%s1865_s29 + $0x224] ss:$8 sps:$4 sm:$0xff]  }
 0x11d   : > { %v1921_v44 = vadd.f32 %v450_v43, %v1909_v38  ;;  %v454_v46 = vmul.f32 %v1912_v39, %v1912_v39  ;;  %v1715_v43 = vld [vmem:[%s1865_s29 + $0x220] ss:$8 sps:$4 sm:$0xff]  }
 0x11e   : > { %v455_v45 = vmul.f32 %v1918_v42, %v1918_v42 }
 0x11f   : > { %v456_v47 = vmul.f32 %v1921_v44, %v1921_v44 }
 0x120   : > { %v457_v51 = vpack.c.bf16 %v455_v45, %v453_v48  ;;  %v1720_v45 = vld [vmem:[%s1865_s29 + $0x234] ss:$8 sps:$4 sm:$0xff]  }
 0x121   : > { %v458_v49 = vpack.c.bf16 %v456_v47, %v454_v46  ;;  %v1718_v46 = vld [vmem:[%s1865_s29 + $0x230] ss:$8 sps:$4 sm:$0xff]   ;;  %v1723_v47 = vld [vmem:[%s1865_s29 + $0x244] ss:$8 sps:$4 sm:$0xff]  }
 0x122   : > { %v1505_v48 = vld [vmem:[%s1865_s29 + $0x250] sm:$0xff] }
 0x123   : > { %482 = vmatprep.subr.bf16.mxu1 %v458_v49  ;;  %v1721_v49 = vld [vmem:[%s1865_s29 + $0x240] ss:$8 sps:$4 sm:$0xff]  }
 0x124   : > { %483 = vmatpush1.bf16.msra.mxu1 %v457_v51  ;;  %v1530_v51 = vcombine.low %v1505_v48, %v1505_v48 }
 0x125   : > { %690 = vmatprep.subr.bf16.mxu1 %v1652_v50  ;;  %v1531_v50 = vcombine.high %v1505_v48, %v1505_v48  ;;  %v1753_v48 = vld [vmem:[%s1865_s29 + $0x2e8] ss:$8 sps:$4 sm:$0xff]  }
 0x127   : > { %1426 = vmatmul.mubr.msk.bf16.vlgmr.msra.gmra.mrb[0].mxu1 %vm478_vm2, %v1935_v52 }
 0x128   : > { %691 = vmatpush1.bf16.msra.mxu1 %v1650_v53  ;;  %1479 = vmatprep.mubr.msk.bf16.mxu1 %vm399_vm0, %v1846_v0  ;;  %v946_v53 = vsel %vm403_vm1, %v1530_v51, 0  ;;  %v1761_v51 = vld [vmem:[%s1865_s29 + $0x30c] ss:$8 sps:$4 sm:$0xff]  }
 0x129   : > { %692 = vmatprep.subr.bf16.mxu1 %v1655_v54 }
 0x12c   : > { %693 = vmatpush1.bf16.msra.mxu1 %v1653_v55 }
 0x12d   : > { %694 = vmatprep.subr.bf16.mxu1 %v1658_v56 }
 0x130   : > { %695 = vmatpush1.bf16.msra.mxu1 %v1656_v57 }
 0x131   : > { %696 = vmatprep.subr.bf16.mxu1 %v1661_v58 }
 0x134   : > { %697 = vmatpush1.bf16.msra.mxu1 %v1659_v59 }
 0x135   : > { %698 = vmatprep.subr.bf16.mxu1 %v1664_v60 }
 0x138   : > { %699 = vmatpush1.bf16.msra.mxu1 %v1662_v61 }
 0x139   : > { %700 = vmatprep.subr.bf16.mxu1 %v1667_v62 }
 0x13c   : > { %701 = vmatpush1.bf16.msra.mxu1 %v1665_v63 }
 0x13d   : > { %702 = vmatprep.subr.bf16.mxu1 %v1670_v1 }
 0x140   : > { %703 = vmatpush1.bf16.msra.mxu1 %v1668_v3 }
 0x141   : > { %704 = vmatprep.subr.bf16.mxu1 %v1673_v4 }
 0x144   : > { %705 = vmatpush1.bf16.msra.mxu1 %v1671_v5 }
 0x145   : > { %706 = vmatprep.subr.bf16.mxu1 %v1676_v6 }
 0x148   : > { %707 = vmatpush1.bf16.msra.mxu1 %v1674_v7 }
 0x149   : > { %708 = vmatprep.subr.bf16.mxu1 %v1679_v8 }
 0x14c   : > { %709 = vmatpush1.bf16.msra.mxu1 %v1677_v9 }
 0x14d   : > { %710 = vmatprep.subr.bf16.mxu1 %v1682_v10 }
 0x150   : > { %711 = vmatpush1.bf16.msra.mxu1 %v1680_v11 }
 0x151   : > { %712 = vmatprep.subr.bf16.mxu1 %v1685_v12 }
 0x154   : > { %713 = vmatpush1.bf16.msra.mxu1 %v1683_v14 }
 0x155   : > { %1478 = vmatprep.subr.msk.bf16.mxu1 %vm403_vm1, %v1477_v15 }
 0x158   : > { %715 = vmatpush1.bf16.msra.mxu1 %v685_v17 }
 0x159   : > { %951 = vmatprep.subr.bf16.mxu1 %v1690_v18 }
 0x15b   : > { %723 = vmatmul.mubr.bf16.vlgmr.msra.gmra.mrb[4].mxu1 %v1897_v32 }
 0x15c   : > { %952 = vmatpush1.bf16.msra.mxu1 %v1688_v19  ;;  %1533 = vmatprep.mubr.msk.bf16.mxu1 %vm399_vm0, %v1846_v0 }
 0x15d   : > { %953 = vmatprep.subr.bf16.mxu1 %v1693_v20 }
 0x160   : > { %954 = vmatpush1.bf16.msra.mxu1 %v1691_v21 }
 0x161   : > { %955 = vmatprep.subr.bf16.mxu1 %v1696_v22  ;;  %v1728_v22 = vld [vmem:[%s1865_s29 + $0x25c] ss:$8 sps:$4 sm:$0xff]  }
 0x164   : > { %956 = vmatpush1.bf16.msra.mxu1 %v1694_v23 }
 0x165   : > { %957 = vmatprep.subr.bf16.mxu1 %v1699_v24  ;;  %v1726_v24 = vld [vmem:[%s1865_s29 + $0x258] ss:$8 sps:$4 sm:$0xff]  }
 0x168   : > { %958 = vmatpush1.bf16.msra.mxu1 %v1697_v25  ;;  %v1731_v25 = vld [vmem:[%s1865_s29 + $0x26c] ss:$8 sps:$4 sm:$0xff]  }
 0x169   : > { %959 = vmatprep.subr.bf16.mxu1 %v1702_v26  ;;  %v1729_v26 = vld [vmem:[%s1865_s29 + $0x268] ss:$8 sps:$4 sm:$0xff]  }
 0x16c   : > { %960 = vmatpush1.bf16.msra.mxu1 %v1700_v27  ;;  %v1734_v27 = vld [vmem:[%s1865_s29 + $0x27c] ss:$8 sps:$4 sm:$0xff]  }
 0x16d   : > { %961 = vmatprep.subr.bf16.mxu1 %v1705_v28  ;;  %v1732_v28 = vld [vmem:[%s1865_s29 + $0x278] ss:$8 sps:$4 sm:$0xff]  }
 0x170   : > { %962 = vmatpush1.bf16.msra.mxu1 %v1703_v29  ;;  %v1737_v29 = vld [vmem:[%s1865_s29 + $0x28c] ss:$8 sps:$4 sm:$0xff]  }
 0x171   : > { %963 = vmatprep.subr.bf16.mxu1 %v1708_v30  ;;  %v1735_v30 = vld [vmem:[%s1865_s29 + $0x288] ss:$8 sps:$4 sm:$0xff]  }
 0x174   : > { %964 = vmatpush1.bf16.msra.mxu1 %v1706_v31  ;;  %v1740_v31 = vld [vmem:[%s1865_s29 + $0x29c] ss:$8 sps:$4 sm:$0xff]  }
 0x175   : > { %965 = vmatprep.subr.bf16.mxu1 %v1711_v33  ;;  %v1738_v33 = vld [vmem:[%s1865_s29 + $0x298] ss:$8 sps:$4 sm:$0xff]  }
 0x178   : > { %966 = vmatpush1.bf16.msra.mxu1 %v1709_v34  ;;  %v1741_v34 = vld [vmem:[%s1865_s29 + $0x2a8] ss:$8 sps:$4 sm:$0xff]  }
 0x179   : > { %967 = vmatprep.subr.bf16.mxu1 %v1714_v36  ;;  %v1746_v36 = vld [vmem:[%s1865_s29 + $0x2bc] ss:$8 sps:$4 sm:$0xff]  }
 0x17c   : > { %968 = vmatpush1.bf16.msra.mxu1 %v1712_v37  ;;  %v1744_v37 = vld [vmem:[%s1865_s29 + $0x2b8] ss:$8 sps:$4 sm:$0xff]  }
 0x17d   : > { %969 = vmatprep.subr.bf16.mxu1 %v1717_v40  ;;  %v1749_v40 = vld [vmem:[%s1865_s29 + $0x2cc] ss:$8 sps:$4 sm:$0xff]  }
 0x180   : > { %970 = vmatpush1.bf16.msra.mxu1 %v1715_v43  ;;  %v1747_v43 = vld [vmem:[%s1865_s29 + $0x2c8] ss:$8 sps:$4 sm:$0xff]  }
 0x181   : > { %971 = vmatprep.subr.bf16.mxu1 %v1720_v45  ;;  %v1752_v45 = vld [vmem:[%s1865_s29 + $0x2dc] ss:$8 sps:$4 sm:$0xff]  }
 0x184   : > { %972 = vmatpush1.bf16.msra.mxu1 %v1718_v46  ;;  %v1750_v46 = vld [vmem:[%s1865_s29 + $0x2d8] ss:$8 sps:$4 sm:$0xff]  }
 0x185   : > { %973 = vmatprep.subr.bf16.mxu1 %v1723_v47  ;;  %v1755_v47 = vld [vmem:[%s1865_s29 + $0x2ec] ss:$8 sps:$4 sm:$0xff]  }
 0x188   : > { %974 = vmatpush1.bf16.msra.mxu1 %v1721_v49  ;;  %v1758_v49 = vld [vmem:[%s1865_s29 + $0x2fc] ss:$8 sps:$4 sm:$0xff]  }
 0x189   : > { %1532 = vmatprep.subr.msk.bf16.mxu1 %vm403_vm1, %v1531_v50  ;;  %v1756_v50 = vld [vmem:[%s1865_s29 + $0x2f8] ss:$8 sps:$4 sm:$0xff]  }
 0x18c   : > { %976 = vmatpush1.bf16.msra.mxu1 %v946_v53  ;;  %v1559_v53 = vld [vmem:[%s1865_s29 + $0x318] sm:$0xff] }
 0x18f   : > { %984 = vmatmul.mubr.bf16.vlgmr.msra.gmra.mrb[8].mxu1 %v1897_v32 }
 0x190   : > { %1293 = vmatprep.mubr.bf16.mxu1 %v1804_v2 }
 0x1fa   : > { %v1999_v54 = vpop.f32.mrb[0].mxu1 }
 0x1fb   : > { %v2001_v55 = vpop.f32.mrb[1].mxu1 }
 0x1fc   : > { %v2003_v56 = vpop.f32.mrb[2].mxu1 }
 0x1fd   : > { %v2005_v57 = vpop.f32.mrb[3].mxu1 }
 0x22e   : > { %v724_v58 = vpop.f32.mrb[4].mxu1 }
 0x22f   : > { %v726_v59 = vpop.f32.mrb[5].mxu1  ;;  %v2011_v62 = vadd.f32 %v724_v58, %v1907_v35  ;;  %v1759_v58 = vld [vmem:[%s1865_s29 + $0x308] ss:$8 sps:$4 sm:$0xff]  }
 0x230   : > { %v2008_v60 = vadd.f32 %v726_v59, %v1907_v35  ;;  %v728_v61 = vpop.f32.mrb[6].mxu1  ;;  %v1585_v59 = vcombine.high %v1559_v53, %v1559_v53 }
 0x231   : > { %v2014_v63 = vadd.f32 %v728_v61, %v1909_v38  ;;  %v730_v1 = vpop.f32.mrb[7].mxu1  ;;  %v733_v7 = vmul.f32 %v2011_v62, %v2011_v62  ;;  %v1584_v61 = vcombine.low %v1559_v53, %v1559_v53 }
 0x232   : > { %v2017_v3 = vadd.f32 %v730_v1, %v1909_v38  ;;  %v734_v5 = vmul.f32 %v2008_v60, %v2008_v60 }
 0x233   : > { %v735_v4 = vmul.f32 %v2014_v63, %v2014_v63  ;;  %v1207_v1 = vsel %vm403_vm1, %v1584_v61, 0 }
 0x234   : > { %v736_v6 = vmul.f32 %v2017_v3, %v2017_v3 }
 0x235   : > { %v737_v9 = vpack.c.bf16 %v735_v4, %v733_v7  ;;  %v2082_v4 = vpop.permute.xlu1 %465 }
 0x236   : > { %v738_v8 = vpack.c.bf16 %v736_v6, %v734_v5  ;;  %v517_v6 = vadd.f32 %v1999_v54, %v2082_v4  ;;  %v519_v7 = vadd.f32 %v2001_v55, %v2082_v4 }
 0x238   : > { %739 = vmatprep.subr.bf16.mxu0 %v738_v8  ;;  %1764 = vrsqrt.f32 %v517_v6 }
 0x239   : > { %740 = vmatpush1.bf16.msra.mxu0 %v737_v9  ;;  %v2084_v5 = vpop.permute.xlu1 %470  ;;  %1766 = vrsqrt.f32 %v519_v7 }
 0x23a   : > { %v521_v8 = vadd.f32 %v2003_v56, %v2084_v5  ;;  %v523_v9 = vadd.f32 %v2005_v57, %v2084_v5 }
 0x23c   : > { %1480 = vmatmul.mubr.msk.bf16.vlgmr.msra.gmra.mrb[4].mxu0 %vm478_vm2, %v1935_v52  ;;  %1768 = vrsqrt.f32 %v521_v8 }
 0x23d   : > { %1032 = vmatprep.mubr.bf16.mxu0 %v1804_v2  ;;  %1770 = vrsqrt.f32 %v523_v9 }
 0x242   : > { %v1765_v57 = vpop.eup %1764 }
 0x262   : > { %v985_v10 = vpop.f32.mrb[8].mxu1 }
 0x263   : > { %v987_v11 = vpop.f32.mrb[9].mxu1  ;;  %v2034_v14 = vadd.f32 %v985_v10, %v1907_v35 }
 0x264   : > { %v2031_v12 = vadd.f32 %v987_v11, %v1907_v35  ;;  %v989_v13 = vpop.f32.mrb[10].mxu1 }
 0x265   : > { %v2037_v15 = vadd.f32 %v989_v13, %v1909_v38  ;;  %v991_v16 = vpop.f32.mrb[11].mxu1  ;;  %v994_v20 = vmul.f32 %v2034_v14, %v2034_v14 }
 0x266   : > { %v2040_v17 = vadd.f32 %v991_v16, %v1909_v38  ;;  %v995_v18 = vmul.f32 %v2031_v12, %v2031_v12 }
 0x267   : > { %v996_v2 = vmul.f32 %v2037_v15, %v2037_v15 }
 0x268   : > { %v997_v19 = vmul.f32 %v2040_v17, %v2040_v17 }
 0x269   : > { %v998_v23 = vpack.c.bf16 %v996_v2, %v994_v20  ;;  %v1767_v2 = vpop.eup %1766 }
 0x26a   : > { %v999_v21 = vpack.c.bf16 %v997_v19, %v995_v18  ;;  %v1769_v18 = vpop.eup %1768 }
 0x26b   : > { %v1771_v19 = vpop.eup %1770 }
 0x26c   : > { %1000 = vmatprep.subr.bf16.mxu0 %v999_v21 }
 0x26d   : > { %1001 = vmatpush1.bf16.msra.mxu0 %v998_v23 }
 0x26e   : > { %1212 = vmatprep.subr.bf16.mxu0 %v1728_v22  ;;  %v529_v22 = vmul.f32 %v1765_v57, %v1915_v41 }
 0x270   : > { %1534 = vmatmul.mubr.msk.bf16.vlgmr.msra.gmra.mrb[8].mxu0 %vm478_vm2, %v1935_v52 }
 0x271   : > { %1213 = vmatpush1.bf16.msra.mxu0 %v1726_v24  ;;  %1587 = vmatprep.mubr.msk.bf16.mxu0 %vm399_vm0, %v1846_v0  ;;  %v1743_v0 = vld [vmem:[%s1865_s29 + $0x2ac] ss:$8 sps:$4 sm:$0xff]  }
 0x272   : > { %1214 = vmatprep.subr.bf16.mxu0 %v1731_v25  ;;  %v530_v25 = vmul.f32 %v1767_v2, %v1912_v39 }
 0x275   : > { %1215 = vmatpush1.bf16.msra.mxu0 %v1729_v26 }
 0x276   : > { %1216 = vmatprep.subr.bf16.mxu0 %v1734_v27 }
 0x279   : > { %1217 = vmatpush1.bf16.msra.mxu0 %v1732_v28  ;;  %v531_v28 = vmul.f32 %v1769_v18, %v1918_v42 }
 0x27a   : > { %1218 = vmatprep.subr.bf16.mxu0 %v1737_v29 }
 0x27d   : > { %1219 = vmatpush1.bf16.msra.mxu0 %v1735_v30 }
 0x27e   : > { %1220 = vmatprep.subr.bf16.mxu0 %v1740_v31  ;;  %v532_v31 = vmul.f32 %v1771_v19, %v1921_v44 }
 0x281   : > { %1221 = vmatpush1.bf16.msra.mxu0 %v1738_v33 }
 0x282   : > { %1222 = vmatprep.subr.bf16.mxu0 %v1743_v0 }
 0x285   : > { %1223 = vmatpush1.bf16.msra.mxu0 %v1741_v34 }
 0x286   : > { %1224 = vmatprep.subr.bf16.mxu0 %v1746_v36 }
 0x289   : > { %1225 = vmatpush1.bf16.msra.mxu0 %v1744_v37 }
 0x28a   : > { %1226 = vmatprep.subr.bf16.mxu0 %v1749_v40 }
 0x28d   : > { %1227 = vmatpush1.bf16.msra.mxu0 %v1747_v43 }
 0x28e   : > { %1228 = vmatprep.subr.bf16.mxu0 %v1752_v45 }
 0x291   : > { %1229 = vmatpush1.bf16.msra.mxu0 %v1750_v46 }
 0x292   : > { %1230 = vmatprep.subr.bf16.mxu0 %v1755_v47 }
 0x295   : > { %1231 = vmatpush1.bf16.msra.mxu0 %v1753_v48 }
 0x296   : > { %1232 = vmatprep.subr.bf16.mxu0 %v1758_v49 }
 0x299   : > { %1233 = vmatpush1.bf16.msra.mxu0 %v1756_v50 }
 0x29a   : > { %1234 = vmatprep.subr.bf16.mxu0 %v1761_v51 }
 0x29d   : > { %1235 = vmatpush1.bf16.msra.mxu0 %v1759_v58 }
 0x29e   : > { %1586 = vmatprep.subr.msk.bf16.mxu0 %vm403_vm1, %v1585_v59 }
 0x2a1   : > { %1237 = vmatpush1.bf16.msra.mxu0 %v1207_v1 }
 0x2a4   : > { %1245 = vmatmul.mubr.bf16.vlgmr.msra.gmra.mrb[12].mxu0 %v1897_v32 }
 0x30f   : > { %v773_v10 = vpop.f32.mrb[4].mxu0 }
 0x310   : > { %v774_v32 = vadd.f32 %v773_v10, %v2082_v4  ;;  %v775_v11 = vpop.f32.mrb[5].mxu0 }
 0x311   : > { %v776_v13 = vadd.f32 %v775_v11, %v2082_v4  ;;  %v777_v54 = vpop.f32.mrb[6].mxu0 }
 0x312   : > { %1772 = vrsqrt.f32 %v774_v32  ;;  %v778_v55 = vadd.f32 %v777_v54, %v2084_v5  ;;  %v779_v16 = vpop.f32.mrb[7].mxu0 }
 0x313   : > { %1774 = vrsqrt.f32 %v776_v13  ;;  %v780_v56 = vadd.f32 %v779_v16, %v2084_v5 }
 0x314   : > { %1776 = vrsqrt.f32 %v778_v55 }
 0x315   : > { %1778 = vrsqrt.f32 %v780_v56 }
 0x31c   : > { %v1773_v20 = vpop.eup %1772 }
 0x31d   : > { %v1775_v21 = vpop.eup %1774  ;;  %v786_v23 = vmul.f32 %v1773_v20, %v2011_v62 }
 0x31e   : > { %v1777_v24 = vpop.eup %1776  ;;  %v787_v26 = vmul.f32 %v1775_v21, %v2008_v60 }
 0x31f   : > { %v1779_v27 = vpop.eup %1778  ;;  %v790_v29 = vmax.f32 %v529_v22, %v786_v23  ;;  %v788_v30 = vmul.f32 %v1777_v24, %v2014_v63 }
 0x320   : > { %v791_v33 = vmax.f32 %v530_v25, %v787_v26  ;;  %v789_v0 = vmul.f32 %v1779_v27, %v2017_v3 }
 0x321   : > { %v792_v34 = vmax.f32 %v531_v28, %v788_v30 }
 0x322   : > { %v793_v41 = vmax.f32 %v532_v31, %v789_v0 }
 0x343   : > { %v1034_v36 = vpop.f32.mrb[8].mxu0 }
 0x344   : > { %v1035_v62 = vadd.f32 %v1034_v36, %v2082_v4  ;;  %v1036_v37 = vpop.f32.mrb[9].mxu0 }
 0x345   : > { %v1037_v39 = vadd.f32 %v1036_v37, %v2082_v4  ;;  %v1038_v60 = vpop.f32.mrb[10].mxu0 }
 0x346   : > { %1780 = vrsqrt.f32 %v1035_v62  ;;  %v1039_v42 = vadd.f32 %v1038_v60, %v2084_v5  ;;  %v1040_v40 = vpop.f32.mrb[11].mxu0 }
 0x347   : > { %1782 = vrsqrt.f32 %v1037_v39  ;;  %v1041_v63 = vadd.f32 %v1040_v40, %v2084_v5 }
 0x348   : > { %1784 = vrsqrt.f32 %v1039_v42 }
 0x349   : > { %1786 = vrsqrt.f32 %v1041_v63 }
 0x350   : > { %v1781_v44 = vpop.eup %1780 }
 0x351   : > { %v1783_v3 = vpop.eup %1782  ;;  %v1047_v43 = vmul.f32 %v1781_v44, %v2034_v14 }
 0x352   : > { %v1785_v45 = vpop.eup %1784  ;;  %v1048_v46 = vmul.f32 %v1783_v3, %v2031_v12 }
 0x353   : > { %v1787_v47 = vpop.eup %1786  ;;  %v1051_v48 = vmax.f32 %v790_v29, %v1047_v43  ;;  %v1049_v49 = vmul.f32 %v1785_v45, %v2037_v15 }
 0x354   : > { %v1052_v50 = vmax.f32 %v791_v33, %v1048_v46  ;;  %v1050_v51 = vmul.f32 %v1787_v47, %v2040_v17 }
 0x355   : > { %v1053_v53 = vmax.f32 %v792_v34, %v1049_v49 }
 0x356   : > { %v1054_v58 = vmax.f32 %v793_v41, %v1050_v51 }
 0x377   : > { %v1246_v59 = vpop.f32.mrb[12].mxu0 }
 0x378   : > { %v1248_v61 = vpop.f32.mrb[13].mxu0  ;;  %v1247_v7 = vadd.f32 %v1246_v59, %v1907_v35 }
 0x379   : > { %v1249_v1 = vadd.f32 %v1248_v61, %v1907_v35  ;;  %v1250_v6 = vpop.f32.mrb[14].mxu0 }
 0x37a   : > { %v1251_v14 = vadd.f32 %v1250_v6, %v1909_v38  ;;  %v1252_v8 = vpop.f32.mrb[15].mxu0  ;;  %v1255_v32 = vmul.f32 %v1247_v7, %v1247_v7 }
 0x37b   : > { %v1253_v12 = vadd.f32 %v1252_v8, %v1909_v38  ;;  %v1256_v10 = vmul.f32 %v1249_v1, %v1249_v1 }
 0x37c   : > { %v1257_v9 = vmul.f32 %v1251_v14, %v1251_v14 }
 0x37d   : > { %v1258_v15 = vmul.f32 %v1253_v12, %v1253_v12 }
 0x37e   : > { %v1259_v17 = vpack.c.bf16 %v1257_v9, %v1255_v32 }
 0x37f   : > { %v1260_v11 = vpack.c.bf16 %v1258_v15, %v1256_v10 }
 0x381   : > { %1261 = vmatprep.subr.bf16.mxu1 %v1260_v11 }
 0x382   : > { %1262 = vmatpush1.bf16.msra.mxu1 %v1259_v17 }
 0x385   : > { %1588 = vmatmul.mubr.msk.bf16.vlgmr.msra.gmra.mrb[12].mxu1 %vm478_vm2, %v1935_v52 }
 0x458   : > { %v1295_v13 = vpop.f32.mrb[12].mxu1 }
 0x459   : > { %v1296_v35 = vadd.f32 %v1295_v13, %v2082_v4  ;;  %v1297_v54 = vpop.f32.mrb[13].mxu1 }
 0x45a   : > { %v1298_v55 = vadd.f32 %v1297_v54, %v2082_v4  ;;  %v1299_v16 = vpop.f32.mrb[14].mxu1 }
 0x45b   : > { %1788 = vrsqrt.f32 %v1296_v35  ;;  %v1300_v38 = vadd.f32 %v1299_v16, %v2084_v5  ;;  %v1301_v56 = vpop.f32.mrb[15].mxu1 }
 0x45c   : > { %1790 = vrsqrt.f32 %v1298_v55  ;;  %v1302_v57 = vadd.f32 %v1301_v56, %v2084_v5 }
 0x45d   : > { %1792 = vrsqrt.f32 %v1300_v38 }
 0x45e   : > { %1794 = vrsqrt.f32 %v1302_v57 }
 0x465   : > { %v1789_v2 = vpop.eup %1788 }
 0x466   : > { %v1791_v18 = vpop.eup %1790  ;;  %v1308_v52 = vmul.f32 %v1789_v2, %v1247_v7 }
 0x467   : > { %v1793_v19 = vpop.eup %1792  ;;  %v1309_v20 = vmul.f32 %v1791_v18, %v1249_v1 }
 0x468   : > { %v1795_v21 = vpop.eup %1794  ;;  %v1312_v22 = vmax.f32 %v1051_v48, %v1308_v52  ;;  %v1310_v4 = vmul.f32 %v1793_v19, %v1251_v14 }
 0x469   : > { %v1313_v23 = vmax.f32 %v1052_v50, %v1309_v20  ;;  %v1311_v24 = vmul.f32 %v1795_v21, %v1253_v12 }
 0x46a   : > { %v1314_v5 = vmax.f32 %v1053_v53, %v1310_v4 }
 0x46b   : > { %v1594_v25 = vpack.c.bf16 %v1313_v23, %v1312_v22  ;;  %v1315_v26 = vmax.f32 %v1054_v58, %v1311_v24 }
 0x46d   : > { %1330 = vst.msk [vmem:[%s224_s16] sm:$0xff] %vm1329_vm4, %v1594_v25  ;;  %v1595_v27 = vpack.c.bf16 %v1315_v26, %v1314_v5 }
 0x46f   : > { %1331 = vst.msk [vmem:[%s224_s16 + $0x8] sm:$0xff] %vm1329_vm4, %v1595_v27 }
 0x470 PF: > { %s15_s18 = sadd.s32 1, %s1802_s18  }
 0x471   : > { %p12_p4 = scmp.ge.s32.totalorder %s15_s18, 6  }
 0x473   :  { %14 = sbr.rel (!%p12_p4) target bundleno = 1 (0x1), region = 73 }

// kernel: metric_model_forward.6
= control target key start
LH: loop header
LB: loop body
LE: loop exit
PB: predicated region body
PF: predicated region fallthrough
CT: control target
= control target key end

     0   :  { %s2540_s18 = smov 0   ;;  %s3021_s0 = inlined_call_operand.vmem [shape: bf16[4,4,400,16], index: 0, kind: input, shape index: {}]   ;;  %s3022_s1 = inlined_call_operand.vmem [shape: bf16[32,400], index: 1, kind: input, shape index: {}]   ;;  %s3023_s2 = inlined_call_operand.vmem [shape: f32[32,1], index: 2, kind: input, shape index: {}]   ;;  %s3024_s3 = inlined_call_operand.vmem [shape: bf16[32,32], index: 3, kind: input, shape index: {}]   ;;  %s3025_s4 = inlined_call_operand.vmem [shape: f32[32,1], index: 4, kind: input, shape index: {}]   ;;  %s3026_s5 = inlined_call_operand.vmem [shape: bf16[4,32,16], index: 5, kind: output, shape index: {}]  }
   0x1 LB: > { %s1883_s19 = sadd.s32 4294967295, %s2507_s18   ;;  %p1887_p0 = scmp.ge.s32.totalorder %s2507_s18, 1  ;;  %s2507_s18 = sphi %s2540_s18, %s15_s18  }
   0x2   : > { %p187_p1 = scmp.lt.s32.totalorder %s2507_s18, 5 }
   0x4   : > { %p188_p2 = pnand %p1887_p0, %p187_p1 }
   0x5   : > { %p215_p3 = scmp.lt.s32.totalorder (!%p188_p2), %s1883_s19, 3  ;;  %v2551_v0 = vld [vmem:[%s3022_s1 + $0x4] ss:$16 sps:$4 sm:$0xff] (!%p188_p2)   ;;  %v2509_v1 = vmov (!%p188_p2), 0   ;;  %vm496_vm0 = vcmask (!%p188_p2), 130048   ;;  %v285_v4 = vld [vmem:[%s3023_s2 + $0x8] sm:$0xff] (!%p188_p2) }
   0x6   : > { %191 = sbr.rel (%p188_p2) target bundleno = 1327 (0x52f), region = 40  ;;  %552 = vmatprep.subr.bf16.mxu1 (!%p188_p2), %v2509_v1  ;;  %2348 = vset.pattern.permute.xlu0 (!%p188_p2), %v2509_v1  ;;  %v2561_v2 = vld [vmem:[%s3022_s1 + $0xc] ss:$16 sps:$4 sm:$0xff] (!%p188_p2)   ;;  %v284_v3 = vld [vmem:[%s3023_s2] sm:$0xff] (!%p188_p2)  ;;  %v286_v5 = vld [vmem:[%s3023_s2 + $0x10] sm:$0xff] (!%p188_p2)  ;;  %vm645_vm1 = vcmask (!%p188_p2), 261120  }
   0x7   : > { %535 = vmatprep.mubr.bf16.mxu0 (!%p188_p2), %v2551_v0  ;;  %2349 = vset.pattern.permute.xlu1 (!%p188_p2), %v2509_v1  ;;  %v287_v7 = vld [vmem:[%s3023_s2 + $0x18] sm:$0xff] (!%p188_p2)  ;;  %v611_v10 = vld [vmem:[%s3025_s4] sm:$0xff] (!%p188_p2)  ;;  %v613_v45 = vld [vmem:[%s3025_s4 + $0x10] sm:$0xff] (!%p188_p2)  ;;  %vm1823_vm2 = vcmask (!%p188_p2), 125952  }
   0x8   : > { %1924 = vmatprep.mubr.msk.bf16.mxu1 (!%p188_p2), %vm496_vm0, %v2561_v2  ;;  %290 = vperm.xlu0 (!%p188_p2), %2348, %v284_v3   ;;  %v2621_v32 = vld [vmem:[%s3022_s1] ss:$16 sps:$4 sm:$0xff] (!%p188_p2)   ;;  %v2626_v33 = vld [vmem:[%s3022_s1 + $0x24] ss:$16 sps:$4 sm:$0xff] (!%p188_p2)   ;;  %v2634_v36 = vld [vmem:[%s3022_s1 + $0x8] ss:$16 sps:$4 sm:$0xff] (!%p188_p2)  }
   0x9   : > { %300 = vperm.xlu1 (!%p188_p2), %2349, %v286_v5   ;;  %v2639_v37 = vld [vmem:[%s3022_s1 + $0x2c] ss:$16 sps:$4 sm:$0xff] (!%p188_p2)   ;;  %v2649_v40 = vld [vmem:[%s3022_s1 + $0x20] ss:$16 sps:$4 sm:$0xff] (!%p188_p2)   ;;  %v2657_v42 = vld [vmem:[%s3022_s1 + $0x28] ss:$16 sps:$4 sm:$0xff] (!%p188_p2)  }
   0xa   : > { %v612_v46 = vld [vmem:[%s3025_s4 + $0x8] sm:$0xff] (!%p188_p2)  ;;  %v614_v47 = vld [vmem:[%s3025_s4 + $0x18] sm:$0xff] (!%p188_p2)  ;;  %v2689_v58 = vld [vmem:[%s3024_s3] sm:$0xff] (!%p188_p2)  }
   0xc   : > { %295 = vperm.xlu0 (!%p188_p2), %2348, %v285_v4  }
   0xd   : > { %s3028_s19 = smov (!%p215_p3, %s1883_s19), 3  ;;  %305 = vperm.xlu1 %2349, %v287_v7  }
   0xe   : > { %s2338_s24 = smul.u32 800, %s3028_s19 }
  0x10   : > { %s2573_s29 = scalar_lea.vmem %s3021_s0, %s2338_s24  ;;  %617 = vperm.xlu0 %2348, %v611_v10  }
  0x11   : > { %v2350_v6 = vld [vmem:[%s2573_s29 + $0x40] sm:$0xff]   ;;  %v2353_v11 = vld [vmem:[%s2573_s29 + $0x48] sm:$0xff]   ;;  %v2356_v14 = vld [vmem:[%s2573_s29 + $0x50] sm:$0xff]   ;;  %622 = vperm.xlu1 %2349, %v612_v46  }
  0x12   : > { %v2351_v8 = vld [vmem:[%s2573_s29 + $0x80] sm:$0xff]   ;;  %2178 = vmatprep.subr.bf16.mxu0 %v2350_v6  ;;  %v2354_v12 = vld [vmem:[%s2573_s29 + $0x88] sm:$0xff]   ;;  %v2357_v15 = vld [vmem:[%s2573_s29 + $0x90] sm:$0xff]  }
  0x13   : > { %v2352_v9 = vld [vmem:[%s2573_s29] sm:$0xff]   ;;  %553 = vmatpush1.bf16.msra.mxu1 %v2351_v8  ;;  %v2355_v13 = vld [vmem:[%s2573_s29 + $0x8] sm:$0xff]   ;;  %v2358_v16 = vld [vmem:[%s2573_s29 + $0x10] sm:$0xff]  }
  0x14   : > { %2179 = vmatpush3.bf16.msra.mxu0 %v2352_v9  ;;  %554 = vmatprep.subr.bf16.mxu1 %v2509_v1  ;;  %v2359_v17 = vld [vmem:[%s2573_s29 + $0x58] sm:$0xff]   ;;  %v2362_v20 = vld [vmem:[%s2573_s29 + $0x60] sm:$0xff]   ;;  %v2365_v23 = vld [vmem:[%s2573_s29 + $0x68] sm:$0xff]  }
  0x15   : > { %2180 = vmatprep.subr.bf16.mxu0 %v2353_v11  ;;  %v2360_v18 = vld [vmem:[%s2573_s29 + $0x98] sm:$0xff]   ;;  %v2363_v21 = vld [vmem:[%s2573_s29 + $0xa0] sm:$0xff]   ;;  %v2366_v24 = vld [vmem:[%s2573_s29 + $0xa8] sm:$0xff]   ;;  %627 = vperm.xlu0 %2348, %v613_v45  }
  0x16   : > { %v2361_v19 = vld [vmem:[%s2573_s29 + $0x18] sm:$0xff]   ;;  %v2364_v22 = vld [vmem:[%s2573_s29 + $0x20] sm:$0xff]   ;;  %v2367_v25 = vld [vmem:[%s2573_s29 + $0x28] sm:$0xff]   ;;  %632 = vperm.xlu1 %2349, %v614_v47  }
  0x17   : > { %555 = vmatpush1.bf16.msra.mxu1 %v2354_v12  ;;  %v2368_v26 = vld [vmem:[%s2573_s29 + $0x70] sm:$0xff]   ;;  %v2371_v29 = vld [vmem:[%s2573_s29 + $0x78] sm:$0xff]   ;;  %v2377_v34 = vld [vmem:[%s2573_s29 + $0xc0] sm:$0xff]  }
  0x18   : > { %2181 = vmatpush3.bf16.msra.mxu0 %v2355_v13  ;;  %556 = vmatprep.subr.bf16.mxu1 %v2509_v1  ;;  %v2369_v27 = vld [vmem:[%s2573_s29 + $0xb0] sm:$0xff]   ;;  %v2372_v30 = vld [vmem:[%s2573_s29 + $0xb8] sm:$0xff]   ;;  %v2381_v35 = vld [vmem:[%s2573_s29 + $0x108] sm:$0xff]  }
  0x19   : > { %2182 = vmatprep.subr.bf16.mxu0 %v2356_v14  ;;  %v2370_v28 = vld [vmem:[%s2573_s29 + $0x30] sm:$0xff]   ;;  %v2373_v31 = vld [vmem:[%s2573_s29 + $0x38] sm:$0xff]   ;;  %v2382_v38 = vld [vmem:[%s2573_s29 + $0xc8] sm:$0xff]  }
  0x1a   : > { %v2385_v39 = vld [vmem:[%s2573_s29 + $0x110] sm:$0xff]   ;;  %v2391_v43 = vld [vmem:[%s2573_s29 + $0x118] sm:$0xff]   ;;  %v2393_v48 = vld [vmem:[%s2573_s29 + $0x120] sm:$0xff]  }
  0x1b   : > { %557 = vmatpush1.bf16.msra.mxu1 %v2357_v15  ;;  %v2387_v41 = vld [vmem:[%s2573_s29 + $0xd0] sm:$0xff]   ;;  %v2392_v44 = vld [vmem:[%s2573_s29 + $0xd8] sm:$0xff]   ;;  %v2394_v49 = vld [vmem:[%s2573_s29 + $0xe0] sm:$0xff]  }
  0x1c   : > { %2183 = vmatpush3.bf16.msra.mxu0 %v2358_v16  ;;  %558 = vmatprep.subr.bf16.mxu1 %v2509_v1  ;;  %v2395_v50 = vld [vmem:[%s2573_s29 + $0x128] sm:$0xff]   ;;  %v2397_v52 = vld [vmem:[%s2573_s29 + $0x130] sm:$0xff]   ;;  %v2399_v54 = vld [vmem:[%s2573_s29 + $0x138] sm:$0xff]  }
  0x1d   : > { %2184 = vmatprep.subr.bf16.mxu0 %v2359_v17  ;;  %v2396_v51 = vld [vmem:[%s2573_s29 + $0xe8] sm:$0xff]   ;;  %v2398_v53 = vld [vmem:[%s2573_s29 + $0xf0] sm:$0xff]   ;;  %v2400_v55 = vld [vmem:[%s2573_s29 + $0xf8] sm:$0xff]  }
  0x1e   : > { %v2401_v56 = vld [vmem:[%s2573_s29 + $0x140] sm:$0xff]   ;;  %v2407_v45 = vld [vmem:[%s2573_s29 + $0x158] sm:$0xff]  }
  0x1f   : > { %559 = vmatpush1.bf16.msra.mxu1 %v2360_v18  ;;  %v2402_v57 = vld [vmem:[%s2573_s29 + $0x100] sm:$0xff]  }
  0x20   : > { %2185 = vmatpush3.bf16.msra.mxu0 %v2361_v19  ;;  %560 = vmatprep.subr.bf16.mxu1 %v2509_v1  ;;  %v2408_v47 = vld [vmem:[%s2573_s29 + $0x160] sm:$0xff]  }
  0x21   : > { %2186 = vmatprep.subr.bf16.mxu0 %v2362_v20 }
  0x23   : > { %561 = vmatpush1.bf16.msra.mxu1 %v2363_v21 }
  0x24   : > { %2187 = vmatpush3.bf16.msra.mxu0 %v2364_v22  ;;  %562 = vmatprep.subr.bf16.mxu1 %v2509_v1 }
  0x25   : > { %2188 = vmatprep.subr.bf16.mxu0 %v2365_v23 }
  0x27   : > { %563 = vmatpush1.bf16.msra.mxu1 %v2366_v24 }
  0x28   : > { %2189 = vmatpush3.bf16.msra.mxu0 %v2367_v25  ;;  %564 = vmatprep.subr.bf16.mxu1 %v2509_v1 }
  0x29   : > { %2190 = vmatprep.subr.bf16.mxu0 %v2368_v26 }
  0x2b   : > { %565 = vmatpush1.bf16.msra.mxu1 %v2369_v27 }
  0x2c   : > { %2191 = vmatpush3.bf16.msra.mxu0 %v2370_v28  ;;  %566 = vmatprep.subr.bf16.mxu1 %v2509_v1 }
  0x2d   : > { %2192 = vmatprep.subr.bf16.mxu0 %v2371_v29 }
  0x2f   : > { %567 = vmatpush1.bf16.msra.mxu1 %v2372_v30 }
  0x30   : > { %2193 = vmatpush3.bf16.msra.mxu0 %v2373_v31  ;;  %568 = vmatprep.subr.bf16.mxu1 %v2509_v1 }
  0x33   : > { %536 = vmatmul.mubr.bf16.vlgmr.msra.gmra.mrb[0].mxu0 %v2621_v32  ;;  %569 = vmatpush1.bf16.msra.mxu1 %v2377_v34 }
  0x34   : > { %2210 = vmatprep.subr.bf16.mxu1 %v2381_v35  ;;  %543 = vmatprep.mubr.bf16.mxu0 %v2626_v33 }
  0x36   : > { %585 = vmatmul.mubr.bf16.vlgmr.msra.gmra.mrb[0].mxu1 %v2634_v36 }
  0x37   : > { %2211 = vmatpush3.bf16.msra.mxu1 %v2382_v38  ;;  %1925 = vmatprep.mubr.msk.bf16.mxu1 %vm496_vm0, %v2639_v37 }
  0x38   : > { %2212 = vmatprep.subr.bf16.mxu1 %v2385_v39 }
  0x3b   : > { %544 = vmatmul.mubr.bf16.gmra.mrb[4].mxu0 %v2649_v40  ;;  %2213 = vmatpush3.bf16.msra.mxu1 %v2387_v41  ;;  %v2726_v41 = vld [vmem:[%s3024_s3 + $0x8] sm:$0xff]  }
  0x3c   : > { %2214 = vmatprep.subr.bf16.mxu1 %v2391_v43  ;;  %2310 = vmatprep.mubr.msk.bf16.mxu0 %vm645_vm1, %v2689_v58  ;;  %v2405_v43 = vld [vmem:[%s2573_s29 + $0x148] sm:$0xff]  }
  0x3e   : > { %593 = vmatmul.mubr.bf16.gmra.mrb[4].mxu1 %v2657_v42 }
  0x3f   : > { %2215 = vmatpush3.bf16.msra.mxu1 %v2392_v44  ;;  %942 = vmatprep.mubr.bf16.mxu1 %v2551_v0  ;;  %v2406_v44 = vld [vmem:[%s2573_s29 + $0x150] sm:$0xff]  }
  0x40   : > { %2216 = vmatprep.subr.bf16.mxu1 %v2393_v48 }
  0x43   : > { %2217 = vmatpush3.bf16.msra.mxu1 %v2394_v49 }
  0x44   : > { %2218 = vmatprep.subr.bf16.mxu1 %v2395_v50 }
  0x47   : > { %2219 = vmatpush3.bf16.msra.mxu1 %v2396_v51 }
  0x48   : > { %2220 = vmatprep.subr.bf16.mxu1 %v2397_v52 }
  0x4b   : > { %2221 = vmatpush3.bf16.msra.mxu1 %v2398_v53  ;;  %v2409_v53 = vld [vmem:[%s2573_s29 + $0x168] sm:$0xff]  }
  0x4c   : > { %2222 = vmatprep.subr.bf16.mxu1 %v2399_v54 }
  0x4f   : > { %2223 = vmatpush3.bf16.msra.mxu1 %v2400_v55  ;;  %v2410_v55 = vld [vmem:[%s2573_s29 + $0x170] sm:$0xff]  }
  0x50   : > { %2224 = vmatprep.subr.bf16.mxu1 %v2401_v56 }
  0x53   : > { %2225 = vmatpush3.bf16.msra.mxu1 %v2402_v57 }
  0x56   : > { %943 = vmatmul.mubr.bf16.vlgmr.msra.gmra.mrb[8].mxu1 %v2621_v32 }
  0x57   : > { %950 = vmatprep.mubr.bf16.mxu1 %v2626_v33 }
  0x5e   : > { %951 = vmatmul.mubr.bf16.gmra.mrb[12].mxu1 %v2649_v40 }
  0x5f   : > { %2318 = vmatprep.mubr.msk.bf16.mxu1 %vm645_vm1, %v2689_v58 }
  0x87   : > { %v2695_v59 = vpop.permute.xlu0 %290 }
  0x88   : > { %v2703_v13 = vpop.permute.xlu1 %300 }
  0x8b   : > { %v2698_v8 = vpop.permute.xlu0 %295 }
  0x8c   : > { %v2712_v27 = vpop.permute.xlu1 %305 }
 0x106   : > { %v2194_v60 = vpop.f32.mrb[0].mxu0 }
 0x107   : > { %v2195_v61 = vpop.f32.mrb[1].mxu0 }
 0x108   : > { %v2196_v62 = vadd.f32 %v2195_v61, %v2194_v60  ;;  %v2197_v63 = vpop.f32.mrb[2].mxu0 }
 0x109   : > { %v2198_v3 = vpop.f32.mrb[3].mxu0  ;;  %v586_v4 = vpop.f32.mrb[0].mxu1 }
 0x10a   : > { %v2199_v5 = vadd.f32 %v2198_v3, %v2197_v63  ;;  %v538_v6 = vadd.f32 %v2196_v62, %v2695_v59  ;;  %v588_v7 = vpop.f32.mrb[1].mxu1  ;;  %v2411_v63 = vld [vmem:[%s2573_s29 + $0x178] sm:$0xff]   ;;  %v2412_v3 = vld [vmem:[%s2573_s29 + $0x180] sm:$0xff]  }
 0x10b   : > { %v589_v9 = vpop.f32.mrb[2].mxu1  ;;  %v2416_v7 = vld [vmem:[%s2573_s29 + $0x1d8] sm:$0xff]  }
 0x10c   : > { %v2700_v10 = vadd.f32 %v586_v4, %v538_v6  ;;  %v541_v11 = vadd.f32 %v2199_v5, %v2698_v8  ;;  %v591_v12 = vpop.f32.mrb[3].mxu1  ;;  %v2413_v4 = vld [vmem:[%s2573_s29 + $0x188] sm:$0xff]   ;;  %v2414_v5 = vld [vmem:[%s2573_s29 + $0x1d0] sm:$0xff]  }
 0x10d   : > { %v2415_v6 = vld [vmem:[%s2573_s29 + $0x190] sm:$0xff]   ;;  %v2419_v12 = vld [vmem:[%s2573_s29 + $0x1a0] sm:$0xff]  }
 0x10e   : > { %v2705_v14 = vadd.f32 %v589_v9, %v541_v11  ;;  %v2200_v15 = vpop.f32.mrb[4].mxu0  ;;  %v601_v17 = vmul.f32 %v2700_v10, %v2700_v10  ;;  %v2417_v9 = vld [vmem:[%s2573_s29 + $0x198] sm:$0xff]   ;;  %v2418_v11 = vld [vmem:[%s2573_s29 + $0x1e0] sm:$0xff]  }
 0x10f   : > { %v2201_v16 = vpop.f32.mrb[5].mxu0 }
 0x110   : > { %v602_v18 = vmul.f32 %v2705_v14, %v2705_v14  ;;  %v2202_v19 = vadd.f32 %v2201_v16, %v2200_v15  ;;  %v2203_v20 = vpop.f32.mrb[6].mxu0  ;;  %v2420_v15 = vld [vmem:[%s2573_s29 + $0x1e8] sm:$0xff]  }
 0x111   : > { %v2204_v21 = vpop.f32.mrb[7].mxu0  ;;  %v594_v22 = vpop.f32.mrb[4].mxu1  ;;  %v2421_v16 = vld [vmem:[%s2573_s29 + $0x1a8] sm:$0xff]  }
 0x112   : > { %v2205_v23 = vadd.f32 %v2204_v21, %v2203_v20  ;;  %v546_v24 = vadd.f32 %v2202_v19, %v2703_v13  ;;  %v596_v25 = vpop.f32.mrb[5].mxu1  ;;  %v605_v26 = vpack.c.bf16 %v602_v18, %v601_v17  ;;  %v2422_v17 = vld [vmem:[%s2573_s29 + $0x1f0] sm:$0xff]   ;;  %v2424_v19 = vld [vmem:[%s2573_s29 + $0x1f8] sm:$0xff]   ;;  %v2426_v21 = vld [vmem:[%s2573_s29 + $0x200] sm:$0xff]  }
 0x113   : > { %v597_v28 = vpop.f32.mrb[6].mxu1  ;;  %v2423_v18 = vld [vmem:[%s2573_s29 + $0x1b0] sm:$0xff]   ;;  %v2425_v20 = vld [vmem:[%s2573_s29 + $0x1b8] sm:$0xff]  }
 0x114   : > { %v2714_v29 = vadd.f32 %v594_v22, %v546_v24  ;;  %v549_v30 = vadd.f32 %v2205_v23, %v2712_v27  ;;  %v599_v31 = vpop.f32.mrb[7].mxu1  ;;  %2306 = vmatprep.subr.bf16.mxu0 %v605_v26  ;;  %v2427_v22 = vld [vmem:[%s2573_s29 + $0x1c0] sm:$0xff]   ;;  %v2428_v23 = vld [vmem:[%s2573_s29 + $0x208] sm:$0xff]  }
 0x115   : > { %2307 = vmatpush3.bf16.msra.mxu0 %v605_v26  ;;  %v2429_v24 = vld [vmem:[%s2573_s29 + $0x1c8] sm:$0xff]  }
 0x116   : > { %v2717_v34 = vadd.f32 %v597_v28, %v549_v30  ;;  %v603_v35 = vmul.f32 %v2714_v29, %v2714_v29 }
 0x118   : > { %v604_v38 = vmul.f32 %v2717_v34, %v2717_v34 }
 0x11a   : > { %v606_v39 = vpack.c.bf16 %v604_v38, %v603_v35 }
 0x11c   : > { %2308 = vmatprep.subr.bf16.mxu0 %v606_v39 }
 0x11d   : > { %2309 = vmatpush3.bf16.msra.mxu0 %v606_v39 }
 0x11e   : > { %959 = vmatprep.subr.bf16.mxu0 %v2509_v1 }
 0x120   : > { %2311 = vmatmul.mubr.msk.bf16.vlgmr.msra.gmra.mrb[8].mxu0 %vm645_vm1, %v2726_v41 }
 0x121   : > { %960 = vmatpush1.bf16.msra.mxu0 %v2405_v43  ;;  %2005 = vmatprep.mubr.msk.bf16.mxu0 %vm496_vm0, %v2561_v2 }
 0x122   : > { %961 = vmatprep.subr.bf16.mxu0 %v2509_v1 }
 0x125   : > { %962 = vmatpush1.bf16.msra.mxu0 %v2406_v44 }
 0x126   : > { %963 = vmatprep.subr.bf16.mxu0 %v2509_v1 }
 0x129   : > { %v2226_v46 = vpop.f32.mrb[8].mxu1  ;;  %964 = vmatpush1.bf16.msra.mxu0 %v2407_v45 }
 0x12a   : > { %v2227_v48 = vpop.f32.mrb[9].mxu1  ;;  %965 = vmatprep.subr.bf16.mxu0 %v2509_v1 }
 0x12b   : > { %v2740_v49 = vadd.f32 %v2227_v48, %v2226_v46  ;;  %v2229_v50 = vpop.f32.mrb[10].mxu1 }
 0x12c   : > { %v2230_v51 = vpop.f32.mrb[11].mxu1 }
 0x12d   : > { %v2742_v52 = vadd.f32 %v2230_v51, %v2229_v50  ;;  %966 = vmatpush1.bf16.msra.mxu0 %v2408_v47  ;;  %v945_v30 = vadd.f32 %v2740_v49, %v2695_v59 }
 0x12e   : > { %967 = vmatprep.subr.bf16.mxu0 %v2509_v1 }
 0x12f   : > { %v948_v39 = vadd.f32 %v2742_v52, %v2698_v8 }
 0x131   : > { %v2232_v54 = vpop.f32.mrb[12].mxu1  ;;  %968 = vmatpush1.bf16.msra.mxu0 %v2409_v53 }
 0x132   : > { %v2233_v56 = vpop.f32.mrb[13].mxu1  ;;  %969 = vmatprep.subr.bf16.mxu0 %v2509_v1 }
 0x133   : > { %v2748_v57 = vadd.f32 %v2233_v56, %v2232_v54  ;;  %v2235_v60 = vpop.f32.mrb[14].mxu1 }
 0x134   : > { %v2236_v61 = vpop.f32.mrb[15].mxu1 }
 0x135   : > { %v2750_v62 = vadd.f32 %v2236_v61, %v2235_v60  ;;  %970 = vmatpush1.bf16.msra.mxu0 %v2410_v55  ;;  %v953_v48 = vadd.f32 %v2748_v57, %v2703_v13 }
 0x136   : > { %971 = vmatprep.subr.bf16.mxu0 %v2509_v1 }
 0x137   : > { %v956_v52 = vadd.f32 %v2750_v62, %v2712_v27  ;;  %v2431_v62 = vld [vmem:[%s2573_s29 + $0x218] sm:$0xff]  }
 0x139   : > { %972 = vmatpush1.bf16.msra.mxu0 %v2411_v63  ;;  %v2430_v63 = vld [vmem:[%s2573_s29 + $0x210] sm:$0xff]  }
 0x13a   : > { %973 = vmatprep.subr.bf16.mxu0 %v2509_v1 }
 0x13d   : > { %974 = vmatpush1.bf16.msra.mxu0 %v2412_v3  ;;  %v2432_v3 = vld [vmem:[%s2573_s29 + $0x220] sm:$0xff]  }
 0x13e   : > { %975 = vmatprep.subr.bf16.mxu0 %v2509_v1 }
 0x141   : > { %976 = vmatpush1.bf16.msra.mxu0 %v2413_v4  ;;  %v2433_v4 = vld [vmem:[%s2573_s29 + $0x228] sm:$0xff]  }
 0x142   : > { %2242 = vmatprep.subr.bf16.mxu0 %v2414_v5 }
 0x144   : > { %992 = vmatmul.mubr.bf16.vlgmr.msra.gmra.mrb[12].mxu0 %v2634_v36 }
 0x145   : > { %2243 = vmatpush3.bf16.msra.mxu0 %v2415_v6  ;;  %2006 = vmatprep.mubr.msk.bf16.mxu0 %vm496_vm0, %v2639_v37 }
 0x146   : > { %2244 = vmatprep.subr.bf16.mxu0 %v2416_v7 }
 0x149   : > { %2245 = vmatpush3.bf16.msra.mxu0 %v2417_v9 }
 0x14a   : > { %2246 = vmatprep.subr.bf16.mxu0 %v2418_v11  ;;  %v2434_v11 = vld [vmem:[%s2573_s29 + $0x230] sm:$0xff]  }
 0x14c   : > { %1000 = vmatmul.mubr.bf16.gmra.mrb[16].mxu0 %v2657_v42 }
 0x14d   : > { %2247 = vmatpush3.bf16.msra.mxu0 %v2419_v12  ;;  %1308 = vmatprep.mubr.bf16.mxu0 %v2551_v0 }
 0x14e   : > { %2248 = vmatprep.subr.bf16.mxu0 %v2420_v15  ;;  %v2435_v15 = vld [vmem:[%s2573_s29 + $0x238] sm:$0xff]  }
 0x151   : > { %2249 = vmatpush3.bf16.msra.mxu0 %v2421_v16 }
 0x152   : > { %2250 = vmatprep.subr.bf16.mxu0 %v2422_v17 }
 0x155   : > { %2251 = vmatpush3.bf16.msra.mxu0 %v2423_v18 }
 0x156   : > { %2252 = vmatprep.subr.bf16.mxu0 %v2424_v19 }
 0x159   : > { %2253 = vmatpush3.bf16.msra.mxu0 %v2425_v20  ;;  %v2436_v20 = vld [vmem:[%s2573_s29 + $0x240] sm:$0xff]  }
 0x15a   : > { %2254 = vmatprep.subr.bf16.mxu0 %v2426_v21 }
 0x15d   : > { %2255 = vmatpush3.bf16.msra.mxu0 %v2427_v22 }
 0x15e   : > { %2256 = vmatprep.subr.bf16.mxu0 %v2428_v23  ;;  %v2437_v23 = vld [vmem:[%s2573_s29 + $0x248] sm:$0xff]  }
 0x161   : > { %2257 = vmatpush3.bf16.msra.mxu0 %v2429_v24  ;;  %v2438_v24 = vld [vmem:[%s2573_s29 + $0x250] sm:$0xff]  }
 0x164   : > { %1309 = vmatmul.mubr.bf16.vlgmr.msra.gmra.mrb[20].mxu0 %v2621_v32 }
 0x165   : > { %1316 = vmatprep.mubr.bf16.mxu0 %v2626_v33 }
 0x16c   : > { %1317 = vmatmul.mubr.bf16.gmra.mrb[24].mxu0 %v2649_v40 }
 0x16d   : > { %2326 = vmatprep.mubr.msk.bf16.mxu0 %vm645_vm1, %v2689_v58 }
 0x1f3   : > { %v2784_v0 = vpop.f32.mrb[8].mxu0 }
 0x1f4   : > { %v2786_v25 = vpop.f32.mrb[9].mxu0 }
 0x1f5   : > { %v2788_v26 = vpop.f32.mrb[10].mxu0 }
 0x1f6   : > { %v2790_v28 = vpop.f32.mrb[11].mxu0 }
 0x217   : > { %v993_v31 = vpop.f32.mrb[12].mxu0 }
 0x218   : > { %v2794_v35 = vadd.f32 %v993_v31, %v945_v30  ;;  %v995_v38 = vpop.f32.mrb[13].mxu0  ;;  %v2439_v30 = vld [vmem:[%s2573_s29 + $0x298] sm:$0xff]  }
 0x219   : > { %v996_v43 = vpop.f32.mrb[14].mxu0  ;;  %v2440_v31 = vld [vmem:[%s2573_s29 + $0x258] sm:$0xff]   ;;  %v2441_v38 = vld [vmem:[%s2573_s29 + $0x2a0] sm:$0xff]  }
 0x21a   : > { %v2798_v44 = vadd.f32 %v996_v43, %v948_v39  ;;  %v998_v45 = vpop.f32.mrb[15].mxu0  ;;  %v1008_v46 = vmul.f32 %v2794_v35, %v2794_v35  ;;  %v2442_v39 = vld [vmem:[%s2573_s29 + $0x260] sm:$0xff]   ;;  %v2443_v43 = vld [vmem:[%s2573_s29 + $0x2a8] sm:$0xff]  }
 0x21b   : > { %v2444_v45 = vld [vmem:[%s2573_s29 + $0x268] sm:$0xff]  }
 0x21c   : > { %v1009_v47 = vmul.f32 %v2798_v44, %v2798_v44 }
 0x21e   : > { %v1012_v49 = vpack.c.bf16 %v1009_v47, %v1008_v46  ;;  %v2445_v46 = vld [vmem:[%s2573_s29 + $0x2b0] sm:$0xff]  }
 0x21f   : > { %v1001_v50 = vpop.f32.mrb[16].mxu0  ;;  %v2496_v47 = vld [vmem:[%s3022_s1 + $0x4] ss:$16 sps:$4 sm:$0xff]  }
 0x220   : > { %v2806_v51 = vadd.f32 %v1001_v50, %v953_v48  ;;  %v1003_v53 = vpop.f32.mrb[17].mxu0  ;;  %2314 = vmatprep.subr.bf16.mxu1 %v1012_v49  ;;  %v2448_v48 = vld [vmem:[%s2573_s29 + $0x278] sm:$0xff]   ;;  %v2450_v50 = vld [vmem:[%s2573_s29 + $0x280] sm:$0xff]  }
 0x221   : > { %v1004_v54 = vpop.f32.mrb[18].mxu0  ;;  %2315 = vmatpush3.bf16.msra.mxu1 %v1012_v49  ;;  %v2449_v49 = vld [vmem:[%s2573_s29 + $0x2c0] sm:$0xff]   ;;  %v2452_v53 = vld [vmem:[%s2573_s29 + $0x288] sm:$0xff]  }
 0x222   : > { %v2810_v55 = vadd.f32 %v1004_v54, %v956_v52  ;;  %v1006_v56 = vpop.f32.mrb[19].mxu0  ;;  %v1010_v57 = vmul.f32 %v2806_v51, %v2806_v51  ;;  %v2453_v52 = vld [vmem:[%s2573_s29 + $0x2d0] sm:$0xff]  }
 0x223   : > { %v2454_v54 = vld [vmem:[%s2573_s29 + $0x290] sm:$0xff]   ;;  %v2874_v56 = vpop.permute.xlu0 %617 }
 0x224   : > { %v1011_v60 = vmul.f32 %v2810_v55, %v2810_v55 }
 0x226   : > { %v1013_v61 = vpack.c.bf16 %v1011_v60, %v1010_v57  ;;  %v2876_v57 = vpop.permute.xlu1 %622 }
 0x227   : > { %v2878_v60 = vpop.permute.xlu0 %627 }
 0x228   : > { %2316 = vmatprep.subr.bf16.mxu1 %v1013_v61 }
 0x229   : > { %2317 = vmatpush3.bf16.msra.mxu1 %v1013_v61  ;;  %v695_v61 = vadd.f32 %v2784_v0, %v2878_v60 }
 0x22a   : > { %1325 = vmatprep.subr.bf16.mxu1 %v2509_v1 }
 0x22b   : > { %2464 = vrsqrt.f32 %v695_v61 }
 0x22c   : > { %2319 = vmatmul.mubr.msk.bf16.vlgmr.msra.gmra.mrb[16].mxu1 %vm645_vm1, %v2726_v41 }
 0x22d   : > { %1326 = vmatpush1.bf16.msra.mxu1 %v2430_v63  ;;  %2084 = vmatprep.mubr.msk.bf16.mxu1 %vm496_vm0, %v2561_v2  ;;  %v2882_v63 = vpop.permute.xlu1 %632 }
 0x22e   : > { %1327 = vmatprep.subr.bf16.mxu1 %v2509_v1 }
 0x231   : > { %1328 = vmatpush1.bf16.msra.mxu1 %v2431_v62 }
 0x232   : > { %1329 = vmatprep.subr.bf16.mxu1 %v2509_v1 }
 0x235   : > { %1330 = vmatpush1.bf16.msra.mxu1 %v2432_v3 }
 0x236   : > { %1331 = vmatprep.subr.bf16.mxu1 %v2509_v1 }
 0x237   : > { %v2258_v5 = vpop.f32.mrb[20].mxu0 }
 0x238   : > { %v2259_v6 = vpop.f32.mrb[21].mxu0 }
 0x239   : > { %v2828_v7 = vadd.f32 %v2259_v6, %v2258_v5  ;;  %v2261_v9 = vpop.f32.mrb[22].mxu0  ;;  %1332 = vmatpush1.bf16.msra.mxu1 %v2433_v4 }
 0x23a   : > { %v2262_v2 = vpop.f32.mrb[23].mxu0  ;;  %1333 = vmatprep.subr.bf16.mxu1 %v2509_v1 }
 0x23b   : > { %v2832_v12 = vadd.f32 %v2262_v2, %v2261_v9 }
 0x23d   : > { %1334 = vmatpush1.bf16.msra.mxu1 %v2434_v11 }
 0x23e   : > { %1335 = vmatprep.subr.bf16.mxu1 %v2509_v1 }
 0x23f   : > { %v2264_v16 = vpop.f32.mrb[24].mxu0 }
 0x240   : > { %v2265_v17 = vpop.f32.mrb[25].mxu0 }
 0x241   : > { %v2836_v18 = vadd.f32 %v2265_v17, %v2264_v16  ;;  %v2267_v19 = vpop.f32.mrb[26].mxu0  ;;  %1336 = vmatpush1.bf16.msra.mxu1 %v2435_v15 }
 0x242   : > { %v2268_v21 = vpop.f32.mrb[27].mxu0  ;;  %1337 = vmatprep.subr.bf16.mxu1 %v2509_v1 }
 0x243   : > { %v2840_v22 = vadd.f32 %v2268_v21, %v2267_v19 }
 0x245   : > { %1338 = vmatpush1.bf16.msra.mxu1 %v2436_v20 }
 0x246   : > { %1339 = vmatprep.subr.bf16.mxu1 %v2509_v1 }
 0x249   : > { %1340 = vmatpush1.bf16.msra.mxu1 %v2437_v23 }
 0x24a   : > { %1341 = vmatprep.subr.bf16.mxu1 %v2509_v1 }
 0x24d   : > { %1342 = vmatpush1.bf16.msra.mxu1 %v2438_v24 }
 0x24e   : > { %2274 = vmatprep.subr.bf16.mxu1 %v2439_v30 }
 0x250   : > { %1358 = vmatmul.mubr.bf16.vlgmr.msra.gmra.mrb[20].mxu1 %v2634_v36  ;;  %v2446_v36 = vld [vmem:[%s2573_s29 + $0x270] sm:$0xff]  }
 0x251   : > { %2275 = vmatpush3.bf16.msra.mxu1 %v2440_v31  ;;  %2085 = vmatprep.mubr.msk.bf16.mxu1 %vm496_vm0, %v2639_v37  ;;  %v2447_v37 = vld [vmem:[%s2573_s29 + $0x2b8] sm:$0xff]  }
 0x252   : > { %2276 = vmatprep.subr.bf16.mxu1 %v2441_v38  ;;  %v1311_v38 = vadd.f32 %v2828_v7, %v2695_v59  ;;  %v1319_v7 = vadd.f32 %v2836_v18, %v2703_v13 }
 0x255   : > { %2277 = vmatpush3.bf16.msra.mxu1 %v2442_v39 }
 0x256   : > { %2278 = vmatprep.subr.bf16.mxu1 %v2443_v43  ;;  %v1314_v43 = vadd.f32 %v2832_v12, %v2698_v8  ;;  %v1322_v12 = vadd.f32 %v2840_v22, %v2712_v27  ;;  %v2456_v22 = vld [vmem:[%s2573_s29 + $0x2e0] sm:$0xff]  }
 0x258   : > { %1366 = vmatmul.mubr.bf16.gmra.mrb[24].mxu1 %v2657_v42  ;;  %v2451_v42 = vld [vmem:[%s2573_s29 + $0x2c8] sm:$0xff]  }
 0x259   : > { %2279 = vmatpush3.bf16.msra.mxu1 %v2444_v45  ;;  %1674 = vmatprep.mubr.bf16.mxu1 %v2496_v47 }
 0x25a   : > { %2280 = vmatprep.subr.bf16.mxu1 %v2445_v46 }
 0x25d   : > { %2281 = vmatpush3.bf16.msra.mxu1 %v2446_v36 }
 0x25e   : > { %2282 = vmatprep.subr.bf16.mxu1 %v2447_v37 }
 0x261   : > { %2283 = vmatpush3.bf16.msra.mxu1 %v2448_v48 }
 0x262   : > { %2284 = vmatprep.subr.bf16.mxu1 %v2449_v49 }
 0x265   : > { %2285 = vmatpush3.bf16.msra.mxu1 %v2450_v50 }
 0x266   : > { %2286 = vmatprep.subr.bf16.mxu1 %v2451_v42 }
 0x269   : > { %2287 = vmatpush3.bf16.msra.mxu1 %v2452_v53 }
 0x26a   : > { %2288 = vmatprep.subr.bf16.mxu1 %v2453_v52 }
 0x26d   : > { %2289 = vmatpush3.bf16.msra.mxu1 %v2454_v54 }
 0x270   : > { %1675 = vmatmul.mubr.bf16.vlgmr.msra.gmra.mrb[28].mxu1 %v2621_v32  ;;  %v687_v32 = vadd.f32 %v2786_v25, %v2874_v56 }
 0x271   : > { %1682 = vmatprep.mubr.bf16.mxu1 %v2626_v33  ;;  %v698_v33 = vadd.f32 %v2788_v26, %v2882_v63 }
 0x272   : > { %2466 = vrsqrt.f32 %v687_v32  ;;  %v2455_v32 = vld [vmem:[%s2573_s29 + $0x2d8] sm:$0xff]  }
 0x273   : > { %2468 = vrsqrt.f32 %v698_v33  ;;  %v2497_v33 = vld [vmem:[%s3022_s1 + $0xc] ss:$16 sps:$4 sm:$0xff]  }
 0x278   : > { %1683 = vmatmul.mubr.bf16.gmra.mrb[32].mxu1 %v2649_v40  ;;  %v690_v40 = vadd.f32 %v2790_v28, %v2876_v57  ;;  %v2465_v28 = vpop.eup %2464 }
 0x279   : > { %2334 = vmatprep.mubr.msk.bf16.mxu1 %vm645_vm1, %v2689_v58  ;;  %v2895_v16 = vmul.f32 %v2465_v28, %v2714_v29  ;;  %v2460_v28 = vld [vmem:[%s2573_s29 + $0x300] sm:$0xff]  }
 0x27a   : > { %2470 = vrsqrt.f32 %v690_v40  ;;  %v2457_v40 = vld [vmem:[%s2573_s29 + $0x2e8] sm:$0xff]  }
 0x27c   : > { %v2467_v6 = vpop.eup %2466 }
 0x27d   : > { %v2469_v9 = vpop.eup %2468  ;;  %v2901_v20 = vmul.f32 %v2467_v6, %v2700_v10 }
 0x27e   : > { %v2907_v24 = vmul.f32 %v2469_v9, %v2717_v34 }
 0x284   : > { %v2471_v11 = vpop.eup %2470 }
 0x2ff   : > { %v2320_v58 = vpop.f32.mrb[16].mxu1 }
 0x300   : > { %v1057_v62 = vadd.f32 %v2320_v58, %v2878_v60  ;;  %v1048_v3 = vpop.f32.mrb[17].mxu1  ;;  %v2458_v58 = vld [vmem:[%s2573_s29 + $0x2f0] sm:$0xff]  }
 0x301   : > { %v1049_v0 = vadd.f32 %v1048_v3, %v2874_v56  ;;  %v2321_v4 = vpop.f32.mrb[18].mxu1 }
 0x302   : > { %2472 = vrsqrt.f32 %v1057_v62  ;;  %v1060_v25 = vadd.f32 %v2321_v4, %v2882_v63  ;;  %v1051_v5 = vpop.f32.mrb[19].mxu1 }
 0x303   : > { %2474 = vrsqrt.f32 %v1049_v0  ;;  %v1052_v26 = vadd.f32 %v1051_v5, %v2876_v57 }
 0x304   : > { %2476 = vrsqrt.f32 %v1060_v25  ;;  %v2459_v25 = vld [vmem:[%s2573_s29 + $0x2f8] sm:$0xff]  }
 0x305   : > { %2478 = vrsqrt.f32 %v1052_v26 }
 0x30c   : > { %v2473_v2 = vpop.eup %2472 }
 0x30d   : > { %v2475_v15 = vpop.eup %2474  ;;  %v2898_v17 = vmul.f32 %v2473_v2, %v2806_v51  ;;  %v2915_v51 = vmul.f32 %v2471_v11, %v2705_v14 }
 0x30e   : > { %v2477_v19 = vpop.eup %2476  ;;  %v2904_v21 = vmul.f32 %v2475_v15, %v2794_v35  ;;  %v2461_v15 = vld [vmem:[%s2573_s29 + $0x308] sm:$0xff]  }
 0x30f   : > { %v2479_v23 = vpop.eup %2478  ;;  %v1073_v30 = vmax.f32 %v2895_v16, %v2898_v17  ;;  %v2912_v29 = vmul.f32 %v2477_v19, %v2810_v55 }
 0x310   : > { %v1071_v10 = vmax.f32 %v2901_v20, %v2904_v21  ;;  %v2920_v31 = vmul.f32 %v2479_v23, %v2798_v44 }
 0x311   : > { %v1074_v35 = vmax.f32 %v2907_v24, %v2912_v29 }
 0x312   : > { %v1072_v34 = vmax.f32 %v2915_v51, %v2920_v31 }
 0x323   : > { %v1359_v55 = vpop.f32.mrb[20].mxu1 }
 0x324   : > { %v2928_v39 = vadd.f32 %v1359_v55, %v1311_v38  ;;  %v1361_v14 = vpop.f32.mrb[21].mxu1  ;;  %v2462_v38 = vld [vmem:[%s2573_s29 + $0x310] sm:$0xff]   ;;  %v2463_v55 = vld [vmem:[%s2573_s29 + $0x318] sm:$0xff]   ;;  %s2173_s29 = sshll.u32 %s3028_s19, 4 }
 0x325   : > { %v1362_v45 = vpop.f32.mrb[22].mxu1  ;;  %v2498_v14 = vld [vmem:[%s3022_s1 + $0x8] ss:$16 sps:$4 sm:$0xff]   ;;  %s224_s27 = scalar_lea.vmem %s3026_s5, %s2173_s29 }
 0x326   : > { %v2932_v46 = vadd.f32 %v1362_v45, %v1314_v43  ;;  %v1364_v44 = vpop.f32.mrb[23].mxu1  ;;  %v1374_v36 = vmul.f32 %v2928_v39, %v2928_v39  ;;  %v2499_v43 = vld [vmem:[%s3022_s1 + $0x2c] ss:$16 sps:$4 sm:$0xff]   ;;  %v2500_v45 = vld [vmem:[%s3022_s1 + $0x28] ss:$16 sps:$4 sm:$0xff]  }
 0x328   : > { %v1375_v47 = vmul.f32 %v2932_v46, %v2932_v46 }
 0x32a   : > { %v1378_v37 = vpack.c.bf16 %v1375_v47, %v1374_v36 }
 0x32b   : > { %v1367_v48 = vpop.f32.mrb[24].mxu1 }
 0x32c   : > { %v2940_v49 = vadd.f32 %v1367_v48, %v1319_v7  ;;  %v1369_v50 = vpop.f32.mrb[25].mxu1  ;;  %2322 = vmatprep.subr.bf16.mxu0 %v1378_v37 }
 0x32d   : > { %v1370_v42 = vpop.f32.mrb[26].mxu1  ;;  %2323 = vmatpush3.bf16.msra.mxu0 %v1378_v37 }
 0x32e   : > { %v2944_v53 = vadd.f32 %v1370_v42, %v1322_v12  ;;  %v1372_v52 = vpop.f32.mrb[27].mxu1  ;;  %v1376_v18 = vmul.f32 %v2940_v49, %v2940_v49 }
 0x330   : > { %v1377_v54 = vmul.f32 %v2944_v53, %v2944_v53 }
 0x332   : > { %v1379_v61 = vpack.c.bf16 %v1377_v54, %v1376_v18 }
 0x334   : > { %2324 = vmatprep.subr.bf16.mxu0 %v1379_v61 }
 0x335   : > { %2325 = vmatpush3.bf16.msra.mxu0 %v1379_v61 }
 0x336   : > { %1691 = vmatprep.subr.bf16.mxu0 %v2509_v1 }
 0x338   : > { %2327 = vmatmul.mubr.msk.bf16.vlgmr.msra.gmra.mrb[28].mxu0 %vm645_vm1, %v2726_v41 }
 0x339   : > { %1692 = vmatpush1.bf16.msra.mxu0 %v2455_v32  ;;  %2163 = vmatprep.mubr.msk.bf16.mxu0 %vm496_vm0, %v2497_v33 }
 0x33a   : > { %1693 = vmatprep.subr.bf16.mxu0 %v2509_v1 }
 0x33d   : > { %1694 = vmatpush1.bf16.msra.mxu0 %v2456_v22 }
 0x33e   : > { %1695 = vmatprep.subr.bf16.mxu0 %v2509_v1 }
 0x341   : > { %1696 = vmatpush1.bf16.msra.mxu0 %v2457_v40 }
 0x342   : > { %1697 = vmatprep.subr.bf16.mxu0 %v2509_v1 }
 0x343   : > { %v2290_v62 = vpop.f32.mrb[28].mxu1 }
 0x344   : > { %v2291_v3 = vpop.f32.mrb[29].mxu1 }
 0x345   : > { %v2292_v0 = vadd.f32 %v2291_v3, %v2290_v62  ;;  %v2293_v4 = vpop.f32.mrb[30].mxu1  ;;  %1698 = vmatpush1.bf16.msra.mxu0 %v2458_v58 }
 0x346   : > { %v2294_v5 = vpop.f32.mrb[31].mxu1  ;;  %1699 = vmatprep.subr.bf16.mxu0 %v2509_v1 }
 0x347   : > { %v2295_v26 = vadd.f32 %v2294_v5, %v2293_v4  ;;  %v1677_v58 = vadd.f32 %v2292_v0, %v2695_v59 }
 0x349   : > { %1700 = vmatpush1.bf16.msra.mxu0 %v2459_v25 }
 0x34a   : > { %1701 = vmatprep.subr.bf16.mxu0 %v2509_v1 }
 0x34b   : > { %v2296_v6 = vpop.f32.mrb[32].mxu1 }
 0x34c   : > { %v2297_v9 = vpop.f32.mrb[33].mxu1 }
 0x34d   : > { %v2298_v11 = vadd.f32 %v2297_v9, %v2296_v6  ;;  %v2299_v2 = vpop.f32.mrb[34].mxu1  ;;  %1702 = vmatpush1.bf16.msra.mxu0 %v2460_v28 }
 0x34e   : > { %v2300_v19 = vpop.f32.mrb[35].mxu1  ;;  %1703 = vmatprep.subr.bf16.mxu0 %v2509_v1 }
 0x34f   : > { %v2301_v23 = vadd.f32 %v2300_v19, %v2299_v2  ;;  %v1685_v3 = vadd.f32 %v2298_v11, %v2703_v13 }
 0x351   : > { %1704 = vmatpush1.bf16.msra.mxu0 %v2461_v15  ;;  %v1688_v51 = vadd.f32 %v2301_v23, %v2712_v27 }
 0x352   : > { %1705 = vmatprep.subr.bf16.mxu0 %v2509_v1 }
 0x355   : > { %1706 = vmatpush1.bf16.msra.mxu0 %v2462_v38 }
 0x356   : > { %1707 = vmatprep.subr.bf16.mxu0 %v2509_v1 }
 0x359   : > { %1708 = vmatpush1.bf16.msra.mxu0 %v2463_v55 }
 0x35c   : > { %1724 = vmatmul.mubr.bf16.vlgmr.msra.gmra.mrb[32].mxu0 %v2498_v14 }
 0x35d   : > { %2164 = vmatprep.mubr.msk.bf16.mxu0 %vm496_vm0, %v2499_v43 }
 0x364   : > { %1732 = vmatmul.mubr.bf16.gmra.mrb[36].mxu0 %v2500_v45 }
 0x40b   : > { %v2328_v44 = vpop.f32.mrb[28].mxu0 }
 0x40c   : > { %v1423_v1 = vadd.f32 %v2328_v44, %v2878_v60  ;;  %v1414_v36 = vpop.f32.mrb[29].mxu0 }
 0x40d   : > { %v1415_v47 = vadd.f32 %v1414_v36, %v2874_v56  ;;  %v2329_v7 = vpop.f32.mrb[30].mxu0 }
 0x40e   : > { %2480 = vrsqrt.f32 %v1423_v1  ;;  %v1426_v37 = vadd.f32 %v2329_v7, %v2882_v63  ;;  %v1417_v48 = vpop.f32.mrb[31].mxu0 }
 0x40f   : > { %2482 = vrsqrt.f32 %v1415_v47  ;;  %v1418_v50 = vadd.f32 %v1417_v48, %v2876_v57 }
 0x410   : > { %2484 = vrsqrt.f32 %v1426_v37 }
 0x411   : > { %2486 = vrsqrt.f32 %v1418_v50 }
 0x418   : > { %v2481_v12 = vpop.eup %2480 }
 0x419   : > { %v2483_v42 = vpop.eup %2482  ;;  %v1435_v52 = vmul.f32 %v2481_v12, %v2940_v49 }
 0x41a   : > { %v2485_v18 = vpop.eup %2484  ;;  %v1433_v54 = vmul.f32 %v2483_v42, %v2928_v39 }
 0x41b   : > { %v2487_v61 = vpop.eup %2486  ;;  %v1439_v32 = vmax.f32 %v1073_v30, %v1435_v52  ;;  %v1436_v22 = vmul.f32 %v2485_v18, %v2944_v53  ;;  %v1680_v53 = vadd.f32 %v2295_v26, %v2698_v8 }
 0x41c   : > { %v1437_v33 = vmax.f32 %v1071_v10, %v1433_v54  ;;  %v1434_v40 = vmul.f32 %v2487_v61, %v2932_v46 }
 0x41d   : > { %v1440_v49 = vmax.f32 %v1074_v35, %v1436_v22 }
 0x41e   : > { %v1438_v39 = vmax.f32 %v1072_v34, %v1434_v40 }
 0x42f   : > { %v1725_v16 = vpop.f32.mrb[32].mxu0 }
 0x430   : > { %v1726_v17 = vadd.f32 %v1725_v16, %v1677_v58  ;;  %v1727_v30 = vpop.f32.mrb[33].mxu0 }
 0x431   : > { %v1728_v62 = vpop.f32.mrb[34].mxu0 }
 0x432   : > { %v1729_v20 = vadd.f32 %v1728_v62, %v1680_v53  ;;  %v1730_v21 = vpop.f32.mrb[35].mxu0  ;;  %v1740_v10 = vmul.f32 %v1726_v17, %v1726_v17 }
 0x434   : > { %v1741_v46 = vmul.f32 %v1729_v20, %v1729_v20 }
 0x436   : > { %v1744_v24 = vpack.c.bf16 %v1741_v46, %v1740_v10 }
 0x437   : > { %v1733_v29 = vpop.f32.mrb[36].mxu0 }
 0x438   : > { %v1734_v35 = vadd.f32 %v1733_v29, %v1685_v3  ;;  %v1735_v4 = vpop.f32.mrb[37].mxu0  ;;  %2330 = vmatprep.subr.bf16.mxu1 %v1744_v24 }
 0x439   : > { %v1736_v59 = vpop.f32.mrb[38].mxu0  ;;  %2331 = vmatpush3.bf16.msra.mxu1 %v1744_v24 }
 0x43a   : > { %v1737_v31 = vadd.f32 %v1736_v59, %v1688_v51  ;;  %v1738_v34 = vpop.f32.mrb[39].mxu0  ;;  %v1742_v0 = vmul.f32 %v1734_v35, %v1734_v35 }
 0x43c   : > { %v1743_v8 = vmul.f32 %v1737_v31, %v1737_v31 }
 0x43e   : > { %v1745_v25 = vpack.c.bf16 %v1743_v8, %v1742_v0 }
 0x440   : > { %2332 = vmatprep.subr.bf16.mxu1 %v1745_v25 }
 0x441   : > { %2333 = vmatpush3.bf16.msra.mxu1 %v1745_v25 }
 0x444   : > { %2335 = vmatmul.mubr.msk.bf16.vlgmr.msra.gmra.mrb[36].mxu1 %vm645_vm1, %v2726_v41 }
 0x517   : > { %v2336_v13 = vpop.f32.mrb[36].mxu1 }
 0x518   : > { %v1789_v5 = vadd.f32 %v2336_v13, %v2878_v60  ;;  %v1780_v26 = vpop.f32.mrb[37].mxu1 }
 0x519   : > { %v1781_v28 = vadd.f32 %v1780_v26, %v2874_v56  ;;  %v2337_v27 = vpop.f32.mrb[38].mxu1 }
 0x51a   : > { %2488 = vrsqrt.f32 %v1789_v5  ;;  %v1792_v6 = vadd.f32 %v2337_v27, %v2882_v63  ;;  %v1783_v9 = vpop.f32.mrb[39].mxu1 }
 0x51b   : > { %2490 = vrsqrt.f32 %v1781_v28  ;;  %v1784_v11 = vadd.f32 %v1783_v9, %v2876_v57 }
 0x51c   : > { %2492 = vrsqrt.f32 %v1792_v6 }
 0x51d   : > { %2494 = vrsqrt.f32 %v1784_v11 }
 0x524   : > { %v2489_v2 = vpop.eup %2488 }
 0x525   : > { %v2491_v15 = vpop.eup %2490  ;;  %v1801_v41 = vmul.f32 %v2489_v2, %v1734_v35 }
 0x526   : > { %v2493_v19 = vpop.eup %2492  ;;  %v1799_v23 = vmul.f32 %v2491_v15, %v1726_v17 }
 0x527   : > { %v2495_v60 = vpop.eup %2494  ;;  %v1805_v38 = vmax.f32 %v1439_v32, %v1801_v41  ;;  %v1802_v55 = vmul.f32 %v2493_v19, %v1737_v31 }
 0x528   : > { %v1803_v56 = vmax.f32 %v1437_v33, %v1799_v23  ;;  %v1800_v63 = vmul.f32 %v2495_v60, %v1729_v20 }
 0x529   : > { %v2176_v14 = vpack.c.bf16 %v1805_v38, %v1805_v38  ;;  %v1806_v57 = vmax.f32 %v1440_v49, %v1802_v55 }
 0x52a   : > { %v2174_v43 = vpack.c.bf16 %v1803_v56, %v1803_v56  ;;  %v1804_v45 = vmax.f32 %v1438_v39, %v1800_v63 }
 0x52b   : > { %1826 = vst.msk [vmem:[%s224_s27 + $0x8] sm:$0xf] %vm1823_vm2, %v2176_v14  ;;  %v2177_v44 = vpack.c.bf16 %v1806_v57, %v1806_v57 }
 0x52c   : > { %1824 = vst.msk [vmem:[%s224_s27] sm:$0xf] %vm1823_vm2, %v2174_v43  ;;  %v2175_v1 = vpack.c.bf16 %v1804_v45, %v1804_v45 }
 0x52d   : > { %1827 = vst.msk [vmem:[%s224_s27 + $0xc] sm:$0xf] %vm1823_vm2, %v2177_v44 }
 0x52e   : > { %1825 = vst.msk [vmem:[%s224_s27 + $0x4] sm:$0xf] %vm1823_vm2, %v2175_v1 }
 0x52f PF: > { %s15_s18 = sadd.s32 1, %s2507_s18  }
 0x530   : > { %p12_p4 = scmp.ge.s32.totalorder %s15_s18, 6  }
 0x532   :  { %14 = sbr.rel (!%p12_p4) target bundleno = 1 (0x1), region = 73 }

// kernel: metric_model_forward.7
= control target key start
LH: loop header
LB: loop body
LE: loop exit
PB: predicated region body
PF: predicated region fallthrough
CT: control target
= control target key end

     0   :  { %s4640_s19 = smov 0   ;;  %s6156_s0 = inlined_call_operand.vmem [shape: bf16[4,4,288,4], index: 0, kind: input, shape index: {}]   ;;  %s6157_s1 = inlined_call_operand.vmem [shape: bf16[64,288], index: 1, kind: input, shape index: {}]   ;;  %s6158_s2 = inlined_call_operand.vmem [shape: f32[64,1], index: 2, kind: input, shape index: {}]   ;;  %s6159_s3 = inlined_call_operand.vmem [shape: bf16[64,64], index: 3, kind: input, shape index: {}]   ;;  %s6160_s4 = inlined_call_operand.vmem [shape: f32[64,1], index: 4, kind: input, shape index: {}]   ;;  %s6161_s5 = inlined_call_operand.vmem [shape: bf16[256,64], index: 5, kind: input, shape index: {}]   ;;  %s6162_s6 = inlined_call_operand.vmem [shape: f32[256,1], index: 6, kind: input, shape index: {}]   ;;  %s6163_s7 = inlined_call_operand.vmem [shape: bf16[256,256], index: 7, kind: input, shape index: {}]   ;;  %s6164_s8 = inlined_call_operand.vmem [shape: f32[256,1], index: 8, kind: input, shape index: {}]   ;;  %s6165_s9 = inlined_call_operand.vmem [shape: bf16[1,256], index: 9, kind: input, shape index: {}]   ;;  %s6166_s10 = inlined_call_operand.<no memory space> [shape: f32[1,1], index: 10, kind: input, shape index: {}]   ;;  %s6167_s11 = inlined_call_operand.vmem [shape: f32[4,1,4], index: 11, kind: output, shape index: {}]  }
   0x1   :  { %v16_v0 = vstv %s6166_s10 }
   0x2   :  { %17 = vst [vmem:[#allocation2] sm:$0x1] %v16_v0 }
   0x3 LB: > { %s3422_s20 = sadd.s32 4294967295, %s4573_s19   ;;  %p3426_p0 = scmp.ge.s32.totalorder %s4573_s19, 1  ;;  %s4573_s19 = sphi %s4640_s19, %s23_s19  }
   0x4   : > { %p339_p1 = scmp.lt.s32.totalorder %s4573_s19, 5 }
   0x6   : > { %p340_p2 = pnand %p3426_p0, %p339_p1 }
   0x8   : > { %343 = sbr.rel (%p340_p2) target bundleno = 2189 (0x88d), region = 64 }
   0xf   : > { %v440_v1 = vld [vmem:[%s6158_s2 + $0x10] sm:$0xff]  ;;  %v438_v2 = vld [vmem:[%s6158_s2] sm:$0xff]  ;;  %p377_p3 = scmp.lt.s32.totalorder %s3422_s20, 3  ;;  %v4575_v3 = vmov 0   ;;  %v441_v4 = vld [vmem:[%s6158_s2 + $0x18] sm:$0xff]  ;;  %vm654_vm0 = vcmask 261120  }
  0x10   : > { %4273 = vset.pattern.permute.xlu1 %v4575_v3  ;;  %4272 = vset.pattern.permute.xlu0 %v4575_v3  ;;  %v439_v5 = vld [vmem:[%s6158_s2 + $0x8] sm:$0xff]  ;;  %v442_v7 = vld [vmem:[%s6158_s2 + $0x20] sm:$0xff]  ;;  %v445_v10 = vld [vmem:[%s6158_s2 + $0x38] sm:$0xff]  ;;  %vm885_vm1 = vcmask 523264   ;;  %vm3373_vm2 = vcmask 24576  }
  0x11   : > { %458 = vperm.xlu1 %4273, %v440_v1   ;;  %448 = vperm.xlu0 %4272, %v438_v2   ;;  %s6226_s20 = smov (!%p377_p3, %s3422_s20), 3  ;;  %v443_v6 = vld [vmem:[%s6158_s2 + $0x28] sm:$0xff]  ;;  %v444_v12 = vld [vmem:[%s6158_s2 + $0x30] sm:$0xff]  ;;  %v817_v16 = vld [vmem:[%s6160_s4] sm:$0xff] }
  0x12   : > { %s4261_s28 = smul.u32 576, %s6226_s20  ;;  %v818_v15 = vld [vmem:[%s6160_s4 + $0x8] sm:$0xff]  ;;  %v820_v19 = vld [vmem:[%s6160_s4 + $0x18] sm:$0xff]  ;;  %v819_v20 = vld [vmem:[%s6160_s4 + $0x10] sm:$0xff]  ;;  %s384_s22 = scalar_lea.vmem %s6167_s11, %s6226_s20 }
  0x13   : > { %v822_v23 = vld [vmem:[%s6160_s4 + $0x28] sm:$0xff]  ;;  %v821_v24 = vld [vmem:[%s6160_s4 + $0x20] sm:$0xff]  ;;  %v824_v29 = vld [vmem:[%s6160_s4 + $0x38] sm:$0xff] }
  0x14   : > { %s4672_s16 = scalar_lea.vmem %s6156_s0, %s4261_s28  ;;  %v4713_v28 = vld [vmem:[%s6157_s1 + $0x4] ss:$12 sps:$4 sm:$0xff]   ;;  %v4727_v33 = vld [vmem:[%s6157_s1 + $0x8] ss:$12 sps:$4 sm:$0xff]   ;;  %v4735_v35 = vld [vmem:[%s6157_s1 + $0x20] ss:$12 sps:$4 sm:$0xff]  }
  0x15   : > { %463 = vperm.xlu1 %4273, %v441_v4   ;;  %453 = vperm.xlu0 %4272, %v439_v5   ;;  %v4274_v8 = vld [vmem:[%s4672_s16 + $0x40] sm:$0xff]   ;;  %v4276_v11 = vld [vmem:[%s4672_s16 + $0x48] sm:$0xff]   ;;  %v4278_v14 = vld [vmem:[%s4672_s16 + $0x50] sm:$0xff]  }
  0x16   : > { %v4275_v9 = vld [vmem:[%s4672_s16] sm:$0xff]   ;;  %3723 = vmatprep.subr.bf16.mxu0 %v4274_v8  ;;  %v4277_v13 = vld [vmem:[%s4672_s16 + $0x8] sm:$0xff]   ;;  %v4279_v17 = vld [vmem:[%s4672_s16 + $0x10] sm:$0xff]   ;;  %699 = vmatprep.mubr.bf16.mxu0 %v4713_v28 }
  0x17   : > { %3724 = vmatpush3.bf16.msra.mxu0 %v4275_v9  ;;  %v4280_v18 = vld [vmem:[%s4672_s16 + $0x58] sm:$0xff]   ;;  %v4282_v22 = vld [vmem:[%s4672_s16 + $0x60] sm:$0xff]   ;;  %v4284_v27 = vld [vmem:[%s4672_s16 + $0x68] sm:$0xff]   ;;  %4097 = vmatprep.mubr.msk.bf16.mxu1 %vm654_vm0, %v4727_v33 }
  0x18   : > { %3725 = vmatprep.subr.bf16.mxu0 %v4276_v11  ;;  %v4281_v21 = vld [vmem:[%s4672_s16 + $0x18] sm:$0xff]   ;;  %v4289_v25 = vld [vmem:[%s4672_s16 + $0x80] sm:$0xff]   ;;  %v823_v30 = vld [vmem:[%s6160_s4 + $0x30] sm:$0xff] }
  0x19   : > { %473 = vperm.xlu1 %4273, %v443_v6   ;;  %468 = vperm.xlu0 %4272, %v442_v7   ;;  %v4283_v26 = vld [vmem:[%s4672_s16 + $0x20] sm:$0xff]   ;;  %v4294_v31 = vld [vmem:[%s4672_s16 + $0x88] sm:$0xff]   ;;  %v4286_v34 = vld [vmem:[%s4672_s16 + $0x70] sm:$0xff]  }
  0x1a   : > { %4093 = vmatprep.subr.bf16.mxu1 %v4289_v25  ;;  %v4285_v32 = vld [vmem:[%s4672_s16 + $0x28] sm:$0xff]   ;;  %v2159_v37 = vld [vmem:[%s6162_s6 + $0x80] sm:$0xff]  ;;  %v4287_v38 = vld [vmem:[%s4672_s16 + $0x30] sm:$0xff]  }
  0x1b   : > { %3726 = vmatpush3.bf16.msra.mxu0 %v4277_v13  ;;  %4094 = vmatpush3.bf16.msra.mxu1 %v4289_v25  ;;  %v2160_v36 = vld [vmem:[%s6162_s6 + $0x88] sm:$0xff]  ;;  %v4288_v39 = vld [vmem:[%s4672_s16 + $0x78] sm:$0xff]   ;;  %v2143_v42 = vld [vmem:[%s6162_s6] sm:$0xff] }
  0x1c   : > { %3727 = vmatprep.subr.bf16.mxu0 %v4278_v14  ;;  %4095 = vmatprep.subr.bf16.mxu1 %v4294_v31  ;;  %v2144_v40 = vld [vmem:[%s6162_s6 + $0x8] sm:$0xff]  ;;  %v4753_v41 = vld [vmem:[%s6157_s1 + $0x38] ss:$12 sps:$4 sm:$0xff]   ;;  %v4764_v44 = vld [vmem:[%s6157_s1 + $0x50] ss:$12 sps:$4 sm:$0xff]  }
  0x1d   : > { %483 = vperm.xlu1 %4273, %v445_v10   ;;  %478 = vperm.xlu0 %4272, %v444_v12   ;;  %v4290_v43 = vld [vmem:[%s4672_s16 + $0x38] sm:$0xff]   ;;  %v2161_v46 = vld [vmem:[%s6162_s6 + $0x90] sm:$0xff]  ;;  %v4775_v47 = vld [vmem:[%s6157_s1] ss:$12 sps:$4 sm:$0xff]  }
  0x1e   : > { %v2162_v45 = vld [vmem:[%s6162_s6 + $0x98] sm:$0xff]  ;;  %v2145_v50 = vld [vmem:[%s6162_s6 + $0x10] sm:$0xff]  ;;  %v2164_v51 = vld [vmem:[%s6162_s6 + $0xa8] sm:$0xff] }
  0x1f   : > { %3728 = vmatpush3.bf16.msra.mxu0 %v4279_v17  ;;  %4096 = vmatpush3.bf16.msra.mxu1 %v4294_v31  ;;  %v4780_v48 = vld [vmem:[%s6157_s1 + $0x1c] ss:$12 sps:$4 sm:$0xff]   ;;  %v2163_v52 = vld [vmem:[%s6162_s6 + $0xa0] sm:$0xff]  ;;  %v2165_v58 = vld [vmem:[%s6162_s6 + $0xb0] sm:$0xff] }
  0x20   : > { %3729 = vmatprep.subr.bf16.mxu0 %v4280_v18  ;;  %v2146_v49 = vld [vmem:[%s6162_s6 + $0x18] sm:$0xff]  ;;  %v4806_v54 = vld [vmem:[%s6157_s1 + $0x34] ss:$12 sps:$4 sm:$0xff]   ;;  %v2148_v55 = vld [vmem:[%s6162_s6 + $0x28] sm:$0xff] }
  0x21   : > { %832 = vperm.xlu1 %4273, %v818_v15   ;;  %827 = vperm.xlu0 %4272, %v817_v16   ;;  %v4801_v53 = vld [vmem:[%s6157_s1 + $0x18] ss:$12 sps:$4 sm:$0xff]   ;;  %v4825_v59 = vld [vmem:[%s6157_s1 + $0x30] ss:$12 sps:$4 sm:$0xff]   ;;  %v2168_v63 = vld [vmem:[%s6162_s6 + $0xc8] sm:$0xff] }
  0x22   : > { %4098 = vmatmul.mubr.msk.bf16.vlgmr.msra.gmra.mrb[0].mxu1 %vm654_vm0, %v4735_v35  ;;  %v2147_v56 = vld [vmem:[%s6162_s6 + $0x20] sm:$0xff]  ;;  %v2166_v57 = vld [vmem:[%s6162_s6 + $0xb8] sm:$0xff]  ;;  %v2149_v62 = vld [vmem:[%s6162_s6 + $0x30] sm:$0xff] }
  0x23   : > { %3730 = vmatpush3.bf16.msra.mxu0 %v4281_v21  ;;  %4101 = vmatprep.mubr.msk.bf16.mxu1 %vm654_vm0, %v4753_v41  ;;  %v4830_v60 = vld [vmem:[%s6157_s1 + $0x4c] ss:$12 sps:$4 sm:$0xff]   ;;  %v2167_v0 = vld [vmem:[%s6162_s6 + $0xc0] sm:$0xff]  ;;  %v4849_v1 = vld [vmem:[%s6157_s1 + $0x48] ss:$12 sps:$4 sm:$0xff]  }
  0x24   : > { %3731 = vmatprep.subr.bf16.mxu0 %v4282_v22  ;;  %v2150_v61 = vld [vmem:[%s6162_s6 + $0x38] sm:$0xff]  ;;  %v2152_v2 = vld [vmem:[%s6162_s6 + $0x48] sm:$0xff]  ;;  %v2151_v3 = vld [vmem:[%s6162_s6 + $0x40] sm:$0xff] }
  0x25   : > { %842 = vperm.xlu1 %4273, %v820_v19   ;;  %837 = vperm.xlu0 %4272, %v819_v20   ;;  %v2170_v4 = vld [vmem:[%s6162_s6 + $0xd8] sm:$0xff]  ;;  %v2169_v5 = vld [vmem:[%s6162_s6 + $0xd0] sm:$0xff]  ;;  %v2172_v8 = vld [vmem:[%s6162_s6 + $0xe8] sm:$0xff] }
  0x26   : > { %v2154_v6 = vld [vmem:[%s6162_s6 + $0x58] sm:$0xff]  ;;  %v2153_v7 = vld [vmem:[%s6162_s6 + $0x50] sm:$0xff]  ;;  %v2171_v9 = vld [vmem:[%s6162_s6 + $0xe0] sm:$0xff] }
  0x27   : > { %3732 = vmatpush3.bf16.msra.mxu0 %v4283_v26  ;;  %v2156_v10 = vld [vmem:[%s6162_s6 + $0x68] sm:$0xff]  ;;  %v2155_v11 = vld [vmem:[%s6162_s6 + $0x60] sm:$0xff]  ;;  %v2174_v12 = vld [vmem:[%s6162_s6 + $0xf8] sm:$0xff] }
  0x28   : > { %3733 = vmatprep.subr.bf16.mxu0 %v4284_v27  ;;  %v2173_v13 = vld [vmem:[%s6162_s6 + $0xf0] sm:$0xff]  ;;  %v2158_v14 = vld [vmem:[%s6162_s6 + $0x78] sm:$0xff]  ;;  %v2721_v16 = vld [vmem:[%s6164_s8 + $0x88] sm:$0xff] }
  0x29   : > { %852 = vperm.xlu1 %4273, %v822_v23   ;;  %847 = vperm.xlu0 %4272, %v821_v24   ;;  %v2157_v15 = vld [vmem:[%s6162_s6 + $0x70] sm:$0xff]  ;;  %v2720_v17 = vld [vmem:[%s6164_s8 + $0x80] sm:$0xff]  ;;  %v2705_v18 = vld [vmem:[%s6164_s8 + $0x8] sm:$0xff] }
  0x2a   : > { %4102 = vmatmul.mubr.msk.bf16.gmra.mrb[4].mxu1 %vm654_vm0, %v4764_v44  ;;  %v2704_v19 = vld [vmem:[%s6164_s8] sm:$0xff]  ;;  %v2723_v20 = vld [vmem:[%s6164_s8 + $0x98] sm:$0xff]  ;;  %v2722_v21 = vld [vmem:[%s6164_s8 + $0x90] sm:$0xff] }
  0x2b   : > { %3734 = vmatpush3.bf16.msra.mxu0 %v4285_v32  ;;  %v2707_v22 = vld [vmem:[%s6164_s8 + $0x18] sm:$0xff]  ;;  %v2706_v23 = vld [vmem:[%s6164_s8 + $0x10] sm:$0xff]  ;;  %v2725_v24 = vld [vmem:[%s6164_s8 + $0xa8] sm:$0xff] }
  0x2c   : > { %3735 = vmatprep.subr.bf16.mxu0 %v4286_v34  ;;  %v2724_v25 = vld [vmem:[%s6164_s8 + $0xa0] sm:$0xff]  ;;  %v2709_v26 = vld [vmem:[%s6164_s8 + $0x28] sm:$0xff]  ;;  %v2711_v31 = vld [vmem:[%s6164_s8 + $0x38] sm:$0xff] }
  0x2d   : > { %862 = vperm.xlu1 %4273, %v824_v29   ;;  %857 = vperm.xlu0 %4272, %v823_v30   ;;  %v2708_v27 = vld [vmem:[%s6164_s8 + $0x20] sm:$0xff]  ;;  %v2727_v29 = vld [vmem:[%s6164_s8 + $0xb8] sm:$0xff]  ;;  %v2726_v30 = vld [vmem:[%s6164_s8 + $0xb0] sm:$0xff] }
  0x2e   : > { %v2710_v32 = vld [vmem:[%s6164_s8 + $0x30] sm:$0xff]  ;;  %v2728_v34 = vld [vmem:[%s6164_s8 + $0xc0] sm:$0xff] }
  0x2f   : > { %3736 = vmatpush3.bf16.msra.mxu0 %v4287_v38  ;;  %v2731_v38 = vld [vmem:[%s6164_s8 + $0xd8] sm:$0xff] }
  0x30   : > { %3737 = vmatprep.subr.bf16.mxu0 %v4288_v39  ;;  %v2730_v39 = vld [vmem:[%s6164_s8 + $0xd0] sm:$0xff] }
  0x31   : > { %2262 = vperm.xlu1 %4273, %v2160_v36   ;;  %2257 = vperm.xlu0 %4272, %v2159_v37   ;;  %v2713_v36 = vld [vmem:[%s6164_s8 + $0x48] sm:$0xff]  ;;  %v2712_v37 = vld [vmem:[%s6164_s8 + $0x40] sm:$0xff] }
  0x33   : > { %3738 = vmatpush3.bf16.msra.mxu0 %v4290_v43  ;;  %v2733_v43 = vld [vmem:[%s6164_s8 + $0xe8] sm:$0xff] }
  0x35   : > { %2182 = vperm.xlu1 %4273, %v2144_v40   ;;  %2177 = vperm.xlu0 %4272, %v2143_v42   ;;  %v2715_v40 = vld [vmem:[%s6164_s8 + $0x58] sm:$0xff]  ;;  %v2714_v42 = vld [vmem:[%s6164_s8 + $0x50] sm:$0xff] }
  0x36   : > { %700 = vmatmul.mubr.bf16.vlgmr.msra.gmra.mrb[0].mxu0 %v4775_v47 }
  0x37   : > { %707 = vmatprep.mubr.bf16.mxu0 %v4780_v48 }
  0x39   : > { %2272 = vperm.xlu1 %4273, %v2162_v45   ;;  %2267 = vperm.xlu0 %4272, %v2161_v46   ;;  %v2732_v45 = vld [vmem:[%s6164_s8 + $0xe0] sm:$0xff]  ;;  %v2717_v46 = vld [vmem:[%s6164_s8 + $0x68] sm:$0xff] }
  0x3d   : > { %2192 = vperm.xlu1 %4273, %v2146_v49   ;;  %2187 = vperm.xlu0 %4272, %v2145_v50   ;;  %v2716_v49 = vld [vmem:[%s6164_s8 + $0x60] sm:$0xff]  ;;  %v2735_v50 = vld [vmem:[%s6164_s8 + $0xf8] sm:$0xff] }
  0x3e   : > { %708 = vmatmul.mubr.bf16.gmra.mrb[4].mxu0 %v4801_v53 }
  0x3f   : > { %715 = vmatprep.mubr.bf16.mxu0 %v4806_v54 }
  0x41   : > { %2282 = vperm.xlu1 %4273, %v2164_v51   ;;  %2277 = vperm.xlu0 %4272, %v2163_v52   ;;  %v2734_v51 = vld [vmem:[%s6164_s8 + $0xf0] sm:$0xff]  ;;  %v2719_v52 = vld [vmem:[%s6164_s8 + $0x78] sm:$0xff] }
  0x45   : > { %2202 = vperm.xlu1 %4273, %v2148_v55   ;;  %2197 = vperm.xlu0 %4272, %v2147_v56   ;;  %v2718_v55 = vld [vmem:[%s6164_s8 + $0x70] sm:$0xff]  ;;  %v3298_v56 = vld [vmem:[#allocation2] sm:$0x1] }
  0x46   : > { %716 = vmatmul.mubr.bf16.gmra.mrb[8].mxu0 %v4825_v59 }
  0x47   : > { %723 = vmatprep.mubr.bf16.mxu0 %v4830_v60 }
  0x49   : > { %2292 = vperm.xlu1 %4273, %v2166_v57   ;;  %2287 = vperm.xlu0 %4272, %v2165_v58   ;;  %v4995_v57 = vld [vmem:[%s6159_s3] sm:$0xff]   ;;  %v4327_v58 = vld [vmem:[%s4672_s16 + $0x110] sm:$0xff]  }
  0x4a   : > { %6178 = vst [vmem:[#allocation3_spill] sm:$0xff] %v4995_v57  ;;  %4113 = vmatprep.mubr.msk.bf16.mxu1 %vm885_vm1, %v4995_v57  ;;  %4121 = vmatprep.subr.bf16.mxu0 %v4327_v58 }
  0x4b   : > { %4122 = vmatpush3.bf16.msra.mxu0 %v4327_v58 }
  0x4d   : > { %2212 = vperm.xlu1 %4273, %v2150_v61   ;;  %2207 = vperm.xlu0 %4272, %v2149_v62   ;;  %v4329_v61 = vld [vmem:[%s4672_s16 + $0x118] sm:$0xff]  }
  0x4e   : > { %724 = vmatmul.mubr.bf16.gmra.mrb[12].mxu0 %v4849_v1  ;;  %4123 = vmatprep.subr.bf16.mxu0 %v4329_v61 }
  0x4f   : > { %4125 = vmatprep.mubr.msk.bf16.mxu0 %vm654_vm0, %v4727_v33  ;;  %v2729_v33 = vld [vmem:[%s6164_s8 + $0xc8] sm:$0xff]  ;;  %4124 = vmatpush3.bf16.msra.mxu0 %v4329_v61 }
  0x51   : > { %2302 = vperm.xlu1 %4273, %v2168_v63   ;;  %2297 = vperm.xlu0 %4272, %v2167_v0  }
  0x55   : > { %2222 = vperm.xlu1 %4273, %v2152_v2   ;;  %2217 = vperm.xlu0 %4272, %v2151_v3  }
  0x56   : > { %4126 = vmatmul.mubr.msk.bf16.vlgmr.msra.gmra.mrb[16].mxu0 %vm654_vm0, %v4735_v35 }
  0x57   : > { %4129 = vmatprep.mubr.msk.bf16.mxu0 %vm654_vm0, %v4753_v41 }
  0x59   : > { %2312 = vperm.xlu1 %4273, %v2170_v4   ;;  %2307 = vperm.xlu0 %4272, %v2169_v5  }
  0x5d   : > { %2232 = vperm.xlu1 %4273, %v2154_v6   ;;  %2227 = vperm.xlu0 %4272, %v2153_v7  }
  0x5e   : > { %4130 = vmatmul.mubr.msk.bf16.gmra.mrb[20].mxu0 %vm654_vm0, %v4764_v44 }
  0x5f   : > { %4141 = vmatprep.mubr.msk.bf16.mxu0 %vm885_vm1, %v4995_v57 }
  0x61   : > { %2322 = vperm.xlu1 %4273, %v2172_v8   ;;  %2317 = vperm.xlu0 %4272, %v2171_v9  }
  0x65   : > { %2242 = vperm.xlu1 %4273, %v2156_v10   ;;  %2237 = vperm.xlu0 %4272, %v2155_v11  }
  0x69   : > { %2332 = vperm.xlu1 %4273, %v2174_v12   ;;  %2327 = vperm.xlu0 %4272, %v2173_v13  }
  0x6d   : > { %2252 = vperm.xlu1 %4273, %v2158_v14   ;;  %2247 = vperm.xlu0 %4272, %v2157_v15  }
  0x71   : > { %2823 = vperm.xlu1 %4273, %v2721_v16   ;;  %2818 = vperm.xlu0 %4272, %v2720_v17  }
  0x75   : > { %2743 = vperm.xlu1 %4273, %v2705_v18   ;;  %2738 = vperm.xlu0 %4272, %v2704_v19  }
  0x79   : > { %2833 = vperm.xlu1 %4273, %v2723_v20   ;;  %2828 = vperm.xlu0 %4272, %v2722_v21  }
  0x7d   : > { %2753 = vperm.xlu1 %4273, %v2707_v22   ;;  %2748 = vperm.xlu0 %4272, %v2706_v23  }
  0x81   : > { %2843 = vperm.xlu1 %4273, %v2725_v24   ;;  %2838 = vperm.xlu0 %4272, %v2724_v25  }
  0x85   : > { %2763 = vperm.xlu1 %4273, %v2709_v26   ;;  %2758 = vperm.xlu0 %4272, %v2708_v27  }
  0x89   : > { %2853 = vperm.xlu1 %4273, %v2727_v29   ;;  %2848 = vperm.xlu0 %4272, %v2726_v30  }
  0x8d   : > { %2773 = vperm.xlu1 %4273, %v2711_v31   ;;  %2768 = vperm.xlu0 %4272, %v2710_v32  }
  0x90   : > { %v5009_v5 = vpop.permute.xlu0 %448  ;;  %v5017_v15 = vpop.permute.xlu1 %458 }
  0x91   : > { %2863 = vperm.xlu1 %4273, %v2729_v33   ;;  %2858 = vperm.xlu0 %4272, %v2728_v34  }
  0x94   : > { %v5012_v12 = vpop.permute.xlu0 %453  ;;  %v5026_v27 = vpop.permute.xlu1 %463 }
  0x95   : > { %2783 = vperm.xlu1 %4273, %v2713_v36   ;;  %2778 = vperm.xlu0 %4272, %v2712_v37  }
  0x99   : > { %2873 = vperm.xlu1 %4273, %v2731_v38   ;;  %2868 = vperm.xlu0 %4272, %v2730_v39   ;;  %v5037_v39 = vpop.permute.xlu0 %468 }
  0x9d   : > { %2793 = vperm.xlu1 %4273, %v2715_v40   ;;  %2788 = vperm.xlu0 %4272, %v2714_v42  }
  0xa1   : > { %2883 = vperm.xlu1 %4273, %v2733_v43   ;;  %2878 = vperm.xlu0 %4272, %v2732_v45  }
  0xa5   : > { %2803 = vperm.xlu1 %4273, %v2717_v46   ;;  %2798 = vperm.xlu0 %4272, %v2716_v49   ;;  %v5040_v46 = vpop.permute.xlu1 %473 }
  0xa9   : > { %2893 = vperm.xlu1 %4273, %v2735_v50   ;;  %2888 = vperm.xlu0 %4272, %v2734_v51  }
  0xad   : > { %2813 = vperm.xlu1 %4273, %v2719_v52   ;;  %2808 = vperm.xlu0 %4272, %v2718_v55  }
  0xb1   : > { %3301 = vperm.xlu0 %4272, %v3298_v56  }
  0xf5   : > { %v4099_v62 = vpop.f32.mrb[0].mxu1 }
  0xf6   : > { %v766_v63 = vpop.f32.mrb[1].mxu1 }
  0xf7   : > { %v4100_v0 = vpop.f32.mrb[2].mxu1 }
  0xf8   : > { %v769_v2 = vpop.f32.mrb[3].mxu1 }
  0xfd   : > { %v4103_v3 = vpop.f32.mrb[4].mxu1 }
  0xfe   : > { %v782_v4 = vpop.f32.mrb[5].mxu1 }
  0xff   : > { %v4104_v7 = vpop.f32.mrb[6].mxu1 }
 0x100   : > { %v785_v8 = vpop.f32.mrb[7].mxu1 }
 0x109   : > { %v3739_v6 = vpop.f32.mrb[0].mxu0 }
 0x10a   : > { %v3740_v35 = vpop.f32.mrb[1].mxu0 }
 0x10b   : > { %v3741_v9 = vadd.f32 %v3740_v35, %v3739_v6  ;;  %v3742_v41 = vpop.f32.mrb[2].mxu0  ;;  %v5054_v35 = vpop.permute.xlu1 %483 }
 0x10c   : > { %v3743_v10 = vpop.f32.mrb[3].mxu0 }
 0x10d   : > { %v3744_v11 = vadd.f32 %v3743_v10, %v3742_v41  ;;  %v702_v44 = vadd.f32 %v3741_v9, %v5009_v5 }
 0x10f   : > { %v5014_v13 = vadd.f32 %v766_v63, %v702_v44  ;;  %v705_v14 = vadd.f32 %v3744_v11, %v5012_v12  ;;  %v5051_v63 = vpop.permute.xlu0 %478 }
 0x111   : > { %v5019_v16 = vadd.f32 %v769_v2, %v705_v14  ;;  %v3745_v17 = vpop.f32.mrb[4].mxu0  ;;  %v805_v19 = vmul.f32 %v5014_v13, %v5014_v13  ;;  %v4310_v14 = vld [vmem:[%s4672_s16 + $0xd0] sm:$0xff]  }
 0x112   : > { %v3746_v18 = vpop.f32.mrb[5].mxu0 }
 0x113   : > { %v806_v20 = vmul.f32 %v5019_v16, %v5019_v16  ;;  %v3747_v21 = vadd.f32 %v3746_v18, %v3745_v17  ;;  %v3748_v22 = vpop.f32.mrb[6].mxu0  ;;  %v5075_v17 = vld [vmem:[%s6159_s3 + $0x10] sm:$0xff]   ;;  %v4312_v18 = vld [vmem:[%s4672_s16 + $0xd8] sm:$0xff]  }
 0x114   : > { %v3749_v23 = vpop.f32.mrb[7].mxu0 }
 0x115   : > { %v710_v24 = vadd.f32 %v3747_v21, %v5017_v15  ;;  %v3750_v25 = vadd.f32 %v3749_v23, %v3748_v22  ;;  %v813_v26 = vpack.c.bf16 %v806_v20, %v805_v19  ;;  %v4313_v19 = vld [vmem:[%s4672_s16 + $0x98] sm:$0xff]   ;;  %v4316_v20 = vld [vmem:[%s4672_s16 + $0xe0] sm:$0xff]   ;;  %v4318_v23 = vld [vmem:[%s4672_s16 + $0xe8] sm:$0xff]  }
 0x116   : > { %v5087_v21 = vld [vmem:[%s6159_s3 + $0x18] sm:$0xff]   ;;  %v4317_v22 = vld [vmem:[%s4672_s16 + $0xa0] sm:$0xff]  }
 0x117   : > { %v5028_v29 = vadd.f32 %v4099_v62, %v710_v24  ;;  %v713_v30 = vadd.f32 %v3750_v25, %v5026_v27  ;;  %4105 = vmatprep.subr.bf16.mxu1 %v813_v26  ;;  %v4319_v24 = vld [vmem:[%s4672_s16 + $0xa8] sm:$0xff]   ;;  %v4320_v25 = vld [vmem:[%s4672_s16 + $0xf0] sm:$0xff]  }
 0x118   : > { %4106 = vmatpush3.bf16.msra.mxu1 %v813_v26  ;;  %v4321_v26 = vld [vmem:[%s4672_s16 + $0xb0] sm:$0xff]  }
 0x119   : > { %v5031_v31 = vadd.f32 %v4100_v0, %v713_v30  ;;  %v3751_v32 = vpop.f32.mrb[8].mxu0  ;;  %v807_v37 = vmul.f32 %v5028_v29, %v5028_v29  ;;  %v4322_v30 = vld [vmem:[%s4672_s16 + $0xf8] sm:$0xff]  }
 0x11a   : > { %v3752_v33 = vpop.f32.mrb[9].mxu0 }
 0x11b   : > { %v3753_v34 = vadd.f32 %v3752_v33, %v3751_v32  ;;  %v3754_v36 = vpop.f32.mrb[10].mxu0  ;;  %v808_v38 = vmul.f32 %v5031_v31, %v5031_v31  ;;  %v4323_v32 = vld [vmem:[%s4672_s16 + $0xb8] sm:$0xff]   ;;  %v4324_v33 = vld [vmem:[%s4672_s16 + $0x100] sm:$0xff]  }
 0x11c   : > { %v3755_v40 = vpop.f32.mrb[11].mxu0 }
 0x11d   : > { %v3756_v42 = vadd.f32 %v3755_v40, %v3754_v36  ;;  %v718_v43 = vadd.f32 %v3753_v34, %v5037_v39  ;;  %v814_v45 = vpack.c.bf16 %v808_v38, %v807_v37  ;;  %v4325_v34 = vld [vmem:[%s4672_s16 + $0xc0] sm:$0xff]   ;;  %v4328_v36 = vld [vmem:[%s4672_s16 + $0xc8] sm:$0xff]  }
 0x11e   : > { %v4330_v37 = vld [vmem:[%s4672_s16 + $0x160] sm:$0xff]   ;;  %v4332_v40 = vld [vmem:[%s4672_s16 + $0x168] sm:$0xff]  }
 0x11f   : > { %v5042_v49 = vadd.f32 %v782_v4, %v718_v43  ;;  %4107 = vmatprep.subr.bf16.mxu1 %v814_v45  ;;  %v721_v50 = vadd.f32 %v3756_v42, %v5040_v46  ;;  %v4331_v38 = vld [vmem:[%s4672_s16 + $0x120] sm:$0xff]   ;;  %v4333_v42 = vld [vmem:[%s4672_s16 + $0x128] sm:$0xff]   ;;  %v4334_v43 = vld [vmem:[%s4672_s16 + $0x170] sm:$0xff]  }
 0x120   : > { %4108 = vmatpush3.bf16.msra.mxu1 %v814_v45  ;;  %v4335_v45 = vld [vmem:[%s4672_s16 + $0x130] sm:$0xff]  }
 0x121   : > { %v5045_v51 = vadd.f32 %v785_v8, %v721_v50  ;;  %v3757_v52 = vpop.f32.mrb[12].mxu0  ;;  %v809_v56 = vmul.f32 %v5042_v49, %v5042_v49  ;;  %v4336_v50 = vld [vmem:[%s4672_s16 + $0x178] sm:$0xff]  }
 0x122   : > { %v3758_v55 = vpop.f32.mrb[13].mxu0 }
 0x123   : > { %v810_v58 = vmul.f32 %v5045_v51, %v5045_v51  ;;  %v3759_v61 = vadd.f32 %v3758_v55, %v3757_v52  ;;  %v3760_v62 = vpop.f32.mrb[14].mxu0  ;;  %v4337_v52 = vld [vmem:[%s4672_s16 + $0x138] sm:$0xff]   ;;  %v4338_v55 = vld [vmem:[%s4672_s16 + $0x180] sm:$0xff]  }
 0x124   : > { %v3761_v0 = vpop.f32.mrb[15].mxu0 }
 0x125   : > { %v726_v2 = vadd.f32 %v3759_v61, %v5051_v63  ;;  %v3762_v4 = vadd.f32 %v3761_v0, %v3760_v62  ;;  %v815_v6 = vpack.c.bf16 %v810_v58, %v809_v56  ;;  %v4339_v56 = vld [vmem:[%s4672_s16 + $0x140] sm:$0xff]   ;;  %v4340_v58 = vld [vmem:[%s4672_s16 + $0x188] sm:$0xff]   ;;  %v4342_v62 = vld [vmem:[%s4672_s16 + $0x190] sm:$0xff]  }
 0x126   : > { %v4341_v61 = vld [vmem:[%s4672_s16 + $0x148] sm:$0xff]   ;;  %v4343_v0 = vld [vmem:[%s4672_s16 + $0x150] sm:$0xff]  }
 0x127   : > { %v5056_v8 = vadd.f32 %v4103_v3, %v726_v2  ;;  %v729_v9 = vadd.f32 %v3762_v4, %v5054_v35  ;;  %4109 = vmatprep.subr.bf16.mxu1 %v815_v6  ;;  %v5069_v3 = vld [vmem:[%s6159_s3 + $0x8] sm:$0xff]   ;;  %v4344_v2 = vld [vmem:[%s4672_s16 + $0x198] sm:$0xff]  }
 0x128   : > { %4110 = vmatpush3.bf16.msra.mxu1 %v815_v6  ;;  %v4345_v4 = vld [vmem:[%s4672_s16 + $0x158] sm:$0xff]   ;;  %v4558_v6 = vld [vmem:[%s6157_s1 + $0x4] ss:$12 sps:$4 sm:$0xff]  }
 0x129   : > { %v5059_v41 = vadd.f32 %v4104_v7, %v729_v9  ;;  %v811_v10 = vmul.f32 %v5056_v8, %v5056_v8  ;;  %v4311_v7 = vld [vmem:[%s4672_s16 + $0x90] sm:$0xff]  }
 0x12a   : > { %v4346_v9 = vld [vmem:[%s4672_s16 + $0x1f0] sm:$0xff]  }
 0x12b   : > { %v812_v11 = vmul.f32 %v5059_v41, %v5059_v41 }
 0x12d   : > { %v816_v44 = vpack.c.bf16 %v812_v11, %v811_v10  ;;  %v4347_v10 = vld [vmem:[%s4672_s16 + $0x1b0] sm:$0xff]   ;;  %v4348_v11 = vld [vmem:[%s4672_s16 + $0x1f8] sm:$0xff]  }
 0x12f   : > { %4111 = vmatprep.subr.bf16.mxu1 %v816_v44 }
 0x130   : > { %4112 = vmatpush3.bf16.msra.mxu1 %v816_v44  ;;  %v4349_v44 = vld [vmem:[%s4672_s16 + $0x1b8] sm:$0xff]  }
 0x131   : > { %3777 = vmatprep.subr.bf16.mxu1 %v4310_v14  ;;  %v4350_v14 = vld [vmem:[%s4672_s16 + $0x200] sm:$0xff]  }
 0x133   : > { %4114 = vmatmul.mubr.msk.bf16.vlgmr.msra.gmra.mrb[8].mxu1 %vm885_vm1, %v5069_v3 }
 0x134   : > { %3778 = vmatpush3.bf16.msra.mxu1 %v4311_v7  ;;  %4117 = vmatprep.mubr.msk.bf16.mxu1 %vm885_vm1, %v5075_v17  ;;  %v4351_v7 = vld [vmem:[%s4672_s16 + $0x1c0] sm:$0xff]  }
 0x135   : > { %3779 = vmatprep.subr.bf16.mxu1 %v4312_v18  ;;  %v4352_v18 = vld [vmem:[%s4672_s16 + $0x208] sm:$0xff]  }
 0x138   : > { %3780 = vmatpush3.bf16.msra.mxu1 %v4313_v19  ;;  %v4353_v19 = vld [vmem:[%s4672_s16 + $0x1c8] sm:$0xff]  }
 0x139   : > { %3781 = vmatprep.subr.bf16.mxu1 %v4316_v20  ;;  %v4356_v20 = vld [vmem:[%s4672_s16 + $0x218] sm:$0xff]  }
 0x13b   : > { %4118 = vmatmul.mubr.msk.bf16.gmra.mrb[12].mxu1 %vm885_vm1, %v5087_v21 }
 0x13c   : > { %3782 = vmatpush3.bf16.msra.mxu1 %v4317_v22  ;;  %1156 = vmatprep.mubr.bf16.mxu1 %v4713_v28  ;;  %v4326_v28 = vld [vmem:[%s4672_s16 + $0x108] sm:$0xff]   ;;  %v4357_v22 = vld [vmem:[%s4672_s16 + $0x1d8] sm:$0xff]  }
 0x13d   : > { %3783 = vmatprep.subr.bf16.mxu1 %v4318_v23  ;;  %v4359_v23 = vld [vmem:[%s4672_s16 + $0x1e0] sm:$0xff]  }
 0x140   : > { %3784 = vmatpush3.bf16.msra.mxu1 %v4319_v24  ;;  %v4361_v24 = vld [vmem:[%s4672_s16 + $0x1e8] sm:$0xff]  }
 0x141   : > { %3785 = vmatprep.subr.bf16.mxu1 %v4320_v25  ;;  %v4559_v25 = vld [vmem:[%s6157_s1] ss:$12 sps:$4 sm:$0xff]  }
 0x144   : > { %3786 = vmatpush3.bf16.msra.mxu1 %v4321_v26  ;;  %v4560_v26 = vld [vmem:[%s6157_s1 + $0x1c] ss:$12 sps:$4 sm:$0xff]  }
 0x145   : > { %3787 = vmatprep.subr.bf16.mxu1 %v4322_v30  ;;  %v4561_v30 = vld [vmem:[%s6157_s1 + $0x18] ss:$12 sps:$4 sm:$0xff]  }
 0x148   : > { %3788 = vmatpush3.bf16.msra.mxu1 %v4323_v32  ;;  %v4562_v32 = vld [vmem:[%s6157_s1 + $0x34] ss:$12 sps:$4 sm:$0xff]  }
 0x149   : > { %3789 = vmatprep.subr.bf16.mxu1 %v4324_v33  ;;  %v4127_v33 = vpop.f32.mrb[16].mxu0 }
 0x14c   : > { %3790 = vmatpush3.bf16.msra.mxu1 %v4325_v34  ;;  %v1223_v34 = vpop.f32.mrb[17].mxu0 }
 0x14d   : > { %3791 = vmatprep.subr.bf16.mxu1 %v4326_v28  ;;  %v4128_v28 = vpop.f32.mrb[18].mxu0 }
 0x150   : > { %3792 = vmatpush3.bf16.msra.mxu1 %v4328_v36  ;;  %v1226_v36 = vpop.f32.mrb[19].mxu0 }
 0x151   : > { %3831 = vmatprep.subr.bf16.mxu1 %v4330_v37  ;;  %v4131_v37 = vpop.f32.mrb[20].mxu0 }
 0x153   : > { %1157 = vmatmul.mubr.bf16.vlgmr.msra.gmra.mrb[16].mxu1 %v4775_v47 }
 0x154   : > { %3832 = vmatpush3.bf16.msra.mxu1 %v4331_v38  ;;  %1164 = vmatprep.mubr.bf16.mxu1 %v4780_v48  ;;  %v1239_v38 = vpop.f32.mrb[21].mxu0 }
 0x155   : > { %3833 = vmatprep.subr.bf16.mxu1 %v4332_v40  ;;  %v5167_v40 = vpop.f32.mrb[22].mxu0 }
 0x158   : > { %3834 = vmatpush3.bf16.msra.mxu1 %v4333_v42  ;;  %v1242_v42 = vpop.f32.mrb[23].mxu0 }
 0x159   : > { %3835 = vmatprep.subr.bf16.mxu1 %v4334_v43 }
 0x15b   : > { %1165 = vmatmul.mubr.bf16.gmra.mrb[20].mxu1 %v4801_v53 }
 0x15c   : > { %3836 = vmatpush3.bf16.msra.mxu1 %v4335_v45  ;;  %1172 = vmatprep.mubr.bf16.mxu1 %v4806_v54 }
 0x15d   : > { %3837 = vmatprep.subr.bf16.mxu1 %v4336_v50 }
 0x160   : > { %3838 = vmatpush3.bf16.msra.mxu1 %v4337_v52 }
 0x161   : > { %3839 = vmatprep.subr.bf16.mxu1 %v4338_v55 }
 0x163   : > { %1173 = vmatmul.mubr.bf16.gmra.mrb[24].mxu1 %v4825_v59 }
 0x164   : > { %3840 = vmatpush3.bf16.msra.mxu1 %v4339_v56  ;;  %1180 = vmatprep.mubr.bf16.mxu1 %v4830_v60 }
 0x165   : > { %3841 = vmatprep.subr.bf16.mxu1 %v4340_v58 }
 0x168   : > { %3842 = vmatpush3.bf16.msra.mxu1 %v4341_v61 }
 0x169   : > { %3843 = vmatprep.subr.bf16.mxu1 %v4342_v62 }
 0x16b   : > { %1181 = vmatmul.mubr.bf16.gmra.mrb[28].mxu1 %v4849_v1 }
 0x16c   : > { %3844 = vmatpush3.bf16.msra.mxu1 %v4343_v0  ;;  %1532 = vmatprep.mubr.bf16.mxu1 %v4558_v6 }
 0x16d   : > { %3845 = vmatprep.subr.bf16.mxu1 %v4344_v2 }
 0x170   : > { %3846 = vmatpush3.bf16.msra.mxu1 %v4345_v4 }
 0x171   : > { %3885 = vmatprep.subr.bf16.mxu1 %v4346_v9 }
 0x173   : > { %1533 = vmatmul.mubr.bf16.vlgmr.msra.gmra.mrb[32].mxu1 %v4775_v47  ;;  %v4354_v47 = vld [vmem:[%s4672_s16 + $0x210] sm:$0xff]  }
 0x174   : > { %3886 = vmatpush3.bf16.msra.mxu1 %v4347_v10  ;;  %1540 = vmatprep.mubr.bf16.mxu1 %v4780_v48  ;;  %v4355_v48 = vld [vmem:[%s4672_s16 + $0x1d0] sm:$0xff]  }
 0x175   : > { %3887 = vmatprep.subr.bf16.mxu1 %v4348_v11 }
 0x178   : > { %3888 = vmatpush3.bf16.msra.mxu1 %v4349_v44 }
 0x179   : > { %3889 = vmatprep.subr.bf16.mxu1 %v4350_v14 }
 0x17b   : > { %1541 = vmatmul.mubr.bf16.gmra.mrb[36].mxu1 %v4801_v53  ;;  %v4358_v53 = vld [vmem:[%s4672_s16 + $0x220] sm:$0xff]  }
 0x17c   : > { %3890 = vmatpush3.bf16.msra.mxu1 %v4351_v7  ;;  %1548 = vmatprep.mubr.bf16.mxu1 %v4806_v54  ;;  %v4360_v54 = vld [vmem:[%s4672_s16 + $0x228] sm:$0xff]  }
 0x17d   : > { %3891 = vmatprep.subr.bf16.mxu1 %v4352_v18 }
 0x180   : > { %3892 = vmatpush3.bf16.msra.mxu1 %v4353_v19 }
 0x181   : > { %3893 = vmatprep.subr.bf16.mxu1 %v4354_v47 }
 0x183   : > { %1549 = vmatmul.mubr.bf16.gmra.mrb[40].mxu1 %v4825_v59 }
 0x184   : > { %3894 = vmatpush3.bf16.msra.mxu1 %v4355_v48  ;;  %1556 = vmatprep.mubr.bf16.mxu1 %v4830_v60 }
 0x185   : > { %3895 = vmatprep.subr.bf16.mxu1 %v4356_v20 }
 0x188   : > { %3896 = vmatpush3.bf16.msra.mxu1 %v4357_v22 }
 0x189   : > { %3897 = vmatprep.subr.bf16.mxu1 %v4358_v53 }
 0x18b   : > { %1557 = vmatmul.mubr.bf16.gmra.mrb[44].mxu1 %v4849_v1 }
 0x18c   : > { %3898 = vmatpush3.bf16.msra.mxu1 %v4359_v23  ;;  %1908 = vmatprep.mubr.bf16.mxu1 %v4558_v6 }
 0x18d   : > { %3899 = vmatprep.subr.bf16.mxu1 %v4360_v54 }
 0x190   : > { %3900 = vmatpush3.bf16.msra.mxu1 %v4361_v24 }
 0x193   : > { %1909 = vmatmul.mubr.bf16.vlgmr.msra.gmra.mrb[48].mxu1 %v4559_v25 }
 0x194   : > { %1916 = vmatprep.mubr.bf16.mxu1 %v4560_v26 }
 0x19b   : > { %1917 = vmatmul.mubr.bf16.gmra.mrb[52].mxu1 %v4561_v30 }
 0x19c   : > { %1924 = vmatprep.mubr.bf16.mxu1 %v4562_v32 }
 0x1a3   : > { %1925 = vmatmul.mubr.bf16.gmra.mrb[56].mxu1 %v4825_v59 }
 0x1a4   : > { %1932 = vmatprep.mubr.bf16.mxu1 %v4830_v60 }
 0x1ab   : > { %1933 = vmatmul.mubr.bf16.gmra.mrb[60].mxu1 %v4849_v1 }
 0x206   : > { %v5169_v43 = vpop.f32.mrb[8].mxu1 }
 0x207   : > { %v5171_v45 = vpop.f32.mrb[9].mxu1 }
 0x208   : > { %v5173_v50 = vpop.f32.mrb[10].mxu1 }
 0x209   : > { %v5175_v59 = vpop.f32.mrb[11].mxu1 }
 0x20e   : > { %v5177_v60 = vpop.f32.mrb[12].mxu1 }
 0x20f   : > { %v5179_v52 = vpop.f32.mrb[13].mxu1 }
 0x210   : > { %v5181_v1 = vpop.f32.mrb[14].mxu1 }
 0x211   : > { %v5183_v55 = vpop.f32.mrb[15].mxu1 }
 0x226   : > { %v3793_v56 = vpop.f32.mrb[16].mxu1 }
 0x227   : > { %v3794_v58 = vpop.f32.mrb[17].mxu1 }
 0x228   : > { %v3795_v61 = vadd.f32 %v3794_v58, %v3793_v56  ;;  %v3796_v62 = vpop.f32.mrb[18].mxu1 }
 0x229   : > { %v3797_v0 = vpop.f32.mrb[19].mxu1 }
 0x22a   : > { %v3798_v2 = vadd.f32 %v3797_v0, %v3796_v62  ;;  %v1159_v4 = vadd.f32 %v3795_v61, %v5009_v5 }
 0x22c   : > { %v5186_v6 = vadd.f32 %v1223_v34, %v1159_v4  ;;  %v1162_v9 = vadd.f32 %v3798_v2, %v5012_v12 }
 0x22e   : > { %v5189_v10 = vadd.f32 %v1226_v36, %v1162_v9  ;;  %v3799_v11 = vpop.f32.mrb[20].mxu1  ;;  %v1254_v14 = vmul.f32 %v5186_v6, %v5186_v6 }
 0x22f   : > { %v3800_v44 = vpop.f32.mrb[21].mxu1 }
 0x230   : > { %v1255_v7 = vmul.f32 %v5189_v10, %v5189_v10  ;;  %v3801_v18 = vadd.f32 %v3800_v44, %v3799_v11  ;;  %v3802_v19 = vpop.f32.mrb[22].mxu1 }
 0x231   : > { %v3803_v47 = vpop.f32.mrb[23].mxu1 }
 0x232   : > { %v1167_v48 = vadd.f32 %v3801_v18, %v5017_v15  ;;  %v3804_v20 = vadd.f32 %v3803_v47, %v3802_v19  ;;  %v1262_v22 = vpack.c.bf16 %v1255_v7, %v1254_v14 }
 0x234   : > { %v5196_v53 = vadd.f32 %v4127_v33, %v1167_v48  ;;  %v1170_v23 = vadd.f32 %v3804_v20, %v5026_v27  ;;  %4133 = vmatprep.subr.bf16.mxu0 %v1262_v22 }
 0x235   : > { %4134 = vmatpush3.bf16.msra.mxu0 %v1262_v22 }
 0x236   : > { %v5199_v54 = vadd.f32 %v4128_v28, %v1170_v23  ;;  %v3805_v24 = vpop.f32.mrb[24].mxu1  ;;  %v1256_v32 = vmul.f32 %v5196_v53, %v5196_v53 }
 0x237   : > { %v3806_v25 = vpop.f32.mrb[25].mxu1 }
 0x238   : > { %v3807_v26 = vadd.f32 %v3806_v25, %v3805_v24  ;;  %v3808_v30 = vpop.f32.mrb[26].mxu1  ;;  %v1257_v34 = vmul.f32 %v5199_v54, %v5199_v54 }
 0x239   : > { %v3809_v36 = vpop.f32.mrb[27].mxu1 }
 0x23a   : > { %v3810_v56 = vadd.f32 %v3809_v36, %v3808_v30  ;;  %v1175_v33 = vadd.f32 %v3807_v26, %v5037_v39  ;;  %v1263_v58 = vpack.c.bf16 %v1257_v34, %v1256_v32  ;;  %v4362_v32 = vld [vmem:[%s4672_s16 + $0x1a0] sm:$0xff]   ;;  %v4363_v34 = vld [vmem:[%s4672_s16 + $0x1a8] sm:$0xff]  }
 0x23c   : > { %v5206_v61 = vadd.f32 %v1239_v38, %v1175_v33  ;;  %4135 = vmatprep.subr.bf16.mxu0 %v1263_v58  ;;  %v1178_v28 = vadd.f32 %v3810_v56, %v5040_v46 }
 0x23d   : > { %4136 = vmatpush3.bf16.msra.mxu0 %v1263_v58 }
 0x23e   : > { %v5209_v62 = vadd.f32 %v1242_v42, %v1178_v28  ;;  %v3811_v0 = vpop.f32.mrb[28].mxu1  ;;  %v1258_v4 = vmul.f32 %v5206_v61, %v5206_v61 }
 0x23f   : > { %v3812_v2 = vpop.f32.mrb[29].mxu1 }
 0x240   : > { %v1259_v9 = vmul.f32 %v5209_v62, %v5209_v62  ;;  %v3813_v11 = vadd.f32 %v3812_v2, %v3811_v0  ;;  %v3814_v44 = vpop.f32.mrb[30].mxu1 }
 0x241   : > { %v3815_v14 = vpop.f32.mrb[31].mxu1 }
 0x242   : > { %v1183_v38 = vadd.f32 %v3813_v11, %v5051_v63  ;;  %v3816_v7 = vadd.f32 %v3815_v14, %v3814_v44  ;;  %v1264_v18 = vpack.c.bf16 %v1259_v9, %v1258_v4  ;;  %v5247_v44 = vld [vmem:[%s6157_s1 + $0x8] ss:$12 sps:$4 sm:$0xff]  }
 0x244   : > { %v5216_v19 = vadd.f32 %v4131_v37, %v1183_v38  ;;  %v1186_v42 = vadd.f32 %v3816_v7, %v5054_v35  ;;  %4137 = vmatprep.subr.bf16.mxu0 %v1264_v18 }
 0x245   : > { %4138 = vmatpush3.bf16.msra.mxu0 %v1264_v18 }
 0x246   : > { %v5220_v47 = vadd.f32 %v5167_v40, %v1186_v42  ;;  %v3847_v48 = vpop.f32.mrb[32].mxu1  ;;  %v1260_v24 = vmul.f32 %v5216_v19, %v5216_v19 }
 0x247   : > { %v3848_v20 = vpop.f32.mrb[33].mxu1 }
 0x248   : > { %v5222_v22 = vadd.f32 %v3848_v20, %v3847_v48  ;;  %v3850_v23 = vpop.f32.mrb[34].mxu1  ;;  %v1261_v37 = vmul.f32 %v5220_v47, %v5220_v47  ;;  %v5258_v48 = vld [vmem:[%s6157_s1 + $0x20] ss:$12 sps:$4 sm:$0xff]  }
 0x249   : > { %v3851_v25 = vpop.f32.mrb[35].mxu1 }
 0x24a   : > { %v5228_v26 = vadd.f32 %v3851_v25, %v3850_v23  ;;  %v1265_v30 = vpack.c.bf16 %v1261_v37, %v1260_v24  ;;  %v5265_v23 = vld [vmem:[%s6157_s1 + $0x38] ss:$12 sps:$4 sm:$0xff]  }
 0x24c   : > { %4139 = vmatprep.subr.bf16.mxu0 %v1265_v30 }
 0x24d   : > { %4140 = vmatpush3.bf16.msra.mxu0 %v1265_v30 }
 0x24e   : > { %v3853_v40 = vpop.f32.mrb[36].mxu1  ;;  %4149 = vmatprep.subr.bf16.mxu0 %v4362_v32 }
 0x24f   : > { %v3854_v36 = vpop.f32.mrb[37].mxu1 }
 0x250   : > { %v5232_v56 = vadd.f32 %v3854_v36, %v3853_v40  ;;  %4142 = vmatmul.mubr.msk.bf16.vlgmr.msra.gmra.mrb[24].mxu0 %vm885_vm1, %v5069_v3  ;;  %v3856_v33 = vpop.f32.mrb[38].mxu1 }
 0x251   : > { %v3857_v58 = vpop.f32.mrb[39].mxu1  ;;  %4145 = vmatprep.mubr.msk.bf16.mxu0 %vm885_vm1, %v5075_v17  ;;  %4150 = vmatpush3.bf16.msra.mxu0 %v4362_v32  ;;  %v5276_v32 = vld [vmem:[%s6157_s1 + $0x50] ss:$12 sps:$4 sm:$0xff]  }
 0x252   : > { %v5238_v28 = vadd.f32 %v3857_v58, %v3856_v33  ;;  %4151 = vmatprep.subr.bf16.mxu0 %v4363_v34 }
 0x255   : > { %4152 = vmatpush3.bf16.msra.mxu0 %v4363_v34 }
 0x256   : > { %v3859_v0 = vpop.f32.mrb[40].mxu1 }
 0x257   : > { %v3860_v2 = vpop.f32.mrb[41].mxu1 }
 0x258   : > { %v5240_v4 = vadd.f32 %v3860_v2, %v3859_v0  ;;  %4146 = vmatmul.mubr.msk.bf16.gmra.mrb[28].mxu0 %vm885_vm1, %v5087_v21  ;;  %v3862_v9 = vpop.f32.mrb[42].mxu1 }
 0x259   : > { %v3863_v11 = vpop.f32.mrb[43].mxu1  ;;  %4153 = vmatprep.mubr.msk.bf16.mxu0 %vm654_vm0, %v5247_v44 }
 0x25a   : > { %v5251_v14 = vadd.f32 %v3863_v11, %v3862_v9 }
 0x25e   : > { %v3865_v38 = vpop.f32.mrb[44].mxu1 }
 0x25f   : > { %v3866_v7 = vpop.f32.mrb[45].mxu1 }
 0x260   : > { %v5253_v18 = vadd.f32 %v3866_v7, %v3865_v38  ;;  %v3868_v42 = vpop.f32.mrb[46].mxu1  ;;  %4154 = vmatmul.mubr.msk.bf16.vlgmr.msra.gmra.mrb[32].mxu0 %vm654_vm0, %v5258_v48 }
 0x261   : > { %v3869_v20 = vpop.f32.mrb[47].mxu1  ;;  %4157 = vmatprep.mubr.msk.bf16.mxu0 %vm654_vm0, %v5265_v23 }
 0x262   : > { %v5269_v24 = vadd.f32 %v3869_v20, %v3868_v42 }
 0x266   : > { %v3901_v37 = vpop.f32.mrb[48].mxu1 }
 0x267   : > { %v3902_v25 = vpop.f32.mrb[49].mxu1 }
 0x268   : > { %v5271_v30 = vadd.f32 %v3902_v25, %v3901_v37  ;;  %4158 = vmatmul.mubr.msk.bf16.gmra.mrb[36].mxu0 %vm654_vm0, %v5276_v32  ;;  %v3904_v40 = vpop.f32.mrb[50].mxu1 }
 0x269   : > { %v3905_v34 = vpop.f32.mrb[51].mxu1  ;;  %4169 = vmatprep.mubr.msk.bf16.mxu0 %vm885_vm1, %v4995_v57 }
 0x26a   : > { %6179 = vst [vmem:[#allocation4_spill] sm:$0xff] %v5271_v30  ;;  %v5282_v36 = vadd.f32 %v3905_v34, %v3904_v40 }
 0x26c   : > { %6180 = vst [vmem:[#allocation5_spill] sm:$0xff] %v5282_v36 }
 0x26e   : > { %v3907_v33 = vpop.f32.mrb[52].mxu1 }
 0x26f   : > { %v3908_v58 = vpop.f32.mrb[53].mxu1 }
 0x270   : > { %v5284_v0 = vadd.f32 %v3908_v58, %v3907_v33  ;;  %v3910_v2 = vpop.f32.mrb[54].mxu1  ;;  %v5296_v58 = vpop.permute.xlu0 %827 }
 0x271   : > { %v3911_v9 = vpop.f32.mrb[55].mxu1 }
 0x272   : > { %v5286_v11 = vadd.f32 %v3911_v9, %v3910_v2  ;;  %v5298_v2 = vpop.permute.xlu1 %832 }
 0x274   : > { %6181 = vst [vmem:[#allocation6_spill] sm:$0xff] %v5286_v11  ;;  %v5300_v9 = vpop.permute.xlu0 %837 }
 0x276   : > { %v3913_v38 = vpop.f32.mrb[56].mxu1 }
 0x277   : > { %v3914_v7 = vpop.f32.mrb[57].mxu1 }
 0x278   : > { %v5288_v42 = vadd.f32 %v3914_v7, %v3913_v38  ;;  %v3916_v20 = vpop.f32.mrb[58].mxu1  ;;  %v5302_v38 = vpop.permute.xlu1 %842 }
 0x279   : > { %v3917_v37 = vpop.f32.mrb[59].mxu1  ;;  %v5304_v7 = vpop.permute.xlu0 %847 }
 0x27a   : > { %6182 = vst [vmem:[#allocation7_spill] sm:$0xff] %v5288_v42  ;;  %v5290_v25 = vadd.f32 %v3917_v37, %v3916_v20  ;;  %v941_v20 = vadd.f32 %v5169_v43, %v5300_v9 }
 0x27c   : > { %6183 = vst [vmem:[#allocation8_spill] sm:$0xff] %v5290_v25  ;;  %4430 = vrsqrt.f32 %v941_v20 }
 0x27d   : > { %v5314_v37 = vpop.permute.xlu0 %857 }
 0x27e   : > { %v3919_v30 = vpop.f32.mrb[60].mxu1  ;;  %v957_v25 = vadd.f32 %v5177_v60, %v5314_v37 }
 0x27f   : > { %v3920_v57 = vpop.f32.mrb[61].mxu1 }
 0x280   : > { %v5292_v40 = vadd.f32 %v3920_v57, %v3919_v30  ;;  %v3922_v34 = vpop.f32.mrb[62].mxu1  ;;  %v933_v57 = vadd.f32 %v5171_v45, %v5296_v58  ;;  %v944_v30 = vadd.f32 %v5173_v50, %v5302_v38 }
 0x281   : > { %v3923_v36 = vpop.f32.mrb[63].mxu1 }
 0x282   : > { %6184 = vst [vmem:[#allocation9_spill] sm:$0xff] %v5292_v40  ;;  %v5294_v33 = vadd.f32 %v3923_v36, %v3922_v34  ;;  %v5312_v36 = vpop.permute.xlu1 %852  ;;  %v936_v34 = vadd.f32 %v5175_v59, %v5298_v2  ;;  %4432 = vrsqrt.f32 %v933_v57  ;;  %v949_v59 = vadd.f32 %v5179_v52, %v5304_v7 }
 0x283   : > { %4434 = vrsqrt.f32 %v944_v30 }
 0x284   : > { %6185 = vst [vmem:[#allocation10_spill] sm:$0xff] %v5294_v33  ;;  %4436 = vrsqrt.f32 %v936_v34 }
 0x285   : > { %4438 = vrsqrt.f32 %v957_v25  ;;  %v952_v25 = vadd.f32 %v5183_v55, %v5312_v36 }
 0x286   : > { %v5322_v40 = vpop.permute.xlu1 %862 }
 0x287   : > { %v960_v57 = vadd.f32 %v5181_v1, %v5322_v40 }
 0x323   : > { %v4143_v43 = vpop.f32.mrb[24].mxu0 }
 0x324   : > { %v1309_v45 = vadd.f32 %v4143_v43, %v5300_v9  ;;  %v1300_v33 = vpop.f32.mrb[25].mxu0 }
 0x325   : > { %v1301_v50 = vadd.f32 %v1300_v33, %v5296_v58  ;;  %v4144_v42 = vpop.f32.mrb[26].mxu0  ;;  %v4431_v33 = vpop.eup %4430 }
 0x326   : > { %4440 = vrsqrt.f32 %v1309_v45  ;;  %v1312_v20 = vadd.f32 %v4144_v42, %v5302_v38  ;;  %v1303_v60 = vpop.f32.mrb[27].mxu0  ;;  %v4433_v52 = vpop.eup %4432 }
 0x327   : > { %4442 = vrsqrt.f32 %v1301_v50  ;;  %v1304_v30 = vadd.f32 %v1303_v60, %v5298_v2  ;;  %v4435_v45 = vpop.eup %4434 }
 0x328   : > { %4444 = vrsqrt.f32 %v1312_v20  ;;  %v4437_v11 = vpop.eup %4436 }
 0x329   : > { %4446 = vrsqrt.f32 %v1304_v30  ;;  %v4439_v55 = vpop.eup %4438 }
 0x32a   : > { %4448 = vrsqrt.f32 %v949_v59 }
 0x32b   : > { %4450 = vrsqrt.f32 %v960_v57  ;;  %v4147_v34 = vpop.f32.mrb[28].mxu0 }
 0x32c   : > { %v1325_v43 = vadd.f32 %v4147_v34, %v5314_v37  ;;  %v1316_v42 = vpop.f32.mrb[29].mxu0  ;;  %4452 = vrsqrt.f32 %v952_v25  ;;  %v5337_v34 = vmul.f32 %v4431_v33, %v5028_v29  ;;  %v1535_v29 = vadd.f32 %v5222_v22, %v5009_v5 }
 0x32d   : > { %v1317_v1 = vadd.f32 %v1316_v42, %v5304_v7  ;;  %v4148_v50 = vpop.f32.mrb[30].mxu0 }
 0x32e   : > { %4454 = vrsqrt.f32 %v1325_v43  ;;  %v1328_v20 = vadd.f32 %v4148_v50, %v5322_v40  ;;  %v1319_v60 = vpop.f32.mrb[31].mxu0  ;;  %v1543_v43 = vadd.f32 %v5232_v56, %v5017_v15  ;;  %v5345_v50 = vmul.f32 %v4433_v52, %v5014_v13 }
 0x32f   : > { %4456 = vrsqrt.f32 %v1317_v1  ;;  %v1320_v59 = vadd.f32 %v1319_v60, %v5312_v36 }
 0x330   : > { %v4441_v57 = vpop.eup %4440  ;;  %4458 = vrsqrt.f32 %v1328_v20  ;;  %v5351_v20 = vmul.f32 %v4435_v45, %v5031_v31  ;;  %v1546_v31 = vadd.f32 %v5238_v28, %v5026_v27 }
 0x331   : > { %v4443_v30 = vpop.eup %4442  ;;  %4460 = vrsqrt.f32 %v1320_v59  ;;  %v5340_v25 = vmul.f32 %v4441_v57, %v5196_v53  ;;  %v5356_v53 = vmul.f32 %v4437_v11, %v5019_v16  ;;  %v1538_v57 = vadd.f32 %v5228_v26, %v5012_v12 }
 0x332   : > { %v4445_v42 = vpop.eup %4444  ;;  %v5348_v1 = vmul.f32 %v4443_v30, %v5186_v6 }
 0x333   : > { %v4447_v60 = vpop.eup %4446  ;;  %v4155_v59 = vpop.f32.mrb[32].mxu0  ;;  %v5359_v33 = vmul.f32 %v4445_v42, %v5199_v54 }
 0x334   : > { %v4449_v56 = vpop.eup %4448  ;;  %v5363_v6 = vadd.f32 %v4155_v59, %v1543_v43  ;;  %v1599_v52 = vpop.f32.mrb[33].mxu0  ;;  %v5368_v45 = vmul.f32 %v4447_v60, %v5189_v10 }
 0x335   : > { %v4451_v22 = vpop.eup %4450  ;;  %v5372_v11 = vadd.f32 %v1599_v52, %v1535_v29  ;;  %v4156_v54 = vpop.f32.mrb[34].mxu0  ;;  %v5385_v29 = vmul.f32 %v4449_v56, %v5042_v49  ;;  %v5388_v52 = vmul.f32 %v4439_v55, %v5056_v8  ;;  %v1559_v8 = vadd.f32 %v5253_v18, %v5051_v63 }
 0x336   : > { %v5378_v42 = vadd.f32 %v4156_v54, %v1546_v31  ;;  %v1602_v43 = vpop.f32.mrb[35].mxu0  ;;  %v4453_v28 = vpop.eup %4452  ;;  %v5391_v26 = vmul.f32 %v4451_v22, %v5059_v41  ;;  %v1551_v41 = vadd.f32 %v5240_v4, %v5037_v39  ;;  %v1632_v10 = vmul.f32 %v5363_v6, %v5363_v6 }
 0x337   : > { %v5382_v60 = vadd.f32 %v1602_v43, %v1538_v57  ;;  %v1630_v31 = vmul.f32 %v5372_v11, %v5372_v11  ;;  %v5407_v55 = vmul.f32 %v4453_v28, %v5045_v51  ;;  %v1562_v51 = vadd.f32 %v5269_v24, %v5054_v35 }
 0x338   : > { %v4455_v59 = vpop.eup %4454  ;;  %v1633_v54 = vmul.f32 %v5378_v42, %v5378_v42 }
 0x339   : > { %v4457_v30 = vpop.eup %4456  ;;  %v1631_v57 = vmul.f32 %v5382_v60, %v5382_v60  ;;  %v5400_v43 = vmul.f32 %v4455_v59, %v5216_v19 }
 0x33a   : > { %v4459_v49 = vpop.eup %4458  ;;  %v5410_v56 = vmul.f32 %v4457_v30, %v5206_v61 }
 0x33b   : > { %v4461_v22 = vpop.eup %4460  ;;  %v4159_v16 = vpop.f32.mrb[36].mxu0  ;;  %v1638_v19 = vpack.c.bf16 %v1631_v57, %v1630_v31  ;;  %v5415_v59 = vmul.f32 %v4459_v49, %v5220_v47  ;;  %v1353_v18 = vmax.f32 %v5388_v52, %v5400_v43  ;;  %v1554_v47 = vadd.f32 %v5251_v14, %v5040_v46  ;;  %v6197_v52 = vld [vmem:[#allocation8_spill] sm:$0xff] }
 0x33c   : > { %v5419_v13 = vadd.f32 %v4159_v16, %v1559_v8  ;;  %v1615_v4 = vpop.f32.mrb[37].mxu0  ;;  %v5424_v61 = vmul.f32 %v4461_v22, %v5209_v62  ;;  %v1351_v30 = vmax.f32 %v5385_v29, %v5410_v56  ;;  %v1639_v57 = vpack.c.bf16 %v1633_v54, %v1632_v10 }
 0x33d   : > { %v5428_v28 = vadd.f32 %v1615_v4, %v1551_v41  ;;  %v4160_v31 = vpop.f32.mrb[38].mxu0  ;;  %4161 = vmatprep.subr.bf16.mxu0 %v1638_v19  ;;  %v1354_v16 = vmax.f32 %v5391_v26, %v5415_v59  ;;  %v4364_v4 = vld [vmem:[%s4672_s16 + $0x230] sm:$0xff]   ;;  %v1930_v43 = vadd.f32 %v6197_v52, %v5040_v46 }
 0x33e   : > { %v5434_v49 = vadd.f32 %v4160_v31, %v1562_v51  ;;  %v1618_v24 = vpop.f32.mrb[39].mxu0  ;;  %4162 = vmatpush3.bf16.msra.mxu0 %v1638_v19  ;;  %v1352_v62 = vmax.f32 %v5407_v55, %v5424_v61  ;;  %v1636_v54 = vmul.f32 %v5419_v13, %v5419_v13  ;;  %v4365_v51 = vld [vmem:[%s4672_s16 + $0x238] sm:$0xff]   ;;  %v6186_v31 = vld [vmem:[#allocation3_spill] sm:$0xff]  ;;  %v4372_v52 = vld [vmem:[%s6161_s5 + $0x30] sm:$0xff]  }
 0x33f   : > { %v5438_v8 = vadd.f32 %v1618_v24, %v1554_v47  ;;  %4163 = vmatprep.subr.bf16.mxu0 %v1639_v57  ;;  %v1634_v41 = vmul.f32 %v5428_v28, %v5428_v28  ;;  %v4366_v61 = vld [vmem:[%s6161_s5] sm:$0xff]  }
 0x340   : > { %v1637_v14 = vmul.f32 %v5434_v49, %v5434_v49  ;;  %4213 = vmatprep.mubr.msk.bf16.mxu1 %vm885_vm1, %v4366_v61 }
 0x341   : > { %v1635_v10 = vmul.f32 %v5438_v8, %v5438_v8 }
 0x342   : > { %4164 = vmatpush3.bf16.msra.mxu0 %v1639_v57  ;;  %v1641_v19 = vpack.c.bf16 %v1637_v14, %v1636_v54 }
 0x343   : > { %v1640_v22 = vpack.c.bf16 %v1635_v10, %v1634_v41 }
 0x345   : > { %4165 = vmatprep.subr.bf16.mxu0 %v1640_v22 }
 0x346   : > { %4166 = vmatpush3.bf16.msra.mxu0 %v1640_v22 }
 0x347   : > { %4167 = vmatprep.subr.bf16.mxu0 %v1641_v19 }
 0x34a   : > { %4168 = vmatpush3.bf16.msra.mxu0 %v1641_v19 }
 0x34b   : > { %4177 = vmatprep.subr.bf16.mxu0 %v4364_v4 }
 0x34d   : > { %4170 = vmatmul.mubr.msk.bf16.vlgmr.msra.gmra.mrb[40].mxu0 %vm885_vm1, %v5069_v3 }
 0x34e   : > { %4173 = vmatprep.mubr.msk.bf16.mxu0 %vm885_vm1, %v5075_v17  ;;  %4178 = vmatpush3.bf16.msra.mxu0 %v4364_v4 }
 0x34f   : > { %4179 = vmatprep.subr.bf16.mxu0 %v4365_v51 }
 0x352   : > { %4180 = vmatpush3.bf16.msra.mxu0 %v4365_v51 }
 0x355   : > { %4174 = vmatmul.mubr.msk.bf16.gmra.mrb[44].mxu0 %vm885_vm1, %v5087_v21 }
 0x356   : > { %4181 = vmatprep.mubr.msk.bf16.mxu0 %vm654_vm0, %v5247_v44 }
 0x35d   : > { %4182 = vmatmul.mubr.msk.bf16.vlgmr.msra.gmra.mrb[48].mxu0 %vm654_vm0, %v5258_v48 }
 0x35e   : > { %4185 = vmatprep.mubr.msk.bf16.mxu0 %vm654_vm0, %v5265_v23 }
 0x365   : > { %4186 = vmatmul.mubr.msk.bf16.gmra.mrb[52].mxu0 %vm654_vm0, %v5276_v32 }
 0x366   : > { %4197 = vmatprep.mubr.msk.bf16.mxu0 %vm885_vm1, %v6186_v31 }
 0x420   : > { %v4171_v47 = vpop.f32.mrb[40].mxu0 }
 0x421   : > { %v1685_v57 = vadd.f32 %v4171_v47, %v5300_v9  ;;  %v1676_v24 = vpop.f32.mrb[41].mxu0 }
 0x422   : > { %v1677_v41 = vadd.f32 %v1676_v24, %v5296_v58  ;;  %v4172_v14 = vpop.f32.mrb[42].mxu0 }
 0x423   : > { %4462 = vrsqrt.f32 %v1685_v57  ;;  %v1688_v44 = vadd.f32 %v4172_v14, %v5302_v38  ;;  %v1679_v48 = vpop.f32.mrb[43].mxu0  ;;  %v1919_v14 = vadd.f32 %v5284_v0, %v5017_v15 }
 0x424   : > { %4464 = vrsqrt.f32 %v1677_v41  ;;  %v1680_v23 = vadd.f32 %v1679_v48, %v5298_v2 }
 0x425   : > { %4466 = vrsqrt.f32 %v1688_v44 }
 0x426   : > { %4468 = vrsqrt.f32 %v1680_v23 }
 0x428   : > { %v4175_v32 = vpop.f32.mrb[44].mxu0 }
 0x429   : > { %v1701_v10 = vadd.f32 %v4175_v32, %v5314_v37  ;;  %v1692_v54 = vpop.f32.mrb[45].mxu0  ;;  %v6187_v32 = vld [vmem:[#allocation4_spill] sm:$0xff] }
 0x42a   : > { %v1693_v22 = vadd.f32 %v1692_v54, %v5304_v7  ;;  %v4176_v19 = vpop.f32.mrb[46].mxu0 }
 0x42b   : > { %4470 = vrsqrt.f32 %v1701_v10  ;;  %v1704_v4 = vadd.f32 %v4176_v19, %v5322_v40  ;;  %v1695_v51 = vpop.f32.mrb[47].mxu0  ;;  %v1911_v10 = vadd.f32 %v6187_v32, %v5009_v5 }
 0x42c   : > { %4472 = vrsqrt.f32 %v1693_v22  ;;  %v1696_v31 = vadd.f32 %v1695_v51, %v5312_v36  ;;  %v6188_v22 = vmax.f32 %v5337_v34, %v5340_v25  ;;  %v6189_v51 = vld [vmem:[#allocation6_spill] sm:$0xff]  ;;  %v6191_v34 = vld [vmem:[#allocation5_spill] sm:$0xff] }
 0x42d   : > { %v4463_v47 = vpop.eup %4462  ;;  %4474 = vrsqrt.f32 %v1704_v4  ;;  %v1922_v15 = vadd.f32 %v6189_v51, %v5026_v27  ;;  %v1914_v25 = vadd.f32 %v6191_v34, %v5012_v12 }
 0x42e   : > { %v4465_v57 = vpop.eup %4464  ;;  %4476 = vrsqrt.f32 %v1696_v31  ;;  %v1717_v24 = vmul.f32 %v4463_v47, %v5363_v6  ;;  %v6192_v47 = vmax.f32 %v5351_v20, %v5359_v33 }
 0x42f   : > { %v4467_v41 = vpop.eup %4466  ;;  %v1715_v44 = vmul.f32 %v4465_v57, %v5372_v11  ;;  %v6190_v11 = vmax.f32 %v5345_v50, %v5348_v1 }
 0x430   : > { %v4469_v48 = vpop.eup %4468  ;;  %v4183_v23 = vpop.f32.mrb[48].mxu0  ;;  %v1718_v54 = vmul.f32 %v4467_v41, %v5378_v42  ;;  %v5484_v19 = vmax.f32 %v6188_v22, %v1717_v24 }
 0x431   : > { %v5486_v4 = vadd.f32 %v4183_v23, %v1919_v14  ;;  %v1975_v6 = vpop.f32.mrb[49].mxu0  ;;  %v1716_v0 = vmul.f32 %v4469_v48, %v5382_v60  ;;  %v5494_v31 = vmax.f32 %v6190_v11, %v1715_v44  ;;  %v6193_v60 = vmax.f32 %v5356_v53, %v5368_v45  ;;  %v6194_v53 = vld [vmem:[#allocation9_spill] sm:$0xff]  ;;  %v6195_v23 = vld [vmem:[#allocation7_spill] sm:$0xff] }
 0x432   : > { %v5496_v5 = vadd.f32 %v1975_v6, %v1911_v10  ;;  %v4184_v42 = vpop.f32.mrb[50].mxu0  ;;  %v5503_v57 = vmax.f32 %v6192_v47, %v1718_v54  ;;  %v1935_v45 = vadd.f32 %v6194_v53, %v5051_v63  ;;  %v1927_v32 = vadd.f32 %v6195_v23, %v5037_v39  ;;  %v6196_v39 = vld [vmem:[#allocation10_spill] sm:$0xff] }
 0x433   : > { %v5505_v24 = vadd.f32 %v4184_v42, %v1922_v15  ;;  %v1978_v27 = vpop.f32.mrb[51].mxu0  ;;  %v5510_v50 = vmax.f32 %v6193_v60, %v1716_v0  ;;  %v2008_v22 = vmul.f32 %v5486_v4, %v5486_v4  ;;  %v1938_v11 = vadd.f32 %v6196_v39, %v5054_v35 }
 0x434   : > { %v5512_v1 = vadd.f32 %v1978_v27, %v1914_v25  ;;  %v2006_v12 = vmul.f32 %v5496_v5, %v5496_v5 }
 0x435   : > { %v4471_v41 = vpop.eup %4470  ;;  %v2009_v20 = vmul.f32 %v5505_v24, %v5505_v24 }
 0x436   : > { %v4473_v14 = vpop.eup %4472  ;;  %v2007_v33 = vmul.f32 %v5512_v1, %v5512_v1  ;;  %v1721_v44 = vmul.f32 %v4471_v41, %v5419_v13 }
 0x437   : > { %v4475_v48 = vpop.eup %4474  ;;  %v1719_v10 = vmul.f32 %v4473_v14, %v5428_v28 }
 0x438   : > { %v4477_v54 = vpop.eup %4476  ;;  %v4187_v6 = vpop.f32.mrb[52].mxu0  ;;  %v2014_v51 = vpack.c.bf16 %v2007_v33, %v2006_v12  ;;  %v1722_v15 = vmul.f32 %v4475_v48, %v5434_v49  ;;  %v5532_v13 = vmax.f32 %v1353_v18, %v1721_v44  ;;  %v2015_v18 = vpack.c.bf16 %v2009_v20, %v2008_v22 }
 0x439   : > { %v5534_v0 = vadd.f32 %v4187_v6, %v1935_v45  ;;  %v1991_v63 = vpop.f32.mrb[53].mxu0  ;;  %v1720_v28 = vmul.f32 %v4477_v54, %v5438_v8  ;;  %v5542_v42 = vmax.f32 %v1351_v30, %v1719_v10 }
 0x43a   : > { %v5544_v34 = vadd.f32 %v1991_v63, %v1927_v32  ;;  %v4188_v49 = vpop.f32.mrb[54].mxu0  ;;  %4189 = vmatprep.subr.bf16.mxu0 %v2014_v51  ;;  %v5551_v25 = vmax.f32 %v1354_v16, %v1722_v15 }
 0x43b   : > { %v5553_v35 = vadd.f32 %v4188_v49, %v1938_v11  ;;  %v1994_v8 = vpop.f32.mrb[55].mxu0  ;;  %4190 = vmatpush3.bf16.msra.mxu0 %v2014_v51  ;;  %v5558_v29 = vmax.f32 %v1352_v62, %v1720_v28  ;;  %v2012_v30 = vmul.f32 %v5534_v0, %v5534_v0  ;;  %v4367_v28 = vld [vmem:[%s6161_s5 + $0x8] sm:$0xff]  }
 0x43c   : > { %v5560_v56 = vadd.f32 %v1994_v8, %v1930_v43  ;;  %4191 = vmatprep.subr.bf16.mxu0 %v2015_v18  ;;  %v2010_v46 = vmul.f32 %v5544_v34, %v5544_v34  ;;  %v4371_v49 = vld [vmem:[%s6161_s5 + $0x28] sm:$0xff]   ;;  %v4373_v43 = vld [vmem:[%s6161_s5 + $0x38] sm:$0xff]  }
 0x43d   : > { %v2013_v26 = vmul.f32 %v5553_v35, %v5553_v35  ;;  %v4377_v8 = vld [vmem:[%s6161_s5 + $0x58] sm:$0xff]  }
 0x43e   : > { %v2011_v59 = vmul.f32 %v5560_v56, %v5560_v56 }
 0x43f   : > { %4192 = vmatpush3.bf16.msra.mxu0 %v2015_v18  ;;  %v2017_v55 = vpack.c.bf16 %v2013_v26, %v2012_v30  ;;  %v4374_v18 = vld [vmem:[%s6161_s5 + $0x40] sm:$0xff]   ;;  %v4381_v26 = vld [vmem:[%s6161_s5 + $0x78] sm:$0xff]  }
 0x440   : > { %v2016_v16 = vpack.c.bf16 %v2011_v59, %v2010_v46  ;;  %v4380_v46 = vld [vmem:[%s6161_s5 + $0x70] sm:$0xff]   ;;  %v4384_v59 = vld [vmem:[%s6163_s7 + $0x4] ss:$8 sps:$4 sm:$0xff]  }
 0x441   : > { %v4387_v30 = vld [vmem:[%s6163_s7 + $0xb4] ss:$8 sps:$4 sm:$0xff]  }
 0x442   : > { %4193 = vmatprep.subr.bf16.mxu0 %v2016_v16 }
 0x443   : > { %4194 = vmatpush3.bf16.msra.mxu0 %v2016_v16  ;;  %v2263_v16 = vpop.permute.xlu1 %2262 }
 0x444   : > { %4195 = vmatprep.subr.bf16.mxu0 %v2017_v55 }
 0x447   : > { %4196 = vmatpush3.bf16.msra.mxu0 %v2017_v55  ;;  %v2258_v55 = vpop.permute.xlu0 %2257  ;;  %v2183_v61 = vpop.permute.xlu1 %2182 }
 0x44a   : > { %4198 = vmatmul.mubr.msk.bf16.vlgmr.msra.gmra.mrb[56].mxu0 %vm885_vm1, %v5069_v3 }
 0x44b   : > { %4201 = vmatprep.mubr.msk.bf16.mxu0 %vm885_vm1, %v5075_v17 }
 0x452   : > { %4202 = vmatmul.mubr.msk.bf16.gmra.mrb[60].mxu0 %vm885_vm1, %v5087_v21 }
 0x453   : > { %3088 = vmatprep.mubr.bf16.mxu0 %v4384_v59 }
 0x51d   : > { %v4199_v62 = vpop.f32.mrb[56].mxu0 }
 0x51e   : > { %v2061_v47 = vadd.f32 %v4199_v62, %v5300_v9  ;;  %v2052_v27 = vpop.f32.mrb[57].mxu0  ;;  %v2178_v62 = vpop.permute.xlu0 %2177 }
 0x51f   : > { %v2053_v60 = vadd.f32 %v2052_v27, %v5296_v58  ;;  %v4200_v41 = vpop.f32.mrb[58].mxu0 }
 0x520   : > { %4478 = vrsqrt.f32 %v2061_v47  ;;  %v2064_v3 = vadd.f32 %v4200_v41, %v5302_v38  ;;  %v2055_v17 = vpop.f32.mrb[59].mxu0  ;;  %v2273_v47 = vpop.permute.xlu1 %2272 }
 0x521   : > { %4480 = vrsqrt.f32 %v2053_v60  ;;  %v2056_v21 = vadd.f32 %v2055_v17, %v5298_v2 }
 0x522   : > { %4482 = vrsqrt.f32 %v2064_v3  ;;  %v2268_v27 = vpop.permute.xlu0 %2267 }
 0x523   : > { %4484 = vrsqrt.f32 %v2056_v21 }
 0x524   : > { %v2193_v60 = vpop.permute.xlu1 %2192 }
 0x525   : > { %v4203_v14 = vpop.f32.mrb[60].mxu0 }
 0x526   : > { %v2077_v12 = vadd.f32 %v4203_v14, %v5314_v37  ;;  %v2068_v20 = vpop.f32.mrb[61].mxu0  ;;  %v2188_v41 = vpop.permute.xlu0 %2187 }
 0x527   : > { %v2069_v33 = vadd.f32 %v2068_v20, %v5304_v7  ;;  %v4204_v9 = vpop.f32.mrb[62].mxu0 }
 0x528   : > { %4486 = vrsqrt.f32 %v2077_v12  ;;  %v2080_v58 = vadd.f32 %v4204_v9, %v5322_v40  ;;  %v2071_v44 = vpop.f32.mrb[63].mxu0  ;;  %v5670_v3 = vpop.permute.xlu1 %2282 }
 0x529   : > { %4488 = vrsqrt.f32 %v2069_v33  ;;  %v2072_v38 = vadd.f32 %v2071_v44, %v5312_v36 }
 0x52a   : > { %v4479_v48 = vpop.eup %4478  ;;  %4490 = vrsqrt.f32 %v2080_v58  ;;  %v2278_v17 = vpop.permute.xlu0 %2277 }
 0x52b   : > { %v4481_v53 = vpop.eup %4480  ;;  %4492 = vrsqrt.f32 %v2072_v38  ;;  %v2093_v2 = vmul.f32 %v4479_v48, %v5486_v4 }
 0x52c   : > { %v4483_v45 = vpop.eup %4482  ;;  %v2091_v37 = vmul.f32 %v4481_v53, %v5496_v5  ;;  %v2203_v21 = vpop.permute.xlu1 %2202 }
 0x52d   : > { %v4485_v23 = vpop.eup %4484  ;;  %v2094_v7 = vmul.f32 %v4483_v45, %v5505_v24  ;;  %v2101_v32 = vmax.f32 %v5484_v19, %v2093_v2 }
 0x52e   : > { %v2092_v40 = vmul.f32 %v4485_v23, %v5512_v1  ;;  %v2099_v10 = vmax.f32 %v5494_v31, %v2091_v37  ;;  %v2198_v20 = vpop.permute.xlu0 %2197 }
 0x52f   : > { %v2102_v36 = vmax.f32 %v5503_v57, %v2094_v7 }
 0x530   : > { %v2100_v54 = vmax.f32 %v5510_v50, %v2092_v40  ;;  %v2293_v58 = vpop.permute.xlu1 %2292 }
 0x531   : > { %v2108_v22 = vpack.c.bf16 %v2102_v36, %v2101_v32 }
 0x532   : > { %v4487_v6 = vpop.eup %4486  ;;  %v2107_v51 = vpack.c.bf16 %v2100_v54, %v2099_v10  ;;  %v2288_v44 = vpop.permute.xlu0 %2287 }
 0x533   : > { %v4489_v4 = vpop.eup %4488  ;;  %v2097_v15 = vmul.f32 %v4487_v6, %v5534_v0 }
 0x534   : > { %v4491_v5 = vpop.eup %4490  ;;  %4205 = vmatprep.subr.bf16.mxu1 %v2107_v51  ;;  %v2095_v24 = vmul.f32 %v4489_v4, %v5544_v34  ;;  %v4370_v34 = vld [vmem:[%s6161_s5 + $0x20] sm:$0xff]   ;;  %v2213_v45 = vpop.permute.xlu1 %2212 }
 0x535   : > { %v4493_v63 = vpop.eup %4492  ;;  %4206 = vmatpush3.bf16.msra.mxu1 %v2107_v51  ;;  %v2098_v19 = vmul.f32 %v4491_v5, %v5553_v35  ;;  %v2105_v31 = vmax.f32 %v5532_v13, %v2097_v15  ;;  %v4368_v13 = vld [vmem:[%s6161_s5 + $0x10] sm:$0xff]  }
 0x536   : > { %4207 = vmatprep.subr.bf16.mxu1 %v2108_v22  ;;  %v2096_v57 = vmul.f32 %v4493_v63, %v5560_v56  ;;  %v2103_v50 = vmax.f32 %v5542_v42, %v2095_v24  ;;  %v4369_v42 = vld [vmem:[%s6161_s5 + $0x18] sm:$0xff]   ;;  %v4376_v35 = vld [vmem:[%s6161_s5 + $0x50] sm:$0xff]   ;;  %v4379_v56 = vld [vmem:[%s6161_s5 + $0x68] sm:$0xff]   ;;  %v5674_v37 = vpop.permute.xlu0 %2207 }
 0x537   : > { %v2106_v1 = vmax.f32 %v5551_v25, %v2098_v19  ;;  %v4375_v25 = vld [vmem:[%s6161_s5 + $0x48] sm:$0xff]  }
 0x538   : > { %v2104_v39 = vmax.f32 %v5558_v29, %v2096_v57  ;;  %v4378_v29 = vld [vmem:[%s6161_s5 + $0x60] sm:$0xff]   ;;  %v5680_v32 = vpop.permute.xlu1 %2302 }
 0x539   : > { %4208 = vmatpush3.bf16.msra.mxu1 %v2108_v22  ;;  %v2110_v0 = vpack.c.bf16 %v2106_v1, %v2105_v31 }
 0x53a   : > { %v2109_v11 = vpack.c.bf16 %v2104_v39, %v2103_v50  ;;  %v5686_v36 = vpop.permute.xlu0 %2297 }
 0x53c   : > { %4209 = vmatprep.subr.bf16.mxu1 %v2109_v11  ;;  %v5688_v54 = vpop.permute.xlu1 %2222 }
 0x53d   : > { %4210 = vmatpush3.bf16.msra.mxu1 %v2109_v11 }
 0x53e   : > { %4211 = vmatprep.subr.bf16.mxu1 %v2110_v0  ;;  %v5694_v51 = vpop.permute.xlu0 %2217 }
 0x540   : > { %v5700_v5 = vpop.permute.xlu1 %2312 }
 0x541   : > { %4212 = vmatpush3.bf16.msra.mxu1 %v2110_v0 }
 0x542   : > { %v5702_v24 = vpop.permute.xlu0 %2307 }
 0x544   : > { %4214 = vmatmul.mubr.msk.bf16.vlgmr.msra.gmra.mrb[64].mxu1 %vm885_vm1, %v4367_v28  ;;  %v5712_v11 = vpop.permute.xlu1 %2232 }
 0x545   : > { %4217 = vmatprep.mubr.msk.bf16.mxu1 %vm885_vm1, %v4368_v13 }
 0x54c   : > { %4218 = vmatmul.mubr.msk.bf16.gmra.mrb[68].mxu1 %vm885_vm1, %v4369_v42 }
 0x54d   : > { %4221 = vmatprep.mubr.msk.bf16.mxu1 %vm885_vm1, %v4370_v34 }
 0x554   : > { %4222 = vmatmul.mubr.msk.bf16.gmra.mrb[72].mxu1 %vm885_vm1, %v4371_v49  ;;  %v5722_v49 = vpop.permute.xlu0 %2227 }
 0x555   : > { %4225 = vmatprep.mubr.msk.bf16.mxu1 %vm885_vm1, %v4372_v52 }
 0x55c   : > { %4226 = vmatmul.mubr.msk.bf16.gmra.mrb[76].mxu1 %vm885_vm1, %v4373_v43 }
 0x55d   : > { %4229 = vmatprep.mubr.msk.bf16.mxu1 %vm885_vm1, %v4374_v18 }
 0x564   : > { %4230 = vmatmul.mubr.msk.bf16.gmra.mrb[80].mxu1 %vm885_vm1, %v4375_v25 }
 0x565   : > { %4233 = vmatprep.mubr.msk.bf16.mxu1 %vm885_vm1, %v4376_v35 }
 0x56c   : > { %4234 = vmatmul.mubr.msk.bf16.gmra.mrb[84].mxu1 %vm885_vm1, %v4377_v8 }
 0x56d   : > { %4237 = vmatprep.mubr.msk.bf16.mxu1 %vm885_vm1, %v4378_v29 }
 0x574   : > { %4238 = vmatmul.mubr.msk.bf16.gmra.mrb[88].mxu1 %vm885_vm1, %v4379_v56 }
 0x575   : > { %4241 = vmatprep.mubr.msk.bf16.mxu1 %vm885_vm1, %v4380_v46 }
 0x57c   : > { %4242 = vmatmul.mubr.msk.bf16.gmra.mrb[92].mxu1 %vm885_vm1, %v4381_v26 }
 0x57d   : > { %3176 = vmatprep.mubr.bf16.mxu1 %v4387_v30 }
 0x617   : > { %v4215_v14 = vpop.f32.mrb[64].mxu1 }
 0x618   : > { %v2497_v12 = vpop.f32.mrb[65].mxu1  ;;  %v5730_v25 = vadd.f32 %v4215_v14, %v2188_v41 }
 0x619   : > { %v4216_v33 = vpop.f32.mrb[66].mxu1  ;;  %v5708_v1 = vadd.f32 %v2497_v12, %v2178_v62 }
 0x61a   : > { %v2500_v9 = vpop.f32.mrb[67].mxu1  ;;  %v5718_v42 = vadd.f32 %v4216_v33, %v2193_v60 }
 0x61b   : > { %v5704_v19 = vadd.f32 %v2500_v9, %v2183_v61  ;;  %v2656_v35 = vmul.f32 %v5708_v1, %v5708_v1 }
 0x61c   : > { %v2659_v46 = vmul.f32 %v5718_v42, %v5718_v42 }
 0x61d   : > { %v2657_v34 = vmul.f32 %v5704_v19, %v5704_v19 }
 0x61f   : > { %v5672_v38 = vpop.f32.mrb[68].mxu1  ;;  %v2688_v26 = vpack.c.bf16 %v2657_v34, %v2656_v35 }
 0x620   : > { %v2513_v48 = vpop.f32.mrb[69].mxu1 }
 0x621   : > { %v4220_v53 = vpop.f32.mrb[70].mxu1 }
 0x622   : > { %v2516_v2 = vpop.f32.mrb[71].mxu1  ;;  %v5755_v33 = vadd.f32 %v4220_v53, %v2213_v45 }
 0x623   : > { %v5738_v59 = vadd.f32 %v2516_v2, %v2203_v21  ;;  %v2318_v21 = vpop.permute.xlu0 %2317 }
 0x627   : > { %v5676_v23 = vpop.f32.mrb[72].mxu1 }
 0x628   : > { %v5678_v7 = vpop.f32.mrb[73].mxu1 }
 0x629   : > { %v5682_v40 = vpop.f32.mrb[74].mxu1  ;;  %v5786_v35 = vadd.f32 %v5678_v7, %v5694_v51 }
 0x62a   : > { %v5684_v10 = vpop.f32.mrb[75].mxu1 }
 0x62f   : > { %v5690_v22 = vpop.f32.mrb[76].mxu1 }
 0x630   : > { %v5692_v6 = vpop.f32.mrb[77].mxu1 }
 0x631   : > { %v5696_v4 = vpop.f32.mrb[78].mxu1 }
 0x632   : > { %v5698_v15 = vpop.f32.mrb[79].mxu1 }
 0x637   : > { %v4231_v63 = vpop.f32.mrb[80].mxu1 }
 0x638   : > { %v2561_v31 = vpop.f32.mrb[81].mxu1  ;;  %v5714_v28 = vadd.f32 %v4231_v63, %v2268_v27  ;;  %v5746_v27 = vadd.f32 %v2513_v48, %v2198_v20  ;;  %v2661_v20 = vmul.f32 %v5738_v59, %v5738_v59 }
 0x639   : > { %v5706_v57 = vadd.f32 %v2561_v31, %v2258_v55  ;;  %v4232_v50 = vpop.f32.mrb[82].mxu1  ;;  %v2663_v31 = vmul.f32 %v5755_v33, %v5755_v33 }
 0x63a   : > { %v5710_v39 = vadd.f32 %v4232_v50, %v2273_v47  ;;  %v2564_v0 = vpop.f32.mrb[83].mxu1  ;;  %6200 = vst [vmem:[#allocation6_spill] sm:$0xff] %v5714_v28  ;;  %v2674_v8 = vmul.f32 %v5714_v28, %v5714_v28  ;;  %v2658_v47 = vmul.f32 %v5730_v25, %v5730_v25  ;;  %v2660_v48 = vmul.f32 %v5746_v27, %v5746_v27 }
 0x63b   : > { %6198 = vst [vmem:[#allocation3_spill] sm:$0xff] %v5706_v57  ;;  %v5716_v13 = vadd.f32 %v2564_v0, %v2263_v16  ;;  %v2672_v52 = vmul.f32 %v5706_v57, %v5706_v57  ;;  %v5740_v16 = vpop.permute.xlu1 %2322  ;;  %v5777_v0 = vadd.f32 %v5684_v10, %v5688_v54 }
 0x63c   : > { %6199 = vst [vmem:[#allocation4_spill] sm:$0xff] %v5710_v39  ;;  %v2675_v43 = vmul.f32 %v5710_v39, %v5710_v39  ;;  %v2689_v12 = vpack.c.bf16 %v2659_v46, %v2658_v47  ;;  %v2690_v50 = vpack.c.bf16 %v2661_v20, %v2660_v48  ;;  %v5811_v46 = vadd.f32 %v5676_v23, %v5722_v49 }
 0x63d   : > { %6201 = vst [vmem:[#allocation5_spill] sm:$0xff] %v5716_v13  ;;  %v2673_v18 = vmul.f32 %v5716_v13, %v5716_v13  ;;  %v2665_v7 = vmul.f32 %v5777_v0, %v5777_v0 }
 0x63e   : > { %v2697_v62 = vpack.c.bf16 %v2675_v43, %v2674_v8 }
 0x63f   : > { %v4235_v29 = vpop.f32.mrb[84].mxu1  ;;  %v2696_v56 = vpack.c.bf16 %v2673_v18, %v2672_v52  ;;  %v2243_v53 = vpop.permute.xlu1 %2242 }
 0x640   : > { %v2577_v30 = vpop.f32.mrb[85].mxu1  ;;  %v5750_v14 = vadd.f32 %v4235_v29, %v2288_v44 }
 0x641   : > { %v5742_v55 = vadd.f32 %v2577_v30, %v2278_v17  ;;  %v4236_v61 = vpop.f32.mrb[86].mxu1  ;;  %3959 = vmatprep.subr.bf16.mxu0 %v2696_v56  ;;  %4245 = vmatprep.subr.bf16.mxu1 %v2696_v56  ;;  %v5799_v56 = vadd.f32 %v5682_v40, %v5712_v11  ;;  %v2664_v40 = vmul.f32 %v5786_v35, %v5786_v35 }
 0x642   : > { %v5748_v60 = vadd.f32 %v4236_v61, %v2293_v58  ;;  %v2580_v41 = vpop.f32.mrb[87].mxu1  ;;  %3960 = vmatpush3.bf16.msra.mxu0 %v2688_v26  ;;  %4253 = vmatpush3.bf16.msra.mxu1 %v2688_v26  ;;  %v2678_v2 = vmul.f32 %v5750_v14, %v5750_v14 }
 0x643   : > { %6202 = vst [vmem:[#allocation9_spill] sm:$0xff] %v5742_v55  ;;  %v5753_v17 = vadd.f32 %v2580_v41, %v5670_v3  ;;  %3961 = vmatprep.subr.bf16.mxu0 %v2697_v62  ;;  %4246 = vmatprep.subr.bf16.mxu1 %v2697_v62  ;;  %v2676_v9 = vmul.f32 %v5742_v55, %v5742_v55  ;;  %v2333_v51 = vpop.permute.xlu1 %2332 }
 0x644   : > { %v2679_v58 = vmul.f32 %v5748_v60, %v5748_v60  ;;  %v5767_v3 = vadd.f32 %v5672_v38, %v5674_v37  ;;  %v2238_v37 = vpop.permute.xlu0 %2237  ;;  %v2667_v62 = vmul.f32 %v5799_v56, %v5799_v56  ;;  %v2692_v47 = vpack.c.bf16 %v2665_v7, %v2664_v40  ;;  %v4382_v7 = vld [vmem:[%s6163_s7] ss:$8 sps:$4 sm:$0xff]  }
 0x645   : > { %6203 = vst [vmem:[#allocation7_spill] sm:$0xff] %v5753_v17  ;;  %v2677_v44 = vmul.f32 %v5753_v17, %v5753_v17  ;;  %v5820_v41 = vadd.f32 %v5698_v15, %v2243_v53  ;;  %v4393_v40 = vld [vmem:[%s6163_s7 + $0xc0] ss:$8 sps:$4 sm:$0xff]  }
 0x646   : > { %3962 = vmatpush3.bf16.msra.mxu0 %v2689_v12  ;;  %4254 = vmatpush3.bf16.msra.mxu1 %v2689_v12  ;;  %v2699_v43 = vpack.c.bf16 %v2679_v58, %v2678_v2  ;;  %v2662_v18 = vmul.f32 %v5767_v3, %v5767_v3  ;;  %v5827_v58 = vadd.f32 %v5692_v6, %v2238_v37 }
 0x647   : > { %v4239_v45 = vpop.f32.mrb[88].mxu1  ;;  %v2698_v63 = vpack.c.bf16 %v2677_v44, %v2676_v9  ;;  %v2666_v9 = vmul.f32 %v5811_v46, %v5811_v46  ;;  %v2253_v15 = vpop.permute.xlu1 %2252  ;;  %v2669_v6 = vmul.f32 %v5820_v41, %v5820_v41 }
 0x648   : > { %v2593_v38 = vpop.f32.mrb[89].mxu1  ;;  %v2691_v29 = vpack.c.bf16 %v2663_v31, %v2662_v18  ;;  %v2328_v11 = vpop.permute.xlu0 %2327 }
 0x649   : > { %v5780_v34 = vadd.f32 %v2593_v38, %v5686_v36  ;;  %v4240_v52 = vpop.f32.mrb[90].mxu1  ;;  %3963 = vmatprep.subr.bf16.mxu0 %v2698_v63  ;;  %4247 = vmatprep.subr.bf16.mxu1 %v2698_v63  ;;  %v5792_v36 = vadd.f32 %v4239_v45, %v5702_v24  ;;  %v2693_v2 = vpack.c.bf16 %v2667_v62, %v2666_v9  ;;  %v4400_v62 = vld [vmem:[%s6163_s7 + $0x34] ss:$8 sps:$4 sm:$0xff]  }
 0x64a   : > { %v5789_v8 = vadd.f32 %v4240_v52, %v5700_v5  ;;  %v2596_v10 = vpop.f32.mrb[91].mxu1  ;;  %3964 = vmatpush3.bf16.msra.mxu0 %v2690_v50  ;;  %4255 = vmatpush3.bf16.msra.mxu1 %v2690_v50  ;;  %v5837_v45 = vadd.f32 %v5696_v4, %v2253_v15  ;;  %v2668_v4 = vmul.f32 %v5827_v58, %v5827_v58  ;;  %v4408_v9 = vld [vmem:[%s6163_s7 + $0xf4] ss:$8 sps:$4 sm:$0xff]   ;;  %v4411_v15 = vld [vmem:[%s6163_s7 + $0xf0] ss:$8 sps:$4 sm:$0xff]  }
 0x64b   : > { %v5795_v54 = vadd.f32 %v2596_v10, %v5680_v32  ;;  %3965 = vmatprep.subr.bf16.mxu0 %v2699_v43  ;;  %4248 = vmatprep.subr.bf16.mxu1 %v2699_v43  ;;  %v2680_v5 = vmul.f32 %v5780_v34, %v5780_v34  ;;  %v2682_v26 = vmul.f32 %v5792_v36, %v5792_v36 }
 0x64c   : > { %v2683_v24 = vmul.f32 %v5789_v8, %v5789_v8  ;;  %v2248_v63 = vpop.permute.xlu0 %2247  ;;  %v2671_v43 = vmul.f32 %v5837_v45, %v5837_v45  ;;  %v2694_v18 = vpack.c.bf16 %v2669_v6, %v2668_v4  ;;  %v4414_v6 = vld [vmem:[%s6163_s7 + $0x50] ss:$8 sps:$4 sm:$0xff]   ;;  %v4421_v4 = vld [vmem:[%s6163_s7 + $0x84] ss:$8 sps:$4 sm:$0xff]  }
 0x64d   : > { %v2681_v32 = vmul.f32 %v5795_v54, %v5795_v54  ;;  %v5848_v38 = vadd.f32 %v5690_v22, %v2248_v63  ;;  %v4415_v63 = vld [vmem:[%s6163_s7 + $0x64] ss:$8 sps:$4 sm:$0xff]  }
 0x64e   : > { %3966 = vmatpush3.bf16.msra.mxu0 %v2691_v29  ;;  %4256 = vmatpush3.bf16.msra.mxu1 %v2691_v29  ;;  %v2701_v20 = vpack.c.bf16 %v2683_v24, %v2682_v26  ;;  %v4390_v24 = vld [vmem:[%s6163_s7 + $0xc4] ss:$8 sps:$4 sm:$0xff]   ;;  %v4396_v26 = vld [vmem:[%s6163_s7 + $0xd4] ss:$8 sps:$4 sm:$0xff]  }
 0x64f   : > { %v4243_v30 = vpop.f32.mrb[92].mxu1  ;;  %v2700_v61 = vpack.c.bf16 %v2681_v32, %v2680_v5  ;;  %v2670_v22 = vmul.f32 %v5848_v38, %v5848_v38  ;;  %v4388_v5 = vld [vmem:[%s6163_s7 + $0x14] ss:$8 sps:$4 sm:$0xff]   ;;  %v4392_v32 = vld [vmem:[%s6163_s7 + $0x10] ss:$8 sps:$4 sm:$0xff]  }
 0x650   : > { %v2609_v23 = vpop.f32.mrb[93].mxu1  ;;  %v5831_v53 = vadd.f32 %v4243_v30, %v2328_v11  ;;  %v4394_v11 = vld [vmem:[%s6163_s7 + $0x24] ss:$8 sps:$4 sm:$0xff]   ;;  %v4398_v30 = vld [vmem:[%s6163_s7 + $0x20] ss:$8 sps:$4 sm:$0xff]  }
 0x651   : > { %v5822_v49 = vadd.f32 %v2609_v23, %v2318_v21  ;;  %v4244_v12 = vpop.f32.mrb[94].mxu1  ;;  %3967 = vmatprep.subr.bf16.mxu0 %v2700_v61  ;;  %4249 = vmatprep.subr.bf16.mxu1 %v2700_v61  ;;  %v2695_v29 = vpack.c.bf16 %v2671_v43, %v2670_v22  ;;  %v4399_v61 = vld [vmem:[%s6163_s7 + $0xd0] ss:$8 sps:$4 sm:$0xff]   ;;  %v5948_v22 = vpop.permute.xlu0 %2818 }
 0x652   : > { %v5829_v44 = vadd.f32 %v4244_v12, %v2333_v51  ;;  %v2612_v48 = vpop.f32.mrb[95].mxu1  ;;  %3968 = vmatpush3.bf16.msra.mxu0 %v2692_v47  ;;  %4257 = vmatpush3.bf16.msra.mxu1 %v2692_v47  ;;  %v2686_v37 = vmul.f32 %v5831_v53, %v5831_v53  ;;  %v4385_v51 = vld [vmem:[%s6163_s7 + $0xb0] ss:$8 sps:$4 sm:$0xff]   ;;  %v4402_v47 = vld [vmem:[%s6163_s7 + $0xe4] ss:$8 sps:$4 sm:$0xff]  }
 0x653   : > { %v5834_v21 = vadd.f32 %v2612_v48, %v5740_v16  ;;  %3969 = vmatprep.subr.bf16.mxu0 %v2701_v20  ;;  %4250 = vmatprep.subr.bf16.mxu1 %v2701_v20  ;;  %v2684_v31 = vmul.f32 %v5822_v49, %v5822_v49  ;;  %v4404_v23 = vld [vmem:[%s6163_s7 + $0x30] ss:$8 sps:$4 sm:$0xff]   ;;  %v4405_v12 = vld [vmem:[%s6163_s7 + $0xe0] ss:$8 sps:$4 sm:$0xff]   ;;  %v4406_v20 = vld [vmem:[%s6163_s7 + $0x44] ss:$8 sps:$4 sm:$0xff]  }
 0x654   : > { %v2687_v50 = vmul.f32 %v5829_v44, %v5829_v44  ;;  %v4410_v48 = vld [vmem:[%s6163_s7 + $0x40] ss:$8 sps:$4 sm:$0xff]   ;;  %v4426_v43 = vld [vmem:[%s6163_s7 + $0x90] ss:$8 sps:$4 sm:$0xff]  }
 0x655   : > { %v2685_v16 = vmul.f32 %v5834_v21, %v5834_v21 }
 0x656   : > { %3970 = vmatpush3.bf16.msra.mxu0 %v2693_v2  ;;  %4258 = vmatpush3.bf16.msra.mxu1 %v2693_v2  ;;  %v2703_v10 = vpack.c.bf16 %v2687_v50, %v2686_v37  ;;  %v4412_v2 = vld [vmem:[%s6163_s7 + $0x54] ss:$8 sps:$4 sm:$0xff]   ;;  %v4423_v37 = vld [vmem:[%s6163_s7 + $0x80] ss:$8 sps:$4 sm:$0xff]  }
 0x657   : > { %v2702_v52 = vpack.c.bf16 %v2685_v16, %v2684_v31  ;;  %v4417_v31 = vld [vmem:[%s6163_s7 + $0x60] ss:$8 sps:$4 sm:$0xff]   ;;  %v4418_v50 = vld [vmem:[%s6163_s7 + $0x74] ss:$8 sps:$4 sm:$0xff]   ;;  %v4420_v16 = vld [vmem:[%s6163_s7 + $0x70] ss:$8 sps:$4 sm:$0xff]  }
 0x659   : > { %3971 = vmatprep.subr.bf16.mxu0 %v2702_v52  ;;  %4251 = vmatprep.subr.bf16.mxu1 %v2702_v52  ;;  %v4424_v52 = vld [vmem:[%s6163_s7 + $0x94] ss:$8 sps:$4 sm:$0xff]  }
 0x65a   : > { %3972 = vmatpush3.bf16.msra.mxu0 %v2694_v18  ;;  %4259 = vmatpush3.bf16.msra.mxu1 %v2694_v18  ;;  %v4427_v18 = vld [vmem:[%s6163_s7 + $0xa4] ss:$8 sps:$4 sm:$0xff]  }
 0x65b   : > { %3973 = vmatprep.subr.bf16.mxu0 %v2703_v10  ;;  %4252 = vmatprep.subr.bf16.mxu1 %v2703_v10  ;;  %v4429_v10 = vld [vmem:[%s6163_s7 + $0xa0] ss:$8 sps:$4 sm:$0xff]  }
 0x65e   : > { %3974 = vmatpush3.bf16.msra.mxu0 %v2695_v29  ;;  %4260 = vmatpush3.bf16.msra.mxu1 %v2695_v29  ;;  %v5950_v29 = vpop.permute.xlu1 %2823 }
 0x661   : > { %3089 = vmatmul.mubr.bf16.vlgmr.msra.gmra.mrb[64].mxu0 %v4382_v7  ;;  %3177 = vmatmul.mubr.bf16.vlgmr.msra.gmra.mrb[96].mxu1 %v4385_v51  ;;  %v2739_v7 = vpop.permute.xlu0 %2738 }
 0x662   : > { %3096 = vmatprep.mubr.bf16.mxu0 %v4388_v5  ;;  %3184 = vmatprep.mubr.bf16.mxu1 %v4390_v24  ;;  %v2744_v51 = vpop.permute.xlu1 %2743 }
 0x665   : > { %v5952_v5 = vpop.permute.xlu0 %2828 }
 0x666   : > { %6204 = vst [vmem:[#allocation10_spill] sm:$0xff] %v5952_v5  ;;  %v5954_v24 = vpop.permute.xlu1 %2833 }
 0x667   : > { %6205 = vst [vmem:[#allocation8_spill] sm:$0xff] %v5954_v24 }
 0x669   : > { %3097 = vmatmul.mubr.bf16.gmra.mrb[68].mxu0 %v4392_v32  ;;  %3185 = vmatmul.mubr.bf16.gmra.mrb[100].mxu1 %v4393_v40  ;;  %v2749_v32 = vpop.permute.xlu0 %2748 }
 0x66a   : > { %3104 = vmatprep.mubr.bf16.mxu0 %v4394_v11  ;;  %3192 = vmatprep.mubr.bf16.mxu1 %v4396_v26  ;;  %v2754_v40 = vpop.permute.xlu1 %2753 }
 0x66d   : > { %v5956_v11 = vpop.permute.xlu0 %2838 }
 0x66e   : > { %6206 = vst [vmem:[#allocation11_spill] sm:$0xff] %v5956_v11  ;;  %v5958_v26 = vpop.permute.xlu1 %2843 }
 0x66f   : > { %6207 = vst [vmem:[#allocation12_spill] sm:$0xff] %v5958_v26 }
 0x671   : > { %3105 = vmatmul.mubr.bf16.gmra.mrb[72].mxu0 %v4398_v30  ;;  %3193 = vmatmul.mubr.bf16.gmra.mrb[104].mxu1 %v4399_v61  ;;  %v5960_v30 = vpop.permute.xlu0 %2758 }
 0x672   : > { %3112 = vmatprep.mubr.bf16.mxu0 %v4400_v62  ;;  %3200 = vmatprep.mubr.bf16.mxu1 %v4402_v47  ;;  %v5962_v61 = vpop.permute.xlu1 %2763 }
 0x675   : > { %v2849_v62 = vpop.permute.xlu0 %2848 }
 0x676   : > { %v2854_v47 = vpop.permute.xlu1 %2853 }
 0x679   : > { %3113 = vmatmul.mubr.bf16.gmra.mrb[76].mxu0 %v4404_v23  ;;  %3201 = vmatmul.mubr.bf16.gmra.mrb[108].mxu1 %v4405_v12  ;;  %v5964_v23 = vpop.permute.xlu0 %2768 }
 0x67a   : > { %3120 = vmatprep.mubr.bf16.mxu0 %v4406_v20  ;;  %3208 = vmatprep.mubr.bf16.mxu1 %v4408_v9  ;;  %v5966_v12 = vpop.permute.xlu1 %2773  ;;  %v3304_v9 = vlaneseq }
 0x67d   : > { %v2859_v20 = vpop.permute.xlu0 %2858 }
 0x681   : > { %3121 = vmatmul.mubr.bf16.gmra.mrb[80].mxu0 %v4410_v48  ;;  %3209 = vmatmul.mubr.bf16.gmra.mrb[112].mxu1 %v4411_v15  ;;  %v4576_v48 = vmov 1966171168  }
 0x682   : > { %3128 = vmatprep.mubr.bf16.mxu0 %v4412_v2  ;;  %v3318_v15 = vunpack.c.l.s4 %v4576_v48  ;;  %v2864_v2 = vpop.permute.xlu1 %2863 }
 0x689   : > { %3129 = vmatmul.mubr.bf16.gmra.mrb[84].mxu0 %v4414_v6  ;;  %v5968_v6 = vpop.permute.xlu0 %2778 }
 0x68a   : > { %3136 = vmatprep.mubr.bf16.mxu0 %v4415_v63  ;;  %v5970_v63 = vshrl.u32 %v3304_v9, 7 }
 0x68c   : > { %6208 = vst [vmem:[#allocation13_spill] sm:$0xff] %v5970_v63 }
 0x691   : > { %3137 = vmatmul.mubr.bf16.gmra.mrb[88].mxu0 %v4417_v31  ;;  %v3319_v31 = vunpack.c.0.s8 %v3318_v15 }
 0x692   : > { %3144 = vmatprep.mubr.bf16.mxu0 %v4418_v50  ;;  %v5975_v50 = vld.sshfl [vmem:[%s6165_s9] sm:$0x11 pattern:$0x75316420] }
 0x693   : > { %6209 = vst [vmem:[#allocation14_spill] sm:$0xff] %v5975_v50 }
 0x699   : > { %3145 = vmatmul.mubr.bf16.gmra.mrb[92].mxu0 %v4420_v16  ;;  %v3316_v16 = vcombine.high %v5975_v50, %v5975_v50 }
 0x69a   : > { %3152 = vmatprep.mubr.bf16.mxu0 %v4421_v4  ;;  %v5980_v4 = vsub.s32 %v3319_v31, %v5970_v63 }
 0x69c   : > { %6210 = vst [vmem:[#allocation15_spill] sm:$0xff] %v5980_v4 }
 0x6a1   : > { %3153 = vmatmul.mubr.bf16.gmra.mrb[96].mxu0 %v4423_v37 }
 0x6a2   : > { %3160 = vmatprep.mubr.bf16.mxu0 %v4424_v52  ;;  %v3330_v52 = vrot.slane %v3316_v16, %v5980_v4 }
 0x6a4   : > { %3365 = vmatprep.mubr.bf16.mxu1 %v3330_v52 }
 0x6a9   : > { %3161 = vmatmul.mubr.bf16.gmra.mrb[100].mxu0 %v4426_v43  ;;  %v5985_v43 = vpop.permute.xlu1 %2783 }
 0x6aa   : > { %3168 = vmatprep.mubr.bf16.mxu0 %v4427_v18  ;;  %v5987_v18 = vpop.permute.xlu0 %2868 }
 0x6ad   : > { %v2874_v13 = vpop.permute.xlu1 %2873 }
 0x6ae   : > { %v5989_v57 = vpop.permute.xlu0 %2788 }
 0x6b1   : > { %3169 = vmatmul.mubr.bf16.gmra.mrb[104].mxu0 %v4429_v10 }
 0x734   : > { %v3975_v10 = vpop.f32.mrb[64].mxu0  ;;  %v4041_v9 = vpop.f32.mrb[96].mxu1 }
 0x735   : > { %v3976_v48 = vpop.f32.mrb[65].mxu0  ;;  %v4042_v15 = vpop.f32.mrb[97].mxu1 }
 0x736   : > { %v3977_v17 = vadd.f32 %v3976_v48, %v3975_v10  ;;  %v4043_v55 = vadd.f32 %v4042_v15, %v4041_v9  ;;  %v3978_v39 = vpop.f32.mrb[66].mxu0  ;;  %v4044_v28 = vpop.f32.mrb[98].mxu1 }
 0x737   : > { %v3979_v31 = vpop.f32.mrb[67].mxu0  ;;  %v4045_v63 = vpop.f32.mrb[99].mxu1 }
 0x738   : > { %v3091_v26 = vadd.f32 %v3977_v17, %v2739_v7  ;;  %v3179_v11 = vadd.f32 %v4043_v55, %v2849_v62  ;;  %v3980_v37 = vadd.f32 %v3979_v31, %v3978_v39  ;;  %v4046_v50 = vadd.f32 %v4045_v63, %v4044_v28  ;;  %v2879_v63 = vpop.permute.xlu0 %2878 }
 0x73a   : > { %4494 = vrsqrt.f32 %v3091_v26  ;;  %v3094_v16 = vadd.f32 %v3980_v37, %v2744_v51  ;;  %v3182_v4 = vadd.f32 %v4046_v50, %v2854_v47 }
 0x73b   : > { %4496 = vrsqrt.f32 %v3179_v11  ;;  %v5991_v11 = vpop.permute.xlu1 %2793 }
 0x73c   : > { %4498 = vrsqrt.f32 %v3094_v16  ;;  %v3981_v52 = vpop.f32.mrb[68].mxu0  ;;  %v4047_v24 = vpop.f32.mrb[100].mxu1 }
 0x73d   : > { %4500 = vrsqrt.f32 %v3182_v4  ;;  %v3982_v10 = vpop.f32.mrb[69].mxu0  ;;  %v4048_v9 = vpop.f32.mrb[101].mxu1 }
 0x73e   : > { %v3983_v48 = vadd.f32 %v3982_v10, %v3981_v52  ;;  %v4049_v15 = vadd.f32 %v4048_v9, %v4047_v24  ;;  %v3984_v5 = vpop.f32.mrb[70].mxu0  ;;  %v4050_v17 = vpop.f32.mrb[102].mxu1 }
 0x73f   : > { %v3985_v55 = vpop.f32.mrb[71].mxu0  ;;  %v4051_v39 = vpop.f32.mrb[103].mxu1 }
 0x740   : > { %v3099_v28 = vadd.f32 %v3983_v48, %v2749_v32  ;;  %v3187_v7 = vadd.f32 %v4049_v15, %v2859_v20  ;;  %v3986_v51 = vadd.f32 %v3985_v55, %v3984_v5  ;;  %v4052_v26 = vadd.f32 %v4051_v39, %v4050_v17 }
 0x742   : > { %4502 = vrsqrt.f32 %v3099_v28  ;;  %v3102_v62 = vadd.f32 %v3986_v51, %v2754_v40  ;;  %v3190_v47 = vadd.f32 %v4052_v26, %v2864_v2 }
 0x743   : > { %4504 = vrsqrt.f32 %v3187_v7 }
 0x744   : > { %v4495_v50 = vpop.eup %4494  ;;  %4506 = vrsqrt.f32 %v3102_v62  ;;  %v3987_v4 = vpop.f32.mrb[72].mxu0 }
 0x745   : > { %v4053_v37 = vpop.f32.mrb[104].mxu1  ;;  %v4497_v24 = vpop.eup %4496  ;;  %4508 = vrsqrt.f32 %v3190_v47  ;;  %v5994_v48 = vmul.f32 %v4495_v50, %v5708_v1 }
 0x746   : > { %v3988_v31 = vpop.f32.mrb[73].mxu0  ;;  %v4054_v16 = vpop.f32.mrb[105].mxu1  ;;  %v6004_v51 = vmul.f32 %v4497_v24, %v5750_v14 }
 0x747   : > { %v4499_v52 = vpop.eup %4498  ;;  %v3989_v32 = vadd.f32 %v3988_v31, %v3987_v4  ;;  %v4055_v20 = vadd.f32 %v4054_v16, %v4053_v37  ;;  %v3990_v5 = vpop.f32.mrb[74].mxu0 }
 0x748   : > { %v4056_v10 = vpop.f32.mrb[106].mxu1  ;;  %v4501_v9 = vpop.eup %4500  ;;  %v5997_v15 = vmul.f32 %v4499_v52, %v5704_v19 }
 0x749   : > { %v3991_v40 = vpop.f32.mrb[75].mxu0  ;;  %v4057_v2 = vpop.f32.mrb[107].mxu1  ;;  %v3107_v17 = vadd.f32 %v3989_v32, %v5960_v30  ;;  %v3195_v55 = vadd.f32 %v4055_v20, %v5987_v18  ;;  %v6007_v26 = vmul.f32 %v4501_v9, %v5748_v60 }
 0x74a   : > { %v3992_v39 = vadd.f32 %v3991_v40, %v3990_v5  ;;  %v4058_v28 = vadd.f32 %v4057_v2, %v4056_v10  ;;  %v3281_v7 = vpack.c.bf16 %v5997_v15, %v5994_v48  ;;  %v2884_v62 = vpop.permute.xlu1 %2883  ;;  %v6010_v47 = vpop.permute.xlu0 %2798  ;;  %v6221_v48 = vld [vmem:[#allocation14_spill] sm:$0xff]  ;;  %v6222_v15 = vld [vmem:[#allocation15_spill] sm:$0xff] }
 0x74b   : > { %4510 = vrsqrt.f32 %v3107_v17  ;;  %v3292_v30 = vpack.c.bf16 %v6007_v26, %v6004_v51  ;;  %v6224_v51 = vld [vmem:[#allocation13_spill] sm:$0xff] }
 0x74c   : > { %v3110_v1 = vadd.f32 %v3992_v39, %v5962_v61  ;;  %v3198_v19 = vadd.f32 %v4058_v28, %v2874_v13  ;;  %4512 = vrsqrt.f32 %v3195_v55  ;;  %v4503_v18 = vpop.eup %4502  ;;  %v3993_v50 = vpop.f32.mrb[76].mxu0  ;;  %v3306_v26 = vsub.s32 0, %v6224_v51 }
 0x74d   : > { %v4059_v4 = vpop.f32.mrb[108].mxu1  ;;  %v4505_v14 = vpop.eup %4504  ;;  %v6015_v5 = vmul.f32 %v4503_v18, %v5730_v25 }
 0x74e   : > { %4514 = vrsqrt.f32 %v3110_v1  ;;  %v3994_v37 = vpop.f32.mrb[77].mxu0  ;;  %v4060_v60 = vpop.f32.mrb[109].mxu1  ;;  %v6024_v39 = vmul.f32 %v4505_v14, %v5780_v34 }
 0x74f   : > { %4516 = vrsqrt.f32 %v3198_v19  ;;  %v4507_v24 = vpop.eup %4506  ;;  %v3995_v31 = vadd.f32 %v3994_v37, %v3993_v50  ;;  %v4061_v16 = vadd.f32 %v4060_v60, %v4059_v4  ;;  %v3996_v61 = vpop.f32.mrb[78].mxu0 }
 0x750   : > { %v4062_v13 = vpop.f32.mrb[110].mxu1  ;;  %v4509_v52 = vpop.eup %4508  ;;  %v6018_v10 = vmul.f32 %v4507_v24, %v5718_v42 }
 0x751   : > { %v3997_v32 = vpop.f32.mrb[79].mxu0  ;;  %v4063_v20 = vpop.f32.mrb[111].mxu1  ;;  %v3115_v9 = vadd.f32 %v3995_v31, %v5964_v23  ;;  %v3203_v40 = vadd.f32 %v4061_v16, %v2879_v63  ;;  %v6027_v28 = vmul.f32 %v4509_v52, %v5795_v54 }
 0x752   : > { %v3998_v2 = vadd.f32 %v3997_v32, %v3996_v61  ;;  %v4064_v17 = vadd.f32 %v4063_v20, %v4062_v13  ;;  %v3282_v55 = vpack.c.bf16 %v6018_v10, %v6015_v5  ;;  %v6030_v42 = vpop.permute.xlu1 %2803  ;;  %v2889_v19 = vpop.permute.xlu0 %2888 }
 0x753   : > { %4518 = vrsqrt.f32 %v3115_v9  ;;  %v3293_v23 = vpack.c.bf16 %v6027_v28, %v6024_v39 }
 0x754   : > { %v3118_v25 = vadd.f32 %v3998_v2, %v5966_v12  ;;  %v3206_v1 = vadd.f32 %v4064_v17, %v2884_v62  ;;  %4520 = vrsqrt.f32 %v3203_v40  ;;  %v3999_v18 = vpop.f32.mrb[80].mxu0  ;;  %v4065_v50 = vpop.f32.mrb[112].mxu1 }
 0x755   : > { %v4511_v63 = vpop.eup %4510  ;;  %v4000_v4 = vpop.f32.mrb[81].mxu0 }
 0x756   : > { %4522 = vrsqrt.f32 %v3118_v25  ;;  %v4513_v34 = vpop.eup %4512  ;;  %v4066_v54 = vpop.f32.mrb[113].mxu1  ;;  %v4001_v37 = vadd.f32 %v4000_v4, %v3999_v18  ;;  %v6035_v61 = vmul.f32 %v4511_v63, %v5746_v27 }
 0x757   : > { %4524 = vrsqrt.f32 %v3206_v1  ;;  %v4067_v60 = vadd.f32 %v4066_v54, %v4065_v50  ;;  %v4002_v12 = vpop.f32.mrb[82].mxu0  ;;  %v4068_v62 = vpop.f32.mrb[114].mxu1  ;;  %v6044_v17 = vmul.f32 %v4513_v34, %v5792_v36 }
 0x758   : > { %v4515_v14 = vpop.eup %4514  ;;  %v4003_v31 = vpop.f32.mrb[83].mxu0  ;;  %v3123_v52 = vadd.f32 %v4001_v37, %v5968_v6 }
 0x759   : > { %v4517_v24 = vpop.eup %4516  ;;  %v4069_v16 = vpop.f32.mrb[115].mxu1  ;;  %v6038_v13 = vmul.f32 %v4515_v14, %v5738_v59  ;;  %v3211_v32 = vadd.f32 %v4067_v60, %v2889_v19  ;;  %v4004_v20 = vadd.f32 %v4003_v31, %v4002_v12 }
 0x75a   : > { %v4070_v9 = vadd.f32 %v4069_v16, %v4068_v62  ;;  %v2894_v40 = vpop.permute.xlu1 %2893  ;;  %v6047_v25 = vmul.f32 %v4517_v24, %v5789_v8  ;;  %4526 = vrsqrt.f32 %v3123_v52 }
 0x75b   : > { %v3283_v2 = vpack.c.bf16 %v6038_v13, %v6035_v61  ;;  %v3126_v27 = vadd.f32 %v4004_v20, %v5985_v43  ;;  %4528 = vrsqrt.f32 %v3211_v32 }
 0x75c   : > { %v3214_v59 = vadd.f32 %v4070_v9, %v2894_v40  ;;  %v3294_v6 = vpack.c.bf16 %v6047_v25, %v6044_v17  ;;  %v4005_v19 = vpop.f32.mrb[84].mxu0 }
 0x75d   : > { %v4519_v1 = vpop.eup %4518  ;;  %4530 = vrsqrt.f32 %v3126_v27  ;;  %v4006_v18 = vpop.f32.mrb[85].mxu0 }
 0x75e   : > { %v4521_v63 = vpop.eup %4520  ;;  %4532 = vrsqrt.f32 %v3214_v59  ;;  %v4007_v36 = vadd.f32 %v4006_v18, %v4005_v19  ;;  %v4008_v34 = vpop.f32.mrb[86].mxu0  ;;  %v6053_v54 = vmul.f32 %v4519_v1, %v5767_v3 }
 0x75f   : > { %v4009_v8 = vpop.f32.mrb[87].mxu0  ;;  %v6060_v60 = vmul.f32 %v4521_v63, %v5822_v49 }
 0x760   : > { %v4523_v50 = vpop.eup %4522  ;;  %v3131_v14 = vadd.f32 %v4007_v36, %v5989_v57  ;;  %v4010_v37 = vadd.f32 %v4009_v8, %v4008_v34  ;;  %v2809_v34 = vpop.permute.xlu0 %2808 }
 0x761   : > { %v4525_v4 = vpop.eup %4524  ;;  %v6056_v43 = vmul.f32 %v4523_v50, %v5755_v33 }
 0x762   : > { %v6063_v12 = vmul.f32 %v4525_v4, %v5834_v21  ;;  %4534 = vrsqrt.f32 %v3131_v14  ;;  %v3134_v24 = vadd.f32 %v4010_v37, %v5991_v11  ;;  %v2814_v37 = vpop.permute.xlu1 %2813 }
 0x763   : > { %v3284_v62 = vpack.c.bf16 %v6056_v43, %v6053_v54 }
 0x764   : > { %v3295_v3 = vpack.c.bf16 %v6063_v12, %v6060_v60  ;;  %v4527_v33 = vpop.eup %4526  ;;  %4536 = vrsqrt.f32 %v3134_v24  ;;  %v4011_v31 = vpop.f32.mrb[88].mxu0 }
 0x765   : > { %v4529_v57 = vpop.eup %4528  ;;  %v4012_v16 = vpop.f32.mrb[89].mxu0  ;;  %v6071_v9 = vmul.f32 %v4527_v33, %v5786_v35 }
 0x766   : > { %v4013_v49 = vadd.f32 %v4012_v16, %v4011_v31  ;;  %v4014_v32 = vpop.f32.mrb[90].mxu0  ;;  %v6078_v59 = vmul.f32 %v4529_v57, %v5831_v53 }
 0x767   : > { %v4531_v52 = vpop.eup %4530  ;;  %v4015_v21 = vpop.f32.mrb[91].mxu0 }
 0x768   : > { %v4533_v20 = vpop.eup %4532  ;;  %v6074_v40 = vmul.f32 %v4531_v52, %v5777_v0  ;;  %v3139_v11 = vadd.f32 %v4013_v49, %v6010_v47  ;;  %v4016_v27 = vadd.f32 %v4015_v21, %v4014_v32 }
 0x769   : > { %v6081_v1 = vmul.f32 %v4533_v20, %v5829_v44 }
 0x76a   : > { %v3285_v19 = vpack.c.bf16 %v6074_v40, %v6071_v9  ;;  %4538 = vrsqrt.f32 %v3139_v11  ;;  %v3142_v63 = vadd.f32 %v4016_v27, %v6030_v42 }
 0x76b   : > { %v3296_v35 = vpack.c.bf16 %v6081_v1, %v6078_v59 }
 0x76c   : > { %v4535_v0 = vpop.eup %4534  ;;  %4540 = vrsqrt.f32 %v3142_v63  ;;  %v4017_v18 = vpop.f32.mrb[92].mxu0 }
 0x76d   : > { %v4018_v47 = vpop.f32.mrb[93].mxu0  ;;  %v6089_v44 = vmul.f32 %v4535_v0, %v5811_v46 }
 0x76e   : > { %v4537_v50 = vpop.eup %4536  ;;  %v4019_v36 = vadd.f32 %v4018_v47, %v4017_v18  ;;  %v4020_v53 = vpop.f32.mrb[94].mxu0 }
 0x76f   : > { %v4021_v4 = vpop.f32.mrb[95].mxu0  ;;  %v6092_v8 = vmul.f32 %v4537_v50, %v5799_v56 }
 0x770   : > { %v3147_v14 = vadd.f32 %v4019_v36, %v2809_v34  ;;  %v4022_v42 = vadd.f32 %v4021_v4, %v4020_v53 }
 0x771   : > { %v3286_v24 = vpack.c.bf16 %v6092_v8, %v6089_v44 }
 0x772   : > { %4542 = vrsqrt.f32 %v3147_v14  ;;  %v3150_v33 = vadd.f32 %v4022_v42, %v2814_v37  ;;  %v6212_v37 = vld [vmem:[#allocation8_spill] sm:$0xff] }
 0x774   : > { %v4539_v31 = vpop.eup %4538  ;;  %4544 = vrsqrt.f32 %v3150_v33  ;;  %v4023_v57 = vpop.f32.mrb[96].mxu0 }
 0x775   : > { %v4024_v16 = vpop.f32.mrb[97].mxu0  ;;  %v3261_v20 = vmul.f32 %v4539_v31, %v5827_v58 }
 0x776   : > { %v4541_v52 = vpop.eup %4540  ;;  %v4025_v49 = vadd.f32 %v4024_v16, %v4023_v57  ;;  %v4026_v32 = vpop.f32.mrb[98].mxu0 }
 0x777   : > { %v4027_v46 = vpop.f32.mrb[99].mxu0  ;;  %v3262_v56 = vmul.f32 %v4541_v52, %v5820_v41  ;;  %v6211_v41 = vld [vmem:[#allocation10_spill] sm:$0xff] }
 0x778   : > { %v3155_v21 = vadd.f32 %v4025_v49, %v5948_v22  ;;  %v4028_v11 = vadd.f32 %v4027_v46, %v4026_v32  ;;  %v6213_v46 = vld [vmem:[#allocation3_spill] sm:$0xff] }
 0x779   : > { %v3287_v27 = vpack.c.bf16 %v3262_v56, %v3261_v20 }
 0x77a   : > { %4546 = vrsqrt.f32 %v3155_v21  ;;  %v3158_v63 = vadd.f32 %v4028_v11, %v5950_v29 }
 0x77c   : > { %v4543_v0 = vpop.eup %4542  ;;  %4548 = vrsqrt.f32 %v3158_v63  ;;  %v4029_v18 = vpop.f32.mrb[100].mxu0 }
 0x77d   : > { %v4030_v47 = vpop.f32.mrb[101].mxu0  ;;  %v3263_v4 = vmul.f32 %v4543_v0, %v5848_v38  ;;  %v6214_v38 = vld [vmem:[#allocation5_spill] sm:$0xff]  ;;  %v6216_v0 = vld [vmem:[#allocation12_spill] sm:$0xff] }
 0x77e   : > { %v4545_v50 = vpop.eup %4544  ;;  %v4031_v36 = vadd.f32 %v4030_v47, %v4029_v18  ;;  %v4032_v53 = vpop.f32.mrb[102].mxu0 }
 0x77f   : > { %v4033_v34 = vpop.f32.mrb[103].mxu0  ;;  %v3264_v58 = vmul.f32 %v4545_v50, %v5837_v45  ;;  %v6215_v45 = vld [vmem:[#allocation11_spill] sm:$0xff] }
 0x780   : > { %v3163_v14 = vadd.f32 %v4031_v36, %v6211_v41  ;;  %v4034_v22 = vadd.f32 %v4033_v34, %v4032_v53  ;;  %v6217_v36 = vld [vmem:[#allocation6_spill] sm:$0xff]  ;;  %v6218_v34 = vld [vmem:[#allocation4_spill] sm:$0xff] }
 0x781   : > { %v3288_v42 = vpack.c.bf16 %v3264_v58, %v3263_v4 }
 0x782   : > { %4550 = vrsqrt.f32 %v3163_v14  ;;  %v3166_v33 = vadd.f32 %v4034_v22, %v6212_v37  ;;  %v6219_v22 = vld [vmem:[#allocation9_spill] sm:$0xff] }
 0x784   : > { %v4547_v29 = vpop.eup %4546  ;;  %4552 = vrsqrt.f32 %v3166_v33  ;;  %v4035_v31 = vpop.f32.mrb[104].mxu0  ;;  %v6220_v33 = vld [vmem:[#allocation7_spill] sm:$0xff] }
 0x785   : > { %v4036_v57 = vpop.f32.mrb[105].mxu0  ;;  %v3265_v20 = vmul.f32 %v4547_v29, %v6213_v46 }
 0x786   : > { %v4549_v16 = vpop.eup %4548  ;;  %v4037_v52 = vadd.f32 %v4036_v57, %v4035_v31  ;;  %v4038_v49 = vpop.f32.mrb[106].mxu0 }
 0x787   : > { %v4039_v32 = vpop.f32.mrb[107].mxu0  ;;  %v3266_v56 = vmul.f32 %v4549_v16, %v6214_v38 }
 0x788   : > { %v3171_v21 = vadd.f32 %v4037_v52, %v6215_v45  ;;  %v4040_v11 = vadd.f32 %v4039_v32, %v4038_v49 }
 0x789   : > { %v3289_v63 = vpack.c.bf16 %v3266_v56, %v3265_v20 }
 0x78a   : > { %4554 = vrsqrt.f32 %v3171_v21  ;;  %v3174_v18 = vadd.f32 %v4040_v11, %v6216_v0 }
 0x78b   : > { %4071 = vmatprep.subr.bf16.mxu1 %v3289_v63 }
 0x78c   : > { %v4551_v47 = vpop.eup %4550  ;;  %4556 = vrsqrt.f32 %v3174_v18  ;;  %4072 = vmatpush3.bf16.msra.mxu1 %v3281_v7  ;;  %v6223_v7 = vrot.slane %v6221_v48, %v6222_v15 }
 0x78d   : > { %v3267_v53 = vmul.f32 %v4551_v47, %v6217_v36 }
 0x78e   : > { %v4553_v50 = vpop.eup %4552 }
 0x78f   : > { %v3268_v4 = vmul.f32 %v4553_v50, %v6218_v34 }
 0x791   : > { %v3290_v58 = vpack.c.bf16 %v3268_v4, %v3267_v53 }
 0x793   : > { %4073 = vmatprep.subr.bf16.mxu1 %v3290_v58 }
 0x794   : > { %v4555_v41 = vpop.eup %4554  ;;  %4074 = vmatpush3.bf16.msra.mxu1 %v3282_v55 }
 0x795   : > { %v3269_v37 = vmul.f32 %v4555_v41, %v6219_v22 }
 0x796   : > { %v4557_v14 = vpop.eup %4556 }
 0x797   : > { %v3270_v29 = vmul.f32 %v4557_v14, %v6220_v33 }
 0x799   : > { %v3291_v31 = vpack.c.bf16 %v3270_v29, %v3269_v37 }
 0x79b   : > { %4075 = vmatprep.subr.bf16.mxu1 %v3291_v31 }
 0x79c   : > { %4076 = vmatpush3.bf16.msra.mxu1 %v3283_v2 }
 0x79d   : > { %4077 = vmatprep.subr.bf16.mxu1 %v3292_v30  ;;  %v3302_v30 = vpop.permute.xlu0 %3301 }
 0x79e   : > { %v3307_v55 = vrot.slane %v3302_v30, %v3306_v26 }
 0x7a0   : > { %4078 = vmatpush3.bf16.msra.mxu1 %v3284_v62 }
 0x7a1   : > { %4079 = vmatprep.subr.bf16.mxu1 %v3293_v23 }
 0x7a4   : > { %4080 = vmatpush3.bf16.msra.mxu1 %v3285_v19 }
 0x7a5   : > { %4081 = vmatprep.subr.bf16.mxu1 %v3294_v6 }
 0x7a8   : > { %4082 = vmatpush3.bf16.msra.mxu1 %v3286_v24 }
 0x7a9   : > { %4083 = vmatprep.subr.bf16.mxu1 %v3295_v3 }
 0x7ac   : > { %4084 = vmatpush3.bf16.msra.mxu1 %v3287_v27 }
 0x7ad   : > { %4085 = vmatprep.subr.bf16.mxu1 %v3296_v35 }
 0x7b0   : > { %4086 = vmatpush3.bf16.msra.mxu1 %v3288_v42 }
 0x7b3   : > { %3366 = vmatmul.mubr.bf16.vlgmr.msra.gmra.mrb[116].mxu1 %v6223_v7 }
 0x886   : > { %v4087_v5 = vpop.f32.mrb[116].mxu1 }
 0x887   : > { %v4088_v10 = vpop.f32.mrb[117].mxu1 }
 0x888   : > { %v4089_v39 = vadd.f32 %v4088_v10, %v4087_v5  ;;  %v4090_v28 = vpop.f32.mrb[118].mxu1 }
 0x889   : > { %v4091_v23 = vpop.f32.mrb[119].mxu1 }
 0x88a   : > { %v3368_v61 = vadd.f32 %v4089_v39, %v3307_v55 }
 0x88c   : > { %3374 = vst.msk [vmem:[%s384_s22] sm:$0x1] %vm3373_vm2, %v3368_v61 }
 0x88d PF: > { %s23_s19 = sadd.s32 1, %s4573_s19  }
 0x88e   : > { %p20_p4 = scmp.ge.s32.totalorder %s23_s19, 6  }
 0x890   :  { %22 = sbr.rel (!%p20_p4) target bundleno = 3 (0x3), region = 97 }

</bundles_post_ra>
